<compile_context>
chip_gen: v5e
topology: v5e:2x2
jax: 0.10.0
libtpu: 0.0.40
codegen_flags: <defaults>
</compile_context>

<pallas_src>
import numpy as np
import jax
import jax.numpy as jnp
from jax.experimental import pallas as pl
from jax.experimental.pallas import tpu as pltpu


# ---------------------------------------------------------------------------
# Geometry constants (32x32x3 input, two 3x3 valid convs, two 2x2 pools)
# ---------------------------------------------------------------------------
_IN_W = 32                 # input width (= lane row stride of conv1 wide output)
_XIN_LANES = 1088          # 32*32 input lanes + zero pad (>= 2*32+2 + _L1)
_L1 = 992                  # conv1 "wide" output lanes (>= 33 + _M1)
_M1 = 928                  # conv1 pool-max lanes (covers r = 64*py + 2*px, py,px < 15)
_P1 = 15                   # pooled-1 grid width (= lane row stride of conv2 wide output)
_S1 = 256                  # pooled-1 lanes: 225 valid + zero pad (= 2*15+2 + _L2)
_L2 = 224                  # conv2 "wide" output lanes (>= 16 + _M2)
_M2 = 178                  # conv2 pool-max lanes (covers r = 30*py + 2*px, py,px < 6)
_P2 = 6                    # pooled-2 grid width
_S2 = 36                   # final spatial positions (6*6)
_FEAT = 64 * _S2           # 2304 flattened features (torch NCHW order)

# Static geometry checks (make the implicit lane-padding inequalities explicit).
assert 2 * _IN_W + 2 + _L1 <= _XIN_LANES, "conv1 taps would read past padded input"
assert _IN_W + 1 + _M1 <= _L1, "pool1 max would read past conv1 wide output"
assert 2 * (_P1 - 1) * _IN_W + 2 * (_P1 - 1) < _M1, "sel1 target rows exceed pool-max range"
assert _P1 * _P1 <= _S1, "pooled-1 valid lanes exceed its padded buffer"
assert 2 * _P1 + 2 + _L2 <= _S1, "conv2 taps would read past pooled-1 buffer"
assert _P1 + 1 + _M2 <= _L2, "pool2 max would read past conv2 wide output"
assert 2 * (_P2 - 1) * _P1 + 2 * (_P2 - 1) < _M2, "sel2 target rows exceed pool-max range"


def _pool_selection(wide_len, wide_w, out_hw, out_cols):
    """0/1 compaction matrix S (wide_len, out_cols):
    S[r, q] = 1 iff q = py*out_hw + px (py,px < out_hw) and r = 2*py*wide_w + 2*px."""
    r = np.arange(wide_len)[:, None]
    q = np.arange(out_cols)[None, :]
    py, px = q // out_hw, q % out_hw
    tgt = 2 * py * wide_w + 2 * px
    return ((r == tgt) & (py < out_hw)).astype(np.float32)


_SEL1 = _pool_selection(_M1, _IN_W, _P1, _S1)   # (928, 256), 0/1 -> exact in bf16
_SEL2 = _pool_selection(_M2, _P1, _P2, _S2)     # (178, 36)


# ---------------------------------------------------------------------------
# Pallas kernels
# ---------------------------------------------------------------------------
def _conv_stage_kernel(x_ref, w1_ref, b1_ref, sel1_ref, w2_ref, b2_ref, sel2_ref, o_ref):
    """Per-block (B images) fused conv1+ReLU+pool + conv2+ReLU+pool, planar (C, H*W) layout."""
    w1 = w1_ref[...]        # (9, 16, 3)  bf16 conv1 taps, tap t = 3*i + j
    b1 = b1_ref[...]        # (16, 1)     f32
    sel1 = sel1_ref[...]    # (928, 256)  bf16 pool1 compaction
    w2 = w2_ref[...]        # (64, 144)   bf16 packed conv2 (K = 48*i + 16*j + c)
    b2 = b2_ref[...]        # (64, 1)     f32
    sel2 = sel2_ref[...]    # (178, 36)   bf16 pool2 compaction

    B = x_ref.shape[0]
    # Fully unrolled per-image loop (equivalent to lax.fori_loop(..., unroll=True)); each
    # image's intermediates die at its o_ref[b] store.
    for b in range(B):
        xin = x_ref[b]                                              # (3, 1088) bf16

        # conv1: 9 shift-and-matmul taps (K=3), f32 accumulation on the MXU.
        acc1 = None
        for t in range(9):
            i, j = divmod(t, 3)
            xs = xin[:, i * _IN_W + j: i * _IN_W + j + _L1]         # (3, 992)
            d = jnp.dot(w1[t], xs, preferred_element_type=jnp.float32)
            acc1 = d if acc1 is None else acc1 + d
        h1 = jnp.maximum(acc1 + b1, 0.0).astype(jnp.bfloat16)       # (16, 992) bf16

        # 2x2 max-pool: max of 4 lane-shifted views (bf16), then compaction matmul (exact).
        m1 = jnp.maximum(
            jnp.maximum(h1[:, 0:_M1], h1[:, 1:1 + _M1]),
            jnp.maximum(h1[:, _IN_W:_IN_W + _M1], h1[:, _IN_W + 1:_IN_W + 1 + _M1]))
        p1 = jnp.dot(m1, sel1, preferred_element_type=jnp.float32)  # (16, 256)
        p1 = p1.astype(jnp.bfloat16)

        # conv2: 9 taps packed into ONE K=144 matmul.  Each shifted slice is 16 bf16 rows
        # (one full sublane tile), so the sublane concatenation is tile-aligned.
        p9 = jnp.concatenate(
            [p1[:, i * _P1 + j: i * _P1 + j + _L2] for i in range(3) for j in range(3)],
            axis=0)                                                  # (144, 224) bf16
        h2 = jnp.maximum(jnp.dot(w2, p9, preferred_element_type=jnp.float32) + b2,
                         0.0).astype(jnp.bfloat16)                   # (64, 224) bf16

        m2 = jnp.maximum(
            jnp.maximum(h2[:, 0:_M2], h2[:, 1:1 + _M2]),
            jnp.maximum(h2[:, _P1:_P1 + _M2], h2[:, _P1 + 1:_P1 + 1 + _M2]))
        feat = jnp.dot(m2, sel2, preferred_element_type=jnp.float32)  # (64, 36)
        o_ref[b] = feat.astype(o_ref.dtype)                           # exact: pure selection


def _fc_stage_kernel(x_ref, w1_ref, b1_ref, w2_ref, b2_ref, w3_ref, b3_ref, o_ref):
    """Fused fc1+ReLU+fc2+ReLU+fc3; bf16 MXU operands, f32 accumulation/epilogue."""
    h = jnp.dot(x_ref[...], w1_ref[...], preferred_element_type=jnp.float32)
    h = jnp.maximum(h + b1_ref[...], 0.0)
    h = jnp.dot(h.astype(jnp.bfloat16), w2_ref[...], preferred_element_type=jnp.float32)
    h = jnp.maximum(h + b2_ref[...], 0.0)
    o = jnp.dot(h.astype(jnp.bfloat16), w3_ref[...], preferred_element_type=jnp.float32) \
        + b3_ref[...]
    o_ref[...] = o.astype(o_ref.dtype)


# ---------------------------------------------------------------------------
# Wrappers
# ---------------------------------------------------------------------------
def _round_up(a, b):
    return (a + b - 1) // b * b


def conv_stage(xp, params, *, block_images=8):
    """xp: (N, 3, _XIN_LANES) bf16 (lane = h*32+w, zero padded) -> (N, 64, 36) bf16."""
    N = xp.shape[0]
    B = min(block_images, N)
    npad = _round_up(N, B)
    if npad != N:
        xp = jnp.pad(xp, ((0, npad - N), (0, 0), (0, 0)))
    sel1 = jnp.asarray(_SEL1, dtype=jnp.bfloat16)
    sel2 = jnp.asarray(_SEL2, dtype=jnp.bfloat16)
    flops = npad * 2 * (9 * 16 * 3 * _L1 + 16 * _M1 * _S1 + 64 * 144 * _L2 + 64 * _M2 * _S2)
    bytes_accessed = (npad * (3 * _XIN_LANES + 64 * _S2) * 2
                      + (_SEL1.size + _SEL2.size) * 2
                      + (9 * 16 * 3 + 64 * 144) * 2 + (16 + 64) * 4)
    out = pl.pallas_call(
        _conv_stage_kernel,
        out_shape=jax.ShapeDtypeStruct((npad, 64, _S2), jnp.bfloat16),
        grid=(npad // B,),
        in_specs=[
            pl.BlockSpec((B, 3, _XIN_LANES), lambda n: (n, 0, 0)),   # B images per step
            pl.BlockSpec((9, 16, 3), lambda n: (0, 0, 0)),           # conv1 taps (resident)
            pl.BlockSpec((16, 1), lambda n: (0, 0)),
            pl.BlockSpec((_M1, _S1), lambda n: (0, 0)),              # pool1 selection
            pl.BlockSpec((64, 144), lambda n: (0, 0)),               # packed conv2 (resident)
            pl.BlockSpec((64, 1), lambda n: (0, 0)),
            pl.BlockSpec((_M2, _S2), lambda n: (0, 0)),              # pool2 selection
        ],
        out_specs=pl.BlockSpec((B, 64, _S2), lambda n: (n, 0, 0)),
        compiler_params=pltpu.CompilerParams(
            dimension_semantics=("parallel",),
            vmem_limit_bytes=32 * 1024 * 1024,
        ),
        cost_estimate=pl.CostEstimate(flops=flops, transcendentals=0,
                                      bytes_accessed=bytes_accessed),
    )(xp, params["w1t"], params["b1"], sel1, params["w2p"], params["b2"], sel2)
    return out[:N]


def fc_stage(flat, params):
    """flat: (N, 2304) bf16 -> (N, out_size) f32, fc1/fc2/fc3 fused in one kernel."""
    N = flat.shape[0]
    out_size = params["fw3"].shape[1]
    tm = min(512, _round_up(N, 8))
    npad = _round_up(N, tm)
    if npad != N:
        flat = jnp.pad(flat, ((0, npad - N), (0, 0)))
    flops = 2 * npad * (_FEAT * 64 + 64 * 32 + 32 * out_size)
    bytes_accessed = (npad * (_FEAT * 2 + out_size * 4)
                      + (_FEAT * 64 + 64 * 32 + 32 * out_size) * 2
                      + (64 + 32 + out_size) * 4)
    out = pl.pallas_call(
        _fc_stage_kernel,
        out_shape=jax.ShapeDtypeStruct((npad, out_size), jnp.float32),
        grid=(npad // tm,),
        in_specs=[
            pl.BlockSpec((tm, _FEAT), lambda i: (i, 0)),
            pl.BlockSpec((_FEAT, 64), lambda i: (0, 0)),     # fc1 weight, VMEM-resident
            pl.BlockSpec((1, 64), lambda i: (0, 0)),
            pl.BlockSpec((64, 32), lambda i: (0, 0)),
            pl.BlockSpec((1, 32), lambda i: (0, 0)),
            pl.BlockSpec((32, out_size), lambda i: (0, 0)),
            pl.BlockSpec((1, out_size), lambda i: (0, 0)),
        ],
        out_specs=pl.BlockSpec((tm, out_size), lambda i: (i, 0)),
        compiler_params=pltpu.CompilerParams(
            dimension_semantics=("parallel",),
            vmem_limit_bytes=32 * 1024 * 1024,
        ),
        cost_estimate=pl.CostEstimate(flops=flops, transcendentals=0,
                                      bytes_accessed=bytes_accessed),
    )(flat, params["fw1"], params["fb1"], params["fw2"], params["fb2"],
      params["fw3"], params["fb3"])
    return out[:N]


def forward(x, params):
    """x: (N, in_size=3072) -> (N, out_size).  Matches NeuralNet.forward."""
    # NOTE: nn.Dropout is declared in __init__ but never applied in forward() -> nothing to do.
    N = x.shape[0]
    # (N, 3072) is already NCHW-flattened; view as (N, 3, 1024), zero-pad the lane dim so the
    # in-kernel shift-and-matmul taps never read OOB, and cast to bf16 (halves the input DMA).
    xp = jnp.pad(x.reshape(N, 3, _IN_W * _IN_W),
                 ((0, 0), (0, 0), (0, _XIN_LANES - _IN_W * _IN_W))).astype(jnp.bfloat16)
    feat = conv_stage(xp, params)          # (N, 64, 36) bf16, all conv work stays in VMEM
    flat = feat.reshape(N, _FEAT)          # free HBM-view reshape; already torch NCHW order
    return fc_stage(flat, params)


# ---------------------------------------------------------------------------
# Deterministic parameter construction (synthetic; shapes from __init__)
# ---------------------------------------------------------------------------
def make_params(key, out_size):
    ks = jax.random.split(key, 10)
    s = 0.05
    conv1_w = jax.random.normal(ks[0], (16, 3, 3, 3), jnp.float32) * s    # (Cout,Cin,kh,kw)
    conv2_w = jax.random.normal(ks[1], (64, 16, 3, 3), jnp.float32) * s
    fc1_w = jax.random.normal(ks[2], (64, _FEAT), jnp.float32) * s        # torch (out, in)
    fc2_w = jax.random.normal(ks[3], (32, 64), jnp.float32) * s
    fc3_w = jax.random.normal(ks[4], (out_size, 32), jnp.float32) * s
    return {
        # conv1 taps: (kh*kw, Cout, Cin); tap t = i*3 + j  <->  w[:, :, i, j]
        "w1t": conv1_w.transpose(2, 3, 0, 1).reshape(9, 16, 3).astype(jnp.bfloat16),
        "b1": (jax.random.normal(ks[5], (16,), jnp.float32) * s).reshape(16, 1),
        # conv2 packed: (Cout, 9*Cin); K index = 48*i + 16*j + c  <->  w[:, c, i, j]
        "w2p": conv2_w.transpose(0, 2, 3, 1).reshape(64, 9 * 16).astype(jnp.bfloat16),
        "b2": (jax.random.normal(ks[6], (64,), jnp.float32) * s).reshape(64, 1),
        # fc weights as (in, out); the conv-stage output already flattens in torch's
        # NCHW order, so fc1 needs no row permutation / activation transpose.
        "fw1": fc1_w.T.astype(jnp.bfloat16),
        "fb1": (jax.random.normal(ks[7], (64,), jnp.float32) * s).reshape(1, 64),
        "fw2": fc2_w.T.astype(jnp.bfloat16),
        "fb2": (jax.random.normal(ks[8], (32,), jnp.float32) * s).reshape(1, 32),
        "fw3": fc3_w.T.astype(jnp.bfloat16),
        "fb3": (jax.random.normal(ks[9], (out_size,), jnp.float32) * s).reshape(1, out_size),
    }


# ---------------------------------------------------------------------------
# Pure-JAX f32 reference (lax conv / reduce_window) for validation
# ---------------------------------------------------------------------------
def forward_reference(x, params):
    N = x.shape[0]
    xi = x.reshape(N, 3, 32, 32).astype(jnp.float32)
    w1 = params["w1t"].astype(jnp.float32).reshape(3, 3, 16, 3).transpose(2, 3, 0, 1)
    w2 = params["w2p"].astype(jnp.float32).reshape(64, 3, 3, 16).transpose(0, 3, 1, 2)

    def conv_relu_pool(h, w, b):
        h = jax.lax.conv_general_dilated(h, w, (1, 1), "VALID",
                                         dimension_numbers=("NCHW", "OIHW", "NCHW"))
        h = jnp.maximum(h + b.reshape(1, -1, 1, 1), 0.0)
        return jax.lax.reduce_window(h, -jnp.inf, jax.lax.max,
                                     (1, 1, 2, 2), (1, 1, 2, 2), "VALID")

    h = conv_relu_pool(xi, w1, params["b1"])
    h = conv_relu_pool(h, w2, params["b2"])
    h = h.reshape(N, -1)
    h = jnp.maximum(h @ params["fw1"].astype(jnp.float32) + params["fb1"], 0.0)
    h = jnp.maximum(h @ params["fw2"].astype(jnp.float32) + params["fb2"], 0.0)
    return h @ params["fw3"].astype(jnp.float32) + params["fb3"]


if __name__ == "__main__":
    out_size = 4
    batch = 2
    key = jax.random.PRNGKey(0)
    k_param, k_x = jax.random.split(key)
    params = make_params(k_param, out_size)
    x = jax.random.normal(k_x, (batch, 3 * 32 * 32), jnp.float32)   # (N, in_size)

    y = jax.jit(forward)(x, params)
    y = jax.block_until_ready(y)
    assert y.shape == (batch, out_size), y.shape
    assert y.dtype == jnp.float32

    y_ref = forward_reference(x, params)
    rel_err = float(jnp.max(jnp.abs(y - y_ref)) / (jnp.max(jnp.abs(y_ref)) + 1e-6))
    assert rel_err < 0.1, f"mismatch vs reference: rel_err={rel_err}"
    print("KERNEL_OK")
</pallas_src>

<mosaic_0001>
module attributes {stable_mosaic.version = 11 : i64} {
  func.func @_conv_stage_kernel(%arg0: i32, %arg1: memref<2x3x1088xbf16, #tpu.memory_space<vmem>>, %arg2: memref<9x16x3xbf16, #tpu.memory_space<vmem>>, %arg3: memref<16x1xf32, #tpu.memory_space<vmem>>, %arg4: memref<928x256xbf16, #tpu.memory_space<vmem>>, %arg5: memref<64x144xbf16, #tpu.memory_space<vmem>>, %arg6: memref<64x1xf32, #tpu.memory_space<vmem>>, %arg7: memref<178x36xbf16, #tpu.memory_space<vmem>>, %arg8: memref<2x64x36xbf16, #tpu.memory_space<vmem>>) attributes {dimension_semantics = [#tpu.dimension_semantics<parallel>], iteration_bounds = array<i64: 1>, scalar_prefetch = 0 : i64, scratch_operands = 0 : i64, tpu.core_type = #tpu.core_type<tc>, window_params = [{transform_indices = @transform_0, window_bounds = array<i64: 2, 3, 1088>}, {pipeline_mode = #tpu.pipeline_mode<synchronous>, transform_indices = @transform_1, window_bounds = array<i64: 9, 16, 3>}, {pipeline_mode = #tpu.pipeline_mode<synchronous>, transform_indices = @transform_2, window_bounds = array<i64: 16, 1>}, {pipeline_mode = #tpu.pipeline_mode<synchronous>, transform_indices = @transform_3, window_bounds = array<i64: 928, 256>}, {pipeline_mode = #tpu.pipeline_mode<synchronous>, transform_indices = @transform_4, window_bounds = array<i64: 64, 144>}, {pipeline_mode = #tpu.pipeline_mode<synchronous>, transform_indices = @transform_5, window_bounds = array<i64: 64, 1>}, {pipeline_mode = #tpu.pipeline_mode<synchronous>, transform_indices = @transform_6, window_bounds = array<i64: 178, 36>}, {transform_indices = @transform_7, window_bounds = array<i64: 2, 64, 36>}]} {
    %c0 = arith.constant 0 : index
    %c0_0 = arith.constant 0 : index
    %c0_1 = arith.constant 0 : index
    %0 = vector.load %arg2[%c0, %c0_0, %c0_1] : memref<9x16x3xbf16, #tpu.memory_space<vmem>>, vector<9x16x3xbf16>
    %c0_2 = arith.constant 0 : index
    %c0_3 = arith.constant 0 : index
    %1 = vector.load %arg3[%c0_2, %c0_3] : memref<16x1xf32, #tpu.memory_space<vmem>>, vector<16x1xf32>
    %c0_4 = arith.constant 0 : index
    %c0_5 = arith.constant 0 : index
    %2 = vector.load %arg4[%c0_4, %c0_5] : memref<928x256xbf16, #tpu.memory_space<vmem>>, vector<928x256xbf16>
    %c0_6 = arith.constant 0 : index
    %c0_7 = arith.constant 0 : index
    %3 = vector.load %arg5[%c0_6, %c0_7] : memref<64x144xbf16, #tpu.memory_space<vmem>>, vector<64x144xbf16>
    %c0_8 = arith.constant 0 : index
    %c0_9 = arith.constant 0 : index
    %4 = vector.load %arg6[%c0_8, %c0_9] : memref<64x1xf32, #tpu.memory_space<vmem>>, vector<64x1xf32>
    %c0_10 = arith.constant 0 : index
    %c0_11 = arith.constant 0 : index
    %5 = vector.load %arg7[%c0_10, %c0_11] : memref<178x36xbf16, #tpu.memory_space<vmem>>, vector<178x36xbf16>
    %c0_12 = arith.constant 0 : index
    %c0_13 = arith.constant 0 : index
    %c0_14 = arith.constant 0 : index
    %6 = vector.load %arg1[%c0_12, %c0_13, %c0_14] : memref<2x3x1088xbf16, #tpu.memory_space<vmem>>, vector<1x3x1088xbf16>
    %7 = vector.shape_cast %6 : vector<1x3x1088xbf16> to vector<3x1088xbf16>
    %8 = vector.extract_strided_slice %7 {offsets = [0, 0], sizes = [3, 992], strides = [1, 1]} : vector<3x1088xbf16> to vector<3x992xbf16>
    %9 = vector.extract_strided_slice %0 {offsets = [0, 0, 0], sizes = [1, 16, 3], strides = [1, 1, 1]} : vector<9x16x3xbf16> to vector<1x16x3xbf16>
    %10 = vector.shape_cast %9 : vector<1x16x3xbf16> to vector<16x3xbf16>
    %cst = arith.constant dense<0.000000e+00> : vector<16x992xf32>
    %11 = tpu.matmul %10, %8, %cst {dimension_numbers = #tpu.dot_dimension_numbers<[1], [0], [0], [1], [0, 0, 1, 1], [], []>} : vector<16x3xbf16>, vector<3x992xbf16>, vector<16x992xf32> -> vector<16x992xf32>
    %12 = vector.extract_strided_slice %7 {offsets = [0, 1], sizes = [3, 992], strides = [1, 1]} : vector<3x1088xbf16> to vector<3x992xbf16>
    %13 = vector.extract_strided_slice %0 {offsets = [1, 0, 0], sizes = [1, 16, 3], strides = [1, 1, 1]} : vector<9x16x3xbf16> to vector<1x16x3xbf16>
    %14 = vector.shape_cast %13 : vector<1x16x3xbf16> to vector<16x3xbf16>
    %cst_15 = arith.constant dense<0.000000e+00> : vector<16x992xf32>
    %15 = tpu.matmul %14, %12, %cst_15 {dimension_numbers = #tpu.dot_dimension_numbers<[1], [0], [0], [1], [0, 0, 1, 1], [], []>} : vector<16x3xbf16>, vector<3x992xbf16>, vector<16x992xf32> -> vector<16x992xf32>
    %16 = arith.addf %11, %15 : vector<16x992xf32>
    %17 = vector.extract_strided_slice %7 {offsets = [0, 2], sizes = [3, 992], strides = [1, 1]} : vector<3x1088xbf16> to vector<3x992xbf16>
    %18 = vector.extract_strided_slice %0 {offsets = [2, 0, 0], sizes = [1, 16, 3], strides = [1, 1, 1]} : vector<9x16x3xbf16> to vector<1x16x3xbf16>
    %19 = vector.shape_cast %18 : vector<1x16x3xbf16> to vector<16x3xbf16>
    %cst_16 = arith.constant dense<0.000000e+00> : vector<16x992xf32>
    %20 = tpu.matmul %19, %17, %cst_16 {dimension_numbers = #tpu.dot_dimension_numbers<[1], [0], [0], [1], [0, 0, 1, 1], [], []>} : vector<16x3xbf16>, vector<3x992xbf16>, vector<16x992xf32> -> vector<16x992xf32>
    %21 = arith.addf %16, %20 : vector<16x992xf32>
    %22 = vector.extract_strided_slice %7 {offsets = [0, 32], sizes = [3, 992], strides = [1, 1]} : vector<3x1088xbf16> to vector<3x992xbf16>
    %23 = vector.extract_strided_slice %0 {offsets = [3, 0, 0], sizes = [1, 16, 3], strides = [1, 1, 1]} : vector<9x16x3xbf16> to vector<1x16x3xbf16>
    %24 = vector.shape_cast %23 : vector<1x16x3xbf16> to vector<16x3xbf16>
    %cst_17 = arith.constant dense<0.000000e+00> : vector<16x992xf32>
    %25 = tpu.matmul %24, %22, %cst_17 {dimension_numbers = #tpu.dot_dimension_numbers<[1], [0], [0], [1], [0, 0, 1, 1], [], []>} : vector<16x3xbf16>, vector<3x992xbf16>, vector<16x992xf32> -> vector<16x992xf32>
    %26 = arith.addf %21, %25 : vector<16x992xf32>
    %27 = vector.extract_strided_slice %7 {offsets = [0, 33], sizes = [3, 992], strides = [1, 1]} : vector<3x1088xbf16> to vector<3x992xbf16>
    %28 = vector.extract_strided_slice %0 {offsets = [4, 0, 0], sizes = [1, 16, 3], strides = [1, 1, 1]} : vector<9x16x3xbf16> to vector<1x16x3xbf16>
    %29 = vector.shape_cast %28 : vector<1x16x3xbf16> to vector<16x3xbf16>
    %cst_18 = arith.constant dense<0.000000e+00> : vector<16x992xf32>
    %30 = tpu.matmul %29, %27, %cst_18 {dimension_numbers = #tpu.dot_dimension_numbers<[1], [0], [0], [1], [0, 0, 1, 1], [], []>} : vector<16x3xbf16>, vector<3x992xbf16>, vector<16x992xf32> -> vector<16x992xf32>
    %31 = arith.addf %26, %30 : vector<16x992xf32>
    %32 = vector.extract_strided_slice %7 {offsets = [0, 34], sizes = [3, 992], strides = [1, 1]} : vector<3x1088xbf16> to vector<3x992xbf16>
    %33 = vector.extract_strided_slice %0 {offsets = [5, 0, 0], sizes = [1, 16, 3], strides = [1, 1, 1]} : vector<9x16x3xbf16> to vector<1x16x3xbf16>
    %34 = vector.shape_cast %33 : vector<1x16x3xbf16> to vector<16x3xbf16>
    %cst_19 = arith.constant dense<0.000000e+00> : vector<16x992xf32>
    %35 = tpu.matmul %34, %32, %cst_19 {dimension_numbers = #tpu.dot_dimension_numbers<[1], [0], [0], [1], [0, 0, 1, 1], [], []>} : vector<16x3xbf16>, vector<3x992xbf16>, vector<16x992xf32> -> vector<16x992xf32>
    %36 = arith.addf %31, %35 : vector<16x992xf32>
    %37 = vector.extract_strided_slice %7 {offsets = [0, 64], sizes = [3, 992], strides = [1, 1]} : vector<3x1088xbf16> to vector<3x992xbf16>
    %38 = vector.extract_strided_slice %0 {offsets = [6, 0, 0], sizes = [1, 16, 3], strides = [1, 1, 1]} : vector<9x16x3xbf16> to vector<1x16x3xbf16>
    %39 = vector.shape_cast %38 : vector<1x16x3xbf16> to vector<16x3xbf16>
    %cst_20 = arith.constant dense<0.000000e+00> : vector<16x992xf32>
    %40 = tpu.matmul %39, %37, %cst_20 {dimension_numbers = #tpu.dot_dimension_numbers<[1], [0], [0], [1], [0, 0, 1, 1], [], []>} : vector<16x3xbf16>, vector<3x992xbf16>, vector<16x992xf32> -> vector<16x992xf32>
    %41 = arith.addf %36, %40 : vector<16x992xf32>
    %42 = vector.extract_strided_slice %7 {offsets = [0, 65], sizes = [3, 992], strides = [1, 1]} : vector<3x1088xbf16> to vector<3x992xbf16>
    %43 = vector.extract_strided_slice %0 {offsets = [7, 0, 0], sizes = [1, 16, 3], strides = [1, 1, 1]} : vector<9x16x3xbf16> to vector<1x16x3xbf16>
    %44 = vector.shape_cast %43 : vector<1x16x3xbf16> to vector<16x3xbf16>
    %cst_21 = arith.constant dense<0.000000e+00> : vector<16x992xf32>
    %45 = tpu.matmul %44, %42, %cst_21 {dimension_numbers = #tpu.dot_dimension_numbers<[1], [0], [0], [1], [0, 0, 1, 1], [], []>} : vector<16x3xbf16>, vector<3x992xbf16>, vector<16x992xf32> -> vector<16x992xf32>
    %46 = arith.addf %41, %45 : vector<16x992xf32>
    %47 = vector.extract_strided_slice %7 {offsets = [0, 66], sizes = [3, 992], strides = [1, 1]} : vector<3x1088xbf16> to vector<3x992xbf16>
    %48 = vector.extract_strided_slice %0 {offsets = [8, 0, 0], sizes = [1, 16, 3], strides = [1, 1, 1]} : vector<9x16x3xbf16> to vector<1x16x3xbf16>
    %49 = vector.shape_cast %48 : vector<1x16x3xbf16> to vector<16x3xbf16>
    %cst_22 = arith.constant dense<0.000000e+00> : vector<16x992xf32>
    %50 = tpu.matmul %49, %47, %cst_22 {dimension_numbers = #tpu.dot_dimension_numbers<[1], [0], [0], [1], [0, 0, 1, 1], [], []>} : vector<16x3xbf16>, vector<3x992xbf16>, vector<16x992xf32> -> vector<16x992xf32>
    %51 = arith.addf %46, %50 : vector<16x992xf32>
    %52 = vector.broadcast %1 : vector<16x1xf32> to vector<16x992xf32>
    %53 = arith.addf %51, %52 : vector<16x992xf32>
    %cst_23 = arith.constant 0.000000e+00 : f32
    %54 = vector.broadcast %cst_23 : f32 to vector<16x992xf32>
    %55 = arith.maximumf %53, %54 : vector<16x992xf32>
    %56 = arith.truncf %55 : vector<16x992xf32> to vector<16x992xbf16>
    %57 = vector.extract_strided_slice %56 {offsets = [0, 0], sizes = [16, 928], strides = [1, 1]} : vector<16x992xbf16> to vector<16x928xbf16>
    %58 = vector.extract_strided_slice %56 {offsets = [0, 1], sizes = [16, 928], strides = [1, 1]} : vector<16x992xbf16> to vector<16x928xbf16>
    %59 = arith.maximumf %57, %58 : vector<16x928xbf16>
    %60 = vector.extract_strided_slice %56 {offsets = [0, 32], sizes = [16, 928], strides = [1, 1]} : vector<16x992xbf16> to vector<16x928xbf16>
    %61 = vector.extract_strided_slice %56 {offsets = [0, 33], sizes = [16, 928], strides = [1, 1]} : vector<16x992xbf16> to vector<16x928xbf16>
    %62 = arith.maximumf %60, %61 : vector<16x928xbf16>
    %63 = arith.maximumf %59, %62 : vector<16x928xbf16>
    %cst_24 = arith.constant dense<0.000000e+00> : vector<16x256xf32>
    %64 = tpu.matmul %63, %2, %cst_24 {dimension_numbers = #tpu.dot_dimension_numbers<[1], [0], [0], [1], [0, 0, 1, 1], [], []>} : vector<16x928xbf16>, vector<928x256xbf16>, vector<16x256xf32> -> vector<16x256xf32>
    %65 = arith.truncf %64 : vector<16x256xf32> to vector<16x256xbf16>
    %66 = vector.extract_strided_slice %65 {offsets = [0, 0], sizes = [16, 224], strides = [1, 1]} : vector<16x256xbf16> to vector<16x224xbf16>
    %67 = vector.extract_strided_slice %65 {offsets = [0, 1], sizes = [16, 224], strides = [1, 1]} : vector<16x256xbf16> to vector<16x224xbf16>
    %68 = vector.extract_strided_slice %65 {offsets = [0, 2], sizes = [16, 224], strides = [1, 1]} : vector<16x256xbf16> to vector<16x224xbf16>
    %69 = vector.extract_strided_slice %65 {offsets = [0, 15], sizes = [16, 224], strides = [1, 1]} : vector<16x256xbf16> to vector<16x224xbf16>
    %70 = vector.extract_strided_slice %65 {offsets = [0, 16], sizes = [16, 224], strides = [1, 1]} : vector<16x256xbf16> to vector<16x224xbf16>
    %71 = vector.extract_strided_slice %65 {offsets = [0, 17], sizes = [16, 224], strides = [1, 1]} : vector<16x256xbf16> to vector<16x224xbf16>
    %72 = vector.extract_strided_slice %65 {offsets = [0, 30], sizes = [16, 224], strides = [1, 1]} : vector<16x256xbf16> to vector<16x224xbf16>
    %73 = vector.extract_strided_slice %65 {offsets = [0, 31], sizes = [16, 224], strides = [1, 1]} : vector<16x256xbf16> to vector<16x224xbf16>
    %74 = vector.extract_strided_slice %65 {offsets = [0, 32], sizes = [16, 224], strides = [1, 1]} : vector<16x256xbf16> to vector<16x224xbf16>
    %75 = tpu.concatenate %66, %67, %68, %69, %70, %71, %72, %73, %74 in 0 : vector<16x224xbf16>, vector<16x224xbf16>, vector<16x224xbf16>, vector<16x224xbf16>, vector<16x224xbf16>, vector<16x224xbf16>, vector<16x224xbf16>, vector<16x224xbf16>, vector<16x224xbf16> -> vector<144x224xbf16>
    %cst_25 = arith.constant dense<0.000000e+00> : vector<64x224xf32>
    %76 = tpu.matmul %3, %75, %cst_25 {dimension_numbers = #tpu.dot_dimension_numbers<[1], [0], [0], [1], [0, 0, 1, 1], [], []>} : vector<64x144xbf16>, vector<144x224xbf16>, vector<64x224xf32> -> vector<64x224xf32>
    %77 = vector.broadcast %4 : vector<64x1xf32> to vector<64x224xf32>
    %78 = arith.addf %76, %77 : vector<64x224xf32>
    %cst_26 = arith.constant 0.000000e+00 : f32
    %79 = vector.broadcast %cst_26 : f32 to vector<64x224xf32>
    %80 = arith.maximumf %78, %79 : vector<64x224xf32>
    %81 = arith.truncf %80 : vector<64x224xf32> to vector<64x224xbf16>
    %82 = vector.extract_strided_slice %81 {offsets = [0, 0], sizes = [64, 178], strides = [1, 1]} : vector<64x224xbf16> to vector<64x178xbf16>
    %83 = vector.extract_strided_slice %81 {offsets = [0, 1], sizes = [64, 178], strides = [1, 1]} : vector<64x224xbf16> to vector<64x178xbf16>
    %84 = arith.maximumf %82, %83 : vector<64x178xbf16>
    %85 = vector.extract_strided_slice %81 {offsets = [0, 15], sizes = [64, 178], strides = [1, 1]} : vector<64x224xbf16> to vector<64x178xbf16>
    %86 = vector.extract_strided_slice %81 {offsets = [0, 16], sizes = [64, 178], strides = [1, 1]} : vector<64x224xbf16> to vector<64x178xbf16>
    %87 = arith.maximumf %85, %86 : vector<64x178xbf16>
    %88 = arith.maximumf %84, %87 : vector<64x178xbf16>
    %cst_27 = arith.constant dense<0.000000e+00> : vector<64x36xf32>
    %89 = tpu.matmul %88, %5, %cst_27 {dimension_numbers = #tpu.dot_dimension_numbers<[1], [0], [0], [1], [0, 0, 1, 1], [], []>} : vector<64x178xbf16>, vector<178x36xbf16>, vector<64x36xf32> -> vector<64x36xf32>
    %90 = arith.truncf %89 : vector<64x36xf32> to vector<64x36xbf16>
    %c0_28 = arith.constant 0 : index
    %c0_29 = arith.constant 0 : index
    %c0_30 = arith.constant 0 : index
    %91 = vector.load %arg8[%c0_28, %c0_29, %c0_30] : memref<2x64x36xbf16, #tpu.memory_space<vmem>>, vector<1x64x36xbf16>
    %92 = vector.shape_cast %91 : vector<1x64x36xbf16> to vector<64x36xbf16>
    %93 = vector.shape_cast %90 : vector<64x36xbf16> to vector<1x64x36xbf16>
    tpu.vector_store %arg8[%c0_28, %c0_29, %c0_30], %93 {strides = array<i32>} : memref<2x64x36xbf16, #tpu.memory_space<vmem>>, vector<1x64x36xbf16>,
    %c1 = arith.constant 1 : index
    %c0_31 = arith.constant 0 : index
    %c0_32 = arith.constant 0 : index
    %94 = vector.load %arg1[%c1, %c0_31, %c0_32] : memref<2x3x1088xbf16, #tpu.memory_space<vmem>>, vector<1x3x1088xbf16>
    %95 = vector.shape_cast %94 : vector<1x3x1088xbf16> to vector<3x1088xbf16>
    %96 = vector.extract_strided_slice %95 {offsets = [0, 0], sizes = [3, 992], strides = [1, 1]} : vector<3x1088xbf16> to vector<3x992xbf16>
    %97 = vector.extract_strided_slice %0 {offsets = [0, 0, 0], sizes = [1, 16, 3], strides = [1, 1, 1]} : vector<9x16x3xbf16> to vector<1x16x3xbf16>
    %98 = vector.shape_cast %97 : vector<1x16x3xbf16> to vector<16x3xbf16>
    %cst_33 = arith.constant dense<0.000000e+00> : vector<16x992xf32>
    %99 = tpu.matmul %98, %96, %cst_33 {dimension_numbers = #tpu.dot_dimension_numbers<[1], [0], [0], [1], [0, 0, 1, 1], [], []>} : vector<16x3xbf16>, vector<3x992xbf16>, vector<16x992xf32> -> vector<16x992xf32>
    %100 = vector.extract_strided_slice %95 {offsets = [0, 1], sizes = [3, 992], strides = [1, 1]} : vector<3x1088xbf16> to vector<3x992xbf16>
    %101 = vector.extract_strided_slice %0 {offsets = [1, 0, 0], sizes = [1, 16, 3], strides = [1, 1, 1]} : vector<9x16x3xbf16> to vector<1x16x3xbf16>
    %102 = vector.shape_cast %101 : vector<1x16x3xbf16> to vector<16x3xbf16>
    %cst_34 = arith.constant dense<0.000000e+00> : vector<16x992xf32>
    %103 = tpu.matmul %102, %100, %cst_34 {dimension_numbers = #tpu.dot_dimension_numbers<[1], [0], [0], [1], [0, 0, 1, 1], [], []>} : vector<16x3xbf16>, vector<3x992xbf16>, vector<16x992xf32> -> vector<16x992xf32>
    %104 = arith.addf %99, %103 : vector<16x992xf32>
    %105 = vector.extract_strided_slice %95 {offsets = [0, 2], sizes = [3, 992], strides = [1, 1]} : vector<3x1088xbf16> to vector<3x992xbf16>
    %106 = vector.extract_strided_slice %0 {offsets = [2, 0, 0], sizes = [1, 16, 3], strides = [1, 1, 1]} : vector<9x16x3xbf16> to vector<1x16x3xbf16>
    %107 = vector.shape_cast %106 : vector<1x16x3xbf16> to vector<16x3xbf16>
    %cst_35 = arith.constant dense<0.000000e+00> : vector<16x992xf32>
    %108 = tpu.matmul %107, %105, %cst_35 {dimension_numbers = #tpu.dot_dimension_numbers<[1], [0], [0], [1], [0, 0, 1, 1], [], []>} : vector<16x3xbf16>, vector<3x992xbf16>, vector<16x992xf32> -> vector<16x992xf32>
    %109 = arith.addf %104, %108 : vector<16x992xf32>
    %110 = vector.extract_strided_slice %95 {offsets = [0, 32], sizes = [3, 992], strides = [1, 1]} : vector<3x1088xbf16> to vector<3x992xbf16>
    %111 = vector.extract_strided_slice %0 {offsets = [3, 0, 0], sizes = [1, 16, 3], strides = [1, 1, 1]} : vector<9x16x3xbf16> to vector<1x16x3xbf16>
    %112 = vector.shape_cast %111 : vector<1x16x3xbf16> to vector<16x3xbf16>
    %cst_36 = arith.constant dense<0.000000e+00> : vector<16x992xf32>
    %113 = tpu.matmul %112, %110, %cst_36 {dimension_numbers = #tpu.dot_dimension_numbers<[1], [0], [0], [1], [0, 0, 1, 1], [], []>} : vector<16x3xbf16>, vector<3x992xbf16>, vector<16x992xf32> -> vector<16x992xf32>
    %114 = arith.addf %109, %113 : vector<16x992xf32>
    %115 = vector.extract_strided_slice %95 {offsets = [0, 33], sizes = [3, 992], strides = [1, 1]} : vector<3x1088xbf16> to vector<3x992xbf16>
    %116 = vector.extract_strided_slice %0 {offsets = [4, 0, 0], sizes = [1, 16, 3], strides = [1, 1, 1]} : vector<9x16x3xbf16> to vector<1x16x3xbf16>
    %117 = vector.shape_cast %116 : vector<1x16x3xbf16> to vector<16x3xbf16>
    %cst_37 = arith.constant dense<0.000000e+00> : vector<16x992xf32>
    %118 = tpu.matmul %117, %115, %cst_37 {dimension_numbers = #tpu.dot_dimension_numbers<[1], [0], [0], [1], [0, 0, 1, 1], [], []>} : vector<16x3xbf16>, vector<3x992xbf16>, vector<16x992xf32> -> vector<16x992xf32>
    %119 = arith.addf %114, %118 : vector<16x992xf32>
    %120 = vector.extract_strided_slice %95 {offsets = [0, 34], sizes = [3, 992], strides = [1, 1]} : vector<3x1088xbf16> to vector<3x992xbf16>
    %121 = vector.extract_strided_slice %0 {offsets = [5, 0, 0], sizes = [1, 16, 3], strides = [1, 1, 1]} : vector<9x16x3xbf16> to vector<1x16x3xbf16>
    %122 = vector.shape_cast %121 : vector<1x16x3xbf16> to vector<16x3xbf16>
    %cst_38 = arith.constant dense<0.000000e+00> : vector<16x992xf32>
    %123 = tpu.matmul %122, %120, %cst_38 {dimension_numbers = #tpu.dot_dimension_numbers<[1], [0], [0], [1], [0, 0, 1, 1], [], []>} : vector<16x3xbf16>, vector<3x992xbf16>, vector<16x992xf32> -> vector<16x992xf32>
    %124 = arith.addf %119, %123 : vector<16x992xf32>
    %125 = vector.extract_strided_slice %95 {offsets = [0, 64], sizes = [3, 992], strides = [1, 1]} : vector<3x1088xbf16> to vector<3x992xbf16>
    %126 = vector.extract_strided_slice %0 {offsets = [6, 0, 0], sizes = [1, 16, 3], strides = [1, 1, 1]} : vector<9x16x3xbf16> to vector<1x16x3xbf16>
    %127 = vector.shape_cast %126 : vector<1x16x3xbf16> to vector<16x3xbf16>
    %cst_39 = arith.constant dense<0.000000e+00> : vector<16x992xf32>
    %128 = tpu.matmul %127, %125, %cst_39 {dimension_numbers = #tpu.dot_dimension_numbers<[1], [0], [0], [1], [0, 0, 1, 1], [], []>} : vector<16x3xbf16>, vector<3x992xbf16>, vector<16x992xf32> -> vector<16x992xf32>
    %129 = arith.addf %124, %128 : vector<16x992xf32>
    %130 = vector.extract_strided_slice %95 {offsets = [0, 65], sizes = [3, 992], strides = [1, 1]} : vector<3x1088xbf16> to vector<3x992xbf16>
    %131 = vector.extract_strided_slice %0 {offsets = [7, 0, 0], sizes = [1, 16, 3], strides = [1, 1, 1]} : vector<9x16x3xbf16> to vector<1x16x3xbf16>
    %132 = vector.shape_cast %131 : vector<1x16x3xbf16> to vector<16x3xbf16>
    %cst_40 = arith.constant dense<0.000000e+00> : vector<16x992xf32>
    %133 = tpu.matmul %132, %130, %cst_40 {dimension_numbers = #tpu.dot_dimension_numbers<[1], [0], [0], [1], [0, 0, 1, 1], [], []>} : vector<16x3xbf16>, vector<3x992xbf16>, vector<16x992xf32> -> vector<16x992xf32>
    %134 = arith.addf %129, %133 : vector<16x992xf32>
    %135 = vector.extract_strided_slice %95 {offsets = [0, 66], sizes = [3, 992], strides = [1, 1]} : vector<3x1088xbf16> to vector<3x992xbf16>
    %136 = vector.extract_strided_slice %0 {offsets = [8, 0, 0], sizes = [1, 16, 3], strides = [1, 1, 1]} : vector<9x16x3xbf16> to vector<1x16x3xbf16>
    %137 = vector.shape_cast %136 : vector<1x16x3xbf16> to vector<16x3xbf16>
    %cst_41 = arith.constant dense<0.000000e+00> : vector<16x992xf32>
    %138 = tpu.matmul %137, %135, %cst_41 {dimension_numbers = #tpu.dot_dimension_numbers<[1], [0], [0], [1], [0, 0, 1, 1], [], []>} : vector<16x3xbf16>, vector<3x992xbf16>, vector<16x992xf32> -> vector<16x992xf32>
    %139 = arith.addf %134, %138 : vector<16x992xf32>
    %140 = vector.broadcast %1 : vector<16x1xf32> to vector<16x992xf32>
    %141 = arith.addf %139, %140 : vector<16x992xf32>
    %cst_42 = arith.constant 0.000000e+00 : f32
    %142 = vector.broadcast %cst_42 : f32 to vector<16x992xf32>
    %143 = arith.maximumf %141, %142 : vector<16x992xf32>
    %144 = arith.truncf %143 : vector<16x992xf32> to vector<16x992xbf16>
    %145 = vector.extract_strided_slice %144 {offsets = [0, 0], sizes = [16, 928], strides = [1, 1]} : vector<16x992xbf16> to vector<16x928xbf16>
    %146 = vector.extract_strided_slice %144 {offsets = [0, 1], sizes = [16, 928], strides = [1, 1]} : vector<16x992xbf16> to vector<16x928xbf16>
    %147 = arith.maximumf %145, %146 : vector<16x928xbf16>
    %148 = vector.extract_strided_slice %144 {offsets = [0, 32], sizes = [16, 928], strides = [1, 1]} : vector<16x992xbf16> to vector<16x928xbf16>
    %149 = vector.extract_strided_slice %144 {offsets = [0, 33], sizes = [16, 928], strides = [1, 1]} : vector<16x992xbf16> to vector<16x928xbf16>
    %150 = arith.maximumf %148, %149 : vector<16x928xbf16>
    %151 = arith.maximumf %147, %150 : vector<16x928xbf16>
    %cst_43 = arith.constant dense<0.000000e+00> : vector<16x256xf32>
    %152 = tpu.matmul %151, %2, %cst_43 {dimension_numbers = #tpu.dot_dimension_numbers<[1], [0], [0], [1], [0, 0, 1, 1], [], []>} : vector<16x928xbf16>, vector<928x256xbf16>, vector<16x256xf32> -> vector<16x256xf32>
    %153 = arith.truncf %152 : vector<16x256xf32> to vector<16x256xbf16>
    %154 = vector.extract_strided_slice %153 {offsets = [0, 0], sizes = [16, 224], strides = [1, 1]} : vector<16x256xbf16> to vector<16x224xbf16>
    %155 = vector.extract_strided_slice %153 {offsets = [0, 1], sizes = [16, 224], strides = [1, 1]} : vector<16x256xbf16> to vector<16x224xbf16>
    %156 = vector.extract_strided_slice %153 {offsets = [0, 2], sizes = [16, 224], strides = [1, 1]} : vector<16x256xbf16> to vector<16x224xbf16>
    %157 = vector.extract_strided_slice %153 {offsets = [0, 15], sizes = [16, 224], strides = [1, 1]} : vector<16x256xbf16> to vector<16x224xbf16>
    %158 = vector.extract_strided_slice %153 {offsets = [0, 16], sizes = [16, 224], strides = [1, 1]} : vector<16x256xbf16> to vector<16x224xbf16>
    %159 = vector.extract_strided_slice %153 {offsets = [0, 17], sizes = [16, 224], strides = [1, 1]} : vector<16x256xbf16> to vector<16x224xbf16>
    %160 = vector.extract_strided_slice %153 {offsets = [0, 30], sizes = [16, 224], strides = [1, 1]} : vector<16x256xbf16> to vector<16x224xbf16>
    %161 = vector.extract_strided_slice %153 {offsets = [0, 31], sizes = [16, 224], strides = [1, 1]} : vector<16x256xbf16> to vector<16x224xbf16>
    %162 = vector.extract_strided_slice %153 {offsets = [0, 32], sizes = [16, 224], strides = [1, 1]} : vector<16x256xbf16> to vector<16x224xbf16>
    %163 = tpu.concatenate %154, %155, %156, %157, %158, %159, %160, %161, %162 in 0 : vector<16x224xbf16>, vector<16x224xbf16>, vector<16x224xbf16>, vector<16x224xbf16>, vector<16x224xbf16>, vector<16x224xbf16>, vector<16x224xbf16>, vector<16x224xbf16>, vector<16x224xbf16> -> vector<144x224xbf16>
    %cst_44 = arith.constant dense<0.000000e+00> : vector<64x224xf32>
    %164 = tpu.matmul %3, %163, %cst_44 {dimension_numbers = #tpu.dot_dimension_numbers<[1], [0], [0], [1], [0, 0, 1, 1], [], []>} : vector<64x144xbf16>, vector<144x224xbf16>, vector<64x224xf32> -> vector<64x224xf32>
    %165 = vector.broadcast %4 : vector<64x1xf32> to vector<64x224xf32>
    %166 = arith.addf %164, %165 : vector<64x224xf32>
    %cst_45 = arith.constant 0.000000e+00 : f32
    %167 = vector.broadcast %cst_45 : f32 to vector<64x224xf32>
    %168 = arith.maximumf %166, %167 : vector<64x224xf32>
    %169 = arith.truncf %168 : vector<64x224xf32> to vector<64x224xbf16>
    %170 = vector.extract_strided_slice %169 {offsets = [0, 0], sizes = [64, 178], strides = [1, 1]} : vector<64x224xbf16> to vector<64x178xbf16>
    %171 = vector.extract_strided_slice %169 {offsets = [0, 1], sizes = [64, 178], strides = [1, 1]} : vector<64x224xbf16> to vector<64x178xbf16>
    %172 = arith.maximumf %170, %171 : vector<64x178xbf16>
    %173 = vector.extract_strided_slice %169 {offsets = [0, 15], sizes = [64, 178], strides = [1, 1]} : vector<64x224xbf16> to vector<64x178xbf16>
    %174 = vector.extract_strided_slice %169 {offsets = [0, 16], sizes = [64, 178], strides = [1, 1]} : vector<64x224xbf16> to vector<64x178xbf16>
    %175 = arith.maximumf %173, %174 : vector<64x178xbf16>
    %176 = arith.maximumf %172, %175 : vector<64x178xbf16>
    %cst_46 = arith.constant dense<0.000000e+00> : vector<64x36xf32>
    %177 = tpu.matmul %176, %5, %cst_46 {dimension_numbers = #tpu.dot_dimension_numbers<[1], [0], [0], [1], [0, 0, 1, 1], [], []>} : vector<64x178xbf16>, vector<178x36xbf16>, vector<64x36xf32> -> vector<64x36xf32>
    %178 = arith.truncf %177 : vector<64x36xf32> to vector<64x36xbf16>
    %c1_47 = arith.constant 1 : index
    %c0_48 = arith.constant 0 : index
    %c0_49 = arith.constant 0 : index
    %179 = vector.load %arg8[%c1_47, %c0_48, %c0_49] : memref<2x64x36xbf16, #tpu.memory_space<vmem>>, vector<1x64x36xbf16>
    %180 = vector.shape_cast %179 : vector<1x64x36xbf16> to vector<64x36xbf16>
    %181 = vector.shape_cast %178 : vector<64x36xbf16> to vector<1x64x36xbf16>
    tpu.vector_store %arg8[%c1_47, %c0_48, %c0_49], %181 {strides = array<i32>} : memref<2x64x36xbf16, #tpu.memory_space<vmem>>, vector<1x64x36xbf16>,
    return
  }
  func.func @transform_0(%arg0: i32) -> (i32, i32, i32) {
    %c0_i32 = arith.constant 0 : i32
    %c0_i32_0 = arith.constant 0 : i32
    %c0_i32_1 = arith.constant 0 : i32
    return %arg0, %c0_i32, %c0_i32_0 : i32, i32, i32
  }
  func.func @transform_1(%arg0: i32) -> (i32, i32, i32) {
    %c0_i32 = arith.constant 0 : i32
    %c0_i32_0 = arith.constant 0 : i32
    %c0_i32_1 = arith.constant 0 : i32
    %c0_i32_2 = arith.constant 0 : i32
    return %c0_i32, %c0_i32_0, %c0_i32_1 : i32, i32, i32
  }
  func.func @transform_2(%arg0: i32) -> (i32, i32) {
    %c0_i32 = arith.constant 0 : i32
    %c0_i32_0 = arith.constant 0 : i32
    %c0_i32_1 = arith.constant 0 : i32
    return %c0_i32, %c0_i32_0 : i32, i32
  }
  func.func @transform_3(%arg0: i32) -> (i32, i32) {
    %c0_i32 = arith.constant 0 : i32
    %c0_i32_0 = arith.constant 0 : i32
    %c0_i32_1 = arith.constant 0 : i32
    return %c0_i32, %c0_i32_0 : i32, i32
  }
  func.func @transform_4(%arg0: i32) -> (i32, i32) {
    %c0_i32 = arith.constant 0 : i32
    %c0_i32_0 = arith.constant 0 : i32
    %c0_i32_1 = arith.constant 0 : i32
    return %c0_i32, %c0_i32_0 : i32, i32
  }
  func.func @transform_5(%arg0: i32) -> (i32, i32) {
    %c0_i32 = arith.constant 0 : i32
    %c0_i32_0 = arith.constant 0 : i32
    %c0_i32_1 = arith.constant 0 : i32
    return %c0_i32, %c0_i32_0 : i32, i32
  }
  func.func @transform_6(%arg0: i32) -> (i32, i32) {
    %c0_i32 = arith.constant 0 : i32
    %c0_i32_0 = arith.constant 0 : i32
    %c0_i32_1 = arith.constant 0 : i32
    return %c0_i32, %c0_i32_0 : i32, i32
  }
  func.func @transform_7(%arg0: i32) -> (i32, i32, i32) {
    %c0_i32 = arith.constant 0 : i32
    %c0_i32_0 = arith.constant 0 : i32
    %c0_i32_1 = arith.constant 0 : i32
    return %arg0, %c0_i32, %c0_i32_0 : i32, i32, i32
  }
}

module attributes {stable_mosaic.version = 11 : i64} {
  func.func @_fc_stage_kernel(%arg0: i32, %arg1: memref<8x2304xbf16, #tpu.memory_space<vmem>>, %arg2: memref<2304x64xbf16, #tpu.memory_space<vmem>>, %arg3: memref<1x64xf32, #tpu.memory_space<vmem>>, %arg4: memref<64x32xbf16, #tpu.memory_space<vmem>>, %arg5: memref<1x32xf32, #tpu.memory_space<vmem>>, %arg6: memref<32x4xbf16, #tpu.memory_space<vmem>>, %arg7: memref<1x4xf32, #tpu.memory_space<vmem>>, %arg8: memref<8x4xf32, #tpu.memory_space<vmem>>) attributes {dimension_semantics = [#tpu.dimension_semantics<parallel>], iteration_bounds = array<i64: 1>, scalar_prefetch = 0 : i64, scratch_operands = 0 : i64, tpu.core_type = #tpu.core_type<tc>, window_params = [{transform_indices = @transform_0, window_bounds = array<i64: 8, 2304>}, {pipeline_mode = #tpu.pipeline_mode<synchronous>, transform_indices = @transform_1, window_bounds = array<i64: 2304, 64>}, {pipeline_mode = #tpu.pipeline_mode<synchronous>, transform_indices = @transform_2, window_bounds = array<i64: 1, 64>}, {pipeline_mode = #tpu.pipeline_mode<synchronous>, transform_indices = @transform_3, window_bounds = array<i64: 64, 32>}, {pipeline_mode = #tpu.pipeline_mode<synchronous>, transform_indices = @transform_4, window_bounds = array<i64: 1, 32>}, {pipeline_mode = #tpu.pipeline_mode<synchronous>, transform_indices = @transform_5, window_bounds = array<i64: 32, 4>}, {pipeline_mode = #tpu.pipeline_mode<synchronous>, transform_indices = @transform_6, window_bounds = array<i64: 1, 4>}, {transform_indices = @transform_7, window_bounds = array<i64: 8, 4>}]} {
    %c0 = arith.constant 0 : index
    %c0_0 = arith.constant 0 : index
    %0 = vector.load %arg1[%c0, %c0_0] : memref<8x2304xbf16, #tpu.memory_space<vmem>>, vector<8x2304xbf16>
    %c0_1 = arith.constant 0 : index
    %c0_2 = arith.constant 0 : index
    %1 = vector.load %arg2[%c0_1, %c0_2] : memref<2304x64xbf16, #tpu.memory_space<vmem>>, vector<2304x64xbf16>
    %cst = arith.constant dense<0.000000e+00> : vector<8x64xf32>
    %2 = tpu.matmul %0, %1, %cst {dimension_numbers = #tpu.dot_dimension_numbers<[1], [0], [0], [1], [0, 0, 1, 1], [], []>} : vector<8x2304xbf16>, vector<2304x64xbf16>, vector<8x64xf32> -> vector<8x64xf32>
    %c0_3 = arith.constant 0 : index
    %c0_4 = arith.constant 0 : index
    %3 = vector.load %arg3[%c0_3, %c0_4] : memref<1x64xf32, #tpu.memory_space<vmem>>, vector<1x64xf32>
    %4 = vector.broadcast %3 : vector<1x64xf32> to vector<8x64xf32>
    %5 = arith.addf %2, %4 : vector<8x64xf32>
    %cst_5 = arith.constant 0.000000e+00 : f32
    %6 = vector.broadcast %cst_5 : f32 to vector<8x64xf32>
    %7 = arith.maximumf %5, %6 : vector<8x64xf32>
    %8 = arith.truncf %7 : vector<8x64xf32> to vector<8x64xbf16>
    %c0_6 = arith.constant 0 : index
    %c0_7 = arith.constant 0 : index
    %9 = vector.load %arg4[%c0_6, %c0_7] : memref<64x32xbf16, #tpu.memory_space<vmem>>, vector<64x32xbf16>
    %cst_8 = arith.constant dense<0.000000e+00> : vector<8x32xf32>
    %10 = tpu.matmul %8, %9, %cst_8 {dimension_numbers = #tpu.dot_dimension_numbers<[1], [0], [0], [1], [0, 0, 1, 1], [], []>} : vector<8x64xbf16>, vector<64x32xbf16>, vector<8x32xf32> -> vector<8x32xf32>
    %c0_9 = arith.constant 0 : index
    %c0_10 = arith.constant 0 : index
    %11 = vector.load %arg5[%c0_9, %c0_10] : memref<1x32xf32, #tpu.memory_space<vmem>>, vector<1x32xf32>
    %12 = vector.broadcast %11 : vector<1x32xf32> to vector<8x32xf32>
    %13 = arith.addf %10, %12 : vector<8x32xf32>
    %cst_11 = arith.constant 0.000000e+00 : f32
    %14 = vector.broadcast %cst_11 : f32 to vector<8x32xf32>
    %15 = arith.maximumf %13, %14 : vector<8x32xf32>
    %16 = arith.truncf %15 : vector<8x32xf32> to vector<8x32xbf16>
    %c0_12 = arith.constant 0 : index
    %c0_13 = arith.constant 0 : index
    %17 = vector.load %arg6[%c0_12, %c0_13] : memref<32x4xbf16, #tpu.memory_space<vmem>>, vector<32x4xbf16>
    %cst_14 = arith.constant dense<0.000000e+00> : vector<8x4xf32>
    %18 = tpu.matmul %16, %17, %cst_14 {dimension_numbers = #tpu.dot_dimension_numbers<[1], [0], [0], [1], [0, 0, 1, 1], [], []>} : vector<8x32xbf16>, vector<32x4xbf16>, vector<8x4xf32> -> vector<8x4xf32>
    %c0_15 = arith.constant 0 : index
    %c0_16 = arith.constant 0 : index
    %19 = vector.load %arg7[%c0_15, %c0_16] : memref<1x4xf32, #tpu.memory_space<vmem>>, vector<1x4xf32>
    %20 = vector.broadcast %19 : vector<1x4xf32> to vector<8x4xf32>
    %21 = arith.addf %18, %20 : vector<8x4xf32>
    %c0_17 = arith.constant 0 : index
    %c0_18 = arith.constant 0 : index
    %22 = vector.load %arg8[%c0_17, %c0_18] : memref<8x4xf32, #tpu.memory_space<vmem>>, vector<8x4xf32>
    tpu.vector_store %arg8[%c0_17, %c0_18], %21 {strides = array<i32>} : memref<8x4xf32, #tpu.memory_space<vmem>>, vector<8x4xf32>,
    return
  }
  func.func @transform_0(%arg0: i32) -> (i32, i32) {
    %c0_i32 = arith.constant 0 : i32
    %c0_i32_0 = arith.constant 0 : i32
    return %arg0, %c0_i32 : i32, i32
  }
  func.func @transform_1(%arg0: i32) -> (i32, i32) {
    %c0_i32 = arith.constant 0 : i32
    %c0_i32_0 = arith.constant 0 : i32
    %c0_i32_1 = arith.constant 0 : i32
    return %c0_i32, %c0_i32_0 : i32, i32
  }
  func.func @transform_2(%arg0: i32) -> (i32, i32) {
    %c0_i32 = arith.constant 0 : i32
    %c0_i32_0 = arith.constant 0 : i32
    %c0_i32_1 = arith.constant 0 : i32
    return %c0_i32, %c0_i32_0 : i32, i32
  }
  func.func @transform_3(%arg0: i32) -> (i32, i32) {
    %c0_i32 = arith.constant 0 : i32
    %c0_i32_0 = arith.constant 0 : i32
    %c0_i32_1 = arith.constant 0 : i32
    return %c0_i32, %c0_i32_0 : i32, i32
  }
  func.func @transform_4(%arg0: i32) -> (i32, i32) {
    %c0_i32 = arith.constant 0 : i32
    %c0_i32_0 = arith.constant 0 : i32
    %c0_i32_1 = arith.constant 0 : i32
    return %c0_i32, %c0_i32_0 : i32, i32
  }
  func.func @transform_5(%arg0: i32) -> (i32, i32) {
    %c0_i32 = arith.constant 0 : i32
    %c0_i32_0 = arith.constant 0 : i32
    %c0_i32_1 = arith.constant 0 : i32
    return %c0_i32, %c0_i32_0 : i32, i32
  }
  func.func @transform_6(%arg0: i32) -> (i32, i32) {
    %c0_i32 = arith.constant 0 : i32
    %c0_i32_0 = arith.constant 0 : i32
    %c0_i32_1 = arith.constant 0 : i32
    return %c0_i32, %c0_i32_0 : i32, i32
  }
  func.func @transform_7(%arg0: i32) -> (i32, i32) {
    %c0_i32 = arith.constant 0 : i32
    %c0_i32_0 = arith.constant 0 : i32
    return %arg0, %c0_i32 : i32, i32
  }
}

</mosaic_0001>

<bundles_post_ra>
// kernel: forward.3
= control target key start
LH: loop header
LB: loop body
LE: loop exit
PB: predicated region body
PF: predicated region fallthrough
CT: control target
= control target key end

     0   :  { %vm1527_vm0 = vcmask 523264   ;;  %vm1566_vm1 = vcmask 261120   ;;  %vm1583_vm2 = vcmask 31744   ;;  %s2873_s1 = inlined_call_operand.vmem [shape: bf16[2304,64], index: 1, kind: input, shape index: {}]   ;;  %s2874_s0 = inlined_call_operand.vmem [shape: bf16[8,2304], index: 0, kind: input, shape index: {}]   ;;  %s2875_s2 = inlined_call_operand.vmem [shape: f32[1,64], index: 2, kind: input, shape index: {}]   ;;  %s2876_s4 = inlined_call_operand.vmem [shape: f32[1,32], index: 4, kind: input, shape index: {}]   ;;  %s2877_s3 = inlined_call_operand.vmem [shape: bf16[64,32], index: 3, kind: input, shape index: {}]   ;;  %s2878_s5 = inlined_call_operand.vmem [shape: bf16[32,4], index: 5, kind: input, shape index: {}]   ;;  %s2879_s6 = inlined_call_operand.vmem [shape: f32[1,4], index: 6, kind: input, shape index: {}]   ;;  %s2880_s7 = inlined_call_operand.vmem [shape: f32[8,4], index: 7, kind: output, shape index: {}]  }
   0x1   :  { %v2198_v0 = vld [vmem:[%s2873_s1 + $0x38] sm:$0xff]  ;;  %v2197_v4 = vld [vmem:[%s2873_s1 + $0x30] sm:$0xff]  ;;  %v2196_v8 = vld [vmem:[%s2873_s1 + $0x28] sm:$0xff] }
   0x2   :  { %v2206_v1 = vld [vmem:[%s2873_s1 + $0x78] sm:$0xff]  ;;  %1255 = vmatpush.bf16.msra.mxu0 %v2198_v0  ;;  %v2205_v5 = vld [vmem:[%s2873_s1 + $0x70] sm:$0xff]  ;;  %v2204_v9 = vld [vmem:[%s2873_s1 + $0x68] sm:$0xff] }
   0x3   :  { %v2214_v2 = vld [vmem:[%s2873_s1 + $0xb8] sm:$0xff]  ;;  %1268 = vmatpush.bf16.msra.mxu1 %v2206_v1  ;;  %v2213_v6 = vld [vmem:[%s2873_s1 + $0xb0] sm:$0xff]  ;;  %v2212_v10 = vld [vmem:[%s2873_s1 + $0xa8] sm:$0xff] }
   0x4   :  { %v2222_v3 = vld [vmem:[%s2873_s1 + $0xf8] sm:$0xff]  ;;  %1281 = vmatpush.bf16.msra.mxu2 %v2214_v2  ;;  %v2221_v7 = vld [vmem:[%s2873_s1 + $0xf0] sm:$0xff]  ;;  %v2220_v11 = vld [vmem:[%s2873_s1 + $0xe8] sm:$0xff] }
   0x5   :  { %1294 = vmatpush.bf16.msra.mxu3 %v2222_v3  ;;  %v2195_v12 = vld [vmem:[%s2873_s1 + $0x20] sm:$0xff]  ;;  %v2194_v16 = vld [vmem:[%s2873_s1 + $0x18] sm:$0xff]  ;;  %v2193_v20 = vld [vmem:[%s2873_s1 + $0x10] sm:$0xff] }
   0x6   :  { %1256 = vmatpush.bf16.msra.mxu0 %v2197_v4  ;;  %v2203_v13 = vld [vmem:[%s2873_s1 + $0x60] sm:$0xff]  ;;  %v2202_v17 = vld [vmem:[%s2873_s1 + $0x58] sm:$0xff]  ;;  %v2201_v21 = vld [vmem:[%s2873_s1 + $0x50] sm:$0xff] }
   0x7   :  { %1269 = vmatpush.bf16.msra.mxu1 %v2205_v5  ;;  %v2211_v14 = vld [vmem:[%s2873_s1 + $0xa0] sm:$0xff]  ;;  %v2210_v18 = vld [vmem:[%s2873_s1 + $0x98] sm:$0xff]  ;;  %v2209_v22 = vld [vmem:[%s2873_s1 + $0x90] sm:$0xff] }
   0x8   :  { %1282 = vmatpush.bf16.msra.mxu2 %v2213_v6  ;;  %v2219_v15 = vld [vmem:[%s2873_s1 + $0xe0] sm:$0xff]  ;;  %v2218_v19 = vld [vmem:[%s2873_s1 + $0xd8] sm:$0xff]  ;;  %v2217_v23 = vld [vmem:[%s2873_s1 + $0xd0] sm:$0xff] }
   0x9   :  { %1295 = vmatpush.bf16.msra.mxu3 %v2221_v7  ;;  %v2192_v24 = vld [vmem:[%s2873_s1 + $0x8] sm:$0xff]  ;;  %v27_v26 = vld [vmem:[%s2874_s0] sm:$0xff]  ;;  %v2230_v35 = vld [vmem:[%s2873_s1 + $0x138] sm:$0xff] }
   0xa   :  { %1257 = vmatpush.bf16.msra.mxu0 %v2196_v8  ;;  %v2200_v25 = vld [vmem:[%s2873_s1 + $0x48] sm:$0xff]  ;;  %v337_v30 = vunpack.c.l.b16 %v27_v26  ;;  %v2191_v31 = vld [vmem:[%s2873_s1] sm:$0xff]  ;;  %v338_v36 = vunpack.c.h.b16 %v27_v26  ;;  %v2238_v37 = vld [vmem:[%s2873_s1 + $0x178] sm:$0xff] }
   0xb   :  { %1270 = vmatpush.bf16.msra.mxu1 %v2204_v9  ;;  %v2208_v27 = vld [vmem:[%s2873_s1 + $0x88] sm:$0xff]  ;;  %v2199_v32 = vld [vmem:[%s2873_s1 + $0x40] sm:$0xff]  ;;  %v2246_v38 = vld [vmem:[%s2873_s1 + $0x1b8] sm:$0xff] }
   0xc   :  { %1283 = vmatpush.bf16.msra.mxu2 %v2212_v10  ;;  %v2216_v28 = vld [vmem:[%s2873_s1 + $0xc8] sm:$0xff]  ;;  %v2207_v34 = vld [vmem:[%s2873_s1 + $0x80] sm:$0xff]  ;;  %v355_v40 = vpack.c.b16 %v337_v30, %v337_v30  ;;  %v2254_v42 = vld [vmem:[%s2873_s1 + $0x1f8] sm:$0xff]  ;;  %v356_v45 = vpack.c.b16 %v338_v36, %v338_v36 }
   0xd   :  { %1296 = vmatpush.bf16.msra.mxu3 %v2220_v11  ;;  %v28_v29 = vld [vmem:[%s2874_s0 + $0x8] sm:$0xff]  ;;  %v2215_v39 = vld [vmem:[%s2873_s1 + $0xc0] sm:$0xff]  ;;  %v2229_v44 = vld [vmem:[%s2873_s1 + $0x130] sm:$0xff] }
   0xe   :  { %1258 = vmatpush.bf16.msra.mxu0 %v2195_v12  ;;  %v339_v33 = vunpack.c.l.b16 %v28_v29  ;;  %v340_v41 = vunpack.c.h.b16 %v28_v29  ;;  %v2237_v46 = vld [vmem:[%s2873_s1 + $0x170] sm:$0xff]  ;;  %v2228_v50 = vld [vmem:[%s2873_s1 + $0x128] sm:$0xff]  ;;  %v2227_v54 = vld [vmem:[%s2873_s1 + $0x120] sm:$0xff] }
   0xf   :  { %1271 = vmatpush.bf16.msra.mxu1 %v2203_v13  ;;  %v2245_v47 = vld [vmem:[%s2873_s1 + $0x1b0] sm:$0xff]  ;;  %v2236_v51 = vld [vmem:[%s2873_s1 + $0x168] sm:$0xff]  ;;  %v2235_v55 = vld [vmem:[%s2873_s1 + $0x160] sm:$0xff] }
  0x10   :  { %1284 = vmatpush.bf16.msra.mxu2 %v2211_v14  ;;  %v357_v43 = vpack.c.b16 %v339_v33, %v339_v33  ;;  %v358_v48 = vpack.c.b16 %v340_v41, %v340_v41  ;;  %v2253_v49 = vld [vmem:[%s2873_s1 + $0x1f0] sm:$0xff]  ;;  %v2244_v52 = vld [vmem:[%s2873_s1 + $0x1a8] sm:$0xff]  ;;  %v2243_v56 = vld [vmem:[%s2873_s1 + $0x1a0] sm:$0xff] }
  0x11   :  { %1297 = vmatpush.bf16.msra.mxu3 %v2219_v15  ;;  %v2252_v53 = vld [vmem:[%s2873_s1 + $0x1e8] sm:$0xff]  ;;  %v2251_v57 = vld [vmem:[%s2873_s1 + $0x1e0] sm:$0xff]  ;;  %v2226_v58 = vld [vmem:[%s2873_s1 + $0x118] sm:$0xff] }
  0x12   :  { %1259 = vmatpush.bf16.msra.mxu0 %v2194_v16  ;;  %v2234_v59 = vld [vmem:[%s2873_s1 + $0x158] sm:$0xff]  ;;  %v2225_v62 = vld [vmem:[%s2873_s1 + $0x110] sm:$0xff]  ;;  %v2224_v2 = vld [vmem:[%s2873_s1 + $0x108] sm:$0xff] }
  0x13   :  { %1272 = vmatpush.bf16.msra.mxu1 %v2202_v17  ;;  %v2242_v60 = vld [vmem:[%s2873_s1 + $0x198] sm:$0xff]  ;;  %v2233_v63 = vld [vmem:[%s2873_s1 + $0x150] sm:$0xff]  ;;  %v2232_v3 = vld [vmem:[%s2873_s1 + $0x148] sm:$0xff] }
  0x14   :  { %1285 = vmatpush.bf16.msra.mxu2 %v2210_v18  ;;  %v2250_v61 = vld [vmem:[%s2873_s1 + $0x1d8] sm:$0xff]  ;;  %v2241_v0 = vld [vmem:[%s2873_s1 + $0x190] sm:$0xff]  ;;  %v2240_v4 = vld [vmem:[%s2873_s1 + $0x188] sm:$0xff] }
  0x15   :  { %1298 = vmatpush.bf16.msra.mxu3 %v2218_v19  ;;  %v2249_v1 = vld [vmem:[%s2873_s1 + $0x1d0] sm:$0xff]  ;;  %v30_v5 = vld [vmem:[%s2874_s0 + $0x18] sm:$0xff]  ;;  %v2248_v7 = vld [vmem:[%s2873_s1 + $0x1c8] sm:$0xff] }
  0x16   :  { %1260 = vmatpush.bf16.msra.mxu0 %v2193_v20  ;;  %v29_v6 = vld [vmem:[%s2874_s0 + $0x10] sm:$0xff]  ;;  %v2223_v8 = vld [vmem:[%s2873_s1 + $0x100] sm:$0xff]  ;;  %v343_v9 = vunpack.c.l.b16 %v30_v5  ;;  %v2262_v14 = vld [vmem:[%s2873_s1 + $0x238] sm:$0xff]  ;;  %v344_v18 = vunpack.c.h.b16 %v30_v5 }
  0x17   :  { %1273 = vmatpush.bf16.msra.mxu1 %v2201_v21  ;;  %v2231_v10 = vld [vmem:[%s2873_s1 + $0x140] sm:$0xff]  ;;  %v341_v12 = vunpack.c.l.b16 %v29_v6  ;;  %v342_v13 = vunpack.c.h.b16 %v29_v6  ;;  %v2270_v15 = vld [vmem:[%s2873_s1 + $0x278] sm:$0xff]  ;;  %v2268_v29 = vld [vmem:[%s2873_s1 + $0x268] sm:$0xff] }
  0x18   :  { %1286 = vmatpush.bf16.msra.mxu2 %v2209_v22  ;;  %v2239_v11 = vld [vmem:[%s2873_s1 + $0x180] sm:$0xff]  ;;  %v2278_v16 = vld [vmem:[%s2873_s1 + $0x2b8] sm:$0xff]  ;;  %v361_v20 = vpack.c.b16 %v343_v9, %v343_v9  ;;  %v362_v26 = vpack.c.b16 %v344_v18, %v344_v18  ;;  %v2276_v30 = vld [vmem:[%s2873_s1 + $0x2a8] sm:$0xff] }
  0x19   :  { %1299 = vmatpush.bf16.msra.mxu3 %v2217_v23  ;;  %v2247_v17 = vld [vmem:[%s2873_s1 + $0x1c0] sm:$0xff]  ;;  %v2286_v19 = vld [vmem:[%s2873_s1 + $0x2f8] sm:$0xff]  ;;  %v359_v21 = vpack.c.b16 %v341_v12, %v341_v12  ;;  %v360_v22 = vpack.c.b16 %v342_v13, %v342_v13  ;;  %v2261_v23 = vld [vmem:[%s2873_s1 + $0x230] sm:$0xff] }
  0x1a   :  { %1261 = vmatpush.bf16.msra.mxu0 %v2192_v24  ;;  %v2269_v24 = vld [vmem:[%s2873_s1 + $0x270] sm:$0xff]  ;;  %v2267_v33 = vld [vmem:[%s2873_s1 + $0x260] sm:$0xff]  ;;  %v2258_v36 = vld [vmem:[%s2873_s1 + $0x218] sm:$0xff] }
  0x1b   :  { %1274 = vmatpush.bf16.msra.mxu1 %v2200_v25  ;;  %v2277_v25 = vld [vmem:[%s2873_s1 + $0x2b0] sm:$0xff]  ;;  %v2292_v6 = vld [vmem:[%s2873_s1 + $0x328] sm:$0xff]  ;;  %v2307_v12 = vld [vmem:[%s2873_s1 + $0x3a0] sm:$0xff] }
  0x1c   :  { %1287 = vmatpush.bf16.msra.mxu2 %v2208_v27  ;;  %v2285_v27 = vld [vmem:[%s2873_s1 + $0x2f0] sm:$0xff]  ;;  %v2316_v9 = vld [vmem:[%s2873_s1 + $0x3e8] sm:$0xff]  ;;  %v2315_v13 = vld [vmem:[%s2873_s1 + $0x3e0] sm:$0xff] }
  0x1d   :  { %1300 = vmatpush.bf16.msra.mxu3 %v2216_v28  ;;  %v2260_v28 = vld [vmem:[%s2873_s1 + $0x228] sm:$0xff]  ;;  %v2265_v41 = vld [vmem:[%s2873_s1 + $0x250] sm:$0xff] }
  0x1e   :  { %1262 = vmatpush.bf16.msra.mxu0 %v2191_v31  ;;  %v2284_v31 = vld [vmem:[%s2873_s1 + $0x2e8] sm:$0xff]  ;;  %v2317_v5 = vld [vmem:[%s2873_s1 + $0x3f0] sm:$0xff] }
  0x1f   :  { %1275 = vmatpush.bf16.msra.mxu1 %v2199_v32  ;;  %v2259_v32 = vld [vmem:[%s2873_s1 + $0x220] sm:$0xff]  ;;  %v2289_v18 = vld [vmem:[%s2873_s1 + $0x310] sm:$0xff] }
  0x20   :  { %1288 = vmatpush.bf16.msra.mxu2 %v2207_v34  ;;  %v2275_v34 = vld [vmem:[%s2873_s1 + $0x2a0] sm:$0xff] }
  0x21   :  { %1301 = vmatpush.bf16.msra.mxu3 %v2215_v39  ;;  %1263 = vmatmul.bf16.vlgmr.msra.gmra.mxu0 %v355_v40  ;;  %v2282_v39 = vld [vmem:[%s2873_s1 + $0x2d8] sm:$0xff]  ;;  %v2257_v40 = vld [vmem:[%s2873_s1 + $0x210] sm:$0xff] }
  0x22   :  { %1307 = vmatpush.bf16.msrb.mxu0 %v2230_v35  ;;  %1276 = vmatmul.bf16.vlgmr.msra.gmra.mxu1 %v356_v45  ;;  %v2283_v35 = vld [vmem:[%s2873_s1 + $0x2e0] sm:$0xff]  ;;  %v2264_v45 = vld [vmem:[%s2873_s1 + $0x248] sm:$0xff] }
  0x23   :  { %1320 = vmatpush.bf16.msrb.mxu1 %v2238_v37  ;;  %1289 = vmatmul.bf16.vlgmr.msra.gmra.mxu2 %v357_v43  ;;  %v2266_v37 = vld [vmem:[%s2873_s1 + $0x258] sm:$0xff]  ;;  %v2281_v43 = vld [vmem:[%s2873_s1 + $0x2d0] sm:$0xff] }
  0x24   :  { %1333 = vmatpush.bf16.msrb.mxu2 %v2246_v38  ;;  %1302 = vmatmul.bf16.vlgmr.msra.gmra.mxu3 %v358_v48  ;;  %v2274_v38 = vld [vmem:[%s2873_s1 + $0x298] sm:$0xff]  ;;  %v32_v48 = vld [vmem:[%s2874_s0 + $0x28] sm:$0xff] }
  0x25   :  { %1346 = vmatpush.bf16.msrb.mxu3 %v2254_v42  ;;  %v2273_v42 = vld [vmem:[%s2873_s1 + $0x290] sm:$0xff] }
  0x26   :  { %1308 = vmatpush.bf16.msrb.mxu0 %v2229_v44  ;;  %v2256_v44 = vld [vmem:[%s2873_s1 + $0x208] sm:$0xff] }
  0x27   :  { %1321 = vmatpush.bf16.msrb.mxu1 %v2237_v46  ;;  %v31_v46 = vld [vmem:[%s2874_s0 + $0x20] sm:$0xff] }
  0x28   :  { %1334 = vmatpush.bf16.msrb.mxu2 %v2245_v47  ;;  %v2272_v47 = vld [vmem:[%s2873_s1 + $0x288] sm:$0xff] }
  0x29   :  { %1347 = vmatpush.bf16.msrb.mxu3 %v2253_v49  ;;  %v2280_v49 = vld [vmem:[%s2873_s1 + $0x2c8] sm:$0xff] }
  0x2a   :  { %1309 = vmatpush.bf16.msrb.mxu0 %v2228_v50  ;;  %v345_v50 = vunpack.c.l.b16 %v31_v46 }
  0x2b   :  { %1322 = vmatpush.bf16.msrb.mxu1 %v2236_v51  ;;  %v2255_v51 = vld [vmem:[%s2873_s1 + $0x200] sm:$0xff] }
  0x2c   :  { %1335 = vmatpush.bf16.msrb.mxu2 %v2244_v52  ;;  %v2263_v52 = vld [vmem:[%s2873_s1 + $0x240] sm:$0xff] }
  0x2d   :  { %1348 = vmatpush.bf16.msrb.mxu3 %v2252_v53  ;;  %v347_v53 = vunpack.c.l.b16 %v32_v48 }
  0x2e   :  { %1310 = vmatpush.bf16.msrb.mxu0 %v2227_v54  ;;  %v2271_v54 = vld [vmem:[%s2873_s1 + $0x280] sm:$0xff] }
  0x2f   :  { %1323 = vmatpush.bf16.msrb.mxu1 %v2235_v55  ;;  %v2294_v55 = vld [vmem:[%s2873_s1 + $0x338] sm:$0xff] }
  0x30   :  { %1336 = vmatpush.bf16.msrb.mxu2 %v2243_v56  ;;  %v346_v56 = vunpack.c.h.b16 %v31_v46  ;;  %v2323_v46 = vld [vmem:[%s2873_s1 + $0x420] sm:$0xff] }
  0x31   :  { %1349 = vmatpush.bf16.msrb.mxu3 %v2251_v57  ;;  %v2302_v57 = vld [vmem:[%s2873_s1 + $0x378] sm:$0xff] }
  0x32   :  { %1311 = vmatpush.bf16.msrb.mxu0 %v2226_v58  ;;  %v2310_v58 = vld [vmem:[%s2873_s1 + $0x3b8] sm:$0xff] }
  0x33   :  { %1324 = vmatpush.bf16.msrb.mxu1 %v2234_v59  ;;  %v348_v59 = vunpack.c.h.b16 %v32_v48  ;;  %v2322_v48 = vld [vmem:[%s2873_s1 + $0x418] sm:$0xff] }
  0x34   :  { %1337 = vmatpush.bf16.msrb.mxu2 %v2242_v60  ;;  %v2279_v60 = vld [vmem:[%s2873_s1 + $0x2c0] sm:$0xff] }
  0x35   :  { %1350 = vmatpush.bf16.msrb.mxu3 %v2250_v61  ;;  %v363_v61 = vpack.c.b16 %v345_v50, %v345_v50  ;;  %v2321_v50 = vld [vmem:[%s2873_s1 + $0x410] sm:$0xff] }
  0x36   :  { %1312 = vmatpush.bf16.msrb.mxu0 %v2225_v62  ;;  %v365_v62 = vpack.c.b16 %v347_v53, %v347_v53  ;;  %v35_v53 = vld [vmem:[%s2874_s0 + $0x40] sm:$0xff] }
  0x37   :  { %1325 = vmatpush.bf16.msrb.mxu1 %v2233_v63  ;;  %v2318_v63 = vld [vmem:[%s2873_s1 + $0x3f8] sm:$0xff] }
  0x38   :  { %1338 = vmatpush.bf16.msrb.mxu2 %v2241_v0  ;;  %v364_v0 = vpack.c.b16 %v346_v56, %v346_v56  ;;  %v2319_v56 = vld [vmem:[%s2873_s1 + $0x400] sm:$0xff] }
  0x39   :  { %1351 = vmatpush.bf16.msrb.mxu3 %v2249_v1  ;;  %v2293_v1 = vld [vmem:[%s2873_s1 + $0x330] sm:$0xff] }
  0x3a   :  { %1313 = vmatpush.bf16.msrb.mxu0 %v2224_v2  ;;  %v366_v2 = vpack.c.b16 %v348_v59, %v348_v59 }
  0x3b   :  { %1326 = vmatpush.bf16.msrb.mxu1 %v2232_v3  ;;  %v2301_v3 = vld [vmem:[%s2873_s1 + $0x370] sm:$0xff] }
  0x3c   :  { %1339 = vmatpush.bf16.msrb.mxu2 %v2240_v4  ;;  %v2309_v4 = vld [vmem:[%s2873_s1 + $0x3b0] sm:$0xff] }
  0x3d   :  { %1352 = vmatpush.bf16.msrb.mxu3 %v2248_v7  ;;  %v2300_v7 = vld [vmem:[%s2873_s1 + $0x368] sm:$0xff] }
  0x3e   :  { %1314 = vmatpush.bf16.msrb.mxu0 %v2223_v8  ;;  %v2308_v8 = vld [vmem:[%s2873_s1 + $0x3a8] sm:$0xff] }
  0x3f   :  { %1327 = vmatpush.bf16.msrb.mxu1 %v2231_v10  ;;  %v2291_v10 = vld [vmem:[%s2873_s1 + $0x320] sm:$0xff] }
  0x40   :  { %1340 = vmatpush.bf16.msrb.mxu2 %v2239_v11  ;;  %v2299_v11 = vld [vmem:[%s2873_s1 + $0x360] sm:$0xff] }
  0x41   :  { %1353 = vmatpush.bf16.msrb.mxu3 %v2247_v17  ;;  %1315 = vmatmul.bf16.vlgmr.msrb.gmra.mxu0 %v359_v21  ;;  %v2314_v17 = vld [vmem:[%s2873_s1 + $0x3d8] sm:$0xff]  ;;  %v2313_v21 = vld [vmem:[%s2873_s1 + $0x3d0] sm:$0xff] }
  0x42   :  { %1359 = vmatpush.bf16.msra.mxu0 %v2262_v14  ;;  %1328 = vmatmul.bf16.vlgmr.msrb.gmra.mxu1 %v360_v22  ;;  %v2290_v14 = vld [vmem:[%s2873_s1 + $0x318] sm:$0xff]  ;;  %v2288_v22 = vld [vmem:[%s2873_s1 + $0x308] sm:$0xff] }
  0x43   :  { %1372 = vmatpush.bf16.msra.mxu1 %v2270_v15  ;;  %1341 = vmatmul.bf16.vlgmr.msrb.gmra.mxu2 %v361_v20  ;;  %v2298_v15 = vld [vmem:[%s2873_s1 + $0x358] sm:$0xff]  ;;  %v2305_v20 = vld [vmem:[%s2873_s1 + $0x390] sm:$0xff] }
  0x44   :  { %1385 = vmatpush.bf16.msra.mxu2 %v2278_v16  ;;  %1354 = vmatmul.bf16.vlgmr.msrb.gmra.mxu3 %v362_v26  ;;  %v2306_v16 = vld [vmem:[%s2873_s1 + $0x398] sm:$0xff] }
  0x45   :  { %1398 = vmatpush.bf16.msra.mxu3 %v2286_v19  ;;  %v2297_v19 = vld [vmem:[%s2873_s1 + $0x350] sm:$0xff]  ;;  %v34_v26 = vld [vmem:[%s2874_s0 + $0x38] sm:$0xff] }
  0x46   :  { %1360 = vmatpush.bf16.msra.mxu0 %v2261_v23  ;;  %v33_v23 = vld [vmem:[%s2874_s0 + $0x30] sm:$0xff] }
  0x47   :  { %1373 = vmatpush.bf16.msra.mxu1 %v2269_v24  ;;  %v2296_v24 = vld [vmem:[%s2873_s1 + $0x348] sm:$0xff] }
  0x48   :  { %1386 = vmatpush.bf16.msra.mxu2 %v2277_v25  ;;  %v2304_v25 = vld [vmem:[%s2873_s1 + $0x388] sm:$0xff] }
  0x49   :  { %1399 = vmatpush.bf16.msra.mxu3 %v2285_v27  ;;  %v2312_v27 = vld [vmem:[%s2873_s1 + $0x3c8] sm:$0xff] }
  0x4a   :  { %1361 = vmatpush.bf16.msra.mxu0 %v2260_v28  ;;  %v349_v28 = vunpack.c.l.b16 %v33_v23 }
  0x4b   :  { %1374 = vmatpush.bf16.msra.mxu1 %v2268_v29  ;;  %v2287_v29 = vld [vmem:[%s2873_s1 + $0x300] sm:$0xff] }
  0x4c   :  { %1387 = vmatpush.bf16.msra.mxu2 %v2276_v30  ;;  %v350_v30 = vunpack.c.h.b16 %v33_v23 }
  0x4d   :  { %1400 = vmatpush.bf16.msra.mxu3 %v2284_v31  ;;  %v2295_v31 = vld [vmem:[%s2873_s1 + $0x340] sm:$0xff] }
  0x4e   :  { %1362 = vmatpush.bf16.msra.mxu0 %v2259_v32  ;;  %v2326_v32 = vld [vmem:[%s2873_s1 + $0x438] sm:$0xff] }
  0x4f   :  { %1375 = vmatpush.bf16.msra.mxu1 %v2267_v33  ;;  %v351_v33 = vunpack.c.l.b16 %v34_v26 }
  0x50   :  { %1388 = vmatpush.bf16.msra.mxu2 %v2275_v34  ;;  %v2303_v34 = vld [vmem:[%s2873_s1 + $0x380] sm:$0xff] }
  0x51   :  { %1401 = vmatpush.bf16.msra.mxu3 %v2283_v35  ;;  %v2334_v35 = vld [vmem:[%s2873_s1 + $0x478] sm:$0xff] }
  0x52   :  { %1363 = vmatpush.bf16.msra.mxu0 %v2258_v36  ;;  %v352_v36 = vunpack.c.h.b16 %v34_v26 }
  0x53   :  { %1376 = vmatpush.bf16.msra.mxu1 %v2266_v37  ;;  %v2311_v37 = vld [vmem:[%s2873_s1 + $0x3c0] sm:$0xff] }
  0x54   :  { %1389 = vmatpush.bf16.msra.mxu2 %v2274_v38  ;;  %v367_v38 = vpack.c.b16 %v349_v28, %v349_v28 }
  0x55   :  { %1402 = vmatpush.bf16.msra.mxu3 %v2282_v39  ;;  %v368_v39 = vpack.c.b16 %v350_v30, %v350_v30  ;;  %v2336_v30 = vld [vmem:[%s2877_s3 + $0x8] sm:$0xff] }
  0x56   :  { %1364 = vmatpush.bf16.msra.mxu0 %v2257_v40  ;;  %v369_v40 = vpack.c.b16 %v351_v33, %v351_v33 }
  0x57   :  { %1377 = vmatpush.bf16.msra.mxu1 %v2265_v41  ;;  %v2325_v41 = vld [vmem:[%s2873_s1 + $0x430] sm:$0xff] }
  0x58   :  { %1390 = vmatpush.bf16.msra.mxu2 %v2273_v42  ;;  %v370_v42 = vpack.c.b16 %v352_v36, %v352_v36 }
  0x59   :  { %1403 = vmatpush.bf16.msra.mxu3 %v2281_v43  ;;  %v2333_v43 = vld [vmem:[%s2873_s1 + $0x470] sm:$0xff] }
  0x5a   :  { %1365 = vmatpush.bf16.msra.mxu0 %v2256_v44  ;;  %v2324_v44 = vld [vmem:[%s2873_s1 + $0x428] sm:$0xff] }
  0x5b   :  { %1378 = vmatpush.bf16.msra.mxu1 %v2264_v45  ;;  %v2332_v45 = vld [vmem:[%s2873_s1 + $0x468] sm:$0xff] }
  0x5c   :  { %1391 = vmatpush.bf16.msra.mxu2 %v2272_v47  ;;  %v2331_v47 = vld [vmem:[%s2873_s1 + $0x460] sm:$0xff] }
  0x5d   :  { %1404 = vmatpush.bf16.msra.mxu3 %v2280_v49  ;;  %v2330_v49 = vld [vmem:[%s2873_s1 + $0x458] sm:$0xff] }
  0x5e   :  { %1366 = vmatpush.bf16.msra.mxu0 %v2255_v51  ;;  %v2329_v51 = vld [vmem:[%s2873_s1 + $0x450] sm:$0xff] }
  0x5f   :  { %1379 = vmatpush.bf16.msra.mxu1 %v2263_v52  ;;  %v2320_v52 = vld [vmem:[%s2873_s1 + $0x408] sm:$0xff] }
  0x60   :  { %1392 = vmatpush.bf16.msra.mxu2 %v2271_v54  ;;  %v2328_v54 = vld [vmem:[%s2873_s1 + $0x448] sm:$0xff] }
  0x61   :  { %1405 = vmatpush.bf16.msra.mxu3 %v2279_v60  ;;  %1367 = vmatmul.bf16.vlgmr.msra.gmra.mxu0 %v363_v61  ;;  %v2341_v61 = vld [vmem:[%s2875_s2] ss:$0 sm:$0xff] }
  0x62   :  { %1411 = vmatpush.bf16.msrb.mxu0 %v2294_v55  ;;  %1380 = vmatmul.bf16.vlgmr.msra.gmra.mxu1 %v364_v0  ;;  %v353_v55 = vunpack.c.l.b16 %v35_v53 }
  0x63   :  { %1424 = vmatpush.bf16.msrb.mxu1 %v2302_v57  ;;  %1393 = vmatmul.bf16.vlgmr.msra.gmra.mxu2 %v365_v62  ;;  %v354_v57 = vunpack.c.h.b16 %v35_v53 }
  0x64   :  { %1437 = vmatpush.bf16.msrb.mxu2 %v2310_v58  ;;  %1406 = vmatmul.bf16.vlgmr.msra.gmra.mxu3 %v366_v2  ;;  %v2327_v58 = vld [vmem:[%s2873_s1 + $0x440] sm:$0xff]  ;;  %v371_v59 = vpack.c.b16 %v353_v55, %v353_v55 }
  0x65   :  { %1450 = vmatpush.bf16.msrb.mxu3 %v2318_v63  ;;  %v372_v60 = vpack.c.b16 %v354_v57, %v354_v57 }
  0x66   :  { %1412 = vmatpush.bf16.msrb.mxu0 %v2293_v1 }
  0x67   :  { %1425 = vmatpush.bf16.msrb.mxu1 %v2301_v3 }
  0x68   :  { %1438 = vmatpush.bf16.msrb.mxu2 %v2309_v4 }
  0x69   :  { %1451 = vmatpush.bf16.msrb.mxu3 %v2317_v5 }
  0x6a   :  { %1413 = vmatpush.bf16.msrb.mxu0 %v2292_v6 }
  0x6b   :  { %1426 = vmatpush.bf16.msrb.mxu1 %v2300_v7 }
  0x6c   :  { %1439 = vmatpush.bf16.msrb.mxu2 %v2308_v8 }
  0x6d   :  { %1452 = vmatpush.bf16.msrb.mxu3 %v2316_v9 }
  0x6e   :  { %1414 = vmatpush.bf16.msrb.mxu0 %v2291_v10 }
  0x6f   :  { %1427 = vmatpush.bf16.msrb.mxu1 %v2299_v11 }
  0x70   :  { %1440 = vmatpush.bf16.msrb.mxu2 %v2307_v12 }
  0x71   :  { %1453 = vmatpush.bf16.msrb.mxu3 %v2315_v13 }
  0x72   :  { %1415 = vmatpush.bf16.msrb.mxu0 %v2290_v14 }
  0x73   :  { %1428 = vmatpush.bf16.msrb.mxu1 %v2298_v15 }
  0x74   :  { %1441 = vmatpush.bf16.msrb.mxu2 %v2306_v16 }
  0x75   :  { %1454 = vmatpush.bf16.msrb.mxu3 %v2314_v17 }
  0x76   :  { %1416 = vmatpush.bf16.msrb.mxu0 %v2289_v18 }
  0x77   :  { %1429 = vmatpush.bf16.msrb.mxu1 %v2297_v19 }
  0x78   :  { %1442 = vmatpush.bf16.msrb.mxu2 %v2305_v20 }
  0x79   :  { %1455 = vmatpush.bf16.msrb.mxu3 %v2313_v21 }
  0x7a   :  { %1417 = vmatpush.bf16.msrb.mxu0 %v2288_v22  ;;  %v2338_v22 = vld [vmem:[%s2877_s3 + $0x18] sm:$0xff] }
  0x7b   :  { %1430 = vmatpush.bf16.msrb.mxu1 %v2296_v24 }
  0x7c   :  { %1443 = vmatpush.bf16.msrb.mxu2 %v2304_v25  ;;  %v2337_v25 = vld [vmem:[%s2877_s3 + $0x10] sm:$0xff] }
  0x7d   :  { %1456 = vmatpush.bf16.msrb.mxu3 %v2312_v27 }
  0x7e   :  { %1418 = vmatpush.bf16.msrb.mxu0 %v2287_v29 }
  0x7f   :  { %1431 = vmatpush.bf16.msrb.mxu1 %v2295_v31 }
  0x80   :  { %1444 = vmatpush.bf16.msrb.mxu2 %v2303_v34  ;;  %v2335_v34 = vld [vmem:[%s2877_s3] sm:$0xff] }
  0x81   :  { %1457 = vmatpush.bf16.msrb.mxu3 %v2311_v37  ;;  %1419 = vmatmul.bf16.vlgmr.msrb.gmra.mxu0 %v367_v38  ;;  %v2340_v37 = vld [vmem:[%s2878_s5 + $0x8] sm:$0xff] }
  0x82   :  { %1463 = vmatpush.bf16.msra.mxu0 %v2326_v32  ;;  %1432 = vmatmul.bf16.vlgmr.msrb.gmra.mxu1 %v368_v39 }
  0x83   :  { %1476 = vmatpush.bf16.msra.mxu1 %v2334_v35  ;;  %1445 = vmatmul.bf16.vlgmr.msrb.gmra.mxu2 %v369_v40  ;;  %v2339_v40 = vld [vmem:[%s2878_s5] sm:$0xff] }
  0x84   :  { %1458 = vmatmul.bf16.vlgmr.msrb.gmra.mxu3 %v370_v42  ;;  %1535 = vmatpush.bf16.msra.mxu2 %v2338_v22 }
  0x85   :  { %1576 = vmatpush.bf16.msra.mxu3 %v2340_v37 }
  0x86   :  { %1464 = vmatpush.bf16.msra.mxu0 %v2325_v41 }
  0x87   :  { %1477 = vmatpush.bf16.msra.mxu1 %v2333_v43 }
  0x88   :  { %1536 = vmatpush.bf16.msra.mxu2 %v2337_v25 }
  0x89   :  { %1577 = vmatpush.bf16.msra.mxu3 %v2339_v40 }
  0x8a   :  { %1465 = vmatpush.bf16.msra.mxu0 %v2324_v44 }
  0x8b   :  { %1478 = vmatpush.bf16.msra.mxu1 %v2332_v45 }
  0x8c   :  { %1537 = vmatpush.bf16.msra.mxu2 %v2336_v30 }
  0x8e   :  { %1466 = vmatpush.bf16.msra.mxu0 %v2323_v46 }
  0x8f   :  { %1479 = vmatpush.bf16.msra.mxu1 %v2331_v47 }
  0x90   :  { %1538 = vmatpush.bf16.msra.mxu2 %v2335_v34 }
  0x92   :  { %1467 = vmatpush.bf16.msra.mxu0 %v2322_v48 }
  0x93   :  { %1480 = vmatpush.bf16.msra.mxu1 %v2330_v49 }
  0x96   :  { %1468 = vmatpush.bf16.msra.mxu0 %v2321_v50 }
  0x97   :  { %1481 = vmatpush.bf16.msra.mxu1 %v2329_v51 }
  0x9a   :  { %1469 = vmatpush.bf16.msra.mxu0 %v2320_v52 }
  0x9b   :  { %1482 = vmatpush.bf16.msra.mxu1 %v2328_v54 }
  0x9e   :  { %1470 = vmatpush.bf16.msra.mxu0 %v2319_v56  ;;  %v1264_v62 = vpop.f32.mrf.mxu0 }
  0x9f   :  { %1483 = vmatpush.bf16.msra.mxu1 %v2327_v58  ;;  %v1265_v63 = vadd.f32 %v2341_v61, %v1264_v62  ;;  %v1277_v0 = vpop.f32.mrf.mxu1 }
  0xa1   :  { %1471 = vmatmul.bf16.vlgmr.msra.gmra.mxu0 %v371_v59  ;;  %v1278_v1 = vadd.f32 %v1277_v0, %v1265_v63 }
  0xa2   :  { %1484 = vmatmul.bf16.vlgmr.msra.gmra.mxu1 %v372_v60  ;;  %v2342_v60 = vld [vmem:[%s2876_s4] ss:$0 sm:$0xff] }
  0xa6   :  { %v1290_v2 = vpop.f32.mrf.mxu2  ;;  %v1266_v4 = vpop.f32.mrf.mxu0 }
  0xa7   :  { %v1291_v3 = vadd.f32 %v1290_v2, %v1278_v1  ;;  %v1303_v5 = vpop.f32.mrf.mxu3  ;;  %v1279_v6 = vpop.f32.mrf.mxu1  ;;  %v2343_v2 = vld [vmem:[%s2879_s6] ss:$0 sm:$0xff] }
  0xa9   :  { %v1304_v7 = vadd.f32 %v1303_v5, %v1291_v3 }
  0xae   :  { %v1292_v8 = vpop.f32.mrf.mxu2 }
  0xaf   :  { %v1305_v9 = vpop.f32.mrf.mxu3 }
  0xbe   :  { %v1316_v10 = vpop.f32.mrf.mxu0 }
  0xbf   :  { %v1329_v11 = vpop.f32.mrf.mxu1  ;;  %v1317_v28 = vadd.f32 %v1316_v10, %v1304_v7 }
  0xc1   :  { %v1330_v29 = vadd.f32 %v1329_v11, %v1317_v28 }
  0xc6   :  { %v1342_v12 = vpop.f32.mrf.mxu2  ;;  %v1318_v14 = vpop.f32.mrf.mxu0 }
  0xc7   :  { %v1355_v13 = vpop.f32.mrf.mxu3  ;;  %v1331_v15 = vpop.f32.mrf.mxu1  ;;  %v1343_v31 = vadd.f32 %v1342_v12, %v1330_v29 }
  0xc9   :  { %v1356_v35 = vadd.f32 %v1355_v13, %v1343_v31 }
  0xce   :  { %v1344_v16 = vpop.f32.mrf.mxu2 }
  0xcf   :  { %v1357_v17 = vpop.f32.mrf.mxu3 }
  0xde   :  { %v1368_v18 = vpop.f32.mrf.mxu0 }
  0xdf   :  { %v1381_v19 = vpop.f32.mrf.mxu1  ;;  %v1369_v36 = vadd.f32 %v1368_v18, %v1356_v35 }
  0xe1   :  { %v1382_v43 = vadd.f32 %v1381_v19, %v1369_v36 }
  0xe6   :  { %v1394_v20 = vpop.f32.mrf.mxu2  ;;  %v1370_v21 = vpop.f32.mrf.mxu0 }
  0xe7   :  { %v1407_v23 = vpop.f32.mrf.mxu3  ;;  %v1383_v24 = vpop.f32.mrf.mxu1  ;;  %v1395_v44 = vadd.f32 %v1394_v20, %v1382_v43 }
  0xe9   :  { %v1408_v45 = vadd.f32 %v1407_v23, %v1395_v44 }
  0xee   :  { %v1396_v26 = vpop.f32.mrf.mxu2 }
  0xef   :  { %v1409_v27 = vpop.f32.mrf.mxu3 }
  0xfe   :  { %v1420_v32 = vpop.f32.mrf.mxu0 }
  0xff   :  { %v1433_v33 = vpop.f32.mrf.mxu1  ;;  %v1421_v48 = vadd.f32 %v1420_v32, %v1408_v45 }
 0x101   :  { %v1434_v49 = vadd.f32 %v1433_v33, %v1421_v48 }
 0x106   :  { %v1446_v38 = vpop.f32.mrf.mxu2  ;;  %v1422_v39 = vpop.f32.mrf.mxu0 }
 0x107   :  { %v1459_v41 = vpop.f32.mrf.mxu3  ;;  %v1435_v42 = vpop.f32.mrf.mxu1  ;;  %v1447_v50 = vadd.f32 %v1446_v38, %v1434_v49 }
 0x109   :  { %v1460_v51 = vadd.f32 %v1459_v41, %v1447_v50 }
 0x10e   :  { %v1448_v46 = vpop.f32.mrf.mxu2 }
 0x10f   :  { %v1461_v47 = vpop.f32.mrf.mxu3 }
 0x11e   :  { %v1472_v52 = vpop.f32.mrf.mxu0 }
 0x11f   :  { %v1473_v53 = vadd.f32 %v1472_v52, %v1460_v51  ;;  %v1485_v54 = vpop.f32.mrf.mxu1 }
 0x121   :  { %v1486_v55 = vadd.f32 %v1485_v54, %v1473_v53 }
 0x123   :  { %v1489_v56 = vmax.f32 %v1486_v55, 0.0 }
 0x125   :  { %v1490_v57 = vpack.c.bf16 %v1489_v56, %v1489_v56 }
 0x126   :  { %v1474_v58 = vpop.f32.mrf.mxu0 }
 0x127   :  { %v1487_v59 = vpop.f32.mrf.mxu1  ;;  %2181 = vmatmul.msk.bf16.vlgmr.msra.gmra.mxu2 %vm1527_vm0, %v1490_v57 }
 0x1aa   :  { %v1540_v61 = vpop.f32.mrf.mxu2 }
 0x1ab   :  { %v1541_v62 = vadd.f32 %v2342_v60, %v1540_v61 }
 0x1ad   :  { %v1544_v63 = vmax.f32 %v1541_v62, 0.0 }
 0x1af   :  { %v1545_v0 = vpack.c.bf16 %v1544_v63, %v1544_v63 }
 0x1b1   :  { %2190 = vmatmul.msk.bf16.vlgmr.msra.gmra.mxu3 %vm1566_vm1, %v1545_v0 }
 0x1b2   :  { %v1542_v1 = vpop.f32.mrf.mxu2 }
 0x234   :  { %v1579_v3 = vpop.f32.mrf.mxu3 }
 0x235   :  { %v1580_v4 = vadd.f32 %v2343_v2, %v1579_v3 }
 0x237   :  { %1584 = vst.msk [vmem:[%s2880_s7] sm:$0xff] %vm1583_vm2, %v1580_v4 }
 0x23c   :  { %v1581_v5 = vpop.f32.mrf.mxu3 }

// kernel: forward.2
= control target key start
LH: loop header
LB: loop body
LE: loop exit
PB: predicated region body
PF: predicated region fallthrough
CT: control target
= control target key end

     0   :  { %12 = vsyncpa [#allocation3], 0  ;;  %s7826_s27 = smov [#allocation2]   ;;  %s7827_s29 = smov 128   ;;  %s11419_s0 = inlined_call_operand.vmem [shape: bf16[2,3,1088], index: 0, kind: input, shape index: {}]   ;;  %s11420_s1 = inlined_call_operand.vmem [shape: bf16[9,16,3], index: 1, kind: input, shape index: {}]   ;;  %s11421_s2 = inlined_call_operand.vmem [shape: f32[16,1], index: 2, kind: input, shape index: {}]   ;;  %s11422_s3 = inlined_call_operand.hbm [shape: bf16[928,256], index: 3, kind: input, shape index: {}]   ;;  %s11423_s4 = inlined_call_operand.vmem [shape: bf16[64,144], index: 4, kind: input, shape index: {}]   ;;  %s11424_s5 = inlined_call_operand.vmem [shape: f32[64,1], index: 5, kind: input, shape index: {}]   ;;  %s11425_s6 = inlined_call_operand.vmem [shape: bf16[178,36], index: 6, kind: input, shape index: {}]   ;;  %s11426_s7 = inlined_call_operand.vmem [shape: bf16[2,64,36], index: 7, kind: output, shape index: {}]  }
   0x1   :  { %s23_s26 = sshll.u32 %s11422_s3, 4  ;;  %s25_s28 = sshll.u32 %s7826_s27, 4  ;;  %s24_s26 = int_to_ptr.hbm [resolvable:$true] %s23_s26  ;;  %s26_s28 = int_to_ptr.vmem [resolvable:$true] %s25_s28 }
   0x2   :  { %s7828_s30 = smov 8  }
   0x3   :  { %31 = dma.hbm_to_vmem [thread:$0]  %s24_s26, 14848, %s26_s28, [#allocation3], %s7827_s29, %s7827_s29, %s7828_s30  }
   0x4   :  { %7824 = dma.done.wait [#allocation3], 14848  }
   0x5   :  { %7825 = vsyncadd [#allocation3], 4294952448  ;;  %v7890_v0 = vld [vmem:[%s11419_s0] sm:$0xff]  ;;  %v7895_v1 = vld [vmem:[%s11419_s0 + $0x8] sm:$0xff]  ;;  %s7829_s3 = smov 127   ;;  %s7830_s12 = smov 126  }
   0x6   :  { %227 = vst [vmem:[#allocation1] ss:$4 sm:$0xff] %v7890_v0  ;;  %s7831_s13 = smov 96   ;;  %s7832_s14 = smov 95   ;;  %v7954_v38 = vld [vmem:[%s11419_s0 + $0x10] sm:$0x3] }
   0x7   :  { %230 = vst [vmem:[#allocation1 + $0x20] ss:$4 sm:$0xff] %v7895_v1  ;;  %vm275_vm0 = vcmask 1040384   ;;  %vm276_vm1 = vcmask 1041408   ;;  %v7833_v46 = vmov 65535   ;;  %vm263_vm2 = vcmask 1039360  }
   0x8   :  { %v277_v47 = vsel %vm275_vm0, 4294967295, %v7833_v46  ;;  %s7834_s17 = smov 94   ;;  %vm271_vm3 = vcmask 23552   ;;  %vm602_vm4 = vcmask 1031168   ;;  %s7835_s22 = smov 64   ;;  %vm805_vm5 = vcmask 785408  }
   0x9   :  { %v7963_v52 = vsel %vm276_vm1, %v277_v47, 0  ;;  %s7836_s25 = smov 63   ;;  %vm1014_vm6 = vcmask 777216   ;;  %s7837_s28 = smov 62   ;;  %vm1223_vm7 = vcmask 769024   ;;  %vm1432_vm8 = vcmask 523264  }
   0xa   :  { %11587 = vst [vmem:[#allocation5_spill] sm:$0xff] %v7963_v52  ;;  %vm1641_vm9 = vcmask 515072   ;;  %vm1850_vm10 = vcmask 506880   ;;  %vm2882_vm11 = vcmask 261120   ;;  %s7840_s26 = smov 98   ;;  %s7841_s27 = smov 111  }
   0xb   :  { %s7842_s29 = smov 112   ;;  %s7843_s30 = smov 113   ;;  %vm3172_vm12 = vcmask 793600   ;;  %vm3164_vm13 = vcmask 801792   ;;  %vm3156_vm14 = vcmask 908288   ;;  %vm11534_vm15 = vcmask 916480  }
   0xc   :  { %vm3140_vm1 = vcmask 924672  }
   0xd   :  { %v235_v2 = vld.sshfl [vmem:[#allocation1 + $0x10] sm:$0xff pattern:$0x73625140]  ;;  %v231_v3 = vld.sshfl [vmem:[#allocation1] sm:$0xff pattern:$0x73625140] }
   0xe   :  { %251 = vrot.lane.b32.xlu1 %v235_v2, %s7829_s3  ;;  %247 = vrot.lane.b32.xlu0 %v231_v3, %s7829_s3  ;;  %v237_v4 = vld.sshfl [vmem:[#allocation1 + $0x18] sm:$0xff pattern:$0x73625140]  ;;  %v233_v5 = vld.sshfl [vmem:[#allocation1 + $0x8] sm:$0xff pattern:$0x73625140] }
   0xf   :  { %420 = vst [vmem:[#allocation1] ss:$4 sm:$0xff] %v7890_v0  ;;  %v245_v6 = vld.sshfl [vmem:[#allocation1 + $0x38] sm:$0xff pattern:$0x73625140]  ;;  %v7980_v2 = vld [vmem:[%s11420_s1 + $0x8] sm:$0xff] }
  0x10   :  { %v239_v7 = vld.sshfl [vmem:[#allocation1 + $0x20] sm:$0xff pattern:$0x73625140]  ;;  %v243_v8 = vld.sshfl [vmem:[#allocation1 + $0x30] sm:$0xff pattern:$0x73625140] }
  0x11   :  { %255 = vrot.lane.b32.xlu2 %v239_v7, %s7829_s3  ;;  %v241_v9 = vld.sshfl [vmem:[#allocation1 + $0x28] sm:$0xff pattern:$0x73625140] }
  0x12   :  { %422 = vst [vmem:[#allocation1 + $0x20] ss:$4 sm:$0xff] %v7895_v1 }
  0x16   :  { %253 = vrot.lane.b32.xlu1 %v237_v4, %s7829_s3  ;;  %249 = vrot.lane.b32.xlu0 %v233_v5, %s7829_s3  ;;  %v7906_v10 = vld.sshfl [vmem:[#allocation1] sm:$0xff pattern:$0x73625140]  ;;  %v7908_v11 = vld.sshfl [vmem:[#allocation1 + $0x8] sm:$0xff pattern:$0x73625140] }
  0x17   :  { %v7910_v12 = vld.sshfl [vmem:[#allocation1 + $0x10] sm:$0xff pattern:$0x73625140]  ;;  %v7912_v13 = vld.sshfl [vmem:[#allocation1 + $0x18] sm:$0xff pattern:$0x73625140] }
  0x18   :  { %567 = vst [vmem:[#allocation1] ss:$4 sm:$0xff] %v7890_v0 }
  0x19   :  { %257 = vrot.lane.b32.xlu2 %v241_v9, %s7829_s3  ;;  %v7916_v14 = vld.sshfl [vmem:[#allocation1 + $0x20] sm:$0xff pattern:$0x73625140]  ;;  %v7918_v15 = vld.sshfl [vmem:[#allocation1 + $0x28] sm:$0xff pattern:$0x73625140]  ;;  %v436_v9 = vand.u32 %v7908_v11, %v7963_v52 }
  0x1a   :  { %v7920_v16 = vld.sshfl [vmem:[#allocation1 + $0x30] sm:$0xff pattern:$0x73625140]  ;;  %v7922_v17 = vld.sshfl [vmem:[#allocation1 + $0x38] sm:$0xff pattern:$0x73625140] }
  0x1b   :  { %569 = vst [vmem:[#allocation1 + $0x20] ss:$4 sm:$0xff] %v7895_v1  ;;  %v448_v11 = vand.u32 %v7922_v17, %v7963_v52  ;;  %v434_v17 = vand.u32 %v7906_v10, %v7963_v52 }
  0x1e   :  { %261 = vrot.lane.b32.xlu1 %v245_v6, %s7829_s3  ;;  %259 = vrot.lane.b32.xlu0 %v243_v8, %s7829_s3  ;;  %v440_v8 = vand.u32 %v7912_v13, %v7963_v52  ;;  %v438_v13 = vand.u32 %v7910_v12, %v7963_v52 }
  0x1f   :  { %v572_v18 = vld.sshfl [vmem:[#allocation1 + $0x8] sm:$0xff pattern:$0x73625140]  ;;  %v574_v19 = vld.sshfl [vmem:[#allocation1 + $0x10] sm:$0xff pattern:$0x73625140] }
  0x20   :  { %v570_v20 = vld.sshfl [vmem:[#allocation1] sm:$0xff pattern:$0x73625140]  ;;  %v576_v21 = vld.sshfl [vmem:[#allocation1 + $0x18] sm:$0xff pattern:$0x73625140] }
  0x21   :  { %586 = vrot.lane.b32.xlu2 %v570_v20, %s7830_s12  ;;  %770 = vst [vmem:[#allocation1] ss:$4 sm:$0xff] %v7890_v0 }
  0x22   :  { %v578_v22 = vld.sshfl [vmem:[#allocation1 + $0x20] sm:$0xff pattern:$0x73625140]  ;;  %v580_v23 = vld.sshfl [vmem:[#allocation1 + $0x28] sm:$0xff pattern:$0x73625140] }
  0x23   :  { %v584_v24 = vld.sshfl [vmem:[#allocation1 + $0x38] sm:$0xff pattern:$0x73625140]  ;;  %v582_v25 = vld.sshfl [vmem:[#allocation1 + $0x30] sm:$0xff pattern:$0x73625140] }
  0x24   :  { %772 = vst [vmem:[#allocation1 + $0x20] ss:$4 sm:$0xff] %v7895_v1 }
  0x26   :  { %588 = vrot.lane.b32.xlu0 %v572_v18, %s7830_s12  ;;  %590 = vrot.lane.b32.xlu1 %v574_v19, %s7830_s12 }
  0x28   :  { %v773_v26 = vld.sshfl [vmem:[#allocation1] sm:$0xff pattern:$0x73625140]  ;;  %v779_v27 = vld.sshfl [vmem:[#allocation1 + $0x18] sm:$0xff pattern:$0x73625140] }
  0x29   :  { %592 = vrot.lane.b32.xlu2 %v576_v21, %s7830_s12  ;;  %v777_v28 = vld.sshfl [vmem:[#allocation1 + $0x10] sm:$0xff pattern:$0x73625140]  ;;  %v775_v29 = vld.sshfl [vmem:[#allocation1 + $0x8] sm:$0xff pattern:$0x73625140] }
  0x2a   :  { %973 = vst [vmem:[#allocation1] ss:$4 sm:$0xff] %v7890_v0 }
  0x2b   :  { %v783_v30 = vld.sshfl [vmem:[#allocation1 + $0x28] sm:$0xff pattern:$0x73625140]  ;;  %v785_v31 = vld.sshfl [vmem:[#allocation1 + $0x30] sm:$0xff pattern:$0x73625140] }
  0x2c   :  { %v787_v32 = vld.sshfl [vmem:[#allocation1 + $0x38] sm:$0xff pattern:$0x73625140]  ;;  %v781_v33 = vld.sshfl [vmem:[#allocation1 + $0x20] sm:$0xff pattern:$0x73625140] }
  0x2d   :  { %975 = vst [vmem:[#allocation1 + $0x20] ss:$4 sm:$0xff] %v7895_v1 }
  0x2e   :  { %594 = vrot.lane.b32.xlu0 %v578_v22, %s7830_s12  ;;  %596 = vrot.lane.b32.xlu1 %v580_v23, %s7830_s12 }
  0x31   :  { %598 = vrot.lane.b32.xlu2 %v582_v25, %s7830_s12  ;;  %v978_v34 = vld.sshfl [vmem:[#allocation1 + $0x8] sm:$0xff pattern:$0x73625140]  ;;  %v976_v35 = vld.sshfl [vmem:[#allocation1] sm:$0xff pattern:$0x73625140] }
  0x32   :  { %v982_v37 = vld.sshfl [vmem:[#allocation1 + $0x18] sm:$0xff pattern:$0x73625140]  ;;  %v980_v39 = vld.sshfl [vmem:[#allocation1 + $0x10] sm:$0xff pattern:$0x73625140] }
  0x33   :  { %993 = vst [vmem:[#allocation1] ss:$4 sm:$0xff] %v7954_v38 }
  0x34   :  { %v984_v36 = vld.sshfl [vmem:[#allocation1 + $0x20] sm:$0xff pattern:$0x73625140]  ;;  %v990_v40 = vld.sshfl [vmem:[#allocation1 + $0x38] sm:$0xff pattern:$0x73625140] }
  0x35   :  { %v988_v41 = vld.sshfl [vmem:[#allocation1 + $0x30] sm:$0xff pattern:$0x73625140]  ;;  %v986_v49 = vld.sshfl [vmem:[#allocation1 + $0x28] sm:$0xff pattern:$0x73625140] }
  0x36   :  { %600 = vrot.lane.b32.xlu0 %v584_v24, %s7830_s12  ;;  %789 = vrot.lane.b32.xlu1 %v773_v26, %s7831_s13  ;;  %1185 = vst [vmem:[#allocation1 + $0x20] ss:$4 sm:$0xff] %v7895_v1 }
  0x39   :  { %791 = vrot.lane.b32.xlu2 %v775_v29, %s7831_s13 }
  0x3a   :  { %v994_v43 = vld.sshfl [vmem:[#allocation1] sm:$0xff pattern:$0x73625140] }
  0x3b   :  { %1183 = vst [vmem:[#allocation1] ss:$4 sm:$0xff] %v7890_v0 }
  0x3d   :  { %v1194_v4 = vld.sshfl [vmem:[#allocation1 + $0x20] sm:$0xff pattern:$0x73625140]  ;;  %v1200_v25 = vld.sshfl [vmem:[#allocation1 + $0x38] sm:$0xff pattern:$0x73625140] }
  0x3e   :  { %795 = vrot.lane.b32.xlu1 %v779_v27, %s7831_s13  ;;  %793 = vrot.lane.b32.xlu0 %v777_v28, %s7831_s13  ;;  %v1198_v12 = vld.sshfl [vmem:[#allocation1 + $0x30] sm:$0xff pattern:$0x73625140]  ;;  %v444_v27 = vand.u32 %v7918_v15, %v7963_v52  ;;  %v446_v28 = vand.u32 %v7920_v16, %v7963_v52  ;;  %v8033_v16 = vld [vmem:[%s11420_s1] sm:$0xff] }
  0x41   :  { %797 = vrot.lane.b32.xlu2 %v781_v33, %s7831_s13 }
  0x42   :  { %v1188_v50 = vld.sshfl [vmem:[#allocation1 + $0x8] sm:$0xff pattern:$0x73625140]  ;;  %v1186_v51 = vld.sshfl [vmem:[#allocation1] sm:$0xff pattern:$0x73625140] }
  0x43   :  { %v1192_v5 = vld.sshfl [vmem:[#allocation1 + $0x18] sm:$0xff pattern:$0x73625140]  ;;  %v1190_v23 = vld.sshfl [vmem:[#allocation1 + $0x10] sm:$0xff pattern:$0x73625140] }
  0x44   :  { %1202 = vst [vmem:[#allocation1] ss:$4 sm:$0xff] %v7954_v38 }
  0x46   :  { %799 = vrot.lane.b32.xlu0 %v783_v30, %s7831_s13  ;;  %801 = vrot.lane.b32.xlu1 %v785_v31, %s7831_s13 }
  0x49   :  { %803 = vrot.lane.b32.xlu2 %v787_v32, %s7831_s13 }
  0x4b   :  { %v1203_v29 = vld.sshfl [vmem:[#allocation1] sm:$0xff pattern:$0x73625140] }
  0x4c   :  { %1392 = vst [vmem:[#allocation1] ss:$4 sm:$0xff] %v7890_v0 }
  0x4e   :  { %998 = vrot.lane.b32.xlu1 %v978_v34, %s7832_s14  ;;  %996 = vrot.lane.b32.xlu0 %v976_v35, %s7832_s14  ;;  %v1196_v35 = vld.sshfl [vmem:[#allocation1 + $0x28] sm:$0xff pattern:$0x73625140] }
  0x4f   :  { %1394 = vst [vmem:[#allocation1 + $0x20] ss:$4 sm:$0xff] %v7895_v1 }
  0x51   :  { %1000 = vrot.lane.b32.xlu2 %v980_v39, %s7832_s14  ;;  %v442_v39 = vand.u32 %v7916_v14, %v7963_v52 }
  0x53   :  { %v1397_v32 = vld.sshfl [vmem:[#allocation1 + $0x8] sm:$0xff pattern:$0x73625140]  ;;  %v1395_v33 = vld.sshfl [vmem:[#allocation1] sm:$0xff pattern:$0x73625140] }
  0x54   :  { %v1399_v47 = vld.sshfl [vmem:[#allocation1 + $0x10] sm:$0xff pattern:$0x73625140] }
  0x56   :  { %1004 = vrot.lane.b32.xlu1 %v984_v36, %s7832_s14  ;;  %1002 = vrot.lane.b32.xlu0 %v982_v37, %s7832_s14 }
  0x59   :  { %1006 = vrot.lane.b32.xlu2 %v986_v49, %s7832_s14 }
  0x5e   :  { %1010 = vrot.lane.b32.xlu1 %v990_v40, %s7832_s14  ;;  %1008 = vrot.lane.b32.xlu0 %v988_v41, %s7832_s14 }
  0x61   :  { %1012 = vrot.lane.b32.xlu2 %v994_v43, %s7832_s14 }
  0x66   :  { %1207 = vrot.lane.b32.xlu1 %v1188_v50, %s7834_s17  ;;  %1205 = vrot.lane.b32.xlu0 %v1186_v51, %s7834_s17  ;;  %v1409_v50 = vld.sshfl [vmem:[#allocation1 + $0x38] sm:$0xff pattern:$0x73625140]  ;;  %v1407_v51 = vld.sshfl [vmem:[#allocation1 + $0x30] sm:$0xff pattern:$0x73625140] }
  0x69   :  { %1209 = vrot.lane.b32.xlu2 %v1190_v23, %s7834_s17 }
  0x6b   :  { %v256_v42 = vpop.permute.xlu2 %255 }
  0x6e   :  { %1213 = vrot.lane.b32.xlu1 %v1194_v4, %s7834_s17  ;;  %1211 = vrot.lane.b32.xlu0 %v1192_v5, %s7834_s17 }
  0x71   :  { %1215 = vrot.lane.b32.xlu2 %v1196_v35, %s7834_s17 }
  0x73   :  { %v258_v48 = vpop.permute.xlu2 %257 }
  0x74   :  { %v268_v55 = vsel %vm263_vm2, %v256_v42, %v258_v48 }
  0x75   :  { %v292_v3 = vand.u32 %v7963_v52, %v268_v55 }
  0x76   :  { %1219 = vrot.lane.b32.xlu1 %v1200_v25, %s7834_s17  ;;  %1217 = vrot.lane.b32.xlu0 %v1198_v12, %s7834_s17 }
  0x79   :  { %1221 = vrot.lane.b32.xlu2 %v1203_v29, %s7834_s17 }
  0x7b   :  { %v8007_v24 = vpop.permute.xlu2 %586 }
  0x7e   :  { %1416 = vrot.lane.b32.xlu1 %v1397_v32, %s7835_s22  ;;  %1414 = vrot.lane.b32.xlu0 %v1395_v33, %s7835_s22 }
  0x80   :  { %v252_v44 = vpop.permute.xlu1 %251  ;;  %v248_v45 = vpop.permute.xlu0 %247 }
  0x81   :  { %1418 = vrot.lane.b32.xlu2 %v1399_v47, %s7835_s22 }
  0x83   :  { %v593_v30 = vpop.permute.xlu2 %592 }
  0x88   :  { %v254_v53 = vpop.permute.xlu1 %253  ;;  %v250_v54 = vpop.permute.xlu0 %249 }
  0x89   :  { %v264_v56 = vsel %vm263_vm2, %v248_v45, %v250_v54  ;;  %v265_v57 = vsel %vm263_vm2, %v250_v54, %v252_v44  ;;  %v266_v58 = vsel %vm263_vm2, %v252_v44, %v254_v53  ;;  %v267_v59 = vsel %vm263_vm2, %v254_v53, %v256_v42  ;;  %v1403_v44 = vld.sshfl [vmem:[#allocation1 + $0x20] sm:$0xff pattern:$0x73625140]  ;;  %v1401_v45 = vld.sshfl [vmem:[#allocation1 + $0x18] sm:$0xff pattern:$0x73625140] }
  0x8a   :  { %v280_v60 = vand.u32 %v7963_v52, %v264_v56  ;;  %v283_v61 = vand.u32 %v7963_v52, %v265_v57  ;;  %v286_v62 = vand.u32 %v7963_v52, %v266_v58  ;;  %v289_v63 = vand.u32 %v7963_v52, %v267_v59  ;;  %1422 = vrot.lane.b32.xlu1 %v1403_v44, %s7835_s22 }
  0x8b   :  { %v599_v40 = vpop.permute.xlu2 %598  ;;  %1420 = vrot.lane.b32.xlu0 %v1401_v45, %s7835_s22  ;;  %1411 = vst [vmem:[#allocation1] ss:$4 sm:$0xff] %v7954_v38 }
  0x8c   :  { %310 = vmatpush.bf16.msra.mxu0 %v280_v60  ;;  %324 = vmatpush.bf16.msra.mxu1 %v283_v61 }
  0x8d   :  { %338 = vmatpush.bf16.msra.mxu2 %v286_v62 }
  0x8f   :  { %6540 = vmatmul.msk.bf16.vlgmr.msra.gmra.mxu0 %vm271_vm3, %v7980_v2  ;;  %6541 = vmatmul.msk.bf16.vlgmr.msra.gmra.mxu1 %vm271_vm3, %v7980_v2 }
  0x90   :  { %352 = vmatpush.bf16.msrb.mxu0 %v289_v63  ;;  %6542 = vmatmul.msk.bf16.vlgmr.msra.gmra.mxu2 %vm271_vm3, %v7980_v2  ;;  %v262_v6 = vpop.permute.xlu1 %261  ;;  %v260_v7 = vpop.permute.xlu0 %259  ;;  %v8089_v63 = vld [vmem:[%s11420_s1 + $0x10] sm:$0xff] }
  0x91   :  { %v301_v18 = vand.u32 %v7963_v52, %v262_v6  ;;  %v269_v19 = vsel %vm263_vm2, %v258_v48, %v260_v7  ;;  %v270_v20 = vsel %vm263_vm2, %v260_v7, %v262_v6  ;;  %v1405_v6 = vld.sshfl [vmem:[#allocation1 + $0x28] sm:$0xff pattern:$0x73625140] }
  0x92   :  { %v295_v21 = vand.u32 %v7963_v52, %v269_v19  ;;  %v298_v22 = vand.u32 %v7963_v52, %v270_v20  ;;  %1428 = vrot.lane.b32.xlu1 %v1409_v50, %s7835_s22  ;;  %v1412_v59 = vld.sshfl [vmem:[#allocation1] sm:$0xff pattern:$0x73625140]  ;;  %1603 = vst [vmem:[#allocation1 + $0x20] ss:$4 sm:$0xff] %v7895_v1  ;;  %1424 = vrot.lane.b32.xlu2 %v1405_v6, %s7835_s22 }
  0x93   :  { %408 = vmatpush.bf16.msra.mxu3 %v301_v18  ;;  %v8060_v48 = vpop.permute.xlu2 %791  ;;  %1426 = vrot.lane.b32.xlu0 %v1407_v51, %s7835_s22  ;;  %1601 = vst [vmem:[#allocation1] ss:$4 sm:$0xff] %v7890_v0 }
  0x94   :  { %366 = vmatpush.bf16.msra.mxu0 %v292_v3  ;;  %380 = vmatpush.bf16.msrb.mxu1 %v295_v21 }
  0x95   :  { %394 = vmatpush.bf16.msrb.mxu2 %v298_v22 }
  0x96   :  { %6547 = vmatmul.msk.bf16.vlgmr.msra.gmra.mxu3 %vm271_vm3, %v7980_v2 }
  0x97   :  { %499 = vmatpush.bf16.msrb.mxu3 %v440_v8 }
  0x98   :  { %471 = vmatpush.bf16.msra.mxu1 %v436_v9  ;;  %v589_v26 = vpop.permute.xlu0 %588  ;;  %v591_v34 = vpop.permute.xlu1 %590 }
  0x99   :  { %485 = vmatpush.bf16.msra.mxu2 %v438_v13  ;;  %v604_v36 = vsel %vm602_vm4, %v589_v26, %v591_v34  ;;  %v605_v37 = vsel %vm602_vm4, %v591_v34, %v593_v30  ;;  %v603_v53 = vsel %vm602_vm4, %v8007_v24, %v589_v26  ;;  %v1612_v13 = vld.sshfl [vmem:[#allocation1 + $0x20] sm:$0xff pattern:$0x73625140] }
  0x9a   :  { %v617_v41 = vand.u32 %v604_v36, %v7963_v52  ;;  %v620_v42 = vand.u32 %v605_v37, %v7963_v52  ;;  %v614_v56 = vand.u32 %v603_v53, %v7963_v52  ;;  %v1606_v3 = vld.sshfl [vmem:[#allocation1 + $0x8] sm:$0xff pattern:$0x73625140]  ;;  %v1604_v4 = vld.sshfl [vmem:[#allocation1] sm:$0xff pattern:$0x73625140]  ;;  %1430 = vrot.lane.b32.xlu2 %v1412_v59, %s7835_s22 }
  0x9b   :  { %555 = vmatpush.bf16.msra.mxu3 %v448_v11  ;;  %v8075_v60 = vpop.permute.xlu2 %797  ;;  %1625 = vrot.lane.b32.xlu1 %v1606_v3, %s7836_s25  ;;  %v1610_v11 = vld.sshfl [vmem:[#allocation1 + $0x18] sm:$0xff pattern:$0x73625140]  ;;  %v1608_v25 = vld.sshfl [vmem:[#allocation1 + $0x10] sm:$0xff pattern:$0x73625140] }
  0x9c   :  { %1623 = vrot.lane.b32.xlu0 %v1604_v4, %s7836_s25  ;;  %1620 = vst [vmem:[#allocation1] ss:$4 sm:$0xff] %v7954_v38 }
  0x9f   :  { %6543 = vmatmul.msk.bf16.vlgmr.msrb.gmra.mxu0 %vm271_vm3, %v7980_v2  ;;  %6545 = vmatmul.msk.bf16.vlgmr.msrb.gmra.mxu1 %vm271_vm3, %v7980_v2 }
  0xa0   :  { %6546 = vmatmul.msk.bf16.vlgmr.msrb.gmra.mxu2 %vm271_vm3, %v7980_v2  ;;  %457 = vmatpush.bf16.msrb.mxu0 %v434_v17  ;;  %v8026_v10 = vpop.permute.xlu0 %594  ;;  %v597_v43 = vpop.permute.xlu1 %596  ;;  %v1618_v17 = vld.sshfl [vmem:[#allocation1 + $0x38] sm:$0xff pattern:$0x73625140] }
  0xa1   :  { %527 = vmatpush.bf16.msrb.mxu1 %v444_v27  ;;  %541 = vmatpush.bf16.msrb.mxu2 %v446_v28  ;;  %v606_v15 = vsel %vm602_vm4, %v593_v30, %v8026_v10  ;;  %v608_v54 = vsel %vm602_vm4, %v597_v43, %v599_v40  ;;  %v607_v7 = vsel %vm602_vm4, %v8026_v10, %v597_v43  ;;  %v1616_v27 = vld.sshfl [vmem:[#allocation1 + $0x30] sm:$0xff pattern:$0x73625140] }
  0xa2   :  { %v623_v31 = vand.u32 %v606_v15, %v7963_v52  ;;  %v629_v57 = vand.u32 %v608_v54, %v7963_v52  ;;  %v626_v18 = vand.u32 %v607_v7, %v7963_v52  ;;  %1627 = vrot.lane.b32.xlu2 %v1608_v25, %s7836_s25 }
  0xa3   :  { %v804_v23 = vpop.permute.xlu2 %803  ;;  %1631 = vrot.lane.b32.xlu1 %v1612_v13, %s7836_s25  ;;  %v1621_v32 = vld.sshfl [vmem:[#allocation1] sm:$0xff pattern:$0x73625140] }
  0xa4   :  { %1629 = vrot.lane.b32.xlu0 %v1610_v11, %s7836_s25  ;;  %v838_v24 = vand.u32 %v804_v23, %v7963_v52  ;;  %1810 = vst [vmem:[#allocation1] ss:$4 sm:$0xff] %v7890_v0  ;;  %v8148_v0 = vld [vmem:[%s11420_s1 + $0x18] sm:$0xff] }
  0xa6   :  { %6555 = vmatmul.msk.bf16.vlgmr.msrb.gmra.mxu3 %vm271_vm3, %v8033_v16 }
  0xa7   :  { %686 = vmatpush.bf16.msrb.mxu3 %v623_v31 }
  0xa8   :  { %v601_v46 = vpop.permute.xlu0 %600  ;;  %v8062_v49 = vpop.permute.xlu1 %789 }
  0xa9   :  { %v635_v14 = vand.u32 %v601_v46, %v7963_v52  ;;  %v609_v55 = vsel %vm602_vm4, %v599_v40, %v601_v46  ;;  %v806_v28 = vsel %vm805_vm5, %v8062_v49, %v8060_v48 }
  0xaa   :  { %v632_v58 = vand.u32 %v609_v55, %v7963_v52  ;;  %v817_v10 = vand.u32 %v806_v28, %v7963_v52 }
  0xab   :  { %1637 = vrot.lane.b32.xlu1 %v1618_v17, %s7836_s25  ;;  %v1001_v15 = vpop.permute.xlu2 %1000  ;;  %v1815_v37 = vld.sshfl [vmem:[#allocation1 + $0x8] sm:$0xff pattern:$0x73625140]  ;;  %v1819_v49 = vld.sshfl [vmem:[#allocation1 + $0x18] sm:$0xff pattern:$0x73625140] }
  0xac   :  { %1635 = vrot.lane.b32.xlu0 %v1616_v27, %s7836_s25  ;;  %v1817_v6 = vld.sshfl [vmem:[#allocation1 + $0x10] sm:$0xff pattern:$0x73625140] }
  0xaf   :  { %6544 = vmatmul.msk.bf16.vlgmr.msra.gmra.mxu0 %vm271_vm3, %v7980_v2  ;;  %6553 = vmatmul.msk.bf16.vlgmr.msra.gmra.mxu1 %vm271_vm3, %v8033_v16 }
  0xb0   :  { %6554 = vmatmul.msk.bf16.vlgmr.msra.gmra.mxu2 %vm271_vm3, %v8033_v16  ;;  %513 = vmatpush.bf16.msra.mxu0 %v442_v39  ;;  %v796_v61 = vpop.permute.xlu1 %795  ;;  %v794_v5 = vpop.permute.xlu0 %793  ;;  %v1813_v39 = vld.sshfl [vmem:[#allocation1] sm:$0xff pattern:$0x73625140] }
  0xb1   :  { %658 = vmatpush.bf16.msra.mxu1 %v617_v41  ;;  %672 = vmatpush.bf16.msra.mxu2 %v620_v42  ;;  %v809_v62 = vsel %vm805_vm5, %v796_v61, %v8075_v60  ;;  %v807_v8 = vsel %vm805_vm5, %v8060_v48, %v794_v5  ;;  %v808_v9 = vsel %vm805_vm5, %v794_v5, %v796_v61  ;;  %v1614_v41 = vld.sshfl [vmem:[#allocation1 + $0x28] sm:$0xff pattern:$0x73625140] }
  0xb2   :  { %v826_v2 = vand.u32 %v809_v62, %v7963_v52  ;;  %v820_v20 = vand.u32 %v807_v8, %v7963_v52  ;;  %v823_v21 = vand.u32 %v808_v9, %v7963_v52  ;;  %1812 = vst [vmem:[#allocation1 + $0x20] ss:$4 sm:$0xff] %v7895_v1  ;;  %1633 = vrot.lane.b32.xlu2 %v1614_v41, %s7836_s25 }
  0xb3   :  { %1834 = vrot.lane.b32.xlu1 %v1815_v37, %s7837_s28  ;;  %v1007_v40 = vpop.permute.xlu2 %1006  ;;  %1829 = vst [vmem:[#allocation1] ss:$4 sm:$0xff] %v7954_v38 }
  0xb4   :  { %1832 = vrot.lane.b32.xlu0 %v1813_v39, %s7837_s28 }
  0xb6   :  { %6559 = vmatmul.msk.bf16.vlgmr.msra.gmra.mxu3 %vm271_vm3, %v8033_v16 }
  0xb7   :  { %742 = vmatpush.bf16.msra.mxu3 %v635_v14 }
  0xb8   :  { %v802_v19 = vpop.permute.xlu1 %801  ;;  %v800_v22 = vpop.permute.xlu0 %799 }
  0xb9   :  { %v811_v29 = vsel %vm805_vm5, %v800_v22, %v802_v19  ;;  %v812_v30 = vsel %vm805_vm5, %v802_v19, %v804_v23  ;;  %v810_v42 = vsel %vm805_vm5, %v8075_v60, %v800_v22  ;;  %v1821_v1 = vld.sshfl [vmem:[#allocation1 + $0x20] sm:$0xff pattern:$0x73625140]  ;;  %v1827_v60 = vld.sshfl [vmem:[#allocation1 + $0x38] sm:$0xff pattern:$0x73625140] }
  0xba   :  { %v835_v31 = vand.u32 %v812_v30, %v7963_v52  ;;  %v829_v45 = vand.u32 %v810_v42, %v7963_v52  ;;  %1639 = vrot.lane.b32.xlu2 %v1621_v32, %s7836_s25  ;;  %v1825_v7 = vld.sshfl [vmem:[#allocation1 + $0x30] sm:$0xff pattern:$0x73625140]  ;;  %v1823_v23 = vld.sshfl [vmem:[#allocation1 + $0x28] sm:$0xff pattern:$0x73625140] }
  0xbb   :  { %v1013_v48 = vpop.permute.xlu2 %1012  ;;  %1840 = vrot.lane.b32.xlu1 %v1821_v1, %s7837_s28  ;;  %v1830_v30 = vld.sshfl [vmem:[#allocation1] sm:$0xff pattern:$0x73625140]  ;;  %v8260_v42 = vld [vmem:[%s11420_s1 + $0x28] sm:$0xff] }
  0xbc   :  { %1838 = vrot.lane.b32.xlu0 %v1819_v49, %s7837_s28 }
  0xbf   :  { %6552 = vmatmul.msk.bf16.vlgmr.msrb.gmra.mxu0 %vm271_vm3, %v8033_v16  ;;  %6557 = vmatmul.msk.bf16.vlgmr.msrb.gmra.mxu1 %vm271_vm3, %v8033_v16 }
  0xc0   :  { %6558 = vmatmul.msk.bf16.vlgmr.msrb.gmra.mxu2 %vm271_vm3, %v8033_v16  ;;  %644 = vmatpush.bf16.msrb.mxu0 %v614_v56  ;;  %v8118_v12 = vpop.permute.xlu1 %998  ;;  %v8120_v26 = vpop.permute.xlu0 %996 }
  0xc1   :  { %714 = vmatpush.bf16.msrb.mxu1 %v629_v57  ;;  %728 = vmatpush.bf16.msrb.mxu2 %v632_v58  ;;  %v1016_v43 = vsel %vm1014_vm6, %v8118_v12, %v1001_v15  ;;  %v1015_v54 = vsel %vm1014_vm6, %v8120_v26, %v8118_v12 }
  0xc2   :  { %v1030_v46 = vand.u32 %v1016_v43, %v7963_v52  ;;  %v1027_v59 = vand.u32 %v1015_v54, %v7963_v52  ;;  %1836 = vrot.lane.b32.xlu2 %v1817_v6, %s7837_s28 }
  0xc3   :  { %v1210_v61 = vpop.permute.xlu2 %1209  ;;  %1846 = vrot.lane.b32.xlu1 %v1827_v60, %s7837_s28 }
  0xc4   :  { %1844 = vrot.lane.b32.xlu0 %v1825_v7, %s7837_s28 }
  0xc6   :  { %6567 = vmatmul.msk.bf16.vlgmr.msrb.gmra.mxu3 %vm271_vm3, %v8089_v63 }
  0xc7   :  { %889 = vmatpush.bf16.msrb.mxu3 %v826_v2  ;;  %v8196_v2 = vld [vmem:[%s11420_s1 + $0x20] sm:$0xff] }
  0xc8   :  { %v8141_v33 = vpop.permute.xlu1 %1004  ;;  %v1003_v34 = vpop.permute.xlu0 %1002 }
  0xc9   :  { %v1018_v35 = vsel %vm1014_vm6, %v1003_v34, %v8141_v33  ;;  %v1017_v44 = vsel %vm1014_vm6, %v1001_v15, %v1003_v34 }
  0xca   :  { %v1036_v36 = vand.u32 %v1018_v35, %v7963_v52  ;;  %v1033_v14 = vand.u32 %v1017_v44, %v7963_v52  ;;  %1842 = vrot.lane.b32.xlu2 %v1823_v23, %s7837_s28 }
  0xcb   :  { %v1216_v9 = vpop.permute.xlu2 %1215 }
  0xcf   :  { %6556 = vmatmul.msk.bf16.vlgmr.msra.gmra.mxu0 %vm271_vm3, %v8033_v16  ;;  %6565 = vmatmul.msk.bf16.vlgmr.msra.gmra.mxu1 %vm271_vm3, %v8089_v63  ;;  %v832_v16 = vand.u32 %v811_v29, %v7963_v52 }
  0xd0   :  { %6566 = vmatmul.msk.bf16.vlgmr.msra.gmra.mxu2 %vm271_vm3, %v8089_v63  ;;  %700 = vmatpush.bf16.msra.mxu0 %v626_v18  ;;  %v1011_v47 = vpop.permute.xlu1 %1010  ;;  %v1009_v50 = vpop.permute.xlu0 %1008  ;;  %v1019_v18 = vsel %vm1014_vm6, %v8141_v33, %v1007_v40 }
  0xd1   :  { %861 = vmatpush.bf16.msra.mxu1 %v820_v20  ;;  %875 = vmatpush.bf16.msra.mxu2 %v823_v21  ;;  %v1022_v51 = vsel %vm1014_vm6, %v1011_v47, %v1013_v48  ;;  %v1020_v57 = vsel %vm1014_vm6, %v1007_v40, %v1009_v50  ;;  %v1021_v58 = vsel %vm1014_vm6, %v1009_v50, %v1011_v47 }
  0xd2   :  { %v1048_v53 = vand.u32 %v1022_v51, %v7963_v52  ;;  %v1042_v62 = vand.u32 %v1020_v57, %v7963_v52  ;;  %v1039_v21 = vand.u32 %v1019_v18, %v7963_v52  ;;  %1848 = vrot.lane.b32.xlu2 %v1830_v30, %s7837_s28 }
  0xd3   :  { %v1222_v25 = vpop.permute.xlu2 %1221 }
  0xd6   :  { %6571 = vmatmul.msk.bf16.vlgmr.msra.gmra.mxu3 %vm271_vm3, %v8089_v63 }
  0xd7   :  { %945 = vmatpush.bf16.msra.mxu3 %v838_v24 }
  0xd8   :  { %v1208_v55 = vpop.permute.xlu1 %1207  ;;  %v1206_v56 = vpop.permute.xlu0 %1205 }
  0xd9   :  { %v1225_v19 = vsel %vm1223_vm7, %v1208_v55, %v1210_v61 }
  0xda   :  { %v1239_v38 = vand.u32 %v1225_v19, %v7963_v52 }
  0xdb   :  { %v1419_v40 = vpop.permute.xlu2 %1418 }
  0xdf   :  { %6564 = vmatmul.msk.bf16.vlgmr.msrb.gmra.mxu0 %vm271_vm3, %v8089_v63  ;;  %6569 = vmatmul.msk.bf16.vlgmr.msrb.gmra.mxu1 %vm271_vm3, %v8089_v63 }
  0xe0   :  { %6570 = vmatmul.msk.bf16.vlgmr.msrb.gmra.mxu2 %vm271_vm3, %v8089_v63  ;;  %847 = vmatpush.bf16.msrb.mxu0 %v817_v10  ;;  %v8198_v3 = vpop.permute.xlu1 %1213  ;;  %v1212_v4 = vpop.permute.xlu0 %1211  ;;  %v1224_v10 = vsel %vm1223_vm7, %v1206_v56, %v1208_v55 }
  0xe1   :  { %917 = vmatpush.bf16.msrb.mxu1 %v832_v16  ;;  %931 = vmatpush.bf16.msrb.mxu2 %v835_v31  ;;  %v1227_v5 = vsel %vm1223_vm7, %v1212_v4, %v8198_v3  ;;  %v1226_v20 = vsel %vm1223_vm7, %v1210_v61, %v1212_v4  ;;  %v1236_v35 = vand.u32 %v1224_v10, %v7963_v52 }
  0xe2   :  { %v1245_v8 = vand.u32 %v1227_v5, %v7963_v52  ;;  %v1242_v11 = vand.u32 %v1226_v20, %v7963_v52  ;;  %v1228_v49 = vsel %vm1223_vm7, %v8198_v3, %v1216_v9 }
  0xe3   :  { %v1248_v56 = vand.u32 %v1228_v49, %v7963_v52 }
  0xe6   :  { %6579 = vmatmul.msk.bf16.vlgmr.msrb.gmra.mxu3 %vm271_vm3, %v8148_v0 }
  0xe7   :  { %1099 = vmatpush.bf16.msrb.mxu3 %v1036_v36 }
  0xe8   :  { %v1220_v24 = vpop.permute.xlu1 %1219  ;;  %v1218_v26 = vpop.permute.xlu0 %1217 }
  0xe9   :  { %v1231_v12 = vsel %vm1223_vm7, %v1220_v24, %v1222_v25  ;;  %v1229_v16 = vsel %vm1223_vm7, %v1216_v9, %v1218_v26  ;;  %v1230_v31 = vsel %vm1223_vm7, %v1218_v26, %v1220_v24 }
  0xea   :  { %v1257_v27 = vand.u32 %v1231_v12, %v7963_v52  ;;  %v1251_v37 = vand.u32 %v1229_v16, %v7963_v52  ;;  %v1254_v39 = vand.u32 %v1230_v31, %v7963_v52 }
  0xec   :  { %v8272_v48 = vpop.permute.xlu2 %1424 }
  0xef   :  { %6568 = vmatmul.msk.bf16.vlgmr.msra.gmra.mxu0 %vm271_vm3, %v8089_v63  ;;  %6577 = vmatmul.msk.bf16.vlgmr.msra.gmra.mxu1 %vm271_vm3, %v8148_v0  ;;  %v1045_v63 = vand.u32 %v1021_v58, %v7963_v52 }
  0xf0   :  { %6578 = vmatmul.msk.bf16.vlgmr.msra.gmra.mxu2 %vm271_vm3, %v8148_v0  ;;  %903 = vmatpush.bf16.msra.mxu0 %v829_v45  ;;  %v1417_v32 = vpop.permute.xlu1 %1416  ;;  %v1415_v34 = vpop.permute.xlu0 %1414 }
  0xf1   :  { %1071 = vmatpush.bf16.msra.mxu1 %v1030_v46  ;;  %1085 = vmatpush.bf16.msra.mxu2 %v1033_v14  ;;  %v1433_v20 = vsel %vm1432_vm8, %v1415_v34, %v1417_v32 }
  0xf2   :  { %v1445_v12 = vand.u32 %v1433_v20, %v7963_v52 }
  0xf6   :  { %6583 = vmatmul.msk.bf16.vlgmr.msra.gmra.mxu3 %vm271_vm3, %v8148_v0 }
  0xf7   :  { %1155 = vmatpush.bf16.msra.mxu3 %v1048_v53  ;;  %v1434_v53 = vsel %vm1432_vm8, %v1417_v32, %v1419_v40  ;;  %v8346_v32 = vld [vmem:[%s11420_s1 + $0x30] sm:$0xff] }
  0xf8   :  { %v1448_v60 = vand.u32 %v1434_v53, %v7963_v52 }
  0xfc   :  { %v8266_v46 = vpop.permute.xlu1 %1422 }
  0xfd   :  { %v1421_v14 = vpop.permute.xlu0 %1420 }
  0xfe   :  { %v1436_v47 = vsel %vm1432_vm8, %v1421_v14, %v8266_v46  ;;  %v1435_v54 = vsel %vm1432_vm8, %v1419_v40, %v1421_v14 }
  0xff   :  { %6576 = vmatmul.msk.bf16.vlgmr.msrb.gmra.mxu0 %vm271_vm3, %v8148_v0  ;;  %6581 = vmatmul.msk.bf16.vlgmr.msrb.gmra.mxu1 %vm271_vm3, %v8148_v0  ;;  %v1454_v1 = vand.u32 %v1436_v47, %v7963_v52  ;;  %v1451_v61 = vand.u32 %v1435_v54, %v7963_v52 }
 0x100   :  { %6582 = vmatmul.msk.bf16.vlgmr.msrb.gmra.mxu2 %vm271_vm3, %v8148_v0  ;;  %1057 = vmatpush.bf16.msrb.mxu0 %v1027_v59 }
 0x101   :  { %1127 = vmatpush.bf16.msrb.mxu1 %v1042_v62  ;;  %1141 = vmatpush.bf16.msrb.mxu2 %v1045_v63  ;;  %v1431_v63 = vpop.permute.xlu2 %1430 }
 0x104   :  { %v1429_v62 = vpop.permute.xlu1 %1428 }
 0x105   :  { %v1440_v3 = vsel %vm1432_vm8, %v1429_v62, %v1431_v63  ;;  %v1427_v5 = vpop.permute.xlu0 %1426 }
 0x106   :  { %6591 = vmatmul.msk.bf16.vlgmr.msrb.gmra.mxu3 %vm271_vm3, %v8196_v2 }
 0x107   :  { %1308 = vmatpush.bf16.msrb.mxu3 %v1245_v8  ;;  %v1466_v8 = vand.u32 %v1440_v3, %v7963_v52 }
 0x109   :  { %v1628_v16 = vpop.permute.xlu2 %1627 }
 0x10c   :  { %v8213_v22 = vpop.f32.mrf.mxu0  ;;  %v8215_v13 = vpop.f32.mrf.mxu1 }
 0x10d   :  { %v8318_v23 = vpop.permute.xlu1 %1625 }
 0x10e   :  { %v8320_v25 = vpop.permute.xlu0 %1623  ;;  %v1643_v47 = vsel %vm1641_vm9, %v8318_v23, %v1628_v16 }
 0x10f   :  { %6580 = vmatmul.msk.bf16.vlgmr.msra.gmra.mxu0 %vm271_vm3, %v8148_v0  ;;  %6589 = vmatmul.msk.bf16.vlgmr.msra.gmra.mxu1 %vm271_vm3, %v8196_v2 }
 0x110   :  { %6590 = vmatmul.msk.bf16.vlgmr.msra.gmra.mxu2 %vm271_vm3, %v8196_v2  ;;  %1113 = vmatpush.bf16.msra.mxu0 %v1039_v21 }
 0x111   :  { %1280 = vmatpush.bf16.msra.mxu1 %v1239_v38  ;;  %1294 = vmatpush.bf16.msra.mxu2 %v1242_v11  ;;  %v1438_v38 = vsel %vm1432_vm8, %v8272_v48, %v1427_v5  ;;  %v1439_v11 = vsel %vm1432_vm8, %v1427_v5, %v1429_v62 }
 0x112   :  { %v1460_v10 = vand.u32 %v1438_v38, %v7963_v52 }
 0x113   :  { %v8227_v17 = vpop.f32.mrf.mxu2 }
 0x114   :  { %v8230_v28 = vpop.f32.mrf.mxu0  ;;  %v8232_v29 = vpop.f32.mrf.mxu1 }
 0x116   :  { %6595 = vmatmul.msk.bf16.vlgmr.msra.gmra.mxu3 %vm271_vm3, %v8196_v2  ;;  %v1630_v40 = vpop.permute.xlu0 %1629 }
 0x117   :  { %1364 = vmatpush.bf16.msra.mxu3 %v1257_v27 }
 0x119   :  { %v8238_v15 = vpop.f32.mrf.mxu3 }
 0x11b   :  { %v8242_v33 = vpop.f32.mrf.mxu2 }
 0x11c   :  { %v354_v0 = vpop.f32.mrf.mxu0  ;;  %v8245_v36 = vpop.f32.mrf.mxu1 }
 0x11f   :  { %6588 = vmatmul.msk.bf16.vlgmr.msrb.gmra.mxu0 %vm271_vm3, %v8196_v2  ;;  %6593 = vmatmul.msk.bf16.vlgmr.msrb.gmra.mxu1 %vm271_vm3, %v8196_v2 }
 0x120   :  { %6594 = vmatmul.msk.bf16.vlgmr.msrb.gmra.mxu2 %vm271_vm3, %v8196_v2  ;;  %1266 = vmatpush.bf16.msrb.mxu0 %v1236_v35 }
 0x121   :  { %v8255_v41 = vpop.f32.mrf.mxu3  ;;  %1336 = vmatpush.bf16.msrb.mxu1 %v1251_v37  ;;  %1350 = vmatpush.bf16.msrb.mxu2 %v1254_v39  ;;  %v8357_v39 = vpop.permute.xlu1 %1631 }
 0x123   :  { %v8262_v43 = vpop.f32.mrf.mxu2 }
 0x124   :  { %v356_v44 = vpop.f32.mrf.mxu0  ;;  %v8264_v45 = vpop.f32.mrf.mxu1 }
 0x126   :  { %6603 = vmatmul.msk.bf16.vlgmr.msrb.gmra.mxu3 %vm271_vm3, %v8260_v42 }
 0x127   :  { %1517 = vmatpush.bf16.msrb.mxu3 %v1454_v1  ;;  %v1644_v1 = vsel %vm1641_vm9, %v1628_v16, %v1630_v40 }
 0x129   :  { %v501_v50 = vpop.f32.mrf.mxu3 }
 0x12a   :  { %v8277_v51 = vadd.f32 %v501_v50, %v354_v0 }
 0x12b   :  { %v8281_v55 = vpop.f32.mrf.mxu2 }
 0x12c   :  { %v8284_v57 = vpop.f32.mrf.mxu0  ;;  %v473_v58 = vpop.f32.mrf.mxu1 }
 0x12d   :  { %v8287_v59 = vadd.f32 %v473_v58, %v8215_v13  ;;  %v1660_v58 = vand.u32 %v1644_v1, %v7963_v52 }
 0x12f   :  { %6592 = vmatmul.msk.bf16.vlgmr.msra.gmra.mxu0 %vm271_vm3, %v8196_v2  ;;  %6601 = vmatmul.msk.bf16.vlgmr.msra.gmra.mxu1 %vm271_vm3, %v8260_v42 }
 0x130   :  { %6602 = vmatmul.msk.bf16.vlgmr.msra.gmra.mxu2 %vm271_vm3, %v8260_v42  ;;  %1322 = vmatpush.bf16.msra.mxu0 %v1248_v56 }
 0x131   :  { %v503_v4 = vpop.f32.mrf.mxu3  ;;  %1489 = vmatpush.bf16.msra.mxu1 %v1448_v60  ;;  %1503 = vmatpush.bf16.msra.mxu2 %v1451_v61  ;;  %v1638_v60 = vpop.permute.xlu1 %1637 }
 0x132   :  { %v8298_v6 = vadd.f32 %v503_v4, %v356_v44  ;;  %v8363_v44 = vpop.permute.xlu2 %1633 }
 0x133   :  { %v487_v7 = vpop.f32.mrf.mxu2 }
 0x134   :  { %v8302_v2 = vadd.f32 %v487_v7, %v8227_v17  ;;  %v8304_v9 = vpop.f32.mrf.mxu0  ;;  %v475_v18 = vpop.f32.mrf.mxu1 }
 0x135   :  { %v8307_v19 = vadd.f32 %v475_v18, %v8232_v29 }
 0x136   :  { %6607 = vmatmul.msk.bf16.vlgmr.msra.gmra.mxu3 %vm271_vm3, %v8260_v42 }
 0x137   :  { %1573 = vmatpush.bf16.msra.mxu3 %v1466_v8 }
 0x139   :  { %v557_v21 = vpop.f32.mrf.mxu3 }
 0x13a   :  { %v8313_v13 = vadd.f32 %v557_v21, %v8238_v15  ;;  %v1463_v15 = vand.u32 %v1439_v11, %v7963_v52  ;;  %v1640_v61 = vpop.permute.xlu2 %1639  ;;  %v8418_v21 = vpop.permute.xlu1 %1834 }
 0x13b   :  { %v489_v24 = vpop.f32.mrf.mxu2 }
 0x13c   :  { %v8324_v26 = vadd.f32 %v489_v24, %v8242_v33  ;;  %v459_v17 = vpop.f32.mrf.mxu0  ;;  %v529_v27 = vpop.f32.mrf.mxu1 }
 0x13d   :  { %v8327_v29 = vadd.f32 %v459_v17, %v8213_v22  ;;  %v8330_v30 = vadd.f32 %v529_v27, %v8245_v36 }
 0x13f   :  { %6600 = vmatmul.msk.bf16.vlgmr.msrb.gmra.mxu0 %vm271_vm3, %v8260_v42  ;;  %6605 = vmatmul.msk.bf16.vlgmr.msrb.gmra.mxu1 %vm271_vm3, %v8260_v42 }
 0x140   :  { %6606 = vmatmul.msk.bf16.vlgmr.msrb.gmra.mxu2 %vm271_vm3, %v8260_v42  ;;  %1475 = vmatpush.bf16.msrb.mxu0 %v1445_v12 }
 0x141   :  { %v559_v22 = vpop.f32.mrf.mxu3  ;;  %1545 = vmatpush.bf16.msrb.mxu1 %v1460_v10  ;;  %1559 = vmatpush.bf16.msrb.mxu2 %v1463_v15  ;;  %v8446_v10 = vld [vmem:[%s11420_s1 + $0x38] sm:$0xff] }
 0x142   :  { %v8341_v31 = vadd.f32 %v559_v22, %v8255_v41  ;;  %v1645_v41 = vsel %vm1641_vm9, %v1630_v40, %v8357_v39 }
 0x143   :  { %v543_v33 = vpop.f32.mrf.mxu2 }
 0x144   :  { %v8349_v34 = vadd.f32 %v543_v33, %v8262_v43  ;;  %v461_v35 = vpop.f32.mrf.mxu0  ;;  %v531_v0 = vpop.f32.mrf.mxu1  ;;  %v1663_v43 = vand.u32 %v1645_v41, %v7963_v52 }
 0x145   :  { %v8352_v36 = vadd.f32 %v461_v35, %v8230_v28  ;;  %v8355_v37 = vadd.f32 %v531_v0, %v8264_v45  ;;  %v1437_v28 = vsel %vm1432_vm8, %v8266_v46, %v8272_v48 }
 0x146   :  { %6615 = vmatmul.msk.bf16.vlgmr.msrb.gmra.mxu3 %vm271_vm3, %v8346_v32  ;;  %v1457_v50 = vand.u32 %v1437_v28, %v7963_v52 }
 0x147   :  { %1726 = vmatpush.bf16.msrb.mxu3 %v1663_v43 }
 0x149   :  { %v688_v14 = vpop.f32.mrf.mxu3 }
 0x14a   :  { %v8370_v45 = vadd.f32 %v688_v14, %v8277_v51  ;;  %v1657_v51 = vand.u32 %v1643_v47, %v7963_v52 }
 0x14b   :  { %v545_v49 = vpop.f32.mrf.mxu2 }
 0x14c   :  { %v8377_v53 = vadd.f32 %v545_v49, %v8281_v55  ;;  %v515_v54 = vpop.f32.mrf.mxu0  ;;  %v660_v56 = vpop.f32.mrf.mxu1  ;;  %v1649_v55 = vsel %vm1641_vm9, %v1638_v60, %v1640_v61 }
 0x14d   :  { %v8380_v46 = vadd.f32 %v515_v54, %v8284_v57  ;;  %v8383_v48 = vadd.f32 %v660_v56, %v8287_v59  ;;  %v1636_v59 = vpop.permute.xlu0 %1635  ;;  %v1675_v3 = vand.u32 %v1649_v55, %v7963_v52 }
 0x14e   :  { %v1647_v20 = vsel %vm1641_vm9, %v8363_v44, %v1636_v59 }
 0x14f   :  { %6604 = vmatmul.msk.bf16.vlgmr.msra.gmra.mxu0 %vm271_vm3, %v8260_v42  ;;  %6613 = vmatmul.msk.bf16.vlgmr.msra.gmra.mxu1 %vm271_vm3, %v8346_v32  ;;  %v1669_v17 = vand.u32 %v1647_v20, %v7963_v52 }
 0x150   :  { %6614 = vmatmul.msk.bf16.vlgmr.msra.gmra.mxu2 %vm271_vm3, %v8346_v32  ;;  %1531 = vmatpush.bf16.msra.mxu0 %v1457_v50 }
 0x151   :  { %v690_v57 = vpop.f32.mrf.mxu3  ;;  %1698 = vmatpush.bf16.msra.mxu1 %v1657_v51  ;;  %1712 = vmatpush.bf16.msra.mxu2 %v1660_v58 }
 0x152   :  { %v8395_v62 = vadd.f32 %v690_v57, %v8298_v6  ;;  %v1642_v6 = vsel %vm1641_vm9, %v8320_v25, %v8318_v23 }
 0x153   :  { %v674_v63 = vpop.f32.mrf.mxu2  ;;  %v1654_v11 = vand.u32 %v1642_v6, %v7963_v52 }
 0x154   :  { %v8399_v42 = vadd.f32 %v674_v63, %v8302_v2  ;;  %v517_v4 = vpop.f32.mrf.mxu0  ;;  %v662_v5 = vpop.f32.mrf.mxu1  ;;  %v61_v63 = vld [vmem:[%s11421_s2] sm:$0xff] }
 0x155   :  { %v8402_v7 = vadd.f32 %v517_v4, %v8304_v9  ;;  %v8405_v8 = vadd.f32 %v662_v5, %v8307_v19  ;;  %v1648_v9 = vsel %vm1641_vm9, %v1636_v59, %v1638_v60  ;;  %v8420_v38 = vpop.permute.xlu0 %1832 }
 0x156   :  { %6619 = vmatmul.msk.bf16.vlgmr.msra.gmra.mxu3 %vm271_vm3, %v8346_v32  ;;  %v1672_v27 = vand.u32 %v1648_v9, %v7963_v52 }
 0x157   :  { %1782 = vmatpush.bf16.msra.mxu3 %v1675_v3  ;;  %v7838_v3 = vmov 0  }
 0x158   :  { %7457 = vset.pattern.permute.xlu0 %v7838_v3  ;;  %7458 = vset.pattern.permute.xlu1 %v7838_v3 }
 0x159   :  { %v744_v18 = vpop.f32.mrf.mxu3  ;;  %2016 = vperm.xlu0 %7457, %v61_v63   ;;  %7539 = vset.pattern.permute.xlu2 %v7838_v3 }
 0x15a   :  { %v8413_v2 = vadd.f32 %v744_v18, %v8313_v13 }
 0x15b   :  { %v676_v19 = vpop.f32.mrf.mxu2 }
 0x15c   :  { %v8424_v24 = vadd.f32 %v676_v19, %v8324_v26  ;;  %v646_v23 = vpop.f32.mrf.mxu0  ;;  %v716_v25 = vpop.f32.mrf.mxu1 }
 0x15d   :  { %v8427_v13 = vadd.f32 %v646_v23, %v8327_v29  ;;  %v8430_v12 = vadd.f32 %v716_v25, %v8330_v30  ;;  %v1837_v26 = vpop.permute.xlu2 %1836  ;;  %v1839_v40 = vpop.permute.xlu0 %1838 }
 0x15e   :  { %v1852_v14 = vsel %vm1850_vm10, %v8418_v21, %v1837_v26  ;;  %v1853_v47 = vsel %vm1850_vm10, %v1837_v26, %v1839_v40 }
 0x15f   :  { %6612 = vmatmul.msk.bf16.vlgmr.msrb.gmra.mxu0 %vm271_vm3, %v8346_v32  ;;  %6617 = vmatmul.msk.bf16.vlgmr.msrb.gmra.mxu1 %vm271_vm3, %v8346_v32  ;;  %v1869_v51 = vand.u32 %v1853_v47, %v7963_v52 }
 0x160   :  { %6618 = vmatmul.msk.bf16.vlgmr.msrb.gmra.mxu2 %vm271_vm3, %v8346_v32  ;;  %1684 = vmatpush.bf16.msrb.mxu0 %v1654_v11 }
 0x161   :  { %v746_v29 = vpop.f32.mrf.mxu3  ;;  %1754 = vmatpush.bf16.msrb.mxu1 %v1669_v17  ;;  %1768 = vmatpush.bf16.msrb.mxu2 %v1672_v27 }
 0x162   :  { %v8441_v30 = vadd.f32 %v746_v29, %v8341_v31  ;;  %v8457_v31 = vpop.permute.xlu1 %1840 }
 0x163   :  { %v730_v15 = vpop.f32.mrf.mxu2  ;;  %v1854_v41 = vsel %vm1850_vm10, %v1839_v40, %v8457_v31 }
 0x164   :  { %v8449_v16 = vadd.f32 %v730_v15, %v8349_v34  ;;  %v648_v22 = vpop.f32.mrf.mxu0  ;;  %v718_v33 = vpop.f32.mrf.mxu1  ;;  %v1872_v34 = vand.u32 %v1854_v41, %v7963_v52 }
 0x165   :  { %v8452_v35 = vadd.f32 %v648_v22, %v8352_v36  ;;  %v8455_v0 = vadd.f32 %v718_v33, %v8355_v37  ;;  %v8464_v43 = vpop.permute.xlu2 %1842  ;;  %v1646_v36 = vsel %vm1641_vm9, %v8357_v39, %v8363_v44  ;;  %v1845_v4 = vpop.permute.xlu0 %1844 }
 0x166   :  { %6627 = vmatmul.msk.bf16.vlgmr.msrb.gmra.mxu3 %vm271_vm3, %v8446_v10  ;;  %v1666_v49 = vand.u32 %v1646_v36, %v7963_v52  ;;  %v1856_v6 = vsel %vm1850_vm10, %v8464_v43, %v1845_v4  ;;  %v1855_v15 = vsel %vm1850_vm10, %v8457_v31, %v8464_v43 }
 0x167   :  { %1935 = vmatpush.bf16.msrb.mxu3 %v1872_v34  ;;  %v1875_v41 = vand.u32 %v1855_v15, %v7963_v52 }
 0x169   :  { %v891_v28 = vpop.f32.mrf.mxu3 }
 0x16a   :  { %v8470_v37 = vadd.f32 %v891_v28, %v8370_v45  ;;  %v1866_v45 = vand.u32 %v1852_v14, %v7963_v52 }
 0x16b   :  { %v732_v1 = vpop.f32.mrf.mxu2 }
 0x16c   :  { %v8477_v50 = vadd.f32 %v732_v1, %v8377_v53  ;;  %v702_v54 = vpop.f32.mrf.mxu0  ;;  %v863_v56 = vpop.f32.mrf.mxu1 }
 0x16d   :  { %v8480_v39 = vadd.f32 %v702_v54, %v8380_v46  ;;  %v8483_v44 = vadd.f32 %v863_v56, %v8383_v48  ;;  %v1847_v53 = vpop.permute.xlu1 %1846  ;;  %v1849_v46 = vpop.permute.xlu2 %1848 }
 0x16e   :  { %v1858_v48 = vsel %vm1850_vm10, %v1847_v53, %v1849_v46  ;;  %v1857_v18 = vsel %vm1850_vm10, %v1845_v4, %v1847_v53 }
 0x16f   :  { %6616 = vmatmul.msk.bf16.vlgmr.msra.gmra.mxu0 %vm271_vm3, %v8346_v32  ;;  %6625 = vmatmul.msk.bf16.vlgmr.msra.gmra.mxu1 %vm271_vm3, %v8446_v10  ;;  %v1884_v61 = vand.u32 %v1858_v48, %v7963_v52 }
 0x170   :  { %6626 = vmatmul.msk.bf16.vlgmr.msra.gmra.mxu2 %vm271_vm3, %v8446_v10  ;;  %1740 = vmatpush.bf16.msra.mxu0 %v1666_v49 }
 0x171   :  { %v8493_v58 = vpop.f32.mrf.mxu3  ;;  %1907 = vmatpush.bf16.msra.mxu1 %v1866_v45  ;;  %1921 = vmatpush.bf16.msra.mxu2 %v1869_v51 }
 0x173   :  { %v877_v60 = vpop.f32.mrf.mxu2 }
 0x174   :  { %v954_v32 = vadd.f32 %v877_v60, %v8399_v42  ;;  %v704_v55 = vpop.f32.mrf.mxu0  ;;  %v8498_v57 = vpop.f32.mrf.mxu1  ;;  %v1851_v42 = vsel %vm1850_vm10, %v8420_v38, %v8418_v21  ;;  %v1878_v21 = vand.u32 %v1856_v6, %v7963_v52  ;;  %v1881_v38 = vand.u32 %v1857_v18, %v7963_v52 }
 0x175   :  { %v8501_v59 = vadd.f32 %v704_v55, %v8402_v7  ;;  %v1863_v9 = vand.u32 %v1851_v42, %v7963_v52 }
 0x176   :  { %6631 = vmatmul.msk.bf16.vlgmr.msra.gmra.mxu3 %vm271_vm3, %v8446_v10 }
 0x177   :  { %11588 = vst [vmem:[#allocation6_spill] sm:$0xff] %v8501_v59  ;;  %1991 = vmatpush.bf16.msra.mxu3 %v1884_v61 }
 0x179   :  { %v947_v5 = vpop.f32.mrf.mxu3 }
 0x17a   :  { %v959_v7 = vadd.f32 %v947_v5, %v8413_v2  ;;  %v62_v2 = vld [vmem:[%s11421_s2 + $0x8] sm:$0xff]  ;;  %s7839_s2 = smov 97  }
 0x17b   :  { %v8515_v20 = vpop.f32.mrf.mxu2  ;;  %2021 = vperm.xlu1 %7458, %v62_v2  }
 0x17c   :  { %v849_v19 = vpop.f32.mrf.mxu0  ;;  %v919_v11 = vpop.f32.mrf.mxu1 }
 0x17d   :  { %v952_v23 = vadd.f32 %v849_v19, %v8427_v13  ;;  %v957_v25 = vadd.f32 %v919_v11, %v8430_v12  ;;  %v7303_v12 = vld [vmem:[%s11420_s1 + $0x40] sm:$0xff] }
 0x17f   :  { %6624 = vmatmul.msk.bf16.vlgmr.msrb.gmra.mxu0 %vm271_vm3, %v8446_v10  ;;  %6629 = vmatmul.msk.bf16.vlgmr.msrb.gmra.mxu1 %vm271_vm3, %v8446_v10 }
 0x180   :  { %6630 = vmatmul.msk.bf16.vlgmr.msrb.gmra.mxu2 %vm271_vm3, %v8446_v10  ;;  %1893 = vmatpush.bf16.msrb.mxu0 %v1863_v9 }
 0x181   :  { %v8531_v13 = vpop.f32.mrf.mxu3  ;;  %1963 = vmatpush.bf16.msrb.mxu1 %v1878_v21  ;;  %1977 = vmatpush.bf16.msrb.mxu2 %v1881_v38 }
 0x183   :  { %v933_v17 = vpop.f32.mrf.mxu2 }
 0x184   :  { %v958_v27 = vadd.f32 %v933_v17, %v8449_v16  ;;  %v8537_v26 = vpop.f32.mrf.mxu0  ;;  %v8539_v29 = vpop.f32.mrf.mxu1 }
 0x186   :  { %6639 = vmatmul.msk.bf16.vlgmr.msrb.gmra.mxu3 %vm271_vm3, %v7303_v12 }
 0x189   :  { %v1101_v22 = vpop.f32.mrf.mxu3 }
 0x18a   :  { %v1165_v33 = vadd.f32 %v1101_v22, %v8470_v37 }
 0x18b   :  { %v8546_v40 = vpop.f32.mrf.mxu2 }
 0x18c   :  { %v905_v34 = vpop.f32.mrf.mxu0  ;;  %v1073_v36 = vpop.f32.mrf.mxu1 }
 0x18d   :  { %v956_v16 = vadd.f32 %v905_v34, %v8480_v39  ;;  %v1163_v28 = vadd.f32 %v1073_v36, %v8483_v44 }
 0x18f   :  { %6628 = vmatmul.msk.bf16.vlgmr.msra.gmra.mxu0 %vm271_vm3, %v8446_v10  ;;  %6637 = vmatmul.msk.bf16.vlgmr.msra.gmra.mxu1 %vm271_vm3, %v7303_v12 }
 0x190   :  { %6638 = vmatmul.msk.bf16.vlgmr.msra.gmra.mxu2 %vm271_vm3, %v7303_v12  ;;  %1949 = vmatpush.bf16.msra.mxu0 %v1875_v41 }
 0x191   :  { %v8555_v31 = vpop.f32.mrf.mxu3 }
 0x193   :  { %v1087_v43 = vpop.f32.mrf.mxu2 }
 0x194   :  { %v1164_v37 = vadd.f32 %v1087_v43, %v954_v32  ;;  %v8557_v14 = vpop.f32.mrf.mxu0  ;;  %v8559_v47 = vpop.f32.mrf.mxu1 }
 0x195   :  { %11589 = vst [vmem:[#allocation7_spill] sm:$0xff] %v8557_v14 }
 0x196   :  { %6643 = vmatmul.msk.bf16.vlgmr.msra.gmra.mxu3 %vm271_vm3, %v7303_v12 }
 0x199   :  { %v1157_v1 = vpop.f32.mrf.mxu3 }
 0x19a   :  { %v1169_v49 = vadd.f32 %v1157_v1, %v959_v7 }
 0x19b   :  { %v8562_v54 = vpop.f32.mrf.mxu2 }
 0x19c   :  { %v1059_v10 = vpop.f32.mrf.mxu0  ;;  %v1129_v56 = vpop.f32.mrf.mxu1 }
 0x19d   :  { %v1162_v39 = vadd.f32 %v1059_v10, %v952_v23  ;;  %v1167_v44 = vadd.f32 %v1129_v56, %v957_v25 }
 0x19f   :  { %6636 = vmatmul.msk.bf16.vlgmr.msrb.gmra.mxu0 %vm271_vm3, %v7303_v12  ;;  %6641 = vmatmul.msk.bf16.vlgmr.msrb.gmra.mxu1 %vm271_vm3, %v7303_v12 }
 0x1a0   :  { %6642 = vmatmul.msk.bf16.vlgmr.msrb.gmra.mxu2 %vm271_vm3, %v7303_v12 }
 0x1a1   :  { %v8567_v45 = vpop.f32.mrf.mxu3 }
 0x1a3   :  { %v1143_v51 = vpop.f32.mrf.mxu2 }
 0x1a4   :  { %v1168_v53 = vadd.f32 %v1143_v51, %v958_v27  ;;  %v8569_v46 = vpop.f32.mrf.mxu0  ;;  %v8571_v48 = vpop.f32.mrf.mxu1 }
 0x1a5   :  { %11590 = vst [vmem:[#allocation8_spill] sm:$0xff] %v8571_v48 }
 0x1a9   :  { %v1310_v60 = vpop.f32.mrf.mxu3 }
 0x1aa   :  { %v1374_v61 = vadd.f32 %v1310_v60, %v1165_v33 }
 0x1ab   :  { %v8573_v32 = vpop.f32.mrf.mxu2 }
 0x1ac   :  { %v1115_v55 = vpop.f32.mrf.mxu0  ;;  %v1282_v63 = vpop.f32.mrf.mxu1 }
 0x1ad   :  { %v1166_v3 = vadd.f32 %v1115_v55, %v956_v16  ;;  %v8575_v4 = vadd.f32 %v1282_v63, %v1163_v28 }
 0x1af   :  { %6640 = vmatmul.msk.bf16.vlgmr.msra.gmra.mxu0 %vm271_vm3, %v7303_v12 }
 0x1b1   :  { %v8578_v42 = vpop.f32.mrf.mxu3 }
 0x1b3   :  { %v1296_v5 = vpop.f32.mrf.mxu2 }
 0x1b4   :  { %v1373_v7 = vadd.f32 %v1296_v5, %v1164_v37  ;;  %v8580_v6 = vpop.f32.mrf.mxu0  ;;  %v8582_v18 = vpop.f32.mrf.mxu1 }
 0x1b5   :  { %11591 = vst [vmem:[#allocation9_spill] sm:$0xff] %v8580_v6 }
 0x1b9   :  { %v1366_v9 = vpop.f32.mrf.mxu3 }
 0x1ba   :  { %v1378_v19 = vadd.f32 %v1366_v9, %v1169_v49 }
 0x1bb   :  { %v8584_v11 = vpop.f32.mrf.mxu2 }
 0x1bc   :  { %v1268_v23 = vpop.f32.mrf.mxu0  ;;  %v1338_v25 = vpop.f32.mrf.mxu1 }
 0x1bd   :  { %v8586_v21 = vadd.f32 %v1268_v23, %v1162_v39  ;;  %v8588_v38 = vadd.f32 %v1338_v25, %v1167_v44 }
 0x1c1   :  { %v8590_v2 = vpop.f32.mrf.mxu3 }
 0x1c3   :  { %v1352_v12 = vpop.f32.mrf.mxu2 }
 0x1c4   :  { %v1377_v17 = vadd.f32 %v1352_v12, %v1168_v53  ;;  %v8592_v27 = vpop.f32.mrf.mxu0  ;;  %v8594_v15 = vpop.f32.mrf.mxu1 }
 0x1c5   :  { %11592 = vst [vmem:[#allocation10_spill] sm:$0xff] %v8594_v15 }
 0x1c9   :  { %v1519_v22 = vpop.f32.mrf.mxu3 }
 0x1ca   :  { %v1583_v59 = vadd.f32 %v1519_v22, %v1374_v61 }
 0x1cb   :  { %v8596_v33 = vpop.f32.mrf.mxu2 }
 0x1cc   :  { %11593 = vst [vmem:[#allocation11_spill] sm:$0xff] %v8596_v33  ;;  %v1324_v41 = vpop.f32.mrf.mxu0  ;;  %v1491_v34 = vpop.f32.mrf.mxu1 }
 0x1cd   :  { %v8598_v36 = vadd.f32 %v1324_v41, %v1166_v3  ;;  %v8641_v33 = vpop.permute.xlu0 %2016 }
 0x1ce   :  { %11607 = vst [vmem:[#allocation25_spill] sm:$0xff] %v8641_v33 }
 0x1cf   :  { %11594 = vst [vmem:[#allocation12_spill] sm:$0xff] %v8598_v36 }
 0x1d1   :  { %v1521_v16 = vpop.f32.mrf.mxu3 }
 0x1d3   :  { %v1505_v28 = vpop.f32.mrf.mxu2 }
 0x1d4   :  { %v8600_v43 = vpop.f32.mrf.mxu0  ;;  %v8602_v37 = vpop.f32.mrf.mxu1 }
 0x1d5   :  { %11595 = vst [vmem:[#allocation13_spill] sm:$0xff] %v8600_v43 }
 0x1d9   :  { %v1575_v1 = vpop.f32.mrf.mxu3 }
 0x1da   :  { %v8604_v49 = vadd.f32 %v1575_v1, %v1378_v19 }
 0x1db   :  { %v1507_v10 = vpop.f32.mrf.mxu2 }
 0x1dc   :  { %v1477_v56 = vpop.f32.mrf.mxu0  ;;  %v8606_v39 = vpop.f32.mrf.mxu1 }
 0x1dd   :  { %11596 = vst [vmem:[#allocation14_spill] sm:$0xff] %v8606_v39 }
 0x1e1   :  { %v8608_v44 = vpop.f32.mrf.mxu3 }
 0x1e2   :  { %11597 = vst [vmem:[#allocation15_spill] sm:$0xff] %v8608_v44 }
 0x1e3   :  { %v1561_v51 = vpop.f32.mrf.mxu2 }
 0x1e4   :  { %v8610_v53 = vadd.f32 %v1561_v51, %v1377_v17  ;;  %v8612_v60 = vpop.f32.mrf.mxu0  ;;  %v8614_v55 = vpop.f32.mrf.mxu1 }
 0x1e5   :  { %11598 = vst [vmem:[#allocation16_spill] sm:$0xff] %v8614_v55 }
 0x1e9   :  { %v1728_v63 = vpop.f32.mrf.mxu3 }
 0x1ea   :  { %v1792_v36 = vadd.f32 %v1728_v63, %v1583_v59 }
 0x1eb   :  { %v8616_v3 = vpop.f32.mrf.mxu2 }
 0x1ec   :  { %11599 = vst [vmem:[#allocation17_spill] sm:$0xff] %v8616_v3  ;;  %v8618_v5 = vpop.f32.mrf.mxu0  ;;  %v1700_v9 = vpop.f32.mrf.mxu1 }
 0x1ed   :  { %11600 = vst [vmem:[#allocation18_spill] sm:$0xff] %v8618_v5  ;;  %v963_v5 = vadd.f32 %v8493_v58, %v8395_v62 }
 0x1ef   :  { %v1173_v3 = vadd.f32 %v8555_v31, %v963_v5  ;;  %v1581_v31 = vadd.f32 %v1491_v34, %v8575_v4  ;;  %v1580_v4 = vadd.f32 %v1477_v56, %v8586_v21 }
 0x1f1   :  { %v1730_v19 = vpop.f32.mrf.mxu3 }
 0x1f3   :  { %v1714_v23 = vpop.f32.mrf.mxu2 }
 0x1f4   :  { %v8620_v25 = vpop.f32.mrf.mxu0  ;;  %v8622_v12 = vpop.f32.mrf.mxu1 }
 0x1f5   :  { %11601 = vst [vmem:[#allocation19_spill] sm:$0xff] %v8620_v25 }
 0x1f9   :  { %v1784_v41 = vpop.f32.mrf.mxu3 }
 0x1fb   :  { %v1716_v1 = vpop.f32.mrf.mxu2 }
 0x1fc   :  { %v1686_v17 = vpop.f32.mrf.mxu0  ;;  %v8624_v51 = vpop.f32.mrf.mxu1 }
 0x1fd   :  { %11602 = vst [vmem:[#allocation20_spill] sm:$0xff] %v8624_v51  ;;  %v1582_v51 = vadd.f32 %v1505_v28, %v1373_v7 }
 0x1ff   :  { %v1791_v61 = vadd.f32 %v1714_v23, %v1582_v51 }
 0x201   :  { %v8626_v52 = vpop.f32.mrf.mxu3 }
 0x202   :  { %11603 = vst [vmem:[#allocation21_spill] sm:$0xff] %v8626_v52 }
 0x203   :  { %v8628_v43 = vpop.f32.mrf.mxu2 }
 0x204   :  { %v8630_v55 = vpop.f32.mrf.mxu0  ;;  %v8632_v6 = vpop.f32.mrf.mxu1 }
 0x205   :  { %11604 = vst [vmem:[#allocation22_spill] sm:$0xff] %v8632_v6  ;;  %v962_v6 = vadd.f32 %v8515_v20, %v8424_v24  ;;  %v961_v20 = vadd.f32 %v8498_v57, %v8405_v8  ;;  %v1789_v57 = vadd.f32 %v1686_v17, %v1580_v4 }
 0x209   :  { %v1937_v15 = vpop.f32.mrf.mxu3 }
 0x20a   :  { %v2001_v48 = vadd.f32 %v1937_v15, %v1792_v36  ;;  %v1171_v36 = vadd.f32 %v8559_v47, %v961_v20 }
 0x20b   :  { %v8634_v14 = vpop.f32.mrf.mxu2 }
 0x20c   :  { %11605 = vst [vmem:[#allocation23_spill] sm:$0xff] %v8634_v14  ;;  %v8636_v25 = vpop.f32.mrf.mxu0  ;;  %v1909_v52 = vpop.f32.mrf.mxu1  ;;  %v1382_v14 = vadd.f32 %v8578_v42, %v1173_v3  ;;  %v8648_v58 = vadd.f32 %v8641_v33, %v2001_v48  ;;  %v1790_v42 = vadd.f32 %v1700_v9, %v1581_v31  ;;  %v1380_v8 = vadd.f32 %v8582_v18, %v1171_v36  ;;  %v11614_v36 = vld [vmem:[#allocation20_spill] sm:$0xff] }
 0x20d   :  { %11606 = vst [vmem:[#allocation24_spill] sm:$0xff] %v8636_v25  ;;  %v1172_v25 = vadd.f32 %v8562_v54, %v962_v6 }
 0x20e   :  { %v1591_v39 = vadd.f32 %v1521_v16, %v1382_v14  ;;  %v2043_v48 = vmax.f32 %v8648_v58, 0.0  ;;  %v1999_v34 = vadd.f32 %v1909_v52, %v1790_v42  ;;  %v1589_v52 = vadd.f32 %v8602_v37, %v1380_v8 }
 0x20f   :  { %v1381_v7 = vadd.f32 %v8584_v11, %v1172_v25  ;;  %v8663_v11 = vpop.permute.xlu1 %2021 }
 0x210   :  { %v1800_v15 = vadd.f32 %v1730_v19, %v1591_v39  ;;  %11608 = vst [vmem:[#allocation26_spill] sm:$0xff] %v8663_v11  ;;  %v960_v39 = vadd.f32 %v8537_v26, %v8452_v35  ;;  %v8674_v56 = vadd.f32 %v8641_v33, %v1999_v34  ;;  %v967_v35 = vadd.f32 %v8531_v13, %v8441_v30 }
 0x211   :  { %v1939_v44 = vpop.f32.mrf.mxu3  ;;  %v1590_v54 = vadd.f32 %v1507_v10, %v1381_v7  ;;  %v1796_v26 = vadd.f32 %v1784_v41, %v8604_v49  ;;  %v1798_v19 = vadd.f32 %v8622_v12, %v1589_v52 }
 0x212   :  { %v2009_v14 = vadd.f32 %v1939_v44, %v1800_v15  ;;  %v1170_v21 = vadd.f32 %v8569_v46, %v960_v39  ;;  %v966_v46 = vadd.f32 %v8546_v40, %v8477_v50  ;;  %v1177_v30 = vadd.f32 %v8567_v45, %v967_v35  ;;  %v11618_v35 = vld [vmem:[#allocation6_spill] sm:$0xff] }
 0x213   :  { %v1923_v22 = vpop.f32.mrf.mxu2  ;;  %v1799_v16 = vadd.f32 %v1716_v1, %v1590_v54  ;;  %v2041_v50 = vmax.f32 %v8674_v56, 0.0  ;;  %v1795_v1 = vadd.f32 %v8628_v43, %v8610_v53  ;;  %v965_v45 = vadd.f32 %v8539_v29, %v8455_v0 }
 0x214   :  { %v2000_v62 = vadd.f32 %v1923_v22, %v1791_v61  ;;  %v8650_v59 = vpop.f32.mrf.mxu0  ;;  %v1911_v28 = vpop.f32.mrf.mxu1  ;;  %v8669_v3 = vadd.f32 %v8663_v11, %v2009_v14  ;;  %v1379_v37 = vadd.f32 %v8592_v27, %v1170_v21  ;;  %v1386_v12 = vadd.f32 %v8590_v2, %v1177_v30 }
 0x215   :  { %v2007_v40 = vadd.f32 %v1911_v28, %v1798_v19  ;;  %v1176_v17 = vadd.f32 %v8573_v32, %v966_v46  ;;  %v11611_v32 = vld [vmem:[#allocation11_spill] sm:$0xff]  ;;  %v11615_v28 = vld [vmem:[#allocation17_spill] sm:$0xff]  ;;  %v11620_v46 = vld [vmem:[#allocation10_spill] sm:$0xff] }
 0x216   :  { %v8655_v24 = vadd.f32 %v8641_v33, %v2000_v62  ;;  %v2051_v25 = vmax.f32 %v8669_v3, 0.0  ;;  %v1588_v41 = vadd.f32 %v8612_v60, %v1379_v37  ;;  %v11609_v60 = vld [vmem:[#allocation14_spill] sm:$0xff]  ;;  %v11610_v62 = vld [vmem:[#allocation15_spill] sm:$0xff] }
 0x217   :  { %v1585_v22 = vadd.f32 %v11609_v60, %v8588_v38  ;;  %v1595_v31 = vadd.f32 %v11610_v62, %v1386_v12  ;;  %v8714_v43 = vadd.f32 %v8663_v11, %v2007_v40  ;;  %v1385_v53 = vadd.f32 %v11611_v32, %v1176_v17  ;;  %v11613_v38 = vld [vmem:[#allocation8_spill] sm:$0xff]  ;;  %v11621_v19 = vld [vmem:[#allocation23_spill] sm:$0xff]  ;;  %v11623_v12 = vld [vmem:[#allocation9_spill] sm:$0xff] }
 0x218   :  { %v2042_v6 = vmax.f32 %v8655_v24, 0.0  ;;  %v1797_v51 = vadd.f32 %v8630_v55, %v1588_v41  ;;  %v11612_v55 = vld [vmem:[#allocation21_spill] sm:$0xff]  ;;  %v1175_v14 = vadd.f32 %v11613_v38, %v965_v45  ;;  %v11624_v45 = vld [vmem:[#allocation16_spill] sm:$0xff]  ;;  %v11627_v38 = vld [vmem:[#allocation19_spill] sm:$0xff] }
 0x219   :  { %v1993_v10 = vpop.f32.mrf.mxu3  ;;  %v1804_v42 = vadd.f32 %v11612_v55, %v1595_v31  ;;  %v1794_v4 = vadd.f32 %v11614_v36, %v1585_v22  ;;  %v1594_v39 = vadd.f32 %v11615_v28, %v1385_v53  ;;  %v2049_v21 = vmax.f32 %v8714_v43, 0.0 }
 0x21a   :  { %v7459_v9 = vpack.i.bf16 %v2043_v48, %v2042_v6  ;;  %v2005_v13 = vadd.f32 %v1993_v10, %v1796_v26  ;;  %v11619_v26 = vld [vmem:[#allocation7_spill] sm:$0xff]  ;;  %v1384_v37 = vadd.f32 %v11620_v46, %v1175_v14 }
 0x21b   :  { %v1925_v44 = vpop.f32.mrf.mxu2  ;;  %v1803_v30 = vadd.f32 %v11621_v19, %v1594_v39 }
 0x21c   :  { %v2008_v63 = vadd.f32 %v1925_v44, %v1799_v16  ;;  %v1895_v47 = vpop.f32.mrf.mxu0  ;;  %7460 = vrot.lane.b32.xlu1 %v7459_v9, %s7829_s3  ;;  %v8711_v7 = vadd.f32 %v8641_v33, %v2005_v13  ;;  %v1965_v2 = vpop.f32.mrf.mxu1  ;;  %v11616_v44 = vld [vmem:[#allocation12_spill] sm:$0xff]  ;;  %v964_v9 = vadd.f32 %v11619_v26, %v11618_v35  ;;  %v1593_v17 = vadd.f32 %v11624_v45, %v1384_v37 }
 0x21d   :  { %v1998_v5 = vadd.f32 %v1895_v47, %v1789_v57  ;;  %v2003_v52 = vadd.f32 %v1965_v2, %v1794_v4  ;;  %v11622_v13 = vld [vmem:[#allocation24_spill] sm:$0xff] }
 0x21e   :  { %v8680_v18 = vadd.f32 %v8663_v11, %v2008_v63  ;;  %v2047_v8 = vmax.f32 %v8711_v7, 0.0  ;;  %v11617_v63 = vld [vmem:[#allocation18_spill] sm:$0xff] }
 0x21f   :  { %v8691_v23 = vadd.f32 %v8641_v33, %v1998_v5  ;;  %v1584_v47 = vadd.f32 %v11617_v63, %v11616_v44  ;;  %v2029_v22 = vadd.f32 %v8641_v33, %v2003_v52 }
 0x220   :  { %v2050_v49 = vmax.f32 %v8680_v18, 0.0 }
 0x221   :  { %v2040_v27 = vmax.f32 %v8691_v23, 0.0  ;;  %v1995_v0 = vpop.f32.mrf.mxu3  ;;  %v1793_v41 = vadd.f32 %v11622_v13, %v1584_v47  ;;  %v2045_v36 = vmax.f32 %v2029_v22, 0.0 }
 0x222   :  { %v2013_v57 = vadd.f32 %v1995_v0, %v1804_v42  ;;  %v11626_v0 = vld [vmem:[#allocation22_spill] sm:$0xff]  ;;  %v7474_v53 = vpack.i.bf16 %v2050_v49, %v2049_v21 }
 0x223   :  { %v1979_v61 = vpop.f32.mrf.mxu2  ;;  %v7464_v16 = vpack.i.bf16 %v2041_v50, %v2040_v27 }
 0x224   :  { %v2004_v15 = vadd.f32 %v1979_v61, %v1795_v1  ;;  %v1897_v20 = vpop.f32.mrf.mxu0  ;;  %v1174_v1 = vadd.f32 %v11623_v12, %v964_v9  ;;  %v1967_v31 = vpop.f32.mrf.mxu1  ;;  %7475 = vrot.lane.b32.xlu0 %v7474_v53, %s7829_s3 }
 0x225   :  { %v2006_v29 = vadd.f32 %v1897_v20, %v1797_v51  ;;  %7465 = vrot.lane.b32.xlu2 %v7464_v16, %s7829_s3  ;;  %v8746_v51 = vadd.f32 %v8663_v11, %v2013_v57 }
 0x226   :  { %v8719_v54 = vadd.f32 %v8641_v33, %v2004_v15  ;;  %v11625_v15 = vld [vmem:[#allocation13_spill] sm:$0xff] }
 0x227   :  { %v8724_v34 = vadd.f32 %v8663_v11, %v2006_v29  ;;  %v1383_v20 = vadd.f32 %v11625_v15, %v1174_v1  ;;  %v1802_v29 = vadd.f32 %v11626_v0, %v1593_v17  ;;  %v2055_v55 = vmax.f32 %v8746_v51, 0.0 }
 0x228   :  { %v2046_v10 = vmax.f32 %v8719_v54, 0.0 }
 0x229   :  { %v2048_v5 = vmax.f32 %v8724_v34, 0.0  ;;  %v1592_v14 = vadd.f32 %v11627_v38, %v1383_v20  ;;  %v2011_v4 = vadd.f32 %v1967_v31, %v1802_v29  ;;  %v7494_v46 = vpack.i.bf16 %v2055_v55, %v2047_v8 }
 0x22a   :  { %v7484_v9 = vpack.i.bf16 %v2046_v10, %v2045_v36 }
 0x22b   :  { %v1981_v40 = vpop.f32.mrf.mxu2  ;;  %v1801_v28 = vadd.f32 %v8650_v59, %v1592_v14  ;;  %v8765_v57 = vadd.f32 %v8663_v11, %v2011_v4 }
 0x22c   :  { %v2012_v61 = vadd.f32 %v1981_v40, %v1803_v30  ;;  %v1951_v60 = vpop.f32.mrf.mxu0 }
 0x22d   :  { %v2002_v62 = vadd.f32 %v1951_v60, %v1793_v41  ;;  %v2053_v52 = vmax.f32 %v8765_v57, 0.0 }
 0x22e   :  { %v8750_v2 = vadd.f32 %v8663_v11, %v2012_v61 }
 0x22f   :  { %v2028_v32 = vadd.f32 %v8641_v33, %v2002_v62  ;;  %v6942_v33 = vld [vmem:[#allocation2 + $0x250] sm:$0xf] }
 0x230   :  { %v2054_v42 = vmax.f32 %v8750_v2, 0.0  ;;  %v7335_v2 = vld [vmem:[#allocation2 + $0xf4] sm:$0xf0] }
 0x231   :  { %v2044_v16 = vmax.f32 %v2028_v32, 0.0 }
 0x232   :  { %v7489_v59 = vpack.i.bf16 %v2054_v42, %v2053_v52 }
 0x233   :  { %v7469_v47 = vpack.i.bf16 %v2048_v5, %v2044_v16 }
 0x234   :  { %v1953_v39 = vpop.f32.mrf.mxu0  ;;  %7490 = vrot.lane.b32.xlu0 %v7489_v59, %s7829_s3 }
 0x235   :  { %v2010_v44 = vadd.f32 %v1953_v39, %v1801_v28  ;;  %7470 = vrot.lane.b32.xlu2 %v7469_v47, %s7829_s3 }
 0x237   :  { %v2036_v63 = vadd.f32 %v8663_v11, %v2010_v44  ;;  %v6950_v11 = vld [vmem:[#allocation2 + $0x260] sm:$0xf] }
 0x239   :  { %v2052_v35 = vmax.f32 %v2036_v63, 0.0 }
 0x23b   :  { %v7479_v26 = vpack.i.bf16 %v2052_v35, %v2051_v25 }
 0x23d   :  { %7480 = vrot.lane.b32.xlu1 %v7479_v26, %s7829_s3  ;;  %7485 = vrot.lane.b32.xlu2 %v7484_v9, %s7829_s3 }
 0x245   :  { %7495 = vrot.lane.b32.xlu1 %v7494_v46, %s7829_s3 }
 0x27f   :  { %v7466_v37 = vpop.permute.xlu2 %7465 }
 0x280   :  { %v7468_v19 = vunpack.i.h.bf16 %v7466_v37  ;;  %v7467_v30 = vunpack.i.l.bf16 %v7466_v37 }
 0x282   :  { %v2129_v41 = vsel %vm263_vm2, %v7467_v30, %v7468_v19 }
 0x283   :  { %v8791_v60 = vmax.f32 %v2040_v27, %v2129_v41  ;;  %v7367_v41 = vld [vmem:[#allocation2 + $0x1f4] sm:$0xf0] }
 0x28e   :  { %v7461_v13 = vpop.permute.xlu1 %7460 }
 0x28f   :  { %v7463_v40 = vunpack.i.h.bf16 %v7461_v13  ;;  %v7462_v12 = vunpack.i.l.bf16 %v7461_v13  ;;  %v7471_v1 = vpop.permute.xlu2 %7470 }
 0x290   :  { %v7472_v45 = vunpack.i.l.bf16 %v7471_v1  ;;  %v7473_v53 = vunpack.i.h.bf16 %v7471_v1 }
 0x291   :  { %v2130_v17 = vsel %vm263_vm2, %v7468_v19, %v7462_v12  ;;  %v2131_v61 = vsel %vm263_vm2, %v7462_v12, %v7463_v40  ;;  %v7333_v12 = vld [vmem:[#allocation2 + $0xe4] sm:$0xf0] }
 0x292   :  { %v8795_v22 = vmax.f32 %v2041_v50, %v2130_v17  ;;  %v2132_v62 = vsel %vm263_vm2, %v7463_v40, %v7472_v45  ;;  %v8800_v31 = vmax.f32 %v2042_v6, %v2131_v61  ;;  %v6758_v40 = vld [vmem:[#allocation2 + $0xe0] sm:$0xf]  ;;  %v7365_v17 = vld [vmem:[#allocation2 + $0x1e4] sm:$0xf0]  ;;  %v6702_v61 = vld [vmem:[#allocation2 + $0x70] sm:$0xf] }
 0x293   :  { %v8804_v15 = vmax.f32 %v2043_v48, %v2132_v62  ;;  %v8885_v62 = vor.u32 %v7333_v12, %v6758_v40  ;;  %v7311_v40 = vld [vmem:[#allocation2 + $0x34] sm:$0xf0] }
 0x294   :  { %v7499_v23 = vpack.i.bf16 %v8800_v31, %v8795_v22 }
 0x295   :  { %11630 = vst [vmem:[#allocation11_spill] sm:$0xff] %v8885_v62 }
 0x296   :  { %7500 = vrot.lane.b32.xlu2 %v7499_v23, %s7831_s13  ;;  %v7476_v6 = vpop.permute.xlu0 %7475  ;;  %v6750_v23 = vld [vmem:[#allocation2 + $0xd0] sm:$0xf] }
 0x297   :  { %v7486_v20 = vpop.permute.xlu2 %7485  ;;  %v7478_v48 = vunpack.i.h.bf16 %v7476_v6  ;;  %v7477_v32 = vunpack.i.l.bf16 %v7476_v6  ;;  %v7363_v6 = vld [vmem:[#allocation2 + $0x1d4] sm:$0xf0] }
 0x298   :  { %v7488_v0 = vunpack.i.h.bf16 %v7486_v20  ;;  %v7487_v29 = vunpack.i.l.bf16 %v7486_v20  ;;  %v7319_v20 = vld [vmem:[#allocation2 + $0x74] sm:$0xf0] }
 0x299   :  { %v2136_v38 = vsel %vm263_vm2, %v7473_v53, %v7477_v32  ;;  %v2137_v14 = vsel %vm263_vm2, %v7477_v32, %v7478_v48 }
 0x29a   :  { %v2133_v56 = vsel %vm263_vm2, %v7472_v45, %v7487_v29  ;;  %v2134_v50 = vsel %vm263_vm2, %v7487_v29, %v7488_v0  ;;  %v8822_v4 = vmax.f32 %v2048_v5, %v2136_v38  ;;  %v6886_v45 = vld [vmem:[#allocation2 + $0x1e0] sm:$0xf]  ;;  %v8890_v29 = vor.u32 %v7319_v20, %v6702_v61  ;;  %v7325_v61 = vld [vmem:[#allocation2 + $0xa4] sm:$0xf0] }
 0x29b   :  { %v8811_v27 = vmax.f32 %v2044_v16, %v2133_v56  ;;  %v8813_v24 = vmax.f32 %v2045_v36, %v2134_v50  ;;  %v8826_v36 = vmax.f32 %v2049_v21, %v2137_v14  ;;  %v7331_v56 = vld [vmem:[#allocation2 + $0xd4] sm:$0xf0]  ;;  %v6694_v50 = vld [vmem:[#allocation2 + $0x60] sm:$0xf]  ;;  %v6686_v14 = vld [vmem:[#allocation2 + $0x50] sm:$0xf] }
 0x29c   :  { %2886 = vmatpush.bf16.msrb.mxu0 %v8890_v29  ;;  %v8896_v53 = vor.u32 %v7331_v56, %v6750_v23  ;;  %v6742_v38 = vld [vmem:[#allocation2 + $0xc0] sm:$0xf]  ;;  %v7357_v23 = vld [vmem:[#allocation2 + $0x1a4] sm:$0xf0] }
 0x29d   :  { %v7509_v58 = vpack.i.bf16 %v8811_v27, %v8804_v15  ;;  %v6854_v20 = vld [vmem:[#allocation2 + $0x1a0] sm:$0xf] }
 0x29e   :  { %11632 = vst [vmem:[#allocation8_spill] sm:$0xff] %v8896_v53 }
 0x29f   :  { %7510 = vrot.lane.b32.xlu1 %v7509_v58, %s7831_s13  ;;  %v6878_v58 = vld [vmem:[#allocation2 + $0x1d0] sm:$0xf] }
 0x2a6   :  { %v7491_v28 = vpop.permute.xlu0 %7490 }
 0x2a7   :  { %v7493_v44 = vunpack.i.h.bf16 %v7491_v28  ;;  %v7492_v63 = vunpack.i.l.bf16 %v7491_v28  ;;  %v8899_v28 = vor.u32 %v7363_v6, %v6878_v58  ;;  %v8935_v58 = vor.u32 %v7357_v23, %v6854_v20  ;;  %v6718_v6 = vld [vmem:[#allocation2 + $0x90] sm:$0xf]  ;;  %v7419_v23 = vld [vmem:[#allocation2 + $0x394] sm:$0xf0] }
 0x2a9   :  { %v2141_v34 = vsel %vm263_vm2, %v7492_v63, %v7493_v44  ;;  %11633 = vst [vmem:[#allocation20_spill] sm:$0xff] %v8899_v28 }
 0x2aa   :  { %v8842_v9 = vmax.f32 %v2053_v52, %v2141_v34  ;;  %v7014_v34 = vld [vmem:[#allocation2 + $0x2e0] sm:$0xf]  ;;  %11642 = vst [vmem:[#allocation9_spill] sm:$0xff] %v8935_v58 }
 0x2ac   :  { %v7534_v54 = vpack.i.bf16 %v8842_v9, %v8813_v24 }
 0x2af   :  { %v7481_v16 = vpop.permute.xlu1 %7480 }
 0x2b0   :  { %v7483_v39 = vunpack.i.h.bf16 %v7481_v16  ;;  %v7482_v57 = vunpack.i.l.bf16 %v7481_v16  ;;  %v7315_v16 = vld [vmem:[#allocation2 + $0x54] sm:$0xf0] }
 0x2b2   :  { %v2138_v47 = vsel %vm263_vm2, %v7478_v48, %v7482_v57  ;;  %v2139_v26 = vsel %vm263_vm2, %v7482_v57, %v7483_v39  ;;  %v2140_v59 = vsel %vm263_vm2, %v7483_v39, %v7492_v63  ;;  %v7317_v48 = vld [vmem:[#allocation2 + $0x64] sm:$0xf0]  ;;  %v7022_v57 = vld [vmem:[#allocation2 + $0x2f0] sm:$0xf]  ;;  %v6870_v63 = vld [vmem:[#allocation2 + $0x1c0] sm:$0xf] }
 0x2b3   :  { %v8834_v5 = vmax.f32 %v2050_v49, %v2138_v47  ;;  %v8838_v43 = vmax.f32 %v2051_v25, %v2139_v26  ;;  %v8840_v21 = vmax.f32 %v2052_v35, %v2140_v59  ;;  %v8893_v32 = vor.u32 %v7317_v48, %v6694_v50  ;;  %v7329_v39 = vld [vmem:[#allocation2 + $0xc4] sm:$0xf0]  ;;  %v7323_v48 = vld [vmem:[#allocation2 + $0x94] sm:$0xf0] }
 0x2b4   :  { %v7361_v47 = vld [vmem:[#allocation2 + $0x1c4] sm:$0xf0]  ;;  %v8904_v59 = vor.u32 %v7315_v16, %v6686_v14  ;;  %v6846_v14 = vld [vmem:[#allocation2 + $0x190] sm:$0xf]  ;;  %v7355_v16 = vld [vmem:[#allocation2 + $0x194] sm:$0xf0] }
 0x2b5   :  { %v7504_v30 = vpack.i.bf16 %v8834_v5, %v8826_v36  ;;  %v7514_v13 = vpack.i.bf16 %v8840_v21, %v8838_v43  ;;  %2887 = vmatpush.bf16.msrb.mxu0 %v8893_v32 }
 0x2b7   :  { %v7496_v46 = vpop.permute.xlu1 %7495  ;;  %7505 = vrot.lane.b32.xlu0 %v7504_v30, %s7831_s13  ;;  %7515 = vrot.lane.b32.xlu2 %v7514_v13, %s7831_s13  ;;  %v7397_v30 = vld [vmem:[#allocation2 + $0x2e4] sm:$0xf0]  ;;  %v8911_v13 = vor.u32 %v7361_v47, %v6870_v63  ;;  %v6710_v63 = vld [vmem:[#allocation2 + $0x80] sm:$0xf] }
 0x2b8   :  { %v7498_v37 = vunpack.i.h.bf16 %v7496_v46  ;;  %v7497_v19 = vunpack.i.l.bf16 %v7496_v46  ;;  %v8907_v46 = vor.u32 %v7329_v39, %v6742_v38  ;;  %v8939_v38 = vor.u32 %v7323_v48, %v6718_v6  ;;  %v6822_v6 = vld [vmem:[#allocation2 + $0x160] sm:$0xf]  ;;  %v7349_v48 = vld [vmem:[#allocation2 + $0x164] sm:$0xf0] }
 0x2b9   :  { %11636 = vst [vmem:[#allocation18_spill] sm:$0xff] %v8911_v13  ;;  %2888 = vmatpush.bf16.msrb.mxu0 %v8904_v59  ;;  %v8943_v39 = vor.u32 %v7355_v16, %v6846_v14  ;;  %v8965_v16 = vor.u32 %v7349_v48, %v6822_v6  ;;  %v6982_v6 = vld [vmem:[#allocation2 + $0x2a0] sm:$0xf] }
 0x2ba   :  { %v8850_v18 = vmax.f32 %v2055_v55, %v7498_v37  ;;  %v2135_v3 = vsel %vm263_vm2, %v7488_v0, %v7497_v19  ;;  %v2142_v49 = vsel %vm263_vm2, %v7493_v44, %v7498_v37  ;;  %v8856_v25 = vmax.f32 %v2047_v8, %v7497_v19  ;;  %v6894_v55 = vld [vmem:[#allocation2 + $0x1f0] sm:$0xf]  ;;  %v7399_v44 = vld [vmem:[#allocation2 + $0x2f4] sm:$0xf0]  ;;  %11635 = vst [vmem:[#allocation12_spill] sm:$0xff] %v8907_v46 }
 0x2bb   :  { %v8860_v52 = vmax.f32 %v2046_v10, %v2135_v3  ;;  %v8864_v35 = vmax.f32 %v2054_v42, %v2142_v49  ;;  %v7519_v8 = vpack.i.bf16 %v8822_v4, %v8791_v60  ;;  %v6766_v10 = vld [vmem:[#allocation2 + $0xf0] sm:$0xf]  ;;  %v8882_v1 = vor.u32 %v7367_v41, %v6894_v55  ;;  %v6678_v37 = vld [vmem:[#allocation2 + $0x40] sm:$0xf]  ;;  %v7313_v19 = vld [vmem:[#allocation2 + $0x44] sm:$0xf0] }
 0x2bc   :  { %v7524_v51 = vpack.i.bf16 %v8850_v18, %v8856_v25  ;;  %v8880_v42 = vor.u32 %v7335_v2, %v6766_v10  ;;  %v8888_v0 = vor.u32 %v7365_v17, %v6886_v45  ;;  %v8901_v26 = vor.u32 %v7399_v44, %v7022_v57  ;;  %v6734_v3 = vld [vmem:[#allocation2 + $0xb0] sm:$0xf]  ;;  %v7327_v49 = vld [vmem:[#allocation2 + $0xb4] sm:$0xf0]  ;;  %v6726_v17 = vld [vmem:[#allocation2 + $0xa0] sm:$0xf] }
 0x2bd   :  { %v7529_v7 = vpack.i.bf16 %v8864_v35, %v8860_v52  ;;  %11629 = vst [vmem:[#allocation15_spill] sm:$0xff] %v8882_v1  ;;  %2928 = vmatpush.bf16.msrb.mxu3 %v8882_v1  ;;  %v7395_v10 = vld [vmem:[#allocation2 + $0x2d4] sm:$0xf0]  ;;  %v8916_v2 = vor.u32 %v7313_v19, %v6678_v37  ;;  %v8919_v55 = vor.u32 %v7327_v49, %v6734_v3  ;;  %v6670_v41 = vld [vmem:[#allocation2 + $0x30] sm:$0xf] }
 0x2be   :  { %7525 = vrot.lane.b32.xlu1 %v7524_v51, %s7831_s13  ;;  %11628 = vst [vmem:[#allocation14_spill] sm:$0xff] %v8880_v42  ;;  %2900 = vmatpush.bf16.msra.mxu2 %v8880_v42  ;;  %v6862_v51 = vld [vmem:[#allocation2 + $0x1b0] sm:$0xf]  ;;  %v8928_v56 = vor.u32 %v7311_v40, %v6670_v41  ;;  %v8931_v50 = vor.u32 %v7325_v61, %v6726_v17  ;;  %v6662_v57 = vld [vmem:[#allocation2 + $0x20] sm:$0xf] }
 0x2bf   :  { %7530 = vrot.lane.b32.xlu2 %v7529_v7, %s7831_s13  ;;  %7520 = vrot.lane.b32.xlu0 %v7519_v8, %s7831_s13  ;;  %11631 = vst [vmem:[#allocation21_spill] sm:$0xff] %v8888_v0  ;;  %v8913_v7 = vor.u32 %v7397_v30, %v7014_v34  ;;  %v7359_v8 = vld [vmem:[#allocation2 + $0x1b4] sm:$0xf0]  ;;  %v7309_v44 = vld [vmem:[#allocation2 + $0x24] sm:$0xf0] }
 0x2c0   :  { %11634 = vst [vmem:[#allocation17_spill] sm:$0xff] %v8901_v26  ;;  %2956 = vmatpush.bf16.msra.mxu1 %v8901_v26  ;;  %v8925_v45 = vor.u32 %v7359_v8, %v6862_v51  ;;  %2889 = vmatpush.bf16.msrb.mxu0 %v8916_v2  ;;  %v8945_v47 = vor.u32 %v7309_v44, %v6662_v57  ;;  %v7321_v34 = vld [vmem:[#allocation2 + $0x84] sm:$0xf0]  ;;  %v6830_v37 = vld [vmem:[#allocation2 + $0x170] sm:$0xf] }
 0x2c1   :  { %2929 = vmatpush.bf16.msrb.mxu3 %v8888_v0  ;;  %11637 = vst [vmem:[#allocation6_spill] sm:$0xff] %v8913_v7  ;;  %v7351_v19 = vld [vmem:[#allocation2 + $0x174] sm:$0xf0]  ;;  %v8948_v30 = vor.u32 %v7321_v34, %v6710_v63  ;;  %v6998_v49 = vld [vmem:[#allocation2 + $0x2c0] sm:$0xf] }
 0x2c2   :  { %2901 = vmatpush.bf16.msra.mxu2 %v8885_v62  ;;  %11638 = vst [vmem:[#allocation7_spill] sm:$0xff] %v8919_v55  ;;  %v8950_v3 = vor.u32 %v7351_v19, %v6830_v37  ;;  %v7393_v51 = vld [vmem:[#allocation2 + $0x2c4] sm:$0xf0]  ;;  %v6654_v40 = vld [vmem:[#allocation2 + $0x10] sm:$0xf] }
 0x2c3   :  { %11640 = vst [vmem:[#allocation23_spill] sm:$0xff] %v8925_v45  ;;  %v8953_v8 = vor.u32 %v7393_v51, %v6998_v49  ;;  %v7307_v17 = vld [vmem:[#allocation2 + $0x14] sm:$0xf0]  ;;  %v7102_v61 = vld [vmem:[#allocation2 + $0x390] sm:$0xf] }
 0x2c4   :  { %2957 = vmatpush.bf16.msra.mxu1 %v8913_v7  ;;  %11641 = vst [vmem:[#allocation24_spill] sm:$0xff] %v8931_v50  ;;  %2890 = vmatpush.bf16.msrb.mxu0 %v8928_v56  ;;  %v8960_v20 = vor.u32 %v7307_v17, %v6654_v40  ;;  %v8963_v14 = vor.u32 %v7419_v23, %v7102_v61  ;;  %v6990_v57 = vld [vmem:[#allocation2 + $0x2b0] sm:$0xf]  ;;  %v7391_v44 = vld [vmem:[#allocation2 + $0x2b4] sm:$0xf0] }
 0x2c5   :  { %2930 = vmatpush.bf16.msrb.mxu3 %v8899_v28  ;;  %11643 = vst [vmem:[#allocation16_spill] sm:$0xff] %v8939_v38  ;;  %v8968_v63 = vor.u32 %v7391_v44, %v6990_v57  ;;  %v6646_v34 = vld [vmem:[#allocation2] sm:$0xf]  ;;  %v7305_v37 = vld [vmem:[#allocation2 + $0x4] sm:$0xf0] }
 0x2c6   :  { %2902 = vmatpush.bf16.msra.mxu2 %v8896_v53  ;;  %11644 = vst [vmem:[#allocation13_spill] sm:$0xff] %v8943_v39  ;;  %v7094_v19 = vld [vmem:[#allocation2 + $0x380] sm:$0xf]  ;;  %v8973_v49 = vor.u32 %v7305_v37, %v6646_v34  ;;  %v7417_v51 = vld [vmem:[#allocation2 + $0x384] sm:$0xf0] }
 0x2c7   :  { %7535 = vrot.lane.b32.xlu0 %v7534_v54, %s7831_s13  ;;  %v7006_v54 = vld [vmem:[#allocation2 + $0x2d0] sm:$0xf]  ;;  %11645 = vst [vmem:[#allocation22_spill] sm:$0xff] %v8948_v30  ;;  %v8975_v40 = vor.u32 %v7417_v51, %v7094_v19  ;;  %v7383_v23 = vld [vmem:[#allocation2 + $0x274] sm:$0xf0] }
 0x2c8   :  { %v8922_v12 = vor.u32 %v7395_v10, %v7006_v54  ;;  %2891 = vmatpush.bf16.msrb.mxu0 %v8945_v47  ;;  %11646 = vst [vmem:[#allocation19_spill] sm:$0xff] %v8953_v8  ;;  %v6838_v54 = vld [vmem:[#allocation2 + $0x180] sm:$0xf]  ;;  %v7353_v10 = vld [vmem:[#allocation2 + $0x184] sm:$0xf0] }
 0x2c9   :  { %2931 = vmatpush.bf16.msrb.mxu3 %v8911_v13  ;;  %v8956_v41 = vor.u32 %v7353_v10, %v6838_v54  ;;  %11648 = vst [vmem:[#allocation28_spill] sm:$0xff] %v8963_v14  ;;  %v6814_v54 = vld [vmem:[#allocation2 + $0x150] sm:$0xf]  ;;  %v7347_v10 = vld [vmem:[#allocation2 + $0x154] sm:$0xf0] }
 0x2ca   :  { %2903 = vmatpush.bf16.msra.mxu2 %v8907_v46  ;;  %11639 = vst [vmem:[#allocation10_spill] sm:$0xff] %v8922_v12  ;;  %2958 = vmatpush.bf16.msra.mxu1 %v8922_v12  ;;  %v8977_v17 = vor.u32 %v7347_v10, %v6814_v54  ;;  %v6958_v61 = vld [vmem:[#allocation2 + $0x270] sm:$0xf]  ;;  %v7389_v57 = vld [vmem:[#allocation2 + $0x2a4] sm:$0xf0] }
 0x2cb   :  { %11647 = vst [vmem:[#allocation27_spill] sm:$0xff] %v8956_v41  ;;  %v8980_v48 = vor.u32 %v7383_v23, %v6958_v61  ;;  %v8983_v44 = vor.u32 %v7389_v57, %v6982_v6  ;;  %v6806_v34 = vld [vmem:[#allocation2 + $0x140] sm:$0xf]  ;;  %v7345_v37 = vld [vmem:[#allocation2 + $0x144] sm:$0xf0] }
 0x2cc   :  { %2892 = vmatpush.bf16.msrb.mxu0 %v8960_v20  ;;  %11649 = vst [vmem:[#allocation29_spill] sm:$0xff] %v8968_v63  ;;  %v8987_v19 = vor.u32 %v7345_v37, %v6806_v34  ;;  %v7381_v51 = vld [vmem:[#allocation2 + $0x264] sm:$0xf0]  ;;  %v6974_v54 = vld [vmem:[#allocation2 + $0x290] sm:$0xf] }
 0x2cd   :  { %2932 = vmatpush.bf16.msrb.mxu3 %v8925_v45  ;;  %11650 = vst [vmem:[#allocation30_spill] sm:$0xff] %v8975_v40  ;;  %v7387_v10 = vld [vmem:[#allocation2 + $0x294] sm:$0xf0]  ;;  %v8990_v61 = vor.u32 %v7381_v51, %v6950_v11  ;;  %v6798_v6 = vld [vmem:[#allocation2 + $0x130] sm:$0xf] }
 0x2ce   :  { %2904 = vmatpush.bf16.msra.mxu2 %v8919_v55  ;;  %2959 = vmatpush.bf16.msra.mxu1 %v8953_v8  ;;  %11651 = vst [vmem:[#allocation31_spill] sm:$0xff] %v8980_v48  ;;  %v8992_v23 = vor.u32 %v7387_v10, %v6974_v54  ;;  %v7343_v57 = vld [vmem:[#allocation2 + $0x134] sm:$0xf0]  ;;  %v7350_v51 = vld [vmem:[#allocation2 + $0x174] sm:$0xf] }
 0x2cf   :  { %11652 = vst [vmem:[#allocation32_spill] sm:$0xff] %v8983_v44  ;;  %v8996_v34 = vor.u32 %v7343_v57, %v6798_v6  ;;  %v6832_v54 = vld [vmem:[#allocation2 + $0x178] sm:$0xf0]  ;;  %v6790_v10 = vld [vmem:[#allocation2 + $0x120] sm:$0xf] }
 0x2d0   :  { %2893 = vmatpush.bf16.msrb.mxu0 %v8973_v49  ;;  %11653 = vst [vmem:[#allocation33_spill] sm:$0xff] %v8990_v61  ;;  %v6934_v8 = vld [vmem:[#allocation2 + $0x240] sm:$0xf]  ;;  %v7342_v13 = vld [vmem:[#allocation2 + $0x134] sm:$0xf] }
 0x2d1   :  { %2933 = vmatpush.bf16.msrb.mxu3 %v8935_v58  ;;  %11654 = vst [vmem:[#allocation34_spill] sm:$0xff] %v8992_v23  ;;  %v6918_v12 = vld [vmem:[#allocation2 + $0x220] sm:$0xf]  ;;  %v6696_v1 = vld [vmem:[#allocation2 + $0x68] sm:$0xf0] }
 0x2d2   :  { %2905 = vmatpush.bf16.msra.mxu2 %v8931_v50  ;;  %2960 = vmatpush.bf16.msra.mxu1 %v8968_v63  ;;  %v7385_v63 = vld [vmem:[#allocation2 + $0x284] sm:$0xf0] }
 0x2d4   :  { %2942 = vmatpush.bf16.msra.mxu0 %v8980_v48 }
 0x2d5   :  { %2934 = vmatpush.bf16.msrb.mxu3 %v8943_v39  ;;  %v7377_v39 = vld [vmem:[#allocation2 + $0x244] sm:$0xf0] }
 0x2d6   :  { %2906 = vmatpush.bf16.msra.mxu2 %v8939_v38  ;;  %2961 = vmatpush.bf16.msra.mxu1 %v8983_v44  ;;  %v9003_v44 = vor.u32 %v7350_v51, %v6832_v54  ;;  %v6782_v51 = vld [vmem:[#allocation2 + $0x110] sm:$0xf]  ;;  %v7339_v54 = vld [vmem:[#allocation2 + $0x114] sm:$0xf0] }
 0x2d8   :  { %2943 = vmatpush.bf16.msra.mxu0 %v8990_v61  ;;  %11657 = vst [vmem:[#allocation37_spill] sm:$0xff] %v9003_v44 }
 0x2d9   :  { %2935 = vmatpush.bf16.msrb.mxu3 %v8956_v41  ;;  %v7341_v41 = vld [vmem:[#allocation2 + $0x124] sm:$0xf0] }
 0x2da   :  { %2907 = vmatpush.bf16.msra.mxu2 %v8948_v30  ;;  %2962 = vmatpush.bf16.msra.mxu1 %v8992_v23  ;;  %v9007_v6 = vor.u32 %v7341_v41, %v6790_v10  ;;  %v6926_v41 = vld [vmem:[#allocation2 + $0x230] sm:$0xf]  ;;  %v9019_v10 = vor.u32 %v7339_v54, %v6782_v51  ;;  %v7337_v23 = vld [vmem:[#allocation2 + $0x104] sm:$0xf0]  ;;  %v6800_v30 = vld [vmem:[#allocation2 + $0x138] sm:$0xf0] }
 0x2db   :  { %v7373_v51 = vld [vmem:[#allocation2 + $0x224] sm:$0xf0] }
 0x2dc   :  { %v9031_v54 = vor.u32 %v7373_v51, %v6918_v12 }
 0x2dd   :  { %2990 = vmatpush.bf16.msra.mxu3 %v8963_v14  ;;  %v6966_v14 = vld [vmem:[#allocation2 + $0x280] sm:$0xf] }
 0x2de   :  { %2914 = vmatpush.bf16.msrb.mxu2 %v8950_v3  ;;  %v9001_v11 = vor.u32 %v7385_v63, %v6966_v14  ;;  %v7348_v14 = vld [vmem:[#allocation2 + $0x164] sm:$0xf]  ;;  %v6824_v63 = vld [vmem:[#allocation2 + $0x168] sm:$0xf0]  ;;  %11662 = vst [vmem:[#allocation42_spill] sm:$0xff] %v9031_v54 }
 0x2e0   :  { %11656 = vst [vmem:[#allocation36_spill] sm:$0xff] %v9001_v11  ;;  %2963 = vmatpush.bf16.msra.mxu1 %v9001_v11  ;;  %v7346_v11 = vld [vmem:[#allocation2 + $0x154] sm:$0xf] }
 0x2e1   :  { %2991 = vmatpush.bf16.msra.mxu3 %v8975_v40  ;;  %v7379_v40 = vld [vmem:[#allocation2 + $0x254] sm:$0xf0] }
 0x2e2   :  { %2915 = vmatpush.bf16.msrb.mxu2 %v8965_v16  ;;  %v8998_v37 = vor.u32 %v7379_v40, %v6942_v33  ;;  %v9009_v33 = vor.u32 %v7377_v39, %v6934_v8  ;;  %v9013_v40 = vor.u32 %v7348_v14, %v6824_v63  ;;  %v7375_v39 = vld [vmem:[#allocation2 + $0x234] sm:$0xf0]  ;;  %v6774_v63 = vld [vmem:[#allocation2 + $0x100] sm:$0xf] }
 0x2e3   :  { %v9022_v8 = vor.u32 %v7375_v39, %v6926_v41  ;;  %v9028_v58 = vor.u32 %v7337_v23, %v6774_v63  ;;  %v7344_v41 = vld [vmem:[#allocation2 + $0x144] sm:$0xf]  ;;  %v6808_v39 = vld [vmem:[#allocation2 + $0x148] sm:$0xf0]  ;;  %v6910_v23 = vld [vmem:[#allocation2 + $0x210] sm:$0xf] }
 0x2e4   :  { %11655 = vst [vmem:[#allocation35_spill] sm:$0xff] %v8998_v37  ;;  %2944 = vmatpush.bf16.msra.mxu0 %v8998_v37  ;;  %3026 = vmatpush.bf16.msrb.mxu1 %v9003_v44  ;;  %v6816_v44 = vld [vmem:[#allocation2 + $0x158] sm:$0xf0]  ;;  %v7371_v63 = vld [vmem:[#allocation2 + $0x214] sm:$0xf0] }
 0x2e5   :  { %11658 = vst [vmem:[#allocation38_spill] sm:$0xff] %v9009_v33  ;;  %v9024_v14 = vor.u32 %v7346_v11, %v6816_v44  ;;  %v9035_v44 = vor.u32 %v7344_v41, %v6808_v39  ;;  %v9045_v26 = vor.u32 %v7371_v63, %v6910_v23  ;;  %v6704_v39 = vld [vmem:[#allocation2 + $0x78] sm:$0xf0]  ;;  %v9059_v63 = vor.u32 %v7342_v13, %v6800_v30 }
 0x2e6   :  { %2916 = vmatpush.bf16.msrb.mxu2 %v8977_v17  ;;  %11659 = vst [vmem:[#allocation39_spill] sm:$0xff] %v9013_v40 }
 0x2e7   :  { %11660 = vst [vmem:[#allocation40_spill] sm:$0xff] %v9022_v8 }
 0x2e8   :  { %2945 = vmatpush.bf16.msra.mxu0 %v9009_v33  ;;  %3027 = vmatpush.bf16.msrb.mxu1 %v9013_v40  ;;  %11661 = vst [vmem:[#allocation41_spill] sm:$0xff] %v9024_v14 }
 0x2e9   :  { %11663 = vst [vmem:[#allocation43_spill] sm:$0xff] %v9035_v44 }
 0x2ea   :  { %2917 = vmatpush.bf16.msrb.mxu2 %v8987_v19  ;;  %11664 = vst [vmem:[#allocation44_spill] sm:$0xff] %v9045_v26 }
 0x2eb   :  { %11665 = vst [vmem:[#allocation45_spill] sm:$0xff] %v9059_v63 }
 0x2ec   :  { %2946 = vmatpush.bf16.msra.mxu0 %v9022_v8  ;;  %3028 = vmatpush.bf16.msrb.mxu1 %v9024_v14  ;;  %v7318_v14 = vld [vmem:[#allocation2 + $0x74] sm:$0xf] }
 0x2ed   :  { %v9063_v0 = vor.u32 %v7318_v14, %v6704_v39  ;;  %v7336_v39 = vld [vmem:[#allocation2 + $0x104] sm:$0xf] }
 0x2ee   :  { %2918 = vmatpush.bf16.msrb.mxu2 %v8996_v34 }
 0x2ef   :  { %11666 = vst [vmem:[#allocation46_spill] sm:$0xff] %v9063_v0 }
 0x2f0   :  { %v9015_v57 = vpop.permute.xlu2 %7500  ;;  %2947 = vmatpush.bf16.msra.mxu0 %v9031_v54  ;;  %3029 = vmatpush.bf16.msrb.mxu1 %v9035_v44  ;;  %v7316_v44 = vld [vmem:[#allocation2 + $0x64] sm:$0xf] }
 0x2f2   :  { %2919 = vmatpush.bf16.msrb.mxu2 %v9007_v6 }
 0x2f4   :  { %2948 = vmatpush.bf16.msra.mxu0 %v9045_v26  ;;  %3030 = vmatpush.bf16.msrb.mxu1 %v9059_v63  ;;  %v7415_v63 = vld [vmem:[#allocation2 + $0x374] sm:$0xf0] }
 0x2f6   :  { %2920 = vmatpush.bf16.msrb.mxu2 %v9019_v10 }
 0x2fa   :  { %2921 = vmatpush.bf16.msrb.mxu2 %v9028_v58 }
 0x311   :  { %v9033_v40 = vpop.permute.xlu2 %7515  ;;  %v9037_v11 = vpop.permute.xlu1 %7510 }
 0x312   :  { %v11454_v7 = vunpack.i.h.bf16 %v9033_v40  ;;  %v11455_v45 = vunpack.i.l.bf16 %v9033_v40  ;;  %v11461_v12 = vunpack.i.h.bf16 %v9037_v11  ;;  %v11462_v51 = vunpack.i.l.bf16 %v9037_v11 }
 0x314   :  { %v2258_v41 = vsel %vm805_vm5, %v11455_v45, %v11454_v7  ;;  %v2251_v28 = vsel %vm805_vm5, %v11462_v51, %v11461_v12  ;;  %v6902_v7 = vld [vmem:[#allocation2 + $0x200] sm:$0xf]  ;;  %v7369_v45 = vld [vmem:[#allocation2 + $0x204] sm:$0xf0]  ;;  %v7340_v12 = vld [vmem:[#allocation2 + $0x124] sm:$0xf] }
 0x315   :  { %v2289_v23 = vmax.f32 %v8838_v43, %v2258_v41  ;;  %v2281_v38 = vmax.f32 %v8804_v15, %v2251_v28  ;;  %v9065_v50 = vor.u32 %v7369_v45, %v6902_v7  ;;  %v6792_v43 = vld [vmem:[#allocation2 + $0x128] sm:$0xf0]  ;;  %v9075_v15 = vor.u32 %v7316_v44, %v6696_v1  ;;  %v7314_v28 = vld [vmem:[#allocation2 + $0x54] sm:$0xf]  ;;  %v6688_v7 = vld [vmem:[#allocation2 + $0x58] sm:$0xf0] }
 0x316   :  { %v9070_v13 = vor.u32 %v7340_v12, %v6792_v43  ;;  %v7338_v45 = vld [vmem:[#allocation2 + $0x114] sm:$0xf]  ;;  %v9081_v14 = vor.u32 %v7314_v28, %v6688_v7  ;;  %v7312_v12 = vld [vmem:[#allocation2 + $0x44] sm:$0xf]  ;;  %v6680_v41 = vld [vmem:[#allocation2 + $0x48] sm:$0xf0]  ;;  %v7502_v28 = vunpack.i.l.bf16 %v9015_v57 }
 0x317   :  { %11667 = vst [vmem:[#allocation47_spill] sm:$0xff] %v9065_v50  ;;  %v9067_v54 = vpack.c.bf16 %v2289_v23, %v2281_v38  ;;  %2949 = vmatpush.bf16.msra.mxu0 %v9065_v50  ;;  %v6784_v38 = vld [vmem:[#allocation2 + $0x118] sm:$0xf0]  ;;  %v6776_v23 = vld [vmem:[#allocation2 + $0x108] sm:$0xf0]  ;;  %v9087_v44 = vor.u32 %v7312_v12, %v6680_v41 }
 0x318   :  { %11668 = vst [vmem:[#allocation48_spill] sm:$0xff] %v9070_v13  ;;  %3031 = vmatpush.bf16.msrb.mxu1 %v9070_v13  ;;  %v9078_v30 = vor.u32 %v7338_v45, %v6784_v38  ;;  %v9084_v1 = vor.u32 %v7336_v39, %v6776_v23  ;;  %v7310_v43 = vld [vmem:[#allocation2 + $0x34] sm:$0xf]  ;;  %v6672_v51 = vld [vmem:[#allocation2 + $0x38] sm:$0xf0]  ;;  %v11472_v45 = vunpack.i.h.bf16 %v9015_v57 }
 0x319   :  { %2936 = vmatmul.bf16.vlgmr.msrb.gmra.mxu3 %v9067_v54  ;;  %11669 = vst [vmem:[#allocation49_spill] sm:$0xff] %v9075_v15  ;;  %v9093_v7 = vor.u32 %v7310_v43, %v6672_v51  ;;  %v7308_v38 = vld [vmem:[#allocation2 + $0x24] sm:$0xf]  ;;  %v7086_v13 = vld [vmem:[#allocation2 + $0x370] sm:$0xf] }
 0x31a   :  { %2998 = vmatpush.bf16.msrb.mxu3 %v9063_v0  ;;  %11670 = vst [vmem:[#allocation50_spill] sm:$0xff] %v9078_v30  ;;  %v2249_v12 = vsel %vm805_vm5, %v7502_v28, %v11472_v45  ;;  %v6656_v51 = vld [vmem:[#allocation2 + $0x18] sm:$0xf0]  ;;  %v9104_v0 = vor.u32 %v7415_v63, %v7086_v13  ;;  %v7304_v45 = vld [vmem:[#allocation2 + $0x4] sm:$0xf] }
 0x31b   :  { %11671 = vst [vmem:[#allocation51_spill] sm:$0xff] %v9081_v14  ;;  %v2279_v43 = vmax.f32 %v8795_v22, %v2249_v12 }
 0x31c   :  { %3032 = vmatpush.bf16.msrb.mxu1 %v9078_v30  ;;  %11672 = vst [vmem:[#allocation52_spill] sm:$0xff] %v9084_v1  ;;  %v6664_v30 = vld [vmem:[#allocation2 + $0x28] sm:$0xf0] }
 0x31d   :  { %11673 = vst [vmem:[#allocation53_spill] sm:$0xff] %v9087_v44 }
 0x31e   :  { %2999 = vmatpush.bf16.msrb.mxu3 %v9075_v15  ;;  %11674 = vst [vmem:[#allocation54_spill] sm:$0xff] %v9093_v7 }
 0x320   :  { %3033 = vmatpush.bf16.msrb.mxu1 %v9084_v1  ;;  %v9099_v1 = vor.u32 %v7308_v38, %v6664_v30  ;;  %v7078_v30 = vld [vmem:[#allocation2 + $0x360] sm:$0xf]  ;;  %v7413_v38 = vld [vmem:[#allocation2 + $0x364] sm:$0xf0] }
 0x321   :  { %v9117_v13 = vor.u32 %v7413_v38, %v7078_v30  ;;  %v7334_v30 = vld [vmem:[#allocation2 + $0xf4] sm:$0xf]  ;;  %v6768_v38 = vld [vmem:[#allocation2 + $0xf8] sm:$0xf0] }
 0x322   :  { %3000 = vmatpush.bf16.msrb.mxu3 %v9081_v14  ;;  %11675 = vst [vmem:[#allocation55_spill] sm:$0xff] %v9099_v1 }
 0x326   :  { %3001 = vmatpush.bf16.msrb.mxu3 %v9087_v44  ;;  %v7306_v44 = vld [vmem:[#allocation2 + $0x14] sm:$0xf] }
 0x329   :  { %v7506_v39 = vpop.permute.xlu0 %7505 }
 0x32a   :  { %v7508_v41 = vunpack.i.h.bf16 %v7506_v39  ;;  %v7507_v23 = vunpack.i.l.bf16 %v7506_v39  ;;  %3002 = vmatpush.bf16.msrb.mxu3 %v9093_v7  ;;  %v9109_v39 = vor.u32 %v7306_v44, %v6656_v51  ;;  %v6648_v7 = vld [vmem:[#allocation2 + $0x8] sm:$0xf0] }
 0x32b   :  { %v9120_v51 = vor.u32 %v7304_v45, %v6648_v7 }
 0x32c   :  { %v2256_v14 = vsel %vm805_vm5, %v7507_v23, %v7508_v41  ;;  %11676 = vst [vmem:[#allocation56_spill] sm:$0xff] %v9109_v39 }
 0x32d   :  { %v2287_v15 = vmax.f32 %v8826_v36, %v2256_v14  ;;  %v6960_v14 = vld [vmem:[#allocation2 + $0x278] sm:$0xf0]  ;;  %11677 = vst [vmem:[#allocation57_spill] sm:$0xff] %v9120_v51 }
 0x32e   :  { %3003 = vmatpush.bf16.msrb.mxu3 %v9099_v1  ;;  %v7411_v1 = vld [vmem:[#allocation2 + $0x354] sm:$0xf0] }
 0x32f   :  { %v9106_v50 = vpack.c.bf16 %v2287_v15, %v2279_v43  ;;  %v7382_v15 = vld [vmem:[#allocation2 + $0x274] sm:$0xf]  ;;  %v7070_v43 = vld [vmem:[#allocation2 + $0x350] sm:$0xf] }
 0x330   :  { %v9111_v26 = vpop.permute.xlu1 %7525 }
 0x331   :  { %2908 = vmatmul.bf16.vlgmr.msra.gmra.mxu2 %v9106_v50  ;;  %v11481_v22 = vunpack.i.h.bf16 %v9111_v26  ;;  %v11482_v36 = vunpack.i.l.bf16 %v9111_v26  ;;  %v7521_v63 = vpop.permute.xlu0 %7520 }
 0x332   :  { %2970 = vmatpush.bf16.msra.mxu2 %v9104_v0  ;;  %v7523_v44 = vunpack.i.h.bf16 %v7521_v63  ;;  %v7522_v12 = vunpack.i.l.bf16 %v7521_v63  ;;  %3004 = vmatpush.bf16.msrb.mxu3 %v9109_v39  ;;  %v9130_v39 = vor.u32 %v7382_v15, %v6960_v14  ;;  %v7409_v15 = vld [vmem:[#allocation2 + $0x344] sm:$0xf0]  ;;  %v11683_v14 = vunpack.i.l.bf16 %v9037_v11 }
 0x333   :  { %v2293_v55 = vmax.f32 %v8850_v18, %v11481_v22  ;;  %v2285_v8 = vmax.f32 %v8856_v25, %v11482_v36  ;;  %v9137_v18 = vor.u32 %v7411_v1, %v7070_v43  ;;  %v7380_v25 = vld [vmem:[#allocation2 + $0x264] sm:$0xf]  ;;  %v6952_v22 = vld [vmem:[#allocation2 + $0x268] sm:$0xf0]  ;;  %v9139_v36 = vpop.permute.xlu2 %7530  ;;  %v7414_v43 = vld [vmem:[#allocation2 + $0x374] sm:$0xf] }
 0x334   :  { %v2255_v46 = vsel %vm805_vm5, %v7523_v44, %v7507_v23  ;;  %v2248_v63 = vsel %vm805_vm5, %v7522_v12, %v7502_v28  ;;  %11678 = vst [vmem:[#allocation58_spill] sm:$0xff] %v9130_v39  ;;  %v9142_v28 = vor.u32 %v7334_v30, %v6768_v38  ;;  %v7062_v23 = vld [vmem:[#allocation2 + $0x340] sm:$0xf]  ;;  %v9152_v1 = vor.u32 %v7380_v25, %v6952_v22  ;;  %v7378_v38 = vld [vmem:[#allocation2 + $0x254] sm:$0xf] }
 0x335   :  { %v9132_v45 = vpack.c.bf16 %v2293_v55, %v2285_v8  ;;  %v2286_v7 = vmax.f32 %v8822_v4, %v2255_v46  ;;  %v2278_v33 = vmax.f32 %v8791_v60, %v2248_v63  ;;  %11679 = vst [vmem:[#allocation59_spill] sm:$0xff] %v9137_v18  ;;  %v11681_v55 = vunpack.i.l.bf16 %v9033_v40  ;;  %v7332_v60 = vld [vmem:[#allocation2 + $0xe4] sm:$0xf]  ;;  %v6760_v8 = vld [vmem:[#allocation2 + $0xe8] sm:$0xf0] }
 0x336   :  { %2971 = vmatpush.bf16.msra.mxu2 %v9117_v13  ;;  %3005 = vmatpush.bf16.msrb.mxu3 %v9120_v51  ;;  %11680 = vst [vmem:[#allocation60_spill] sm:$0xff] %v9142_v28  ;;  %v11684_v44 = vunpack.i.h.bf16 %v9015_v57  ;;  %v9163_v30 = vor.u32 %v7409_v15, %v7062_v23  ;;  %v6944_v22 = vld [vmem:[#allocation2 + $0x258] sm:$0xf0]  ;;  %v9167_v57 = vor.u32 %v7332_v60, %v6760_v8  ;;  %v11687_v23 = vunpack.i.h.bf16 %v9139_v36 }
 0x337   :  { %v2257_v4 = vsel %vm805_vm5, %v7508_v41, %v11681_v55  ;;  %v9147_v46 = vpack.c.bf16 %v2286_v7, %v2278_v33  ;;  %7108 = vmatmul.msk.bf16.vlgmr.msra.gmra.mxu3 %vm2882_vm11, %v9132_v45  ;;  %11682 = vst [vmem:[#allocation61_spill] sm:$0xff] %v9152_v1  ;;  %v7054_v55 = vld [vmem:[#allocation2 + $0x330] sm:$0xf]  ;;  %v6752_v33 = vld [vmem:[#allocation2 + $0xd8] sm:$0xf0]  ;;  %v9177_v60 = vor.u32 %v7378_v38, %v6944_v22 }
 0x338   :  { %v2250_v12 = vsel %vm805_vm5, %v11684_v44, %v11683_v14  ;;  %11685 = vst [vmem:[#allocation62_spill] sm:$0xff] %v9163_v30  ;;  %v2288_v63 = vmax.f32 %v8834_v5, %v2257_v4  ;;  %v7407_v14 = vld [vmem:[#allocation2 + $0x334] sm:$0xf0]  ;;  %v7330_v44 = vld [vmem:[#allocation2 + $0xd4] sm:$0xf]  ;;  %v11688_v5 = vunpack.i.l.bf16 %v9139_v36 }
 0x339   :  { %v7536_v41 = vpop.permute.xlu0 %7535  ;;  %2894 = vmatmul.bf16.vlgmr.msrb.gmra.mxu0 %v9147_v46  ;;  %11686 = vst [vmem:[#allocation63_spill] sm:$0xff] %v9167_v57  ;;  %v2280_v51 = vmax.f32 %v8800_v31, %v2250_v12  ;;  %v7376_v31 = vld [vmem:[#allocation2 + $0x244] sm:$0xf]  ;;  %v6936_v12 = vld [vmem:[#allocation2 + $0x248] sm:$0xf0] }
 0x33a   :  { %3054 = vmatpush.bf16.msra.mxu3 %v9130_v39  ;;  %2972 = vmatpush.bf16.msra.mxu2 %v9137_v18  ;;  %v7538_v7 = vunpack.i.h.bf16 %v7536_v41  ;;  %v7537_v25 = vunpack.i.l.bf16 %v7536_v41  ;;  %v7088_v39 = vld [vmem:[#allocation2 + $0x378] sm:$0xf0]  ;;  %11689 = vst [vmem:[#allocation64_spill] sm:$0xff] %v9177_v60  ;;  %v7046_v38 = vld [vmem:[#allocation2 + $0x320] sm:$0xf] }
 0x33b   :  { %3012 = vmatpush.bf16.msrb.mxu0 %v9142_v28  ;;  %v9182_v28 = vor.u32 %v7407_v14, %v7054_v55  ;;  %v9184_v53 = vpack.c.bf16 %v2288_v63, %v2280_v51  ;;  %v7405_v22 = vld [vmem:[#allocation2 + $0x324] sm:$0xf0]  ;;  %v11693_v55 = vunpack.i.h.bf16 %v9033_v40  ;;  %v11694_v51 = vunpack.i.h.bf16 %v9037_v11  ;;  %v6928_v40 = vld [vmem:[#allocation2 + $0x238] sm:$0xf0] }
 0x33c   :  { %v2260_v15 = vsel %vm805_vm5, %v7538_v7, %v11687_v23  ;;  %v2253_v4 = vsel %vm805_vm5, %v7537_v25, %v11688_v5  ;;  %v9187_v23 = vor.u32 %v7330_v44, %v6752_v33  ;;  %v9189_v5 = vor.u32 %v7414_v43, %v7088_v39  ;;  %v7374_v33 = vld [vmem:[#allocation2 + $0x234] sm:$0xf]  ;;  %v7403_v44 = vld [vmem:[#allocation2 + $0x314] sm:$0xf0] }
 0x33d   :  { %v2291_v8 = vmax.f32 %v8842_v9, %v2260_v15  ;;  %v2283_v41 = vmax.f32 %v8813_v24, %v2253_v4  ;;  %11690 = vst [vmem:[#allocation65_spill] sm:$0xff] %v9182_v28  ;;  %v6744_v24 = vld [vmem:[#allocation2 + $0xc8] sm:$0xf0]  ;;  %v7412_v15 = vld [vmem:[#allocation2 + $0x364] sm:$0xf]  ;;  %v2259_v14 = vsel %vm805_vm5, %v11693_v55, %v7538_v7  ;;  %v2252_v63 = vsel %vm805_vm5, %v11694_v51, %v7537_v25 }
 0x33e   :  { %3055 = vmatpush.bf16.msra.mxu3 %v9152_v1  ;;  %2973 = vmatpush.bf16.msra.mxu2 %v9163_v30  ;;  %11691 = vst [vmem:[#allocation66_spill] sm:$0xff] %v9187_v23  ;;  %v7328_v1 = vld [vmem:[#allocation2 + $0xc4] sm:$0xf]  ;;  %v7080_v4 = vld [vmem:[#allocation2 + $0x368] sm:$0xf0]  ;;  %v9201_v39 = vor.u32 %v7376_v31, %v6936_v12  ;;  %v9205_v43 = vor.u32 %v7405_v22, %v7046_v38 }
 0x33f   :  { %3013 = vmatpush.bf16.msrb.mxu0 %v9167_v57  ;;  %11692 = vst [vmem:[#allocation67_spill] sm:$0xff] %v9189_v5  ;;  %v9191_v9 = vpack.c.bf16 %v2291_v8, %v2283_v41  ;;  %v9209_v11 = vor.u32 %v7328_v1, %v6744_v24  ;;  %v9211_v7 = vor.u32 %v7412_v15, %v7080_v4  ;;  %v7038_v25 = vld [vmem:[#allocation2 + $0x310] sm:$0xf]  ;;  %v7326_v8 = vld [vmem:[#allocation2 + $0xb4] sm:$0xf] }
 0x340   :  { %11695 = vst [vmem:[#allocation68_spill] sm:$0xff] %v9201_v39  ;;  %v2290_v41 = vmax.f32 %v8840_v21, %v2259_v14  ;;  %v2282_v31 = vmax.f32 %v8811_v27, %v2252_v63  ;;  %v6736_v12 = vld [vmem:[#allocation2 + $0xb8] sm:$0xf0]  ;;  %v7410_v38 = vld [vmem:[#allocation2 + $0x354] sm:$0xf]  ;;  %v9216_v55 = vor.u32 %v7374_v33, %v6928_v40  ;;  %v9219_v1 = vor.u32 %v7403_v44, %v7038_v25 }
 0x341   :  { %2922 = vmatmul.bf16.vlgmr.msrb.gmra.mxu2 %v9184_v53  ;;  %2964 = vmatmul.bf16.vlgmr.msra.gmra.mxu1 %v9191_v9  ;;  %11696 = vst [vmem:[#allocation69_spill] sm:$0xff] %v9205_v43  ;;  %v7072_v22 = vld [vmem:[#allocation2 + $0x358] sm:$0xf0]  ;;  %v7030_v24 = vld [vmem:[#allocation2 + $0x300] sm:$0xf]  ;;  %v9223_v21 = vor.u32 %v7326_v8, %v6736_v12  ;;  %v11703_v33 = vunpack.i.l.bf16 %v9111_v26  ;;  %v11704_v40 = vunpack.i.l.bf16 %v9139_v36  ;;  %v11705_v44 = vunpack.i.h.bf16 %v9111_v26 }
 0x342   :  { %3056 = vmatpush.bf16.msra.mxu3 %v9177_v60  ;;  %2974 = vmatpush.bf16.msra.mxu2 %v9182_v28  ;;  %11697 = vst [vmem:[#allocation70_spill] sm:$0xff] %v9209_v11  ;;  %v7372_v15 = vld [vmem:[#allocation2 + $0x224] sm:$0xf]  ;;  %v6920_v4 = vld [vmem:[#allocation2 + $0x228] sm:$0xf0]  ;;  %v9225_v27 = vor.u32 %v7410_v38, %v7072_v22 }
 0x343   :  { %3014 = vmatpush.bf16.msrb.mxu0 %v9187_v23  ;;  %3082 = vmatpush.bf16.msra.mxu1 %v9189_v5  ;;  %11698 = vst [vmem:[#allocation71_spill] sm:$0xff] %v9211_v7  ;;  %v7401_v14 = vld [vmem:[#allocation2 + $0x304] sm:$0xf0]  ;;  %v7324_v51 = vld [vmem:[#allocation2 + $0xa4] sm:$0xf]  ;;  %v2254_v25 = vsel %vm805_vm5, %v11704_v40, %v11703_v33  ;;  %v9241_v38 = vor.u32 %v7372_v15, %v6920_v4 }
 0x344   :  { %11699 = vst [vmem:[#allocation72_spill] sm:$0xff] %v9216_v55  ;;  %v6728_v63 = vld [vmem:[#allocation2 + $0xa8] sm:$0xf0]  ;;  %v7366_v8 = vld [vmem:[#allocation2 + $0x1f4] sm:$0xf]  ;;  %v9245_v26 = vor.u32 %v7401_v14, %v7030_v24 }
 0x345   :  { %11700 = vst [vmem:[#allocation73_spill] sm:$0xff] %v9219_v1  ;;  %v6896_v12 = vld [vmem:[#allocation2 + $0x1f8] sm:$0xf0]  ;;  %v7408_v22 = vld [vmem:[#allocation2 + $0x344] sm:$0xf] }
 0x346   :  { %3057 = vmatpush.bf16.msra.mxu3 %v9201_v39  ;;  %2975 = vmatpush.bf16.msra.mxu2 %v9205_v43  ;;  %11701 = vst [vmem:[#allocation74_spill] sm:$0xff] %v9223_v21  ;;  %v11706_v39 = vunpack.i.h.bf16 %v9139_v36  ;;  %v7064_v60 = vld [vmem:[#allocation2 + $0x348] sm:$0xf0]  ;;  %v9247_v36 = vor.u32 %v7324_v51, %v6728_v63  ;;  %v9253_v15 = vor.u32 %v7366_v8, %v6896_v12  ;;  %v7322_v4 = vld [vmem:[#allocation2 + $0x94] sm:$0xf] }
 0x347   :  { %3015 = vmatpush.bf16.msrb.mxu0 %v9209_v11  ;;  %3083 = vmatpush.bf16.msra.mxu1 %v9211_v7  ;;  %11702 = vst [vmem:[#allocation75_spill] sm:$0xff] %v9225_v27  ;;  %v9237_v7 = vpack.c.bf16 %v2290_v41, %v2282_v31  ;;  %v6912_v41 = vld [vmem:[#allocation2 + $0x218] sm:$0xf0]  ;;  %v9255_v33 = vor.u32 %v7408_v22, %v7064_v60  ;;  %v7364_v24 = vld [vmem:[#allocation2 + $0x1e4] sm:$0xf] }
 0x348   :  { %v2261_v5 = vsel %vm805_vm5, %v11706_v39, %v11705_v44  ;;  %3006 = vmatmul.bf16.vlgmr.msrb.gmra.mxu3 %v9147_v46  ;;  %11707 = vst [vmem:[#allocation76_spill] sm:$0xff] %v9241_v38  ;;  %v7370_v39 = vld [vmem:[#allocation2 + $0x214] sm:$0xf]  ;;  %v2284_v46 = vmax.f32 %v8860_v52, %v2254_v25  ;;  %v6720_v40 = vld [vmem:[#allocation2 + $0x98] sm:$0xf0] }
 0x349   :  { %2950 = vmatmul.bf16.vlgmr.msra.gmra.mxu0 %v9237_v7  ;;  %11708 = vst [vmem:[#allocation77_spill] sm:$0xff] %v9245_v26  ;;  %v2292_v31 = vmax.f32 %v8864_v35, %v2261_v5  ;;  %v6888_v14 = vld [vmem:[#allocation2 + $0x1e8] sm:$0xf0]  ;;  %v9258_v51 = vor.u32 %v7370_v39, %v6912_v41  ;;  %v7406_v63 = vld [vmem:[#allocation2 + $0x334] sm:$0xf]  ;;  %v9265_v60 = vor.u32 %v7322_v4, %v6720_v40 }
 0x34a   :  { %3058 = vmatpush.bf16.msra.mxu3 %v9216_v55  ;;  %2976 = vmatpush.bf16.msra.mxu2 %v9219_v1  ;;  %11709 = vst [vmem:[#allocation78_spill] sm:$0xff] %v9247_v36  ;;  %v7056_v52 = vld [vmem:[#allocation2 + $0x338] sm:$0xf0]  ;;  %v7368_v35 = vld [vmem:[#allocation2 + $0x204] sm:$0xf]  ;;  %v9267_v44 = vor.u32 %v7364_v24, %v6888_v14 }
 0x34b   :  { %3016 = vmatpush.bf16.msrb.mxu0 %v9223_v21  ;;  %3084 = vmatpush.bf16.msra.mxu1 %v9225_v27  ;;  %11710 = vst [vmem:[#allocation79_spill] sm:$0xff] %v9253_v15  ;;  %v6904_v5 = vld [vmem:[#allocation2 + $0x208] sm:$0xf0]  ;;  %v9261_v25 = vpack.c.bf16 %v2292_v31, %v2284_v46  ;;  %v7320_v8 = vld [vmem:[#allocation2 + $0x84] sm:$0xf]  ;;  %v9270_v22 = vor.u32 %v7406_v63, %v7056_v52 }
 0x34c   :  { %11711 = vst [vmem:[#allocation80_spill] sm:$0xff] %v9255_v33  ;;  %v6712_v12 = vld [vmem:[#allocation2 + $0x88] sm:$0xf0]  ;;  %v7362_v39 = vld [vmem:[#allocation2 + $0x1d4] sm:$0xf]  ;;  %v9274_v46 = vor.u32 %v7368_v35, %v6904_v5 }
 0x34d   :  { %11712 = vst [vmem:[#allocation81_spill] sm:$0xff] %v9258_v51  ;;  %v6880_v41 = vld [vmem:[#allocation2 + $0x1d8] sm:$0xf0]  ;;  %v7404_v4 = vld [vmem:[#allocation2 + $0x324] sm:$0xf]  ;;  %v9279_v24 = vor.u32 %v7320_v8, %v6712_v12 }
 0x34e   :  { %3059 = vmatpush.bf16.msra.mxu3 %v9241_v38  ;;  %2977 = vmatpush.bf16.msra.mxu2 %v9245_v26  ;;  %11713 = vst [vmem:[#allocation82_spill] sm:$0xff] %v9265_v60  ;;  %v7398_v38 = vld [vmem:[#allocation2 + $0x2f4] sm:$0xf]  ;;  %v7024_v31 = vld [vmem:[#allocation2 + $0x2f8] sm:$0xf0]  ;;  %v9281_v14 = vor.u32 %v7362_v39, %v6880_v41 }
 0x34f   :  { %3017 = vmatpush.bf16.msrb.mxu0 %v9247_v36  ;;  %11714 = vst [vmem:[#allocation83_spill] sm:$0xff] %v9267_v44  ;;  %3085 = vmatpush.bf16.msra.mxu1 %v9255_v33  ;;  %v7048_v40 = vld [vmem:[#allocation2 + $0x328] sm:$0xf0]  ;;  %v9284_v63 = vor.u32 %v7398_v38, %v7024_v31  ;;  %v7360_v35 = vld [vmem:[#allocation2 + $0x1c4] sm:$0xf] }
 0x350   :  { %11715 = vst [vmem:[#allocation84_spill] sm:$0xff] %v9270_v22  ;;  %v9286_v52 = vor.u32 %v7404_v4, %v7048_v40  ;;  %v6872_v5 = vld [vmem:[#allocation2 + $0x1c8] sm:$0xf0]  ;;  %v7402_v33 = vld [vmem:[#allocation2 + $0x314] sm:$0xf] }
 0x351   :  { %2978 = vmatmul.bf16.vlgmr.msra.gmra.mxu2 %v9261_v25  ;;  %11716 = vst [vmem:[#allocation85_spill] sm:$0xff] %v9274_v46  ;;  %3034 = vmatmul.bf16.vlgmr.msrb.gmra.mxu1 %v9184_v53  ;;  %v7016_v53 = vld [vmem:[#allocation2 + $0x2e8] sm:$0xf0]  ;;  %v7040_v27 = vld [vmem:[#allocation2 + $0x318] sm:$0xf0]  ;;  %v9291_v8 = vor.u32 %v7360_v35, %v6872_v5 }
 0x352   :  { %3040 = vmatpush.bf16.msrb.mxu2 %v9253_v15  ;;  %3060 = vmatpush.bf16.msra.mxu3 %v9258_v51  ;;  %11717 = vst [vmem:[#allocation86_spill] sm:$0xff] %v9279_v24  ;;  %v7396_v51 = vld [vmem:[#allocation2 + $0x2e4] sm:$0xf]  ;;  %v9297_v12 = vor.u32 %v7402_v33, %v7040_v27  ;;  %v7358_v39 = vld [vmem:[#allocation2 + $0x1b4] sm:$0xf] }
 0x353   :  { %3018 = vmatpush.bf16.msrb.mxu0 %v9265_v60  ;;  %11718 = vst [vmem:[#allocation87_spill] sm:$0xff] %v9281_v14  ;;  %3086 = vmatpush.bf16.msra.mxu1 %v9270_v22  ;;  %v9295_v38 = vor.u32 %v7396_v51, %v7016_v53  ;;  %v6864_v41 = vld [vmem:[#allocation2 + $0x1b8] sm:$0xf0]  ;;  %v7394_v31 = vld [vmem:[#allocation2 + $0x2d4] sm:$0xf] }
 0x354   :  { %11719 = vst [vmem:[#allocation88_spill] sm:$0xff] %v9284_v63  ;;  %v7008_v4 = vld [vmem:[#allocation2 + $0x2d8] sm:$0xf0]  ;;  %v7400_v40 = vld [vmem:[#allocation2 + $0x304] sm:$0xf]  ;;  %v9302_v35 = vor.u32 %v7358_v39, %v6864_v41 }
 0x355   :  { %11720 = vst [vmem:[#allocation89_spill] sm:$0xff] %v9286_v52  ;;  %v9306_v27 = vor.u32 %v7394_v31, %v7008_v4  ;;  %v7356_v51 = vld [vmem:[#allocation2 + $0x1a4] sm:$0xf]  ;;  %v6856_v5 = vld [vmem:[#allocation2 + $0x1a8] sm:$0xf0] }
 0x356   :  { %3041 = vmatpush.bf16.msrb.mxu2 %v9267_v44  ;;  %3061 = vmatpush.bf16.msra.mxu3 %v9274_v46  ;;  %11721 = vst [vmem:[#allocation90_spill] sm:$0xff] %v9291_v8  ;;  %v7032_v46 = vld [vmem:[#allocation2 + $0x308] sm:$0xf0]  ;;  %v7354_v39 = vld [vmem:[#allocation2 + $0x194] sm:$0xf] }
 0x357   :  { %3019 = vmatpush.bf16.msrb.mxu0 %v9279_v24  ;;  %3087 = vmatpush.bf16.msra.mxu1 %v9286_v52  ;;  %11722 = vst [vmem:[#allocation91_spill] sm:$0xff] %v9295_v38  ;;  %v9308_v33 = vor.u32 %v7400_v40, %v7032_v46  ;;  %v7000_v53 = vld [vmem:[#allocation2 + $0x2c8] sm:$0xf0]  ;;  %v9311_v52 = vor.u32 %v7356_v51, %v6856_v5  ;;  %v6848_v41 = vld [vmem:[#allocation2 + $0x198] sm:$0xf0] }
 0x358   :  { %11723 = vst [vmem:[#allocation92_spill] sm:$0xff] %v9297_v12  ;;  %v7390_v31 = vld [vmem:[#allocation2 + $0x2b4] sm:$0xf]  ;;  %v6992_v4 = vld [vmem:[#allocation2 + $0x2b8] sm:$0xf0]  ;;  %v9319_v46 = vor.u32 %v7354_v39, %v6848_v41 }
 0x359   :  { %3062 = vmatmul.bf16.vlgmr.msra.gmra.mxu3 %v9237_v7  ;;  %11724 = vst [vmem:[#allocation93_spill] sm:$0xff] %v9302_v35  ;;  %v7392_v7 = vld [vmem:[#allocation2 + $0x2c4] sm:$0xf]  ;;  %v9322_v40 = vor.u32 %v7390_v31, %v6992_v4  ;;  %v6840_v5 = vld [vmem:[#allocation2 + $0x188] sm:$0xf0] }
 0x35a   :  { %3042 = vmatpush.bf16.msrb.mxu2 %v9281_v14  ;;  %3020 = vmatmul.bf16.vlgmr.msrb.gmra.mxu0 %v9106_v50  ;;  %11725 = vst [vmem:[#allocation94_spill] sm:$0xff] %v9306_v27  ;;  %v9315_v50 = vor.u32 %v7392_v7, %v7000_v53  ;;  %v7352_v51 = vld [vmem:[#allocation2 + $0x184] sm:$0xf]  ;;  %v7418_v7 = vld [vmem:[#allocation2 + $0x394] sm:$0xf] }
 0x35b   :  { %3068 = vmatpush.bf16.msra.mxu0 %v9284_v63  ;;  %3088 = vmatpush.bf16.msra.mxu1 %v9297_v12  ;;  %11726 = vst [vmem:[#allocation95_spill] sm:$0xff] %v9308_v33  ;;  %v7388_v12 = vld [vmem:[#allocation2 + $0x2a4] sm:$0xf]  ;;  %v7104_v53 = vld [vmem:[#allocation2 + $0x398] sm:$0xf0]  ;;  %v9325_v22 = vor.u32 %v7352_v51, %v6840_v5 }
 0x35c   :  { %11727 = vst [vmem:[#allocation96_spill] sm:$0xff] %v9311_v52  ;;  %v7386_v39 = vld [vmem:[#allocation2 + $0x294] sm:$0xf]  ;;  %v9330_v41 = vor.u32 %v7418_v7, %v7104_v53  ;;  %v7416_v31 = vld [vmem:[#allocation2 + $0x384] sm:$0xf] }
 0x35d   :  { %11728 = vst [vmem:[#allocation97_spill] sm:$0xff] %v9315_v50  ;;  %v7096_v4 = vld [vmem:[#allocation2 + $0x388] sm:$0xf0]  ;;  %v7384_v5 = vld [vmem:[#allocation2 + $0x284] sm:$0xf] }
 0x35e   :  { %3043 = vmatpush.bf16.msrb.mxu2 %v9291_v8  ;;  %11729 = vst [vmem:[#allocation98_spill] sm:$0xff] %v9319_v46  ;;  %v9337_v51 = vor.u32 %v7416_v31, %v7096_v4 }
 0x35f   :  { %3069 = vmatpush.bf16.msra.mxu0 %v9295_v38  ;;  %3089 = vmatpush.bf16.msra.mxu1 %v9308_v33  ;;  %11730 = vst [vmem:[#allocation99_spill] sm:$0xff] %v9322_v40  ;;  %v6984_v33 = vld [vmem:[#allocation2 + $0x2a8] sm:$0xf0] }
 0x360   :  { %11731 = vst [vmem:[#allocation100_spill] sm:$0xff] %v9325_v22 }
 0x361   :  { %11733 = vst [vmem:[#allocation102_spill] sm:$0xff] %v9330_v41 }
 0x362   :  { %3044 = vmatpush.bf16.msrb.mxu2 %v9302_v35  ;;  %3090 = vmatmul.bf16.vlgmr.msra.gmra.mxu1 %v9261_v25  ;;  %v9328_v25 = vor.u32 %v7388_v12, %v6984_v33  ;;  %11735 = vst [vmem:[#allocation104_spill] sm:$0xff] %v9337_v51 }
 0x363   :  { %3070 = vmatpush.bf16.msra.mxu0 %v9306_v27 }
 0x364   :  { %11732 = vst [vmem:[#allocation101_spill] sm:$0xff] %v9328_v25 }
 0x366   :  { %3045 = vmatpush.bf16.msrb.mxu2 %v9311_v52 }
 0x367   :  { %3071 = vmatpush.bf16.msra.mxu0 %v9315_v50  ;;  %v6976_v50 = vld [vmem:[#allocation2 + $0x298] sm:$0xf0] }
 0x368   :  { %v9334_v27 = vor.u32 %v7386_v39, %v6976_v50 }
 0x36a   :  { %3046 = vmatpush.bf16.msrb.mxu2 %v9319_v46  ;;  %11734 = vst [vmem:[#allocation103_spill] sm:$0xff] %v9334_v27 }
 0x36b   :  { %3072 = vmatpush.bf16.msra.mxu0 %v9322_v40  ;;  %v6968_v40 = vld [vmem:[#allocation2 + $0x288] sm:$0xf0] }
 0x36c   :  { %v9341_v12 = vor.u32 %v7384_v5, %v6968_v40 }
 0x36e   :  { %3047 = vmatpush.bf16.msrb.mxu2 %v9325_v22  ;;  %11736 = vst [vmem:[#allocation105_spill] sm:$0xff] %v9341_v12 }
 0x36f   :  { %3073 = vmatpush.bf16.msra.mxu0 %v9328_v25 }
 0x371   :  { %3048 = vmatmul.bf16.vlgmr.msrb.gmra.mxu2 %v9067_v54 }
 0x372   :  { %3102 = vmatpush.bf16.msra.mxu2 %v9330_v41 }
 0x373   :  { %3074 = vmatpush.bf16.msra.mxu0 %v9334_v27 }
 0x376   :  { %3103 = vmatpush.bf16.msra.mxu2 %v9337_v51 }
 0x377   :  { %3075 = vmatpush.bf16.msra.mxu0 %v9341_v12 }
 0x37a   :  { %3076 = vmatmul.bf16.vlgmr.msra.gmra.mxu0 %v9191_v9 }
 0x381   :  { %7109 = vmatmul.msk.bf16.vlgmr.msra.gmra.mxu2 %vm2882_vm11, %v9132_v45 }
 0x39c   :  { %v2937_v50 = vpop.f32.mrf.mxu3 }
 0x3a4   :  { %v2939_v39 = vpop.f32.mrf.mxu3 }
 0x3b4   :  { %v2909_v33 = vpop.f32.mrf.mxu2 }
 0x3b6   :  { %v2895_v7 = vpop.f32.mrf.mxu0 }
 0x3b7   :  { %v2910_v46 = vadd.f32 %v2909_v33, %v2895_v7 }
 0x3ba   :  { %v2993_v4 = vpop.f32.mrf.mxu3 }
 0x3bc   :  { %v2911_v53 = vpop.f32.mrf.mxu2 }
 0x3be   :  { %v2897_v31 = vpop.f32.mrf.mxu0  ;;  %v2965_v40 = vpop.f32.mrf.mxu1 }
 0x3bf   :  { %v2912_v52 = vadd.f32 %v2911_v53, %v2897_v31 }
 0x3c2   :  { %v2995_v25 = vpop.f32.mrf.mxu3 }
 0x3c4   :  { %v2923_v54 = vpop.f32.mrf.mxu2 }
 0x3c5   :  { %v2924_v11 = vadd.f32 %v2923_v54, %v2910_v46 }
 0x3c6   :  { %v2951_v27 = vpop.f32.mrf.mxu0  ;;  %v2967_v38 = vpop.f32.mrf.mxu1 }
 0x3c7   :  { %v2938_v15 = vadd.f32 %v2937_v50, %v2924_v11 }
 0x3c9   :  { %v2952_v62 = vadd.f32 %v2951_v27, %v2938_v15  ;;  %v192_v27 = vld [vmem:[%s11424_s5 + $0x28] sm:$0xff] }
 0x3cb   :  { %v3007_v63 = vpop.f32.mrf.mxu3  ;;  %v2966_v53 = vadd.f32 %v2965_v40, %v2952_v62 }
 0x3cc   :  { %v2925_v5 = vpop.f32.mrf.mxu2 }
 0x3cd   :  { %v2926_v8 = vadd.f32 %v2925_v5, %v2912_v52 }
 0x3ce   :  { %v2953_v55 = vpop.f32.mrf.mxu0  ;;  %v3035_v24 = vpop.f32.mrf.mxu1 }
 0x3cf   :  { %v2940_v1 = vadd.f32 %v2939_v39, %v2926_v8 }
 0x3d3   :  { %v3009_v45 = vpop.f32.mrf.mxu3 }
 0x3d4   :  { %v2979_v12 = vpop.f32.mrf.mxu2 }
 0x3d6   :  { %v3037_v36 = vpop.f32.mrf.mxu1 }
 0x3d7   :  { %v3021_v9 = vpop.f32.mrf.mxu0 }
 0x3d8   :  { %v3022_v22 = vadd.f32 %v3021_v9, %v3007_v63  ;;  %v2954_v63 = vadd.f32 %v2953_v55, %v2940_v1 }
 0x3da   :  { %v3036_v23 = vadd.f32 %v3035_v24, %v3022_v22  ;;  %v2968_v22 = vadd.f32 %v2967_v38, %v2954_v63  ;;  %v189_v38 = vld [vmem:[%s11424_s5 + $0x10] sm:$0xff] }
 0x3dc   :  { %v2981_v51 = vpop.f32.mrf.mxu2  ;;  %v3063_v21 = vpop.f32.mrf.mxu3 }
 0x3dd   :  { %v2982_v52 = vadd.f32 %v2981_v51, %v2968_v22  ;;  %v187_v22 = vld [vmem:[%s11424_s5] sm:$0xff] }
 0x3df   :  { %v3023_v60 = vpop.f32.mrf.mxu0  ;;  %v3091_v37 = vpop.f32.mrf.mxu1 }
 0x3e0   :  { %v3024_v35 = vadd.f32 %v3023_v60, %v3009_v45  ;;  %v2980_v60 = vadd.f32 %v2979_v12, %v2966_v53 }
 0x3e2   :  { %v3038_v26 = vadd.f32 %v3037_v36, %v3024_v35  ;;  %v2994_v36 = vadd.f32 %v2993_v4, %v2980_v60  ;;  %v194_v35 = vld [vmem:[%s11424_s5 + $0x38] sm:$0xff] }
 0x3e4   :  { %v3065_v30 = vpop.f32.mrf.mxu3 }
 0x3e7   :  { %v3093_v11 = vpop.f32.mrf.mxu1 }
 0x3f4   :  { %v3049_v41 = vpop.f32.mrf.mxu2 }
 0x3f5   :  { %v3050_v57 = vadd.f32 %v3049_v41, %v3036_v23 }
 0x3f7   :  { %v3077_v14 = vpop.f32.mrf.mxu0  ;;  %v3064_v43 = vadd.f32 %v3063_v21, %v3050_v57  ;;  %v2996_v21 = vadd.f32 %v2995_v25, %v2982_v52 }
 0x3f9   :  { %v3078_v9 = vadd.f32 %v3077_v14, %v3064_v43  ;;  %v191_v14 = vld [vmem:[%s11424_s5 + $0x20] sm:$0xff] }
 0x3fb   :  { %v3092_v23 = vadd.f32 %v3091_v37, %v3078_v9  ;;  %v188_v37 = vld [vmem:[%s11424_s5 + $0x8] sm:$0xff] }
 0x3fc   :  { %v3051_v44 = vpop.f32.mrf.mxu2 }
 0x3fd   :  { %v3052_v28 = vadd.f32 %v3051_v44, %v3038_v26 }
 0x3ff   :  { %v3066_v33 = vadd.f32 %v3065_v30, %v3052_v28  ;;  %v3079_v46 = vpop.f32.mrf.mxu0 }
 0x401   :  { %v3080_v24 = vadd.f32 %v3079_v46, %v3066_v33 }
 0x403   :  { %v3094_v8 = vadd.f32 %v3093_v11, %v3080_v24  ;;  %v7421_v11 = vld [vmem:[%s11423_s4 + $0x4] sm:$0xf0] }
 0x404   :  { %v3105_v7 = vpop.f32.mrf.mxu2 }
 0x405   :  { %v3106_v41 = vadd.f32 %v3105_v7, %v3092_v23 }
 0x407   :  { %v3110_v26 = vpack.c.bf16 %v3106_v41, %v2994_v36  ;;  %v7112_v41 = vld [vmem:[%s11423_s4] sm:$0xf] }
 0x408   :  { %v9415_v36 = vor.u32 %v7421_v11, %v7112_v41 }
 0x409   :  { %v3114_v55 = vunpack.c.l.b16 %v3110_v26  ;;  %v3115_v43 = vunpack.c.h.b16 %v3110_v26 }
 0x40a   :  { %11737 = vst [vmem:[#allocation106_spill] sm:$0xff] %v9415_v36 }
 0x40c   :  { %v3107_v57 = vpop.f32.mrf.mxu2 }
 0x40d   :  { %v3108_v15 = vadd.f32 %v3107_v57, %v3094_v8  ;;  %v7420_v8 = vld [vmem:[%s11423_s4 + $0x4] sm:$0xf]  ;;  %v7114_v57 = vld [vmem:[%s11423_s4 + $0x8] sm:$0xf0] }
 0x40f   :  { %v3111_v44 = vpack.c.bf16 %v3108_v15, %v2996_v21  ;;  %v9426_v15 = vor.u32 %v7420_v8, %v7114_v57 }
 0x411   :  { %v3116_v28 = vunpack.c.l.b16 %v3111_v44  ;;  %v3117_v30 = vunpack.c.h.b16 %v3111_v44  ;;  %11738 = vst [vmem:[#allocation107_spill] sm:$0xff] %v9426_v15 }
 0x413   :  { %v9348_v62 = vpack.c.b16 %v3116_v28, %v3114_v55  ;;  %v9350_v1 = vpack.c.b16 %v3117_v30, %v3115_v43  ;;  %v190_v55 = vld [vmem:[%s11424_s5 + $0x18] sm:$0xff]  ;;  %v193_v43 = vld [vmem:[%s11424_s5 + $0x30] sm:$0xff] }
 0x414   :  { %v7120_v28 = vld [vmem:[%s11423_s4 + $0x10] sm:$0xf]  ;;  %v7423_v30 = vld [vmem:[%s11423_s4 + $0x14] sm:$0xf0] }
 0x415   :  { %3170 = vrot.lane.b32.xlu2 %v9350_v1, %s7839_s2  ;;  %3160 = vrot.lane.b32.xlu0 %v9348_v62, %s7840_s26 }
 0x416   :  { %3168 = vrot.lane.b32.xlu1 %v9348_v62, %s7839_s2 }
 0x41d   :  { %3152 = vrot.lane.b32.xlu2 %v9348_v62, %s7841_s27  ;;  %3154 = vrot.lane.b32.xlu0 %v9350_v1, %s7841_s27 }
 0x41e   :  { %3162 = vrot.lane.b32.xlu1 %v9350_v1, %s7840_s26 }
 0x425   :  { %3146 = vrot.lane.b32.xlu2 %v9350_v1, %s7842_s29  ;;  %3136 = vrot.lane.b32.xlu0 %v9348_v62, %s7843_s30 }
 0x426   :  { %3144 = vrot.lane.b32.xlu1 %v9348_v62, %s7842_s29 }
 0x42d   :  { %3129 = vrot.lane.b32.xlu2 %v9348_v62, %s7830_s12  ;;  %3131 = vrot.lane.b32.xlu0 %v9350_v1, %s7830_s12 }
 0x42e   :  { %3138 = vrot.lane.b32.xlu1 %v9350_v1, %s7843_s30 }
 0x435   :  { %3124 = vrot.lane.b32.xlu2 %v9350_v1, %s7829_s3  ;;  %3176 = vrot.lane.b32.xlu0 %v9348_v62, %s7831_s13 }
 0x436   :  { %3122 = vrot.lane.b32.xlu1 %v9348_v62, %s7829_s3 }
 0x43d   :  { %3190 = vperm.xlu0 %7457, %v188_v37   ;;  %3185 = vperm.xlu2 %7539, %v187_v22   ;;  %v7122_v37 = vld [vmem:[%s11423_s4 + $0x18] sm:$0xf0] }
 0x43e   :  { %3178 = vrot.lane.b32.xlu1 %v9350_v1, %s7831_s13 }
 0x445   :  { %3205 = vperm.xlu0 %7457, %v191_v14   ;;  %3200 = vperm.xlu2 %7539, %v190_v55  }
 0x446   :  { %3195 = vperm.xlu1 %7458, %v189_v38   ;;  %v7128_v38 = vld [vmem:[%s11423_s4 + $0x20] sm:$0xf] }
 0x44d   :  { %3220 = vperm.xlu0 %7457, %v194_v35   ;;  %3215 = vperm.xlu2 %7539, %v193_v43   ;;  %v7425_v35 = vld [vmem:[%s11423_s4 + $0x24] sm:$0xf0] }
 0x44e   :  { %3210 = vperm.xlu1 %7458, %v192_v27   ;;  %v9468_v27 = vor.u32 %v7425_v35, %v7128_v38 }
 0x450   :  { %11741 = vst [vmem:[#allocation110_spill] sm:$0xff] %v9468_v27 }
 0x46f   :  { %v3171_v25 = vpop.permute.xlu2 %3170 }
 0x470   :  { %3330 = vmatpush.bf16.msrb.mxu0 %v3171_v25 }
 0x477   :  { %v3153_v39 = vpop.permute.xlu2 %3152 }
 0x47f   :  { %v3147_v40 = vpop.permute.xlu2 %3146 }
 0x487   :  { %v3161_v51 = vpop.permute.xlu0 %3160  ;;  %v3130_v33 = vpop.permute.xlu2 %3129 }
 0x488   :  { %v3169_v12 = vpop.permute.xlu1 %3168 }
 0x489   :  { %v3173_v50 = vsel %vm3172_vm12, %v3169_v12, %v3171_v25  ;;  %v7424_v25 = vld [vmem:[%s11423_s4 + $0x24] sm:$0xf] }
 0x48a   :  { %3272 = vmatpush.bf16.msrb.mxu2 %v3173_v50  ;;  %v7136_v50 = vld [vmem:[%s11423_s4 + $0x30] sm:$0xf] }
 0x48f   :  { %v3155_v31 = vpop.permute.xlu0 %3154  ;;  %v3125_v24 = vpop.permute.xlu2 %3124 }
 0x490   :  { %v3163_v54 = vpop.permute.xlu1 %3162  ;;  %v3157_v5 = vsel %vm3156_vm14, %v3153_v39, %v3155_v31  ;;  %v7427_v39 = vld [vmem:[%s11423_s4 + $0x34] sm:$0xf0] }
 0x491   :  { %3331 = vmatpush.bf16.msrb.mxu0 %v3163_v54  ;;  %v3165_v4 = vsel %vm3164_vm13, %v3161_v51, %v3163_v54  ;;  %v7130_v51 = vld [vmem:[%s11423_s4 + $0x28] sm:$0xf0]  ;;  %v7426_v54 = vld [vmem:[%s11423_s4 + $0x34] sm:$0xf] }
 0x492   :  { %3273 = vmatpush.bf16.msrb.mxu2 %v3165_v4  ;;  %v9477_v12 = vor.u32 %v7424_v25, %v7130_v51  ;;  %v7138_v4 = vld [vmem:[%s11423_s4 + $0x38] sm:$0xf0] }
 0x494   :  { %11742 = vst [vmem:[#allocation111_spill] sm:$0xff] %v9477_v12 }
 0x495   :  { %3332 = vmatpush.bf16.msrb.mxu0 %v3155_v31  ;;  %v9490_v31 = vor.u32 %v7427_v39, %v7136_v50 }
 0x496   :  { %3274 = vmatpush.bf16.msrb.mxu2 %v3157_v5 }
 0x497   :  { %v3137_v45 = vpop.permute.xlu0 %3136  ;;  %11743 = vst [vmem:[#allocation112_spill] sm:$0xff] %v9490_v31 }
 0x498   :  { %v3145_v63 = vpop.permute.xlu1 %3144 }
 0x499   :  { %3333 = vmatpush.bf16.msrb.mxu0 %v3147_v40  ;;  %v3149_v9 = vsel %vm11534_vm15, %v3145_v63, %v3147_v40  ;;  %vm11585_vm15 = vcmask 130048   ;;  %v9499_v40 = vor.u32 %v7426_v54, %v7138_v4 }
 0x49a   :  { %3275 = vmatpush.bf16.msrb.mxu2 %v3149_v9 }
 0x49b   :  { %11744 = vst [vmem:[#allocation113_spill] sm:$0xff] %v9499_v40 }
 0x49f   :  { %v3132_v46 = vpop.permute.xlu0 %3131 }
 0x4a0   :  { %v3139_v7 = vpop.permute.xlu1 %3138  ;;  %v3133_v60 = vsel %vm602_vm4, %v3130_v33, %v3132_v46 }
 0x4a1   :  { %3334 = vmatpush.bf16.msrb.mxu0 %v3139_v7  ;;  %v3141_v53 = vsel %vm3140_vm1, %v3137_v45, %v3139_v7  ;;  %v9506_v45 = vpop.permute.xlu2 %3185 }
 0x4a2   :  { %3276 = vmatpush.bf16.msrb.mxu2 %v3141_v53  ;;  %11745 = vst [vmem:[#allocation114_spill] sm:$0xff] %v9506_v45 }
 0x4a5   :  { %3335 = vmatpush.bf16.msrb.mxu0 %v3132_v46 }
 0x4a6   :  { %3277 = vmatpush.bf16.msrb.mxu2 %v3133_v60 }
 0x4a7   :  { %v3177_v21 = vpop.permute.xlu0 %3176 }
 0x4a8   :  { %v3123_v23 = vpop.permute.xlu1 %3122 }
 0x4a9   :  { %3336 = vmatpush.bf16.msrb.mxu0 %v3125_v24  ;;  %v3126_v52 = vsel %vm263_vm2, %v3123_v23, %v3125_v24 }
 0x4aa   :  { %3278 = vmatpush.bf16.msrb.mxu2 %v3126_v52 }
 0x4ad   :  { %3337 = vmatpush.bf16.msrb.mxu0 %v9350_v1  ;;  %v7422_v1 = vld [vmem:[%s11423_s4 + $0x14] sm:$0xf] }
 0x4ae   :  { %3279 = vmatpush.bf16.msrb.mxu2 %v9348_v62  ;;  %v9446_v62 = vor.u32 %v7423_v30, %v7120_v28  ;;  %v9455_v14 = vor.u32 %v7422_v1, %v7122_v37 }
 0x4af   :  { %v9516_v41 = vpop.permute.xlu0 %3190 }
 0x4b0   :  { %3338 = vmatmul.bf16.vlgmr.msrb.gmra.mxu0 %v9415_v36  ;;  %v3179_v26 = vpop.permute.xlu1 %3178  ;;  %11739 = vst [vmem:[#allocation108_spill] sm:$0xff] %v9446_v62 }
 0x4b1   :  { %v3180_v44 = vsel %vm805_vm5, %v3177_v21, %v3179_v26  ;;  %3280 = vmatmul.bf16.vlgmr.msrb.gmra.mxu2 %v9415_v36  ;;  %3366 = vmatpush.bf16.msrb.mxu1 %v3179_v26  ;;  %11740 = vst [vmem:[#allocation109_spill] sm:$0xff] %v9455_v14 }
 0x4b2   :  { %3308 = vmatpush.bf16.msrb.mxu3 %v3180_v44  ;;  %11746 = vst [vmem:[#allocation115_spill] sm:$0xff] %v9516_v41 }
 0x4b4   :  { %7146 = vmatmul.msk.bf16.vlgmr.msrb.gmra.mxu1 %vm11585_vm15, %v9426_v15 }
 0x4b5   :  { %7142 = vmatmul.msk.bf16.vlgmr.msrb.gmra.mxu3 %vm11585_vm15, %v9426_v15 }
 0x4b8   :  { %v9531_v37 = vpop.permute.xlu1 %3195 }
 0x4b9   :  { %11747 = vst [vmem:[#allocation116_spill] sm:$0xff] %v9531_v37 }
 0x4c0   :  { %3343 = vmatmul.bf16.gmra.mxu0 %v9446_v62 }
 0x4c1   :  { %3285 = vmatmul.bf16.gmra.mxu2 %v9446_v62 }
 0x4c4   :  { %7147 = vmatmul.msk.bf16.gmra.mxu1 %vm11585_vm15, %v9455_v14 }
 0x4c5   :  { %7143 = vmatmul.msk.bf16.gmra.mxu3 %vm11585_vm15, %v9455_v14 }
 0x4d0   :  { %3348 = vmatmul.bf16.gmra.mxu0 %v9468_v27 }
 0x4d1   :  { %3290 = vmatmul.bf16.gmra.mxu2 %v9468_v27 }
 0x4d4   :  { %7148 = vmatmul.msk.bf16.gmra.mxu1 %vm11585_vm15, %v9477_v12 }
 0x4d5   :  { %7144 = vmatmul.msk.bf16.gmra.mxu3 %vm11585_vm15, %v9477_v12 }
 0x4e0   :  { %3353 = vmatmul.bf16.gmra.mxu0 %v9490_v31 }
 0x4e1   :  { %3295 = vmatmul.bf16.gmra.mxu2 %v9490_v31  ;;  %v9795_v31 = vld [vmem:[%s11420_s1 + $0x8] sm:$0xff] }
 0x4e4   :  { %7149 = vmatmul.msk.bf16.gmra.mxu1 %vm11585_vm15, %v9499_v40 }
 0x4e5   :  { %7145 = vmatmul.msk.bf16.gmra.mxu3 %vm11585_vm15, %v9499_v40  ;;  %vm3788_vm15 = vcmask 289792  }
 0x52d   :  { %v3339_v5 = vpop.f32.mrf.mxu0 }
 0x52e   :  { %v3340_v63 = vadd.f32 %v3339_v5, %v9506_v45 }
 0x531   :  { %v3368_v9 = vpop.f32.mrf.mxu1 }
 0x532   :  { %v9509_v7 = vadd.f32 %v3368_v9, %v3340_v63 }
 0x534   :  { %v3281_v33 = vpop.f32.mrf.mxu2  ;;  %v11540_v22 = vmax.f32 %v9509_v7, 0.0 }
 0x535   :  { %v3282_v53 = vadd.f32 %v3281_v33, %v9506_v45  ;;  %v3341_v46 = vpop.f32.mrf.mxu0  ;;  %v9546_v33 = vpop.permute.xlu2 %3200 }
 0x536   :  { %v3342_v8 = vadd.f32 %v3341_v46, %v9516_v41  ;;  %11748 = vst [vmem:[#allocation117_spill] sm:$0xff] %v9546_v33 }
 0x538   :  { %v3310_v60 = vpop.f32.mrf.mxu3 }
 0x539   :  { %v9513_v24 = vadd.f32 %v3310_v60, %v3282_v53  ;;  %v3370_v23 = vpop.f32.mrf.mxu1 }
 0x53a   :  { %v9519_v21 = vadd.f32 %v3370_v23, %v3342_v8 }
 0x53b   :  { %v11539_v52 = vmax.f32 %v9513_v24, 0.0 }
 0x53c   :  { %v3283_v11 = vpop.f32.mrf.mxu2  ;;  %v3391_v30 = vmax.f32 %v9519_v21, 0.0 }
 0x53d   :  { %v3344_v57 = vpop.f32.mrf.mxu0  ;;  %v3284_v26 = vadd.f32 %v3283_v11, %v9516_v41  ;;  %v7540_v28 = vpack.i.bf16 %v11540_v22, %v11539_v52 }
 0x53e   :  { %v3345_v35 = vadd.f32 %v3344_v57, %v9531_v37 }
 0x53f   :  { %7541 = vrot.lane.b32.xlu1 %v7540_v28, %s7829_s3 }
 0x540   :  { %v3312_v44 = vpop.f32.mrf.mxu3 }
 0x541   :  { %v9522_v55 = vadd.f32 %v3312_v44, %v3284_v26  ;;  %v3373_v43 = vpop.f32.mrf.mxu1 }
 0x542   :  { %v9534_v51 = vadd.f32 %v3373_v43, %v3345_v35 }
 0x543   :  { %v3390_v1 = vmax.f32 %v9522_v55, 0.0 }
 0x544   :  { %v3286_v38 = vpop.f32.mrf.mxu2  ;;  %v11538_v63 = vmax.f32 %v9534_v51, 0.0 }
 0x545   :  { %v3346_v25 = vpop.f32.mrf.mxu0  ;;  %v3287_v50 = vadd.f32 %v3286_v38, %v9531_v37  ;;  %v7545_v5 = vpack.i.bf16 %v3391_v30, %v3390_v1  ;;  %v9561_v38 = vpop.permute.xlu0 %3205 }
 0x546   :  { %v3347_v46 = vadd.f32 %v3346_v25, %v9546_v33  ;;  %11749 = vst [vmem:[#allocation118_spill] sm:$0xff] %v9561_v38 }
 0x547   :  { %7546 = vrot.lane.b32.xlu2 %v7545_v5, %s7829_s3 }
 0x548   :  { %v3315_v39 = vpop.f32.mrf.mxu3 }
 0x549   :  { %v9537_v54 = vadd.f32 %v3315_v39, %v3287_v50  ;;  %v3375_v4 = vpop.f32.mrf.mxu1 }
 0x54a   :  { %v9549_v23 = vadd.f32 %v3375_v4, %v3347_v46 }
 0x54b   :  { %v11535_v9 = vmax.f32 %v9537_v54, 0.0 }
 0x54c   :  { %v3288_v53 = vpop.f32.mrf.mxu2  ;;  %v11537_v43 = vmax.f32 %v9549_v23, 0.0 }
 0x54d   :  { %v3349_v60 = vpop.f32.mrf.mxu0  ;;  %v3289_v11 = vadd.f32 %v3288_v53, %v9546_v33  ;;  %v7550_v44 = vpack.i.bf16 %v11538_v63, %v11535_v9  ;;  %v9588_v63 = vpop.permute.xlu2 %3215 }
 0x54e   :  { %v3350_v25 = vadd.f32 %v3349_v60, %v9561_v38  ;;  %v9576_v60 = vpop.permute.xlu1 %3210  ;;  %11751 = vst [vmem:[#allocation120_spill] sm:$0xff] %v9588_v63 }
 0x54f   :  { %7551 = vrot.lane.b32.xlu0 %v7550_v44, %s7829_s3  ;;  %11750 = vst [vmem:[#allocation119_spill] sm:$0xff] %v9576_v60 }
 0x550   :  { %v3317_v8 = vpop.f32.mrf.mxu3 }
 0x551   :  { %v9552_v57 = vadd.f32 %v3317_v8, %v3289_v11  ;;  %v3378_v26 = vpop.f32.mrf.mxu1 }
 0x552   :  { %v9564_v50 = vadd.f32 %v3378_v26, %v3350_v25 }
 0x553   :  { %v11536_v28 = vmax.f32 %v9552_v57, 0.0 }
 0x554   :  { %v3291_v35 = vpop.f32.mrf.mxu2  ;;  %v11542_v8 = vmax.f32 %v9564_v50, 0.0 }
 0x555   :  { %v3292_v39 = vadd.f32 %v3291_v35, %v9561_v38  ;;  %v3351_v4 = vpop.f32.mrf.mxu0  ;;  %v7555_v46 = vpack.i.bf16 %v11537_v43, %v11536_v28 }
 0x556   :  { %v3352_v35 = vadd.f32 %v3351_v4, %v9576_v60 }
 0x557   :  { %7556 = vrot.lane.b32.xlu1 %v7555_v46, %s7829_s3 }
 0x558   :  { %v3320_v5 = vpop.f32.mrf.mxu3 }
 0x559   :  { %v9567_v53 = vadd.f32 %v3320_v5, %v3292_v39  ;;  %v3380_v11 = vpop.f32.mrf.mxu1 }
 0x55a   :  { %v9579_v25 = vadd.f32 %v3380_v11, %v3352_v35 }
 0x55b   :  { %v11541_v44 = vmax.f32 %v9567_v53, 0.0 }
 0x55c   :  { %v3293_v26 = vpop.f32.mrf.mxu2  ;;  %v11546_v46 = vmax.f32 %v9579_v25, 0.0 }
 0x55d   :  { %v3294_v39 = vadd.f32 %v3293_v26, %v9576_v60  ;;  %v7560_v28 = vpack.i.bf16 %v11542_v8, %v11541_v44  ;;  %v3354_v43 = vpop.f32.mrf.mxu0 }
 0x55e   :  { %v3355_v26 = vadd.f32 %v3354_v43, %v9588_v63 }
 0x55f   :  { %7561 = vrot.lane.b32.xlu2 %v7560_v28, %s7829_s3 }
 0x560   :  { %v3322_v5 = vpop.f32.mrf.mxu3 }
 0x561   :  { %v9582_v9 = vadd.f32 %v3322_v5, %v3294_v39  ;;  %v3383_v4 = vpop.f32.mrf.mxu1 }
 0x562   :  { %v9594_v35 = vadd.f32 %v3383_v4, %v3355_v26 }
 0x563   :  { %v11543_v52 = vmax.f32 %v9582_v9, 0.0 }
 0x564   :  { %v3296_v11 = vpop.f32.mrf.mxu2  ;;  %v11545_v8 = vmax.f32 %v9594_v35, 0.0 }
 0x565   :  { %v3297_v39 = vadd.f32 %v3296_v11, %v9588_v63  ;;  %v7565_v44 = vpack.i.bf16 %v11546_v46, %v11543_v52 }
 0x567   :  { %7566 = vrot.lane.b32.xlu0 %v7565_v44, %s7829_s3  ;;  %v9619_v44 = vld [vmem:[%s11419_s0 + $0x12] sm:$0xff] }
 0x568   :  { %v3325_v5 = vpop.f32.mrf.mxu3  ;;  %3802 = vst [vmem:[#allocation1] ss:$4 sm:$0xff] %v9619_v44 }
 0x569   :  { %v9597_v22 = vadd.f32 %v3325_v5, %v3297_v39 }
 0x56b   :  { %v11544_v28 = vmax.f32 %v9597_v22, 0.0 }
 0x56c   :  { %v3298_v21 = vpop.f32.mrf.mxu2 }
 0x56d   :  { %v7570_v43 = vpack.i.bf16 %v11545_v8, %v11544_v28 }
 0x56f   :  { %7571 = vrot.lane.b32.xlu0 %v7570_v43, %s7829_s3  ;;  %v3806_v46 = vld.sshfl [vmem:[#allocation1] sm:$0xff pattern:$0x73625140] }
 0x5a1   :  { %v7547_v4 = vpop.permute.xlu2 %7546 }
 0x5a2   :  { %v7549_v11 = vunpack.i.h.bf16 %v7547_v4  ;;  %v7548_v26 = vunpack.i.l.bf16 %v7547_v4  ;;  %v3808_v4 = vld.sshfl [vmem:[#allocation1 + $0x8] sm:$0xff pattern:$0x73625140] }
 0x5a3   :  { %3824 = vrot.lane.b32.xlu0 %v3808_v4, %s7829_s3  ;;  %v11754_v4 = vmax.f32 %v9513_v24, 0.0 }
 0x5a4   :  { %v9613_v39 = vmax.f32 %v3391_v30, %v7549_v11  ;;  %v3477_v5 = vsel %vm263_vm2, %v7548_v26, %v7549_v11  ;;  %v9629_v30 = vpop.permute.xlu0 %3220  ;;  %v3356_v11 = vpop.f32.mrf.mxu0 }
 0x5a5   :  { %v9623_v52 = vmax.f32 %v3390_v1, %v3477_v5  ;;  %11752 = vst [vmem:[#allocation121_spill] sm:$0xff] %v9629_v30  ;;  %v3327_v26 = vpop.f32.mrf.mxu3  ;;  %v3299_v28 = vadd.f32 %v3298_v21, %v9629_v30  ;;  %v3385_v1 = vpop.f32.mrf.mxu1  ;;  %v3357_v63 = vadd.f32 %v3356_v11, %v9629_v30 }
 0x5a7   :  { %v7585_v43 = vpack.i.bf16 %v9613_v39, %v9623_v52  ;;  %v9634_v60 = vadd.f32 %v3327_v26, %v3299_v28  ;;  %v9641_v37 = vadd.f32 %v3385_v1, %v3357_v63 }
 0x5a9   :  { %7586 = vrot.lane.b32.xlu2 %v7585_v43, %s7843_s30  ;;  %v11753_v43 = vmax.f32 %v9509_v7, 0.0  ;;  %v11562_v11 = vmax.f32 %v9641_v37, 0.0  ;;  %v3810_v7 = vld.sshfl [vmem:[#allocation1 + $0x10] sm:$0xff pattern:$0x73625140] }
 0x5ab   :  { %3826 = vrot.lane.b32.xlu0 %v3810_v7, %s7829_s3 }
 0x5b1   :  { %v7542_v55 = vpop.permute.xlu1 %7541  ;;  %3822 = vrot.lane.b32.xlu2 %v3806_v46, %s7829_s3 }
 0x5b2   :  { %v7544_v5 = vunpack.i.h.bf16 %v7542_v55  ;;  %v7543_v8 = vunpack.i.l.bf16 %v7542_v55  ;;  %v11561_v55 = vmax.f32 %v9634_v60, 0.0 }
 0x5b4   :  { %v9638_v38 = vmax.f32 %v11753_v43, %v7544_v5  ;;  %v3476_v33 = vsel %vm263_vm2, %v7543_v8, %v7544_v5  ;;  %v7580_v24 = vpack.i.bf16 %v11562_v11, %v11561_v55  ;;  %v11756_v43 = vmax.f32 %v9537_v54, 0.0 }
 0x5b5   :  { %v9645_v21 = vmax.f32 %v11754_v4, %v3476_v33  ;;  %v11755_v33 = vmax.f32 %v9534_v51, 0.0 }
 0x5b7   :  { %v7575_v28 = vpack.i.bf16 %v9638_v38, %v9645_v21 }
 0x5b9   :  { %7576 = vrot.lane.b32.xlu1 %v7575_v28, %s7843_s30  ;;  %v7562_v5 = vpop.permute.xlu2 %7561 }
 0x5ba   :  { %v7564_v28 = vunpack.i.h.bf16 %v7562_v5  ;;  %v7563_v7 = vunpack.i.l.bf16 %v7562_v5  ;;  %v9684_v5 = vld [vmem:[%s11419_s0 + $0x1a] sm:$0xff] }
 0x5bb   :  { %3805 = vst [vmem:[#allocation1 + $0x20] ss:$4 sm:$0xff] %v9684_v5 }
 0x5bc   :  { %v3480_v51 = vsel %vm263_vm2, %v7563_v7, %v7564_v28 }
 0x5c1   :  { %v7552_v63 = vpop.permute.xlu0 %7551  ;;  %7581 = vrot.lane.b32.xlu1 %v7580_v24, %s7829_s3  ;;  %v3812_v24 = vld.sshfl [vmem:[#allocation1 + $0x18] sm:$0xff pattern:$0x73625140] }
 0x5c2   :  { %v7554_v8 = vunpack.i.h.bf16 %v7552_v63  ;;  %v7553_v26 = vunpack.i.l.bf16 %v7552_v63  ;;  %3981 = vst [vmem:[#allocation1] ss:$4 sm:$0xff] %v9619_v44 }
 0x5c4   :  { %v9660_v46 = vmax.f32 %v11755_v33, %v7554_v8  ;;  %v3478_v1 = vsel %vm263_vm2, %v7553_v26, %v7554_v8  ;;  %v11757_v33 = vmax.f32 %v9549_v23, 0.0  ;;  %v11758_v26 = vmax.f32 %v9552_v57, 0.0 }
 0x5c5   :  { %v9665_v4 = vmax.f32 %v11756_v43, %v3478_v1  ;;  %v11759_v23 = vmax.f32 %v9564_v50, 0.0 }
 0x5c7   :  { %v7590_v55 = vpack.i.bf16 %v9660_v46, %v9665_v4  ;;  %v9689_v43 = vmax.f32 %v11759_v23, %v7564_v28 }
 0x5c9   :  { %v7557_v63 = vpop.permute.xlu1 %7556  ;;  %7591 = vrot.lane.b32.xlu1 %v7590_v55, %s7843_s30 }
 0x5ca   :  { %v7559_v30 = vunpack.i.h.bf16 %v7557_v63  ;;  %v7558_v41 = vunpack.i.l.bf16 %v7557_v63 }
 0x5cc   :  { %v9673_v8 = vmax.f32 %v11757_v33, %v7559_v30  ;;  %v3479_v54 = vsel %vm263_vm2, %v7558_v41, %v7559_v30  ;;  %v11760_v41 = vmax.f32 %v9567_v53, 0.0  ;;  %v3814_v33 = vld.sshfl [vmem:[#allocation1 + $0x20] sm:$0xff pattern:$0x73625140]  ;;  %v11761_v53 = vmax.f32 %v9579_v25, 0.0 }
 0x5cd   :  { %v9678_v1 = vmax.f32 %v11758_v26, %v3479_v54  ;;  %v11762_v54 = vmax.f32 %v9582_v9, 0.0  ;;  %v11763_v25 = vmax.f32 %v9594_v35, 0.0  ;;  %v11764_v9 = vmax.f32 %v9597_v22, 0.0  ;;  %v7434_v35 = vld [vmem:[%s11425_s6 + $0x30] sm:$0xff]  ;;  %v217_v22 = vld [vmem:[%s11425_s6 + $0x58] sm:$0x1] }
 0x5ce   :  { %v9693_v30 = vmax.f32 %v11760_v41, %v3480_v51 }
 0x5cf   :  { %v7595_v57 = vpack.i.bf16 %v9673_v8, %v9678_v1 }
 0x5d0   :  { %v7600_v50 = vpack.i.bf16 %v9689_v43, %v9693_v30 }
 0x5d1   :  { %7596 = vrot.lane.b32.xlu2 %v7595_v57, %s7843_s30  ;;  %3828 = vrot.lane.b32.xlu1 %v3812_v24, %s7829_s3 }
 0x5d9   :  { %v7567_v55 = vpop.permute.xlu0 %7566  ;;  %7601 = vrot.lane.b32.xlu2 %v7600_v50, %s7843_s30  ;;  %3830 = vrot.lane.b32.xlu1 %v3814_v33, %s7829_s3  ;;  %v7435_v50 = vld [vmem:[%s11425_s6 + $0x38] sm:$0xff] }
 0x5da   :  { %v7569_v7 = vunpack.i.h.bf16 %v7567_v55  ;;  %v7568_v63 = vunpack.i.l.bf16 %v7567_v55  ;;  %3722 = vmatpush.bf16.msra.mxu3 %v7435_v50  ;;  %v7430_v50 = vld [vmem:[%s11425_s6 + $0x10] sm:$0xff] }
 0x5dc   :  { %v9704_v28 = vmax.f32 %v11761_v53, %v7569_v7  ;;  %v3481_v51 = vsel %vm263_vm2, %v7568_v63, %v7569_v7  ;;  %v3816_v53 = vld.sshfl [vmem:[#allocation1 + $0x28] sm:$0xff pattern:$0x73625140] }
 0x5dd   :  { %v9709_v26 = vmax.f32 %v11762_v54, %v3481_v51  ;;  %v3682_v51 = vunpack.c.l.b16 %v217_v22  ;;  %v3820_v54 = vld.sshfl [vmem:[#allocation1 + $0x38] sm:$0xff pattern:$0x73625140]  ;;  %v7428_v22 = vld [vmem:[%s11425_s6] sm:$0xff] }
 0x5de   :  { %3723 = vmatpush.bf16.msra.mxu3 %v7434_v35  ;;  %v7436_v35 = vld [vmem:[%s11425_s6 + $0x40] sm:$0xff] }
 0x5df   :  { %v7605_v57 = vpack.i.bf16 %v9704_v28, %v9709_v26 }
 0x5e1   :  { %v7572_v24 = vpop.permute.xlu0 %7571  ;;  %7606 = vrot.lane.b32.xlu0 %v7605_v57, %s7843_s30  ;;  %3832 = vrot.lane.b32.xlu2 %v3816_v53, %s7829_s3  ;;  %v7429_v53 = vld [vmem:[%s11425_s6 + $0x8] sm:$0xff] }
 0x5e2   :  { %v7574_v23 = vunpack.i.h.bf16 %v7572_v24  ;;  %v7573_v41 = vunpack.i.l.bf16 %v7572_v24  ;;  %v3818_v24 = vld.sshfl [vmem:[#allocation1 + $0x30] sm:$0xff pattern:$0x73625140] }
 0x5e3   :  { %3983 = vst [vmem:[#allocation1 + $0x20] ss:$4 sm:$0xff] %v9684_v5 }
 0x5e4   :  { %v9717_v55 = vmax.f32 %v11763_v25, %v7574_v23  ;;  %v3482_v7 = vsel %vm263_vm2, %v7573_v41, %v7574_v23  ;;  %v3694_v23 = vpack.c.b16 %v3682_v51, %v3682_v51  ;;  %v7433_v41 = vld [vmem:[%s11425_s6 + $0x28] sm:$0xff]  ;;  %v7438_v25 = vld [vmem:[%s11425_s6 + $0x50] sm:$0xff] }
 0x5e5   :  { %v9722_v63 = vmax.f32 %v11764_v9, %v3482_v7  ;;  %3724 = vmatpush.bf16.msra.mxu3 %v7433_v41  ;;  %v7432_v7 = vld [vmem:[%s11425_s6 + $0x20] sm:$0xff]  ;;  %v7437_v9 = vld [vmem:[%s11425_s6 + $0x48] sm:$0xff]  ;;  %v9778_v41 = vld.sshfl [vmem:[#allocation1 + $0x18] sm:$0xff pattern:$0x73625140] }
 0x5e6   :  { %v9743_v57 = vsel %vm275_vm0, %v3694_v23, 0  ;;  %v9776_v23 = vld.sshfl [vmem:[#allocation1 + $0x10] sm:$0xff pattern:$0x73625140]  ;;  %vm3706_vm0 = vcmask 408576  }
 0x5e7   :  { %v7610_v33 = vpack.i.bf16 %v9717_v55, %v9722_v63  ;;  %11765 = vst [vmem:[#allocation122_spill] sm:$0xff] %v9743_v57  ;;  %3755 = vmatpush.bf16.msra.mxu1 %v9743_v57 }
 0x5e9   :  { %7611 = vrot.lane.b32.xlu0 %v7610_v33, %s7843_s30  ;;  %3834 = vrot.lane.b32.xlu2 %v3818_v24, %s7829_s3  ;;  %v7431_v33 = vld [vmem:[%s11425_s6 + $0x18] sm:$0xff]  ;;  %v9774_v24 = vld.sshfl [vmem:[#allocation1 + $0x8] sm:$0xff pattern:$0x73625140] }
 0x5ea   :  { %3725 = vmatpush.bf16.msra.mxu3 %v7432_v7  ;;  %v9789_v40 = vld.sshfl [vmem:[#allocation1 + $0x38] sm:$0xff pattern:$0x73625140] }
 0x5eb   :  { %3756 = vmatpush.bf16.msra.mxu1 %v7438_v25 }
 0x5ee   :  { %3726 = vmatpush.bf16.msra.mxu3 %v7431_v33  ;;  %v11766_v33 = vld [vmem:[#allocation5_spill] sm:$0xff] }
 0x5ef   :  { %3757 = vmatpush.bf16.msra.mxu1 %v7437_v9 }
 0x5f1   :  { %3836 = vrot.lane.b32.xlu0 %v3820_v54, %s7829_s3  ;;  %v9772_v54 = vld.sshfl [vmem:[#allocation1] sm:$0xff pattern:$0x73625140] }
 0x5f2   :  { %3727 = vmatpush.bf16.msra.mxu3 %v7430_v50  ;;  %4120 = vst [vmem:[#allocation1] ss:$4 sm:$0xff] %v9619_v44 }
 0x5f3   :  { %3758 = vmatpush.bf16.msra.mxu1 %v7436_v35  ;;  %v9785_v35 = vld.sshfl [vmem:[#allocation1 + $0x28] sm:$0xff pattern:$0x73625140] }
 0x5f6   :  { %3728 = vmatpush.bf16.msra.mxu3 %v7429_v53  ;;  %v9783_v53 = vld.sshfl [vmem:[#allocation1 + $0x20] sm:$0xff pattern:$0x73625140] }
 0x5fa   :  { %3729 = vmatpush.bf16.msra.mxu3 %v7428_v22  ;;  %v9787_v22 = vld.sshfl [vmem:[#allocation1 + $0x30] sm:$0xff pattern:$0x73625140] }
 0x5fb   :  { %4122 = vst [vmem:[#allocation1 + $0x20] ss:$4 sm:$0xff] %v9684_v5 }
 0x603   :  { %v7587_v51 = vpop.permute.xlu2 %7586 }
 0x604   :  { %v7589_v11 = vunpack.i.h.bf16 %v7587_v51  ;;  %v7588_v45 = vunpack.i.l.bf16 %v7587_v51 }
 0x606   :  { %v3616_v14 = vmax.f32 %v9613_v39, %v7589_v11 }
 0x60b   :  { %v3823_v25 = vpop.permute.xlu2 %3822 }
 0x615   :  { %v3825_v7 = vpop.permute.xlu0 %3824 }
 0x616   :  { %v3838_v9 = vsel %vm263_vm2, %v3823_v25, %v3825_v7 }
 0x617   :  { %v3846_v50 = vand.u32 %v3838_v9, %v11766_v33  ;;  %v3590_v9 = vsel %vm3140_vm1, %v7588_v45, %v7589_v11  ;;  %v4131_v45 = vld.sshfl [vmem:[#allocation1 + $0x20] sm:$0xff pattern:$0x73625140] }
 0x618   :  { %v3615_v57 = vmax.f32 %v9623_v52, %v3590_v9  ;;  %4147 = vrot.lane.b32.xlu0 %v4131_v45, %s7830_s12  ;;  %v4127_v9 = vld.sshfl [vmem:[#allocation1 + $0x10] sm:$0xff pattern:$0x73625140] }
 0x619   :  { %3876 = vmatpush.bf16.msra.mxu2 %v3846_v50 }
 0x61c   :  { %7201 = vmatmul.msk.bf16.vlgmr.msra.gmra.mxu2 %vm271_vm3, %v9795_v31 }
 0x61d   :  { %v3827_v27 = vpop.permute.xlu0 %3826 }
 0x61e   :  { %v3839_v51 = vsel %vm263_vm2, %v3825_v7, %v3827_v27 }
 0x61f   :  { %v3849_v61 = vand.u32 %v3839_v51, %v11766_v33 }
 0x621   :  { %3890 = vmatpush.bf16.msra.mxu0 %v3849_v61 }
 0x624   :  { %7202 = vmatmul.msk.bf16.vlgmr.msra.gmra.mxu0 %vm271_vm3, %v9795_v31 }
 0x62b   :  { %v7577_v25 = vpop.permute.xlu1 %7576 }
 0x62c   :  { %v7579_v50 = vunpack.i.h.bf16 %v7577_v25  ;;  %v7578_v12 = vunpack.i.l.bf16 %v7577_v25 }
 0x62e   :  { %v3614_v62 = vmax.f32 %v9638_v38, %v7579_v50  ;;  %v3589_v15 = vsel %vm3140_vm1, %v7578_v12, %v7579_v50  ;;  %v7597_v12 = vpop.permute.xlu2 %7596  ;;  %v4123_v50 = vld.sshfl [vmem:[#allocation1] sm:$0xff pattern:$0x73625140] }
 0x62f   :  { %v3613_v36 = vmax.f32 %v9645_v21, %v3589_v15  ;;  %v11767_v15 = vmax.f32 %v9641_v37, 0.0  ;;  %v7598_v21 = vunpack.i.l.bf16 %v7597_v12 }
 0x630   :  { %v3630_v42 = vpack.c.bf16 %v3616_v14, %v3614_v62  ;;  %v11768_v14 = vmax.f32 %v9634_v60, 0.0 }
 0x631   :  { %v3629_v18 = vpack.c.bf16 %v3615_v57, %v3613_v36  ;;  %v4135_v36 = vld.sshfl [vmem:[#allocation1 + $0x30] sm:$0xff pattern:$0x73625140] }
 0x632   :  { %7194 = vmatmul.msk.bf16.vlgmr.msra.gmra.mxu1 %vm3706_vm0, %v3630_v42  ;;  %v7599_v42 = vunpack.i.h.bf16 %v7597_v12  ;;  %4151 = vrot.lane.b32.xlu0 %v4135_v36, %s7830_s12 }
 0x633   :  { %v7582_v39 = vpop.permute.xlu1 %7581  ;;  %3730 = vmatmul.bf16.vlgmr.msra.gmra.mxu3 %v3629_v18 }
 0x634   :  { %v7584_v38 = vunpack.i.h.bf16 %v7582_v39  ;;  %v7583_v11 = vunpack.i.l.bf16 %v7582_v39  ;;  %v3592_v57 = vsel %vm3140_vm1, %v7598_v21, %v7599_v42  ;;  %v3620_v51 = vmax.f32 %v9673_v8, %v7599_v42  ;;  %v4129_v39 = vld.sshfl [vmem:[#allocation1 + $0x18] sm:$0xff pattern:$0x73625140] }
 0x635   :  { %4145 = vrot.lane.b32.xlu2 %v4129_v39, %s7830_s12  ;;  %v4137_v42 = vld.sshfl [vmem:[#allocation1 + $0x38] sm:$0xff pattern:$0x73625140] }
 0x636   :  { %v9813_v52 = vmax.f32 %v11767_v15, %v7584_v38  ;;  %v3483_v62 = vsel %vm263_vm2, %v7583_v11, %v7584_v38  ;;  %v4125_v38 = vld.sshfl [vmem:[#allocation1 + $0x8] sm:$0xff pattern:$0x73625140]  ;;  %v7602_v11 = vpop.permute.xlu2 %7601  ;;  %v3619_v15 = vmax.f32 %v9678_v1, %v3592_v57 }
 0x637   :  { %v9818_v61 = vmax.f32 %v11768_v14, %v3483_v62  ;;  %4314 = vst [vmem:[#allocation1] ss:$4 sm:$0xff] %v9619_v44  ;;  %v7603_v39 = vunpack.i.l.bf16 %v7602_v11 }
 0x639   :  { %v7615_v37 = vpack.i.bf16 %v9813_v52, %v9818_v61 }
 0x63b   :  { %v7592_v18 = vpop.permute.xlu1 %7591  ;;  %7616 = vrot.lane.b32.xlu1 %v7615_v37, %s7843_s30 }
 0x63c   :  { %v7594_v7 = vunpack.i.h.bf16 %v7592_v18  ;;  %v7593_v25 = vunpack.i.l.bf16 %v7592_v18 }
 0x63d   :  { %4141 = vrot.lane.b32.xlu2 %v4125_v38, %s7830_s12 }
 0x63e   :  { %v3618_v60 = vmax.f32 %v9660_v46, %v7594_v7  ;;  %v3591_v45 = vsel %vm3140_vm1, %v7593_v25, %v7594_v7  ;;  %v4321_v21 = vld.sshfl [vmem:[#allocation1 + $0x10] sm:$0xff pattern:$0x73625140]  ;;  %v4323_v18 = vld.sshfl [vmem:[#allocation1 + $0x18] sm:$0xff pattern:$0x73625140]  ;;  %v3833_v57 = vpop.permute.xlu2 %3832 }
 0x63f   :  { %v3617_v12 = vmax.f32 %v9665_v4, %v3591_v45  ;;  %4337 = vrot.lane.b32.xlu0 %v4321_v21, %s7831_s13  ;;  %v4317_v4 = vld.sshfl [vmem:[#allocation1] sm:$0xff pattern:$0x73625140]  ;;  %v9837_v1 = vld.sshfl [vmem:[#allocation1 + $0x8] sm:$0xff pattern:$0x73625140]  ;;  %v7604_v45 = vunpack.i.h.bf16 %v7602_v11 }
 0x640   :  { %v3632_v62 = vpack.c.bf16 %v3620_v51, %v3618_v60  ;;  %4508 = vst [vmem:[#allocation1] ss:$4 sm:$0xff] %v9619_v44  ;;  %v4133_v7 = vld.sshfl [vmem:[#allocation1 + $0x28] sm:$0xff pattern:$0x73625140] }
 0x641   :  { %v3631_v36 = vpack.c.bf16 %v3619_v15, %v3617_v12  ;;  %4316 = vst [vmem:[#allocation1 + $0x20] ss:$4 sm:$0xff] %v9684_v5  ;;  %v3593_v11 = vsel %vm3140_vm1, %v7603_v39, %v7604_v45  ;;  %v3622_v21 = vmax.f32 %v9689_v43, %v7604_v45  ;;  %v3996_v39 = vand.u32 %v9776_v23, %v11766_v33  ;;  %v9904_v23 = vld [vmem:[%s11420_s1] sm:$0xff] }
 0x642   :  { %7195 = vmatmul.msk.bf16.gmra.mxu1 %vm3706_vm0, %v3632_v62 }
 0x643   :  { %3735 = vmatmul.bf16.gmra.mxu3 %v3631_v36  ;;  %v3829_v46 = vpop.permute.xlu1 %3828  ;;  %4143 = vrot.lane.b32.xlu1 %v4127_v9, %s7830_s12 }
 0x644   :  { %v3840_v8 = vsel %vm263_vm2, %v3827_v27, %v3829_v46 }
 0x645   :  { %v3852_v14 = vand.u32 %v3840_v8, %v11766_v33  ;;  %4149 = vrot.lane.b32.xlu2 %v4133_v7, %s7830_s12  ;;  %v3621_v7 = vmax.f32 %v9693_v30, %v3593_v11  ;;  %v4000_v11 = vand.u32 %v9783_v53, %v11766_v33 }
 0x646   :  { %v3835_v60 = vpop.permute.xlu2 %3834 }
 0x647   :  { %3904 = vmatpush.bf16.msrb.mxu2 %v3852_v14  ;;  %4333 = vrot.lane.b32.xlu0 %v4317_v4, %s7831_s13  ;;  %v3843_v15 = vsel %vm263_vm2, %v3833_v57, %v3835_v60  ;;  %v4517_v30 = vld.sshfl [vmem:[#allocation1 + $0x18] sm:$0xff pattern:$0x73625140] }
 0x648   :  { %v4331_v38 = vld.sshfl [vmem:[#allocation1 + $0x38] sm:$0xff pattern:$0x73625140]  ;;  %v4327_v12 = vld.sshfl [vmem:[#allocation1 + $0x28] sm:$0xff pattern:$0x73625140]  ;;  %v3861_v62 = vand.u32 %v3843_v15, %v11766_v33 }
 0x649   :  { %v4325_v36 = vld.sshfl [vmem:[#allocation1 + $0x20] sm:$0xff pattern:$0x73625140] }
 0x64a   :  { %7203 = vmatmul.msk.bf16.vlgmr.msrb.gmra.mxu2 %vm271_vm3, %v9795_v31 }
 0x64b   :  { %v3831_v27 = vpop.permute.xlu1 %3830  ;;  %4139 = vrot.lane.b32.xlu1 %v4123_v50, %s7830_s12 }
 0x64c   :  { %v3841_v25 = vsel %vm263_vm2, %v3829_v46, %v3831_v27  ;;  %v3842_v37 = vsel %vm263_vm2, %v3831_v27, %v3833_v57  ;;  %v4329_v46 = vld.sshfl [vmem:[#allocation1 + $0x30] sm:$0xff pattern:$0x73625140] }
 0x64d   :  { %v3855_v9 = vand.u32 %v3841_v25, %v11766_v33  ;;  %v3858_v51 = vand.u32 %v3842_v37, %v11766_v33  ;;  %4510 = vst [vmem:[#allocation1 + $0x20] ss:$4 sm:$0xff] %v9684_v5  ;;  %v3992_v25 = vand.u32 %v9772_v54, %v11766_v33  ;;  %4341 = vrot.lane.b32.xlu2 %v4325_v36, %s7831_s13  ;;  %v4513_v54 = vld.sshfl [vmem:[#allocation1 + $0x8] sm:$0xff pattern:$0x73625140] }
 0x64f   :  { %3918 = vmatpush.bf16.msrb.mxu0 %v3855_v9  ;;  %3932 = vmatpush.bf16.msra.mxu2 %v3858_v51 }
 0x650   :  { %4347 = vrot.lane.b32.xlu0 %v4331_v38, %s7831_s13 }
 0x652   :  { %7204 = vmatmul.msk.bf16.vlgmr.msrb.gmra.mxu0 %vm271_vm3, %v9795_v31 }
 0x653   :  { %v7607_v50 = vpop.permute.xlu0 %7606  ;;  %3946 = vmatpush.bf16.msra.mxu0 %v3861_v62  ;;  %4153 = vrot.lane.b32.xlu1 %v4137_v42, %s7830_s12  ;;  %v4515_v42 = vld.sshfl [vmem:[#allocation1 + $0x10] sm:$0xff pattern:$0x73625140] }
 0x654   :  { %v7609_v8 = vunpack.i.h.bf16 %v7607_v50  ;;  %v7608_v14 = vunpack.i.l.bf16 %v7607_v50  ;;  %v4519_v15 = vld.sshfl [vmem:[#allocation1 + $0x20] sm:$0xff pattern:$0x73625140]  ;;  %v4523_v62 = vld.sshfl [vmem:[#allocation1 + $0x30] sm:$0xff pattern:$0x73625140]  ;;  %v4004_v50 = vand.u32 %v9787_v22, %v11766_v33 }
 0x655   :  { %4345 = vrot.lane.b32.xlu2 %v4329_v46, %s7831_s13  ;;  %v4521_v36 = vld.sshfl [vmem:[#allocation1 + $0x28] sm:$0xff pattern:$0x73625140]  ;;  %v4525_v46 = vld.sshfl [vmem:[#allocation1 + $0x38] sm:$0xff pattern:$0x73625140] }
 0x656   :  { %v3624_v4 = vmax.f32 %v9704_v28, %v7609_v8  ;;  %v3594_v57 = vsel %vm3140_vm1, %v7608_v14, %v7609_v8  ;;  %v9877_v28 = vld [vmem:[%s11419_s0 + $0x22] sm:$0x3]  ;;  %4711 = vst [vmem:[#allocation1 + $0x20] ss:$4 sm:$0xff] %v9684_v5 }
 0x657   :  { %v3623_v27 = vmax.f32 %v9709_v26, %v3594_v57  ;;  %4015 = vmatpush.bf16.msrb.mxu0 %v3992_v25  ;;  %v4511_v26 = vld.sshfl [vmem:[#allocation1] sm:$0xff pattern:$0x73625140] }
 0x658   :  { %v3634_v37 = vpack.c.bf16 %v3624_v4, %v3622_v21  ;;  %4537 = vrot.lane.b32.xlu0 %v4517_v30, %s7832_s14  ;;  %4528 = vst [vmem:[#allocation1] ss:$4 sm:$0xff] %v9877_v28  ;;  %v3994_v4 = vand.u32 %v9774_v24, %v11766_v33 }
 0x659   :  { %v3633_v9 = vpack.c.bf16 %v3623_v27, %v3621_v7 }
 0x65a   :  { %7196 = vmatmul.msk.bf16.gmra.mxu1 %vm3706_vm0, %v3634_v37  ;;  %7205 = vmatmul.msk.bf16.vlgmr.msra.gmra.mxu2 %vm271_vm3, %v9795_v31 }
 0x65b   :  { %v9868_v43 = vpop.permute.xlu0 %7611  ;;  %3740 = vmatmul.bf16.gmra.mxu3 %v3633_v9  ;;  %4339 = vrot.lane.b32.xlu1 %v4323_v18, %s7831_s13 }
 0x65c   :  { %4029 = vmatpush.bf16.msrb.mxu1 %v3994_v4  ;;  %v7614_v24 = vunpack.i.h.bf16 %v9868_v43  ;;  %v7613_v9 = vunpack.i.l.bf16 %v9868_v43  ;;  %v3998_v43 = vand.u32 %v9778_v41, %v11766_v33 }
 0x65d   :  { %4535 = vrot.lane.b32.xlu2 %v4515_v42, %s7832_s14  ;;  %v4724_v8 = vld.sshfl [vmem:[#allocation1 + $0x30] sm:$0xff pattern:$0x73625140]  ;;  %v4722_v57 = vld.sshfl [vmem:[#allocation1 + $0x28] sm:$0xff pattern:$0x73625140] }
 0x65e   :  { %v4726_v53 = vld.sshfl [vmem:[#allocation1 + $0x38] sm:$0xff pattern:$0x73625140] }
 0x660   :  { %4533 = vrot.lane.b32.xlu0 %v4513_v54, %s7832_s14 }
 0x662   :  { %7206 = vmatmul.msk.bf16.vlgmr.msra.gmra.mxu0 %vm271_vm3, %v9795_v31 }
 0x663   :  { %v3837_v51 = vpop.permute.xlu0 %3836  ;;  %4335 = vrot.lane.b32.xlu1 %v9837_v1, %s7831_s13  ;;  %4071 = vmatpush.bf16.msra.mxu0 %v4000_v11 }
 0x664   :  { %v3844_v18 = vsel %vm263_vm2, %v3835_v60, %v3837_v51  ;;  %v3867_v45 = vand.u32 %v3837_v51, %v11766_v33  ;;  %v4529_v60 = vld.sshfl [vmem:[#allocation1] sm:$0xff pattern:$0x73625140] }
 0x665   :  { %v3864_v38 = vand.u32 %v3844_v18, %v11766_v33  ;;  %4709 = vst [vmem:[#allocation1] ss:$4 sm:$0xff] %v9619_v44  ;;  %4531 = vrot.lane.b32.xlu2 %v4511_v26, %s7832_s14  ;;  %v3595_v18 = vsel %vm3140_vm1, %v7613_v9, %v7614_v24  ;;  %v9979_v9 = vld [vmem:[%s11420_s1 + $0x10] sm:$0xff] }
 0x666   :  { %3974 = vmatpush.bf16.msrb.mxu3 %v3867_v45 }
 0x667   :  { %3960 = vmatpush.bf16.msrb.mxu2 %v3864_v38 }
 0x668   :  { %4547 = vrot.lane.b32.xlu0 %v4529_v60, %s7832_s14 }
 0x66a   :  { %7207 = vmatmul.msk.bf16.vlgmr.msrb.gmra.mxu2 %vm271_vm3, %v9795_v31  ;;  %4057 = vmatpush.bf16.msra.mxu3 %v3998_v43 }
 0x66b   :  { %4043 = vmatpush.bf16.msra.mxu2 %v3996_v39  ;;  %4343 = vrot.lane.b32.xlu1 %v4327_v12, %s7831_s13  ;;  %v4720_v12 = vld.sshfl [vmem:[#allocation1 + $0x20] sm:$0xff pattern:$0x73625140] }
 0x66c   :  { %v4718_v22 = vld.sshfl [vmem:[#allocation1 + $0x18] sm:$0xff pattern:$0x73625140]  ;;  %v4714_v1 = vld.sshfl [vmem:[#allocation1 + $0x8] sm:$0xff pattern:$0x73625140] }
 0x66d   :  { %4545 = vrot.lane.b32.xlu2 %v4525_v46, %s7832_s14  ;;  %v4712_v14 = vld.sshfl [vmem:[#allocation1] sm:$0xff pattern:$0x73625140]  ;;  %v4716_v21 = vld.sshfl [vmem:[#allocation1 + $0x10] sm:$0xff pattern:$0x73625140] }
 0x66e   :  { %4728 = vst [vmem:[#allocation1] ss:$4 sm:$0xff] %v9877_v28 }
 0x66f   :  { %4099 = vmatpush.bf16.msrb.mxu2 %v4004_v50  ;;  %4911 = vst [vmem:[#allocation1 + $0x20] ss:$4 sm:$0xff] %v9684_v5  ;;  %v3625_v50 = vmax.f32 %v9722_v63, %v3595_v18 }
 0x670   :  { %4737 = vrot.lane.b32.xlu0 %v4718_v22, %s7834_s17 }
 0x672   :  { %7209 = vmatmul.msk.bf16.vlgmr.msrb.gmra.mxu0 %vm271_vm3, %v9904_v23 }
 0x673   :  { %4539 = vrot.lane.b32.xlu1 %v4519_v15, %s7832_s14  ;;  %v4002_v15 = vand.u32 %v9785_v35, %v11766_v33 }
 0x675   :  { %4735 = vrot.lane.b32.xlu2 %v4716_v21, %s7834_s17  ;;  %v4729_v7 = vld.sshfl [vmem:[#allocation1] sm:$0xff pattern:$0x73625140]  ;;  %4085 = vmatpush.bf16.msra.mxu1 %v4002_v15 }
 0x676   :  { %4909 = vst [vmem:[#allocation1] ss:$4 sm:$0xff] %v9619_v44  ;;  %v4920_v26 = vld.sshfl [vmem:[#allocation1 + $0x20] sm:$0xff pattern:$0x73625140] }
 0x677   :  { %v4924_v60 = vld.sshfl [vmem:[#allocation1 + $0x30] sm:$0xff pattern:$0x73625140] }
 0x678   :  { %4733 = vrot.lane.b32.xlu0 %v4714_v1, %s7834_s17 }
 0x67a   :  { %7211 = vmatmul.msk.bf16.vlgmr.msra.gmra.mxu2 %vm271_vm3, %v9904_v23 }
 0x67b   :  { %4543 = vrot.lane.b32.xlu1 %v4523_v62, %s7832_s14  ;;  %v3626_v62 = vmax.f32 %v9717_v55, %v7614_v24 }
 0x67d   :  { %4731 = vrot.lane.b32.xlu2 %v4712_v14, %s7834_s17  ;;  %v4918_v25 = vld.sshfl [vmem:[#allocation1 + $0x18] sm:$0xff pattern:$0x73625140]  ;;  %v4914_v30 = vld.sshfl [vmem:[#allocation1 + $0x8] sm:$0xff pattern:$0x73625140] }
 0x67e   :  { %v4912_v11 = vld.sshfl [vmem:[#allocation1] sm:$0xff pattern:$0x73625140]  ;;  %v4916_v35 = vld.sshfl [vmem:[#allocation1 + $0x10] sm:$0xff pattern:$0x73625140] }
 0x67f   :  { %4928 = vst [vmem:[#allocation1] ss:$4 sm:$0xff] %v9877_v28 }
 0x680   :  { %4747 = vrot.lane.b32.xlu0 %v4729_v7, %s7834_s17 }
 0x682   :  { %7213 = vmatmul.msk.bf16.vlgmr.msra.gmra.mxu0 %vm271_vm3, %v9904_v23 }
 0x683   :  { %4541 = vrot.lane.b32.xlu1 %v4521_v36, %s7832_s14 }
 0x685   :  { %4745 = vrot.lane.b32.xlu2 %v4726_v53, %s7834_s17  ;;  %v4922_v53 = vld.sshfl [vmem:[#allocation1 + $0x28] sm:$0xff pattern:$0x73625140] }
 0x686   :  { %v4929_v7 = vld.sshfl [vmem:[#allocation1] sm:$0xff pattern:$0x73625140] }
 0x687   :  { %5109 = vst [vmem:[#allocation1] ss:$4 sm:$0xff] %v9619_v44 }
 0x688   :  { %4937 = vrot.lane.b32.xlu0 %v4918_v25, %s7835_s22 }
 0x68a   :  { %7215 = vmatmul.msk.bf16.vlgmr.msrb.gmra.mxu2 %vm271_vm3, %v9904_v23  ;;  %v9932_v27 = vpop.permute.xlu0 %4147 }
 0x68b   :  { %4739 = vrot.lane.b32.xlu1 %v4720_v12, %s7834_s17 }
 0x68d   :  { %4935 = vrot.lane.b32.xlu2 %v4916_v35, %s7835_s22 }
 0x68f   :  { %v9935_v37 = vpop.permute.xlu2 %4145 }
 0x690   :  { %4933 = vrot.lane.b32.xlu0 %v4914_v30, %s7835_s22 }
 0x693   :  { %4743 = vrot.lane.b32.xlu1 %v4724_v8, %s7834_s17 }
 0x695   :  { %4931 = vrot.lane.b32.xlu2 %v4912_v11, %s7835_s22 }
 0x697   :  { %v4142_v38 = vpop.permute.xlu2 %4141 }
 0x698   :  { %4947 = vrot.lane.b32.xlu0 %v4929_v7, %s7835_s22 }
 0x69b   :  { %4741 = vrot.lane.b32.xlu1 %v4722_v57, %s7834_s17 }
 0x69f   :  { %v9963_v21 = vpop.permute.xlu2 %4149  ;;  %v9996_v43 = vpop.f32.mrf.mxu2 }
 0x6a0   :  { %v4159_v24 = vsel %vm602_vm4, %v9932_v27, %v9963_v21 }
 0x6a1   :  { %v4175_v18 = vand.u32 %v4159_v24, %v11766_v33 }
 0x6a3   :  { %4939 = vrot.lane.b32.xlu1 %v4920_v26, %s7835_s22 }
 0x6a4   :  { %v9943_v51 = vpop.permute.xlu0 %4151 }
 0x6a5   :  { %v4160_v24 = vsel %vm602_vm4, %v9963_v21, %v9943_v51 }
 0x6ab   :  { %4943 = vrot.lane.b32.xlu1 %v4924_v60, %s7835_s22  ;;  %v4006_v60 = vand.u32 %v9789_v40, %v11766_v33 }
 0x6ad   :  { %v7617_v42 = vpop.permute.xlu1 %7616 }
 0x6ae   :  { %v7619_v45 = vunpack.i.h.bf16 %v7617_v42  ;;  %v7618_v39 = vunpack.i.l.bf16 %v7617_v42 }
 0x6af   :  { %v3760_v54 = vpop.f32.mrf.mxu1 }
 0x6b0   :  { %v3628_v36 = vmax.f32 %v9813_v52, %v7619_v45  ;;  %v3596_v46 = vsel %vm3140_vm1, %v7618_v39, %v7619_v45  ;;  %v9989_v39 = vpop.permute.xlu2 %4341 }
 0x6b1   :  { %v3627_v22 = vmax.f32 %v9818_v61, %v3596_v46  ;;  %v9959_v41 = vpop.permute.xlu0 %4337 }
 0x6b2   :  { %v3636_v1 = vpack.c.bf16 %v3628_v36, %v3626_v62  ;;  %v9998_v62 = vpop.f32.mrf.mxu0 }
 0x6b3   :  { %v3635_v14 = vpack.c.bf16 %v3627_v22, %v3625_v50  ;;  %4941 = vrot.lane.b32.xlu1 %v4922_v53, %s7835_s22  ;;  %v5118_v50 = vld.sshfl [vmem:[#allocation1 + $0x18] sm:$0xff pattern:$0x73625140] }
 0x6b4   :  { %7197 = vmatmul.msk.bf16.gmra.mxu1 %vm3706_vm0, %v3636_v1  ;;  %v4926_v22 = vld.sshfl [vmem:[#allocation1 + $0x38] sm:$0xff pattern:$0x73625140]  ;;  %5137 = vrot.lane.b32.xlu0 %v5118_v50, %s7836_s25 }
 0x6b5   :  { %v4144_v63 = vpop.permute.xlu1 %4143  ;;  %3745 = vmatmul.bf16.gmra.mxu3 %v3635_v14  ;;  %5111 = vst [vmem:[#allocation1 + $0x20] ss:$4 sm:$0xff] %v9684_v5  ;;  %4945 = vrot.lane.b32.xlu2 %v4926_v22, %s7835_s22 }
 0x6b6   :  { %v3731_v12 = vpop.f32.mrf.mxu3  ;;  %v4157_v61 = vsel %vm602_vm4, %v4144_v63, %v9935_v37 }
 0x6b7   :  { %v3761_v8 = vadd.f32 %v3760_v54, %v3731_v12  ;;  %v3762_v52 = vpop.f32.mrf.mxu1  ;;  %v4169_v4 = vand.u32 %v4157_v61, %v11766_v33  ;;  %v4156_v54 = vsel %vm602_vm4, %v4142_v38, %v4144_v63  ;;  %v5114_v63 = vld.sshfl [vmem:[#allocation1 + $0x8] sm:$0xff pattern:$0x73625140] }
 0x6b9   :  { %v3780_v55 = vpack.c.bf16 %v3761_v8, %v3761_v8  ;;  %4221 = vmatpush.bf16.msra.mxu2 %v4169_v4  ;;  %v9987_v45 = vpop.permute.xlu0 %4333  ;;  %v10022_v8 = vpop.f32.mrf.mxu2 }
 0x6ba   :  { %11769 = vst [vmem:[#allocation5_spill] sm:$0xff] %v10022_v8  ;;  %v10024_v14 = vpop.f32.mrf.mxu0 }
 0x6bb   :  { %3789 = vst.msk [vmem:[%s11426_s7] sm:$0xf] %vm3788_vm15, %v3780_v55  ;;  %v10028_v55 = vpop.permute.xlu2 %4345 }
 0x6bc   :  { %7219 = vmatmul.msk.bf16.vlgmr.msra.gmra.mxu2 %vm271_vm3, %v9979_v9  ;;  %v5120_v4 = vld.sshfl [vmem:[#allocation1 + $0x20] sm:$0xff pattern:$0x73625140]  ;;  %5133 = vrot.lane.b32.xlu0 %v5114_v63, %s7836_s25  ;;  %v5124_v21 = vld.sshfl [vmem:[#allocation1 + $0x30] sm:$0xff pattern:$0x73625140] }
 0x6bd   :  { %v4140_v26 = vpop.permute.xlu1 %4139  ;;  %5139 = vrot.lane.b32.xlu1 %v5120_v4, %s7836_s25  ;;  %v5122_v63 = vld.sshfl [vmem:[#allocation1 + $0x28] sm:$0xff pattern:$0x73625140] }
 0x6be   :  { %v3733_v57 = vpop.f32.mrf.mxu3  ;;  %v4155_v42 = vsel %vm602_vm4, %v4140_v26, %v4142_v38  ;;  %v4166_v38 = vand.u32 %v4156_v54, %v11766_v33  ;;  %v4158_v54 = vsel %vm602_vm4, %v9935_v37, %v9932_v27  ;;  %v5116_v27 = vld.sshfl [vmem:[#allocation1 + $0x10] sm:$0xff pattern:$0x73625140] }
 0x6bf   :  { %v3763_v25 = vadd.f32 %v3762_v52, %v3733_v57  ;;  %v4163_v15 = vand.u32 %v4155_v42, %v11766_v33  ;;  %v3765_v36 = vpop.f32.mrf.mxu1  ;;  %5135 = vrot.lane.b32.xlu2 %v5116_v27, %s7836_s25 }
 0x6c1   :  { %v3781_v30 = vpack.c.bf16 %v3763_v25, %v3763_v25  ;;  %4193 = vmatpush.bf16.msrb.mxu0 %v4163_v15  ;;  %v4178_v15 = vand.u32 %v4160_v24, %v11766_v33 }
 0x6c3   :  { %3790 = vst.msk [vmem:[%s11426_s7 + $0x4] sm:$0xf] %vm3788_vm15, %v3781_v30 }
 0x6c4   :  { %7210 = vmatmul.msk.bf16.vlgmr.msrb.gmra.mxu1 %vm271_vm3, %v9904_v23  ;;  %7217 = vmatmul.msk.bf16.vlgmr.msrb.gmra.mxu0 %vm271_vm3, %v9979_v9 }
 0x6c5   :  { %4249 = vmatpush.bf16.msra.mxu0 %v4175_v18  ;;  %v10009_v11 = vpop.permute.xlu1 %4153  ;;  %7208 = vmatmul.msk.bf16.vlgmr.msrb.gmra.mxu3 %vm271_vm3, %v9795_v31  ;;  %v10026_v31 = vpop.permute.xlu0 %4347 }
 0x6c6   :  { %v3736_v46 = vpop.f32.mrf.mxu3  ;;  %4207 = vmatpush.bf16.msrb.mxu1 %v4166_v38  ;;  %v4161_v40 = vsel %vm602_vm4, %v9943_v51, %v10009_v11  ;;  %4113 = vmatpush.bf16.msrb.mxu3 %v4006_v60  ;;  %v4355_v7 = vsel %vm805_vm5, %v10028_v55, %v10026_v31  ;;  %v5112_v38 = vld.sshfl [vmem:[#allocation1] sm:$0xff pattern:$0x73625140] }
 0x6c7   :  { %v3766_v1 = vadd.f32 %v3765_v36, %v3736_v46  ;;  %v4181_v35 = vand.u32 %v4161_v40, %v11766_v33  ;;  %v3767_v52 = vpop.f32.mrf.mxu1  ;;  %v4375_v26 = vand.u32 %v4355_v7, %v11766_v33  ;;  %v4172_v36 = vand.u32 %v4158_v54, %v11766_v33  ;;  %5143 = vrot.lane.b32.xlu1 %v5124_v21, %s7836_s25  ;;  %v10069_v46 = vpop.permute.xlu2 %4535 }
 0x6c8   :  { %5128 = vst [vmem:[#allocation1] ss:$4 sm:$0xff] %v9877_v28  ;;  %5131 = vrot.lane.b32.xlu2 %v5112_v38, %s7836_s25 }
 0x6c9   :  { %v3782_v12 = vpack.c.bf16 %v3766_v1, %v3766_v1  ;;  %4277 = vmatpush.bf16.msrb.mxu2 %v4181_v35 }
 0x6cb   :  { %3791 = vst.msk [vmem:[%s11426_s7 + $0x8] sm:$0xf] %vm3788_vm15, %v3782_v12 }
 0x6cc   :  { %7223 = vmatmul.msk.bf16.vlgmr.msrb.gmra.mxu2 %vm271_vm3, %v9979_v9 }
 0x6cd   :  { %v10037_v25 = vpop.permute.xlu1 %4339  ;;  %v10054_v18 = vpop.f32.mrf.mxu2 }
 0x6ce   :  { %v3738_v61 = vpop.f32.mrf.mxu3  ;;  %v4351_v30 = vsel %vm805_vm5, %v9959_v41, %v10037_v25  ;;  %v10067_v37 = vpop.permute.xlu0 %4537 }
 0x6cf   :  { %v3768_v57 = vadd.f32 %v3767_v52, %v3738_v61  ;;  %v4363_v42 = vand.u32 %v4351_v30, %v11766_v33  ;;  %v10056_v51 = vpop.f32.mrf.mxu0  ;;  %v4551_v22 = vsel %vm1014_vm6, %v10069_v46, %v10067_v37  ;;  %v5129_v4 = vld.sshfl [vmem:[#allocation1] sm:$0xff pattern:$0x73625140]  ;;  %5141 = vrot.lane.b32.xlu1 %v5122_v63, %s7836_s25 }
 0x6d0   :  { %v4564_v52 = vand.u32 %v4551_v22, %v11766_v33  ;;  %5147 = vrot.lane.b32.xlu0 %v5129_v4, %s7836_s25  ;;  %5309 = vst [vmem:[#allocation1] ss:$4 sm:$0xff] %v9619_v44  ;;  %v5126_v22 = vld.sshfl [vmem:[#allocation1 + $0x38] sm:$0xff pattern:$0x73625140] }
 0x6d1   :  { %v3783_v53 = vpack.c.bf16 %v3768_v57, %v3768_v57  ;;  %4415 = vmatpush.bf16.msra.mxu2 %v4363_v42  ;;  %5311 = vst [vmem:[#allocation1 + $0x20] ss:$4 sm:$0xff] %v9684_v5  ;;  %5145 = vrot.lane.b32.xlu2 %v5126_v22, %s7836_s25 }
 0x6d3   :  { %3792 = vst.msk [vmem:[%s11426_s7 + $0xc] sm:$0xf] %vm3788_vm15, %v3783_v53  ;;  %v4532_v53 = vpop.permute.xlu2 %4531 }
 0x6d4   :  { %7214 = vmatmul.msk.bf16.vlgmr.msra.gmra.mxu1 %vm271_vm3, %v9904_v23  ;;  %7221 = vmatmul.msk.bf16.vlgmr.msra.gmra.mxu0 %vm271_vm3, %v9979_v9 }
 0x6d5   :  { %4471 = vmatpush.bf16.msrb.mxu2 %v4375_v26  ;;  %7212 = vmatmul.msk.bf16.vlgmr.msra.gmra.mxu3 %vm271_vm3, %v9904_v23  ;;  %v4336_v60 = vpop.permute.xlu1 %4335  ;;  %v10079_v12 = vpop.f32.mrf.mxu2 }
 0x6d6   :  { %4263 = vmatpush.bf16.msra.mxu1 %v4178_v15  ;;  %v4349_v50 = vsel %vm805_vm5, %v9987_v45, %v4336_v60  ;;  %4235 = vmatpush.bf16.msra.mxu3 %v4172_v36  ;;  %11770 = vst [vmem:[#allocation123_spill] sm:$0xff] %v10079_v12  ;;  %v10090_v45 = vld [vmem:[%s11420_s1 + $0x18] sm:$0xff]  ;;  %v10094_v7 = vpop.permute.xlu0 %4533  ;;  %v4350_v44 = vsel %vm805_vm5, %v4336_v60, %v9959_v41 }
 0x6d7   :  { %v4357_v1 = vand.u32 %v4349_v50, %v11766_v33  ;;  %v10081_v40 = vpop.f32.mrf.mxu0  ;;  %v3770_v35 = vpop.f32.mrf.mxu1  ;;  %v4549_v42 = vsel %vm1014_vm6, %v4532_v53, %v10094_v7  ;;  %v4360_v36 = vand.u32 %v4350_v44, %v11766_v33  ;;  %v4184_v41 = vand.u32 %v10009_v11, %v11766_v33  ;;  %v5318_v50 = vld.sshfl [vmem:[#allocation1 + $0x18] sm:$0xff pattern:$0x73625140] }
 0x6d8   :  { %v4558_v60 = vand.u32 %v4549_v42, %v11766_v33  ;;  %5337 = vrot.lane.b32.xlu0 %v5318_v50, %s7837_s28  ;;  %v4352_v44 = vsel %vm805_vm5, %v10037_v25, %v9989_v39 }
 0x6d9   :  { %4387 = vmatpush.bf16.msrb.mxu0 %v4357_v1 }
 0x6db   :  { %v10135_v4 = vpop.permute.xlu2 %4545 }
 0x6dc   :  { %7227 = vmatmul.msk.bf16.vlgmr.msra.gmra.mxu2 %vm271_vm3, %v10090_v45 }
 0x6dd   :  { %v4344_v30 = vpop.permute.xlu1 %4343  ;;  %4616 = vmatpush.bf16.msra.mxu2 %v4564_v52  ;;  %v10108_v21 = vpop.f32.mrf.mxu2  ;;  %v5314_v52 = vld.sshfl [vmem:[#allocation1 + $0x8] sm:$0xff pattern:$0x73625140] }
 0x6de   :  { %v3741_v61 = vpop.f32.mrf.mxu3  ;;  %v4353_v26 = vsel %vm805_vm5, %v9989_v39, %v4344_v30  ;;  %v4354_v53 = vsel %vm805_vm5, %v4344_v30, %v10028_v55  ;;  %v4366_v55 = vand.u32 %v4352_v44, %v11766_v33  ;;  %v5316_v30 = vld.sshfl [vmem:[#allocation1 + $0x10] sm:$0xff pattern:$0x73625140] }
 0x6df   :  { %v3771_v57 = vadd.f32 %v3770_v35, %v3741_v61  ;;  %v4369_v54 = vand.u32 %v4353_v26, %v11766_v33  ;;  %v10110_v15 = vpop.f32.mrf.mxu0  ;;  %v3772_v38 = vpop.f32.mrf.mxu1  ;;  %v5320_v61 = vld.sshfl [vmem:[#allocation1 + $0x20] sm:$0xff pattern:$0x73625140]  ;;  %5335 = vrot.lane.b32.xlu2 %v5316_v30, %s7837_s28  ;;  %v4378_v30 = vand.u32 %v10026_v31, %v11766_v33 }
 0x6e0   :  { %5333 = vrot.lane.b32.xlu0 %v5314_v52, %s7837_s28  ;;  %5339 = vrot.lane.b32.xlu1 %v5320_v61, %s7837_s28  ;;  %v10186_v52 = vld [vmem:[%s11420_s1 + $0x20] sm:$0xff] }
 0x6e1   :  { %v3784_v24 = vpack.c.bf16 %v3771_v57, %v3771_v57  ;;  %4443 = vmatpush.bf16.msra.mxu0 %v4369_v54 }
 0x6e3   :  { %3793 = vst.msk [vmem:[%s11426_s7 + $0x10] sm:$0xf] %vm3788_vm15, %v3784_v24  ;;  %v10168_v25 = vpop.permute.xlu2 %4735 }
 0x6e4   :  { %7218 = vmatmul.msk.bf16.vlgmr.msrb.gmra.mxu1 %vm271_vm3, %v9979_v9  ;;  %7225 = vmatmul.msk.bf16.vlgmr.msrb.gmra.mxu0 %vm271_vm3, %v10090_v45 }
 0x6e5   :  { %7216 = vmatmul.msk.bf16.vlgmr.msrb.gmra.mxu3 %vm271_vm3, %v9904_v23  ;;  %v10124_v11 = vpop.permute.xlu1 %4539  ;;  %4401 = vmatpush.bf16.msrb.mxu1 %v4360_v36  ;;  %v10130_v5 = vpop.f32.mrf.mxu2 }
 0x6e6   :  { %v3743_v27 = vpop.f32.mrf.mxu3  ;;  %4291 = vmatpush.bf16.msrb.mxu3 %v4184_v41  ;;  %4588 = vmatpush.bf16.msrb.mxu0 %v4558_v60  ;;  %11771 = vst [vmem:[#allocation124_spill] sm:$0xff] %v10130_v5  ;;  %v10141_v23 = vpop.permute.xlu0 %4547  ;;  %v5324_v41 = vld.sshfl [vmem:[#allocation1 + $0x30] sm:$0xff pattern:$0x73625140] }
 0x6e7   :  { %v3773_v1 = vadd.f32 %v3772_v38, %v3743_v27  ;;  %v10132_v63 = vpop.f32.mrf.mxu0  ;;  %v4372_v38 = vand.u32 %v4354_v53, %v11766_v33 }
 0x6e8   :  { %5343 = vrot.lane.b32.xlu1 %v5324_v41, %s7837_s28 }
 0x6e9   :  { %v3785_v35 = vpack.c.bf16 %v3773_v1, %v3773_v1  ;;  %v5322_v1 = vld.sshfl [vmem:[#allocation1 + $0x28] sm:$0xff pattern:$0x73625140] }
 0x6eb   :  { %3794 = vst.msk [vmem:[%s11426_s7 + $0x14] sm:$0xf] %vm3788_vm15, %v3785_v35  ;;  %v4732_v53 = vpop.permute.xlu2 %4731 }
 0x6ec   :  { %7231 = vmatmul.msk.bf16.vlgmr.msrb.gmra.mxu2 %vm271_vm3, %v10090_v45 }
 0x6ed   :  { %v10143_v57 = vpop.permute.xlu1 %4543  ;;  %v10154_v54 = vpop.f32.mrf.mxu2 }
 0x6ee   :  { %v4555_v24 = vsel %vm1014_vm6, %v10143_v57, %v10135_v4  ;;  %v10166_v39 = vpop.permute.xlu0 %4737 }
 0x6ef   :  { %v4576_v26 = vand.u32 %v4555_v24, %v11766_v33  ;;  %v4017_v42 = vpop.f32.mrf.mxu0  ;;  %v4751_v60 = vsel %vm1223_vm7, %v10168_v25, %v10166_v39  ;;  %v5312_v24 = vld.sshfl [vmem:[#allocation1] sm:$0xff pattern:$0x73625140] }
 0x6f0   :  { %v10157_v36 = vadd.f32 %v4017_v42, %v9996_v43  ;;  %v4764_v35 = vand.u32 %v4751_v60, %v11766_v33  ;;  %5341 = vrot.lane.b32.xlu1 %v5322_v1, %s7837_s28  ;;  %5328 = vst [vmem:[#allocation1] ss:$4 sm:$0xff] %v9877_v28  ;;  %5331 = vrot.lane.b32.xlu2 %v5312_v24, %s7837_s28 }
 0x6f1   :  { %4672 = vmatpush.bf16.msrb.mxu2 %v4576_v26  ;;  %v4550_v26 = vsel %vm1014_vm6, %v10094_v7, %v10069_v46  ;;  %v5326_v46 = vld.sshfl [vmem:[#allocation1 + $0x38] sm:$0xff pattern:$0x73625140] }
 0x6f3   :  { %v10209_v28 = vpop.permute.xlu2 %4745 }
 0x6f4   :  { %7222 = vmatmul.msk.bf16.vlgmr.msra.gmra.mxu1 %vm271_vm3, %v9979_v9  ;;  %7229 = vmatmul.msk.bf16.vlgmr.msra.gmra.mxu0 %vm271_vm3, %v10090_v45 }
 0x6f5   :  { %7220 = vmatmul.msk.bf16.vlgmr.msra.gmra.mxu3 %vm271_vm3, %v9979_v9  ;;  %v4542_v43 = vpop.permute.xlu1 %4541  ;;  %4457 = vmatpush.bf16.msra.mxu1 %v4372_v38  ;;  %v10179_v22 = vpop.f32.mrf.mxu2 }
 0x6f6   :  { %v4553_v27 = vsel %vm1014_vm6, %v10124_v11, %v4542_v43  ;;  %4429 = vmatpush.bf16.msra.mxu3 %v4366_v55  ;;  %11772 = vst [vmem:[#allocation125_spill] sm:$0xff] %v10179_v22  ;;  %v4734_v61 = vpop.permute.xlu0 %4733  ;;  %v4561_v55 = vand.u32 %v4550_v26, %v11766_v33  ;;  %v4554_v1 = vsel %vm1014_vm6, %v4542_v43, %v10143_v57 }
 0x6f7   :  { %v4570_v50 = vand.u32 %v4553_v27, %v11766_v33  ;;  %v4749_v42 = vsel %vm1223_vm7, %v4732_v53, %v4734_v61  ;;  %v10218_v60 = vpop.f32.mrf.mxu0  ;;  %v4552_v53 = vsel %vm1014_vm6, %v10067_v37, %v10124_v11 }
 0x6f8   :  { %v4758_v27 = vand.u32 %v4749_v42, %v11766_v33  ;;  %5345 = vrot.lane.b32.xlu2 %v5326_v46, %s7837_s28  ;;  %11774 = vst [vmem:[#allocation127_spill] sm:$0xff] %v10218_v60  ;;  %v4567_v57 = vand.u32 %v4552_v53, %v11766_v33  ;;  %v4556_v53 = vsel %vm1014_vm6, %v10135_v4, %v10141_v23 }
 0x6f9   :  { %4644 = vmatpush.bf16.msra.mxu0 %v4570_v50 }
 0x6fb   :  { %v10245_v37 = vpop.permute.xlu2 %4935 }
 0x6fc   :  { %7235 = vmatmul.msk.bf16.vlgmr.msra.gmra.mxu2 %vm271_vm3, %v10186_v52 }
 0x6fd   :  { %4816 = vmatpush.bf16.msra.mxu2 %v4764_v35  ;;  %v10190_v44 = vpop.permute.xlu1 %4739  ;;  %v4045_v41 = vpop.f32.mrf.mxu2 }
 0x6fe   :  { %v10199_v38 = vadd.f32 %v4045_v41, %v10054_v18  ;;  %v10225_v35 = vpop.permute.xlu0 %4747 }
 0x6ff   :  { %v4073_v41 = vpop.f32.mrf.mxu0 }
 0x703   :  { %v4932_v46 = vpop.permute.xlu2 %4931 }
 0x704   :  { %7226 = vmatmul.msk.bf16.vlgmr.msrb.gmra.mxu1 %vm271_vm3, %v10090_v45  ;;  %7233 = vmatmul.msk.bf16.vlgmr.msrb.gmra.mxu0 %vm271_vm3, %v10186_v52 }
 0x705   :  { %7224 = vmatmul.msk.bf16.vlgmr.msrb.gmra.mxu3 %vm271_vm3, %v9979_v9  ;;  %4602 = vmatpush.bf16.msrb.mxu1 %v4561_v55  ;;  %v4744_v18 = vpop.permute.xlu1 %4743  ;;  %v10215_v7 = vpop.f32.mrf.mxu2  ;;  %v4573_v55 = vand.u32 %v4554_v1, %v11766_v33 }
 0x706   :  { %4485 = vmatpush.bf16.msrb.mxu3 %v4378_v30  ;;  %4788 = vmatpush.bf16.msrb.mxu0 %v4758_v27  ;;  %v4755_v31 = vsel %vm1223_vm7, %v4744_v18, %v10209_v28  ;;  %11773 = vst [vmem:[#allocation126_spill] sm:$0xff] %v10215_v7  ;;  %v10237_v30 = vadd.f32 %v4073_v41, %v10108_v21  ;;  %v10249_v21 = vpop.permute.xlu0 %4937  ;;  %v10258_v27 = vld [vmem:[%s11420_s1 + $0x28] sm:$0xff] }
 0x707   :  { %v4776_v50 = vand.u32 %v4755_v31, %v11766_v33  ;;  %v4951_v11 = vsel %vm1432_vm8, %v10245_v37, %v10249_v21  ;;  %v4579_v41 = vand.u32 %v4556_v53, %v11766_v33 }
 0x70c   :  { %7239 = vmatmul.msk.bf16.vlgmr.msrb.gmra.mxu2 %vm271_vm3, %v10186_v52 }
 0x70d   :  { %4872 = vmatpush.bf16.msrb.mxu2 %v4776_v50  ;;  %v4742_v9 = vpop.permute.xlu1 %4741  ;;  %v4101_v26 = vpop.f32.mrf.mxu2  ;;  %v4750_v50 = vsel %vm1223_vm7, %v4734_v61, %v10168_v25 }
 0x70e   :  { %v4753_v24 = vsel %vm1223_vm7, %v10190_v44, %v4742_v9  ;;  %v10233_v42 = vadd.f32 %v4101_v26, %v10154_v54  ;;  %v4964_v54 = vand.u32 %v4951_v11, %v11766_v33  ;;  %v4934_v1 = vpop.permute.xlu0 %4933  ;;  %v4761_v26 = vand.u32 %v4750_v50, %v11766_v33 }
 0x70f   :  { %v4770_v43 = vand.u32 %v4753_v24, %v11766_v33  ;;  %v4949_v24 = vsel %vm1432_vm8, %v4932_v46, %v4934_v1  ;;  %v10279_v25 = vpop.permute.xlu2 %4945  ;;  %v4754_v11 = vsel %vm1223_vm7, %v4742_v9, %v4744_v18 }
 0x710   :  { %v4773_v50 = vand.u32 %v4754_v11, %v11766_v33 }
 0x714   :  { %7230 = vmatmul.msk.bf16.vlgmr.msra.gmra.mxu1 %vm271_vm3, %v10090_v45  ;;  %7237 = vmatmul.msk.bf16.vlgmr.msra.gmra.mxu0 %vm271_vm3, %v10186_v52 }
 0x715   :  { %7228 = vmatmul.msk.bf16.vlgmr.msra.gmra.mxu3 %vm271_vm3, %v10090_v45  ;;  %4658 = vmatpush.bf16.msra.mxu1 %v4573_v55  ;;  %v10262_v31 = vpop.permute.xlu1 %4939  ;;  %v4958_v55 = vand.u32 %v4949_v24, %v11766_v33 }
 0x716   :  { %4630 = vmatpush.bf16.msra.mxu3 %v4567_v57  ;;  %4844 = vmatpush.bf16.msra.mxu0 %v4770_v43  ;;  %v5329_v57 = vld.sshfl [vmem:[#allocation1] sm:$0xff pattern:$0x73625140] }
 0x717   :  { %5347 = vrot.lane.b32.xlu0 %v5329_v57, %s7837_s28 }
 0x719   :  { %v10308_v18 = vpop.permute.xlu2 %5135 }
 0x71c   :  { %7243 = vmatmul.msk.bf16.vlgmr.msra.gmra.mxu2 %vm271_vm3, %v10258_v27 }
 0x71d   :  { %5016 = vmatpush.bf16.msra.mxu2 %v4964_v54  ;;  %v10281_v4 = vpop.permute.xlu1 %4943  ;;  %v4752_v54 = vsel %vm1223_vm7, %v10166_v39, %v10190_v44  ;;  %v10312_v39 = vpop.f32.mrf.mxu2 }
 0x71e   :  { %v4955_v23 = vsel %vm1432_vm8, %v10281_v4, %v10279_v25  ;;  %v4767_v24 = vand.u32 %v4752_v54, %v11766_v33  ;;  %11775 = vst [vmem:[#allocation128_spill] sm:$0xff] %v10312_v39  ;;  %v10325_v54 = vld [vmem:[%s11420_s1 + $0x30] sm:$0xff] }
 0x71f   :  { %v4976_v61 = vand.u32 %v4955_v23, %v11766_v33 }
 0x724   :  { %7234 = vmatmul.msk.bf16.vlgmr.msrb.gmra.mxu1 %vm271_vm3, %v10186_v52  ;;  %7241 = vmatmul.msk.bf16.vlgmr.msrb.gmra.mxu0 %vm271_vm3, %v10258_v27 }
 0x725   :  { %7232 = vmatmul.msk.bf16.vlgmr.msrb.gmra.mxu3 %vm271_vm3, %v10090_v45  ;;  %4802 = vmatpush.bf16.msrb.mxu1 %v4761_v26  ;;  %v10290_v45 = vpop.permute.xlu0 %4947  ;;  %v10292_v43 = vpop.permute.xlu1 %4941 }
 0x726   :  { %4988 = vmatpush.bf16.msrb.mxu0 %v4958_v55  ;;  %4686 = vmatpush.bf16.msrb.mxu3 %v4579_v41  ;;  %v4953_v46 = vsel %vm1432_vm8, %v10262_v31, %v10292_v43  ;;  %v10319_v41 = vpop.f32.mrf.mxu0 }
 0x727   :  { %v4970_v26 = vand.u32 %v4953_v46, %v11766_v33  ;;  %11776 = vst [vmem:[#allocation129_spill] sm:$0xff] %v10319_v41  ;;  %v5132_v46 = vpop.permute.xlu2 %5131 }
 0x72c   :  { %7247 = vmatmul.msk.bf16.vlgmr.msrb.gmra.mxu2 %vm271_vm3, %v10258_v27 }
 0x72d   :  { %5072 = vmatpush.bf16.msrb.mxu2 %v4976_v61  ;;  %v10314_v44 = vpop.permute.xlu0 %5137 }
 0x72e   :  { %v5151_v9 = vsel %vm1641_vm9, %v10308_v18, %v10314_v44 }
 0x72f   :  { %v5164_v57 = vand.u32 %v5151_v9, %v11766_v33 }
 0x731   :  { %v3775_v53 = vpop.f32.mrf.mxu1 }
 0x734   :  { %7238 = vmatmul.msk.bf16.vlgmr.msra.gmra.mxu1 %vm271_vm3, %v10186_v52  ;;  %7245 = vmatmul.msk.bf16.vlgmr.msra.gmra.mxu0 %vm271_vm3, %v10258_v27 }
 0x735   :  { %7236 = vmatmul.msk.bf16.vlgmr.msra.gmra.mxu3 %vm271_vm3, %v10186_v52  ;;  %4858 = vmatpush.bf16.msra.mxu1 %v4773_v50  ;;  %v10333_v50 = vpop.permute.xlu0 %5133 }
 0x736   :  { %4830 = vmatpush.bf16.msra.mxu3 %v4767_v24  ;;  %5044 = vmatpush.bf16.msra.mxu0 %v4970_v26  ;;  %v4950_v24 = vsel %vm1432_vm8, %v4934_v1, %v10245_v37  ;;  %v4756_v26 = vsel %vm1223_vm7, %v10209_v28, %v10225_v35 }
 0x737   :  { %v4779_v12 = vand.u32 %v4756_v26, %v11766_v33  ;;  %v4954_v26 = vsel %vm1432_vm8, %v10292_v43, %v10281_v4 }
 0x738   :  { %v3746_v55 = vpop.f32.mrf.mxu3 }
 0x739   :  { %v3776_v23 = vadd.f32 %v3775_v53, %v3746_v55  ;;  %v3777_v61 = vpop.f32.mrf.mxu1  ;;  %v10335_v53 = vpop.permute.xlu1 %5139  ;;  %v5149_v55 = vsel %vm1641_vm9, %v5132_v46, %v10333_v50 }
 0x73a   :  { %v5158_v28 = vand.u32 %v5149_v55, %v11766_v33 }
 0x73b   :  { %v3786_v11 = vpack.c.bf16 %v3776_v23, %v3776_v23 }
 0x73c   :  { %7251 = vmatmul.msk.bf16.vlgmr.msra.gmra.mxu2 %vm271_vm3, %v10325_v54 }
 0x73d   :  { %3795 = vst.msk [vmem:[%s11426_s7 + $0x18] sm:$0xf] %vm3788_vm15, %v3786_v11  ;;  %5216 = vmatpush.bf16.msra.mxu2 %v5164_v57  ;;  %v4961_v57 = vand.u32 %v4950_v24, %v11766_v33 }
 0x73f   :  { %v4223_v9 = vpop.f32.mrf.mxu2 }
 0x740   :  { %v10345_v23 = vadd.f32 %v4223_v9, %v10199_v38  ;;  %v3748_v11 = vpop.f32.mrf.mxu3  ;;  %v10357_v38 = vpop.permute.xlu2 %5145  ;;  %v4952_v9 = vsel %vm1432_vm8, %v10249_v21, %v10262_v31 }
 0x741   :  { %v3778_v39 = vadd.f32 %v3777_v61, %v3748_v11  ;;  %v4031_v22 = vpop.f32.mrf.mxu1  ;;  %v4195_v7 = vpop.f32.mrf.mxu0  ;;  %v4967_v4 = vand.u32 %v4952_v9, %v11766_v33 }
 0x742   :  { %v10350_v37 = vadd.f32 %v4195_v7, %v10157_v36  ;;  %v10365_v36 = vpop.permute.xlu1 %5143  ;;  %v4032_v5 = vadd.f32 %v4031_v22, %v9998_v62 }
 0x743   :  { %v3787_v35 = vpack.c.bf16 %v3778_v39, %v3778_v39  ;;  %v5155_v7 = vsel %vm1641_vm9, %v10365_v36, %v10357_v38 }
 0x744   :  { %7242 = vmatmul.msk.bf16.vlgmr.msrb.gmra.mxu1 %vm271_vm3, %v10258_v27  ;;  %7249 = vmatmul.msk.bf16.vlgmr.msrb.gmra.mxu0 %vm271_vm3, %v10325_v54  ;;  %v5176_v24 = vand.u32 %v5155_v7, %v11766_v33 }
 0x745   :  { %3796 = vst.msk [vmem:[%s11426_s7 + $0x1c] sm:$0xf] %vm3788_vm15, %v3787_v35  ;;  %7240 = vmatmul.msk.bf16.vlgmr.msrb.gmra.mxu3 %vm271_vm3, %v10186_v52  ;;  %5002 = vmatpush.bf16.msrb.mxu1 %v4961_v57  ;;  %v10381_v52 = vpop.permute.xlu0 %5147  ;;  %v4973_v35 = vand.u32 %v4954_v26, %v11766_v33 }
 0x746   :  { %5188 = vmatpush.bf16.msrb.mxu0 %v5158_v28  ;;  %4886 = vmatpush.bf16.msrb.mxu3 %v4779_v12 }
 0x747   :  { %v10370_v1 = vpop.f32.mrf.mxu2 }
 0x748   :  { %11777 = vst [vmem:[#allocation130_spill] sm:$0xff] %v10370_v1  ;;  %v10372_v39 = vpop.f32.mrf.mxu3  ;;  %v5150_v1 = vsel %vm1641_vm9, %v10333_v50, %v10308_v18 }
 0x749   :  { %v10374_v61 = vpop.f32.mrf.mxu1  ;;  %v10376_v46 = vpop.f32.mrf.mxu0  ;;  %v5161_v60 = vand.u32 %v5150_v1, %v11766_v33 }
 0x74a   :  { %11778 = vst [vmem:[#allocation131_spill] sm:$0xff] %v10376_v46  ;;  %v10383_v12 = vpop.permute.xlu1 %5141 }
 0x74b   :  { %v5153_v11 = vsel %vm1641_vm9, %v10335_v53, %v10383_v12 }
 0x74c   :  { %7255 = vmatmul.msk.bf16.vlgmr.msrb.gmra.mxu2 %vm271_vm3, %v10325_v54  ;;  %v5170_v21 = vand.u32 %v5153_v11, %v11766_v33 }
 0x74d   :  { %5272 = vmatpush.bf16.msrb.mxu2 %v5176_v24  ;;  %v10415_v31 = vpop.permute.xlu0 %5337 }
 0x74f   :  { %v4279_v55 = vpop.f32.mrf.mxu2 }
 0x750   :  { %v10395_v57 = vadd.f32 %v4279_v55, %v10233_v42  ;;  %v10397_v28 = vpop.f32.mrf.mxu3  ;;  %v10411_v42 = vpop.permute.xlu2 %5335 }
 0x751   :  { %v10400_v7 = vpop.f32.mrf.mxu1  ;;  %v4251_v24 = vpop.f32.mrf.mxu0 }
 0x752   :  { %v10404_v43 = vadd.f32 %v4251_v24, %v10237_v30  ;;  %v5351_v30 = vsel %vm1850_vm10, %v10411_v42, %v10415_v31 }
 0x753   :  { %v5364_v24 = vand.u32 %v5351_v30, %v11766_v33  ;;  %v4956_v30 = vsel %vm1432_vm8, %v10279_v25, %v10290_v45 }
 0x754   :  { %7246 = vmatmul.msk.bf16.vlgmr.msra.gmra.mxu1 %vm271_vm3, %v10258_v27  ;;  %7253 = vmatmul.msk.bf16.vlgmr.msra.gmra.mxu0 %vm271_vm3, %v10325_v54  ;;  %v4979_v18 = vand.u32 %v4956_v30, %v11766_v33  ;;  %v4088_v30 = vadd.f32 %v10400_v7, %v10110_v15 }
 0x755   :  { %7244 = vmatmul.msk.bf16.vlgmr.msra.gmra.mxu3 %vm271_vm3, %v10258_v27  ;;  %5058 = vmatpush.bf16.msra.mxu1 %v4973_v35  ;;  %v10432_v35 = vld [vmem:[%s11420_s1 + $0x38] sm:$0xff] }
 0x756   :  { %5030 = vmatpush.bf16.msra.mxu3 %v4967_v4  ;;  %5244 = vmatpush.bf16.msra.mxu0 %v5170_v21  ;;  %v10436_v21 = vpop.permute.xlu0 %5333 }
 0x757   :  { %v10420_v26 = vpop.f32.mrf.mxu2 }
 0x758   :  { %11779 = vst [vmem:[#allocation132_spill] sm:$0xff] %v10420_v26  ;;  %v10422_v9 = vpop.f32.mrf.mxu3  ;;  %v5332_v4 = vpop.permute.xlu2 %5331 }
 0x759   :  { %v10424_v55 = vpop.f32.mrf.mxu1  ;;  %v10426_v11 = vpop.f32.mrf.mxu0  ;;  %v5349_v41 = vsel %vm1850_vm10, %v5332_v4, %v10436_v21  ;;  %v4060_v15 = vadd.f32 %v10422_v9, %v10056_v51  ;;  %v5350_v51 = vsel %vm1850_vm10, %v10436_v21, %v10411_v42  ;;  %v5156_v9 = vsel %vm1641_vm9, %v10357_v38, %v10381_v52 }
 0x75a   :  { %11780 = vst [vmem:[#allocation133_spill] sm:$0xff] %v10426_v11  ;;  %v10438_v26 = vpop.permute.xlu1 %5339  ;;  %v5358_v45 = vand.u32 %v5349_v41, %v11766_v33  ;;  %v5179_v42 = vand.u32 %v5156_v9, %v11766_v33 }
 0x75c   :  { %7259 = vmatmul.msk.bf16.vlgmr.msra.gmra.mxu2 %vm271_vm3, %v10432_v35 }
 0x75d   :  { %5416 = vmatpush.bf16.msra.mxu2 %v5364_v24 }
 0x75f   :  { %v4417_v11 = vpop.f32.mrf.mxu2 }
 0x760   :  { %v10450_v24 = vadd.f32 %v4417_v11, %v10345_v23  ;;  %v4061_v46 = vpop.f32.mrf.mxu3  ;;  %v10464_v62 = vpop.permute.xlu2 %5345 }
 0x761   :  { %v4209_v8 = vpop.f32.mrf.mxu1  ;;  %v4389_v48 = vpop.f32.mrf.mxu0 }
 0x762   :  { %v10454_v50 = vadd.f32 %v4209_v8, %v4032_v5  ;;  %v10457_v25 = vadd.f32 %v4389_v48, %v10350_v37  ;;  %v10468_v22 = vpop.permute.xlu1 %5343  ;;  %v4034_v5 = vadd.f32 %v10374_v61, %v10024_v14  ;;  %v5154_v14 = vsel %vm1641_vm9, %v10383_v12, %v10365_v36 }
 0x763   :  { %v5355_v48 = vsel %vm1850_vm10, %v10468_v22, %v10464_v62 }
 0x764   :  { %7250 = vmatmul.msk.bf16.vlgmr.msrb.gmra.mxu1 %vm271_vm3, %v10325_v54  ;;  %7257 = vmatmul.msk.bf16.vlgmr.msrb.gmra.mxu0 %vm271_vm3, %v10432_v35 }
 0x765   :  { %7248 = vmatmul.msk.bf16.vlgmr.msrb.gmra.mxu3 %vm271_vm3, %v10258_v27  ;;  %5202 = vmatpush.bf16.msrb.mxu1 %v5161_v60  ;;  %v5376_v60 = vand.u32 %v5355_v48, %v11766_v33  ;;  %v5173_v48 = vand.u32 %v5154_v14, %v11766_v33 }
 0x766   :  { %5388 = vmatpush.bf16.msrb.mxu0 %v5358_v45  ;;  %5086 = vmatpush.bf16.msrb.mxu3 %v4979_v18 }
 0x767   :  { %v10473_v8 = vpop.f32.mrf.mxu2 }
 0x768   :  { %v4115_v41 = vpop.f32.mrf.mxu3 }
 0x769   :  { %v10478_v23 = vadd.f32 %v4115_v41, %v10372_v39  ;;  %v4211_v37 = vpop.f32.mrf.mxu1  ;;  %v10480_v27 = vpop.f32.mrf.mxu0  ;;  %v5152_v39 = vsel %vm1641_vm9, %v10314_v44, %v10335_v53 }
 0x76a   :  { %v10483_v1 = vadd.f32 %v4211_v37, %v4034_v5  ;;  %v10487_v11 = vpop.permute.xlu1 %5341  ;;  %v5167_v41 = vand.u32 %v5152_v39, %v11766_v33 }
 0x76b   :  { %v5353_v4 = vsel %vm1850_vm10, %v10438_v26, %v10487_v11 }
 0x76c   :  { %7263 = vmatmul.msk.bf16.vlgmr.msrb.gmra.mxu2 %vm271_vm3, %v10432_v35  ;;  %v5370_v37 = vand.u32 %v5353_v4, %v11766_v33 }
 0x76d   :  { %5472 = vmatpush.bf16.msrb.mxu2 %v5376_v60 }
 0x76f   :  { %v4473_v61 = vpop.f32.mrf.mxu2 }
 0x770   :  { %v4498_v18 = vadd.f32 %v4473_v61, %v10395_v57  ;;  %v4117_v45 = vpop.f32.mrf.mxu3  ;;  %v10525_v61 = vld [vmem:[%s11420_s1 + $0x40] sm:$0xff] }
 0x771   :  { %v4118_v5 = vadd.f32 %v4117_v45, %v10397_v28  ;;  %v4265_v36 = vpop.f32.mrf.mxu1  ;;  %v4445_v12 = vpop.f32.mrf.mxu0  ;;  %v4090_v28 = vadd.f32 %v10424_v55, %v10132_v63  ;;  %v4062_v63 = vadd.f32 %v4061_v46, %v10081_v40  ;;  %v5361_v45 = vand.u32 %v5350_v51, %v11766_v33  ;;  %v11789_v51 = vld [vmem:[#allocation35_spill] sm:$0xff] }
 0x772   :  { %v4303_v44 = vadd.f32 %v4265_v36, %v4088_v30  ;;  %v4496_v53 = vadd.f32 %v4445_v12, %v10404_v43 }
 0x774   :  { %7254 = vmatmul.msk.bf16.vlgmr.msra.gmra.mxu1 %vm271_vm3, %v10325_v54  ;;  %7261 = vmatmul.msk.bf16.vlgmr.msra.gmra.mxu0 %vm271_vm3, %v10432_v35 }
 0x775   :  { %7252 = vmatmul.msk.bf16.vlgmr.msra.gmra.mxu3 %vm271_vm3, %v10325_v54  ;;  %5258 = vmatpush.bf16.msra.mxu1 %v5173_v48 }
 0x776   :  { %5230 = vmatpush.bf16.msra.mxu3 %v5167_v41  ;;  %5444 = vmatpush.bf16.msra.mxu0 %v5370_v37 }
 0x777   :  { %v10514_v57 = vpop.f32.mrf.mxu2 }
 0x778   :  { %v4237_v7 = vpop.f32.mrf.mxu3 }
 0x779   :  { %v4301_v43 = vadd.f32 %v4237_v7, %v4060_v15  ;;  %v4267_v60 = vpop.f32.mrf.mxu1  ;;  %v10518_v14 = vpop.f32.mrf.mxu0  ;;  %v11786_v15 = vld [vmem:[#allocation33_spill] sm:$0xff] }
 0x77a   :  { %v10520_v39 = vadd.f32 %v4267_v60, %v4090_v28  ;;  %v11787_v28 = vld [vmem:[#allocation62_spill] sm:$0xff]  ;;  %v11788_v60 = vld [vmem:[#allocation11_spill] sm:$0xff] }
 0x77c   :  { %7267 = vmatmul.msk.bf16.vlgmr.msra.gmra.mxu2 %vm271_vm3, %v10525_v61 }
 0x77d   :  { %5816 = vmatpush.bf16.msra.mxu2 %v8950_v3 }
 0x77f   :  { %v4618_v55 = vpop.f32.mrf.mxu2 }
 0x780   :  { %v4695_v4 = vadd.f32 %v4618_v55, %v10450_v24  ;;  %v4239_v30 = vpop.f32.mrf.mxu3  ;;  %v11792_v55 = vld [vmem:[#allocation38_spill] sm:$0xff] }
 0x781   :  { %v10539_v48 = vadd.f32 %v4239_v30, %v4062_v63  ;;  %v4403_v36 = vpop.f32.mrf.mxu1  ;;  %v4590_v3 = vpop.f32.mrf.mxu0  ;;  %5817 = vmatpush.bf16.msra.mxu2 %v8965_v16  ;;  %v11791_v63 = vld [vmem:[#allocation8_spill] sm:$0xff] }
 0x782   :  { %v4493_v40 = vadd.f32 %v4403_v36, %v10454_v50  ;;  %v4693_v46 = vadd.f32 %v4590_v3, %v10457_v25 }
 0x784   :  { %7258 = vmatmul.msk.bf16.vlgmr.msrb.gmra.mxu1 %vm271_vm3, %v10432_v35  ;;  %7265 = vmatmul.msk.bf16.vlgmr.msrb.gmra.mxu0 %vm271_vm3, %v10525_v61 }
 0x785   :  { %7256 = vmatmul.msk.bf16.vlgmr.msrb.gmra.mxu3 %vm271_vm3, %v10325_v54  ;;  %5402 = vmatpush.bf16.msrb.mxu1 %v5361_v45  ;;  %v11794_v45 = vld [vmem:[#allocation69_spill] sm:$0xff] }
 0x786   :  { %5286 = vmatpush.bf16.msrb.mxu3 %v5179_v42  ;;  %5788 = vmatpush.bf16.msrb.mxu0 %v8890_v29  ;;  %v5354_v29 = vsel %vm1850_vm10, %v10487_v11, %v10468_v22  ;;  %v11795_v42 = vld [vmem:[#allocation12_spill] sm:$0xff] }
 0x787   :  { %v10552_v16 = vpop.f32.mrf.mxu2  ;;  %5818 = vmatpush.bf16.msra.mxu2 %v8977_v17  ;;  %v5352_v17 = vsel %vm1850_vm10, %v10415_v31, %v10438_v26 }
 0x788   :  { %v4293_v38 = vpop.f32.mrf.mxu3  ;;  %v5367_v41 = vand.u32 %v5352_v17, %v11766_v33  ;;  %v11799_v17 = vld [vmem:[#allocation15_spill] sm:$0xff] }
 0x789   :  { %v4305_v52 = vadd.f32 %v4293_v38, %v10478_v23  ;;  %v10556_v21 = vpop.f32.mrf.mxu1  ;;  %v10558_v24 = vpop.f32.mrf.mxu0  ;;  %v11796_v38 = vld [vmem:[#allocation40_spill] sm:$0xff] }
 0x78a   :  { %5789 = vmatpush.bf16.msrb.mxu0 %v8893_v32  ;;  %v5348_v26 = vpop.permute.xlu0 %5347 }
 0x78b   :  { %5819 = vmatpush.bf16.msra.mxu2 %v8987_v19  ;;  %v5373_v19 = vand.u32 %v5354_v29, %v11766_v33  ;;  %v11798_v29 = vld [vmem:[#allocation7_spill] sm:$0xff] }
 0x78c   :  { %7271 = vmatmul.msk.bf16.vlgmr.msrb.gmra.mxu2 %vm271_vm3, %v10525_v61 }
 0x78e   :  { %5790 = vmatpush.bf16.msrb.mxu0 %v8904_v59 }
 0x78f   :  { %v4674_v54 = vpop.f32.mrf.mxu2  ;;  %5820 = vmatpush.bf16.msra.mxu2 %v8996_v34 }
 0x790   :  { %v4699_v50 = vadd.f32 %v4674_v54, %v4498_v18  ;;  %v4295_v32 = vpop.f32.mrf.mxu3  ;;  %v5356_v18 = vsel %vm1850_vm10, %v10464_v62, %v5348_v26  ;;  %v11785_v62 = vld [vmem:[#allocation14_spill] sm:$0xff]  ;;  %v11806_v26 = vld [vmem:[#allocation20_spill] sm:$0xff] }
 0x791   :  { %v10573_v25 = vadd.f32 %v4295_v32, %v4118_v5  ;;  %v4459_v23 = vpop.f32.mrf.mxu1  ;;  %v4646_v12 = vpop.f32.mrf.mxu0  ;;  %v11800_v54 = vld [vmem:[#allocation42_spill] sm:$0xff]  ;;  %v11801_v32 = vld [vmem:[#allocation77_spill] sm:$0xff] }
 0x792   :  { %v4497_v22 = vadd.f32 %v4459_v23, %v4303_v44  ;;  %v4697_v11 = vadd.f32 %v4646_v12, %v4496_v53  ;;  %5791 = vmatpush.bf16.msrb.mxu0 %v8916_v2 }
 0x793   :  { %11781 = vst [vmem:[#allocation134_spill] sm:$0xff] %v10573_v25  ;;  %5821 = vmatpush.bf16.msra.mxu2 %v9007_v6 }
 0x794   :  { %7262 = vmatmul.msk.bf16.vlgmr.msra.gmra.mxu1 %vm271_vm3, %v10432_v35  ;;  %7269 = vmatmul.msk.bf16.vlgmr.msra.gmra.mxu0 %vm271_vm3, %v10525_v61 }
 0x795   :  { %7260 = vmatmul.msk.bf16.vlgmr.msra.gmra.mxu3 %vm271_vm3, %v10432_v35  ;;  %5458 = vmatpush.bf16.msra.mxu1 %v5373_v19 }
 0x796   :  { %5430 = vmatpush.bf16.msra.mxu3 %v5367_v41  ;;  %5792 = vmatpush.bf16.msrb.mxu0 %v8928_v56  ;;  %v11802_v41 = vld [vmem:[#allocation24_spill] sm:$0xff] }
 0x797   :  { %v10585_v59 = vpop.f32.mrf.mxu2  ;;  %5822 = vmatpush.bf16.msra.mxu2 %v9019_v10 }
 0x798   :  { %11782 = vst [vmem:[#allocation135_spill] sm:$0xff] %v10585_v59  ;;  %v4431_v2 = vpop.f32.mrf.mxu3 }
 0x799   :  { %v4495_v34 = vadd.f32 %v4431_v2, %v4301_v43  ;;  %v10588_v6 = vpop.f32.mrf.mxu1  ;;  %v10590_v31 = vpop.f32.mrf.mxu0  ;;  %v11805_v2 = vld [vmem:[#allocation16_spill] sm:$0xff] }
 0x79a   :  { %5793 = vmatpush.bf16.msrb.mxu0 %v8945_v47 }
 0x79b   :  { %5823 = vmatpush.bf16.msra.mxu2 %v9028_v58  ;;  %v5379_v58 = vand.u32 %v5356_v18, %v11766_v33 }
 0x79e   :  { %5794 = vmatpush.bf16.msrb.mxu0 %v8960_v20  ;;  %v11784_v20 = vld [vmem:[#allocation59_spill] sm:$0xff] }
 0x79f   :  { %5872 = vmatpush.bf16.msrb.mxu2 %v9104_v0  ;;  %v4818_v56 = vpop.f32.mrf.mxu2  ;;  %v11783_v0 = vld [vmem:[#allocation31_spill] sm:$0xff] }
 0x7a0   :  { %v10598_v10 = vadd.f32 %v4818_v56, %v4695_v4  ;;  %v10600_v5 = vpop.f32.mrf.mxu3  ;;  %v11807_v56 = vld [vmem:[#allocation47_spill] sm:$0xff] }
 0x7a1   :  { %v4604_v44 = vpop.f32.mrf.mxu1  ;;  %v4790_v53 = vpop.f32.mrf.mxu0 }
 0x7a2   :  { %v4694_v47 = vadd.f32 %v4604_v44, %v4493_v40  ;;  %v4893_v37 = vadd.f32 %v4790_v53, %v4693_v46  ;;  %5795 = vmatpush.bf16.msrb.mxu0 %v8973_v49  ;;  %v11808_v53 = vld [vmem:[#allocation22_spill] sm:$0xff] }
 0x7a3   :  { %5873 = vmatpush.bf16.msrb.mxu2 %v9117_v13 }
 0x7a4   :  { %7266 = vmatmul.msk.bf16.vlgmr.msrb.gmra.mxu1 %vm271_vm3, %v10525_v61 }
 0x7a5   :  { %7264 = vmatmul.msk.bf16.vlgmr.msrb.gmra.mxu3 %vm271_vm3, %v10432_v35  ;;  %5802 = vmatpush.bf16.msrb.mxu1 %v11785_v62  ;;  %v11790_v35 = vld [vmem:[#allocation65_spill] sm:$0xff] }
 0x7a6   :  { %5844 = vmatpush.bf16.msra.mxu0 %v11783_v0  ;;  %5486 = vmatpush.bf16.msrb.mxu3 %v5379_v58  ;;  %v11810_v62 = vld [vmem:[#allocation17_spill] sm:$0xff] }
 0x7a7   :  { %5874 = vmatpush.bf16.msrb.mxu2 %v11784_v20  ;;  %v10612_v13 = vpop.f32.mrf.mxu2  ;;  %v11809_v20 = vld [vmem:[#allocation18_spill] sm:$0xff] }
 0x7a8   :  { %v4487_v33 = vpop.f32.mrf.mxu3 }
 0x7a9   :  { %v4499_v49 = vadd.f32 %v4487_v33, %v4305_v52  ;;  %v10616_v7 = vpop.f32.mrf.mxu1  ;;  %v10618_v43 = vpop.f32.mrf.mxu0  ;;  %5803 = vmatpush.bf16.msrb.mxu1 %v11788_v60  ;;  %v11797_v52 = vld [vmem:[#allocation73_spill] sm:$0xff]  ;;  %v11812_v33 = vld [vmem:[#allocation6_spill] sm:$0xff] }
 0x7aa   :  { %5845 = vmatpush.bf16.msra.mxu0 %v11786_v15  ;;  %v11811_v15 = vld [vmem:[#allocation23_spill] sm:$0xff] }
 0x7ab   :  { %5875 = vmatpush.bf16.msrb.mxu2 %v11787_v28 }
 0x7ad   :  { %5804 = vmatpush.bf16.msrb.mxu1 %v11791_v63  ;;  %v11813_v63 = vld [vmem:[#allocation9_spill] sm:$0xff] }
 0x7ae   :  { %5846 = vmatpush.bf16.msra.mxu0 %v11789_v51 }
 0x7af   :  { %5876 = vmatpush.bf16.msrb.mxu2 %v11790_v35  ;;  %v4874_v9 = vpop.f32.mrf.mxu2 }
 0x7b0   :  { %v10625_v4 = vadd.f32 %v4874_v9, %v4699_v50  ;;  %v10627_v30 = vpop.f32.mrf.mxu3  ;;  %v11816_v9 = vld [vmem:[#allocation19_spill] sm:$0xff] }
 0x7b1   :  { %11793 = vst [vmem:[#allocation31_spill] sm:$0xff] %v10627_v30  ;;  %v4660_v36 = vpop.f32.mrf.mxu1  ;;  %v4846_v3 = vpop.f32.mrf.mxu0  ;;  %5805 = vmatpush.bf16.msrb.mxu1 %v11795_v42  ;;  %v11820_v42 = vld [vmem:[#allocation29_spill] sm:$0xff] }
 0x7b2   :  { %5847 = vmatpush.bf16.msra.mxu0 %v11792_v55  ;;  %v4698_v40 = vadd.f32 %v4660_v36, %v4497_v22  ;;  %v10631_v46 = vadd.f32 %v4846_v3, %v4697_v11  ;;  %v11803_v22 = vld [vmem:[#allocation21_spill] sm:$0xff]  ;;  %v11804_v11 = vld [vmem:[#allocation44_spill] sm:$0xff]  ;;  %v11819_v3 = vld [vmem:[#allocation27_spill] sm:$0xff] }
 0x7b3   :  { %5877 = vmatpush.bf16.msrb.mxu2 %v11794_v45 }
 0x7b4   :  { %7270 = vmatmul.msk.bf16.vlgmr.msra.gmra.mxu1 %vm271_vm3, %v10525_v61 }
 0x7b5   :  { %7268 = vmatmul.msk.bf16.vlgmr.msra.gmra.mxu3 %vm271_vm3, %v10525_v61  ;;  %5806 = vmatpush.bf16.msrb.mxu1 %v11798_v29  ;;  %v11823_v29 = vld [vmem:[#allocation30_spill] sm:$0xff] }
 0x7b6   :  { %5848 = vmatpush.bf16.msra.mxu0 %v11796_v38  ;;  %5830 = vmatpush.bf16.msra.mxu3 %v11799_v17  ;;  %v11821_v38 = vld [vmem:[#allocation28_spill] sm:$0xff] }
 0x7b7   :  { %5878 = vmatpush.bf16.msrb.mxu2 %v11797_v52  ;;  %v10674_v36 = vpop.f32.mrf.mxu2  ;;  %v11822_v52 = vld [vmem:[#allocation32_spill] sm:$0xff] }
 0x7b8   :  { %v4632_v50 = vpop.f32.mrf.mxu3  ;;  %11818 = vst [vmem:[#allocation14_spill] sm:$0xff] %v10674_v36 }
 0x7b9   :  { %v4696_v19 = vadd.f32 %v4632_v50, %v4495_v34  ;;  %v10643_v23 = vpop.f32.mrf.mxu1  ;;  %v10645_v12 = vpop.f32.mrf.mxu0  ;;  %5807 = vmatpush.bf16.msrb.mxu1 %v11802_v41  ;;  %v11824_v41 = vld [vmem:[#allocation34_spill] sm:$0xff] }
 0x7ba   :  { %5849 = vmatpush.bf16.msra.mxu0 %v11800_v54  ;;  %5831 = vmatpush.bf16.msra.mxu3 %v11803_v22  ;;  %v11825_v22 = vld [vmem:[#allocation36_spill] sm:$0xff] }
 0x7bb   :  { %5879 = vmatpush.bf16.msrb.mxu2 %v11801_v32 }
 0x7bd   :  { %5808 = vmatpush.bf16.msrb.mxu1 %v11805_v2 }
 0x7be   :  { %5850 = vmatpush.bf16.msra.mxu0 %v11804_v11  ;;  %5832 = vmatpush.bf16.msra.mxu3 %v11806_v26 }
 0x7c0   :  { %v10653_v18 = vpop.f32.mrf.mxu3 }
 0x7c1   :  { %v4804_v44 = vpop.f32.mrf.mxu1  ;;  %v4990_v34 = vpop.f32.mrf.mxu0  ;;  %5809 = vmatpush.bf16.msrb.mxu1 %v11808_v53 }
 0x7c2   :  { %5851 = vmatpush.bf16.msra.mxu0 %v11807_v56  ;;  %v4894_v58 = vadd.f32 %v4804_v44, %v4694_v47  ;;  %v5093_v0 = vadd.f32 %v4990_v34, %v4893_v37  ;;  %5833 = vmatpush.bf16.msra.mxu3 %v11809_v20  ;;  %v11814_v47 = vld [vmem:[#allocation10_spill] sm:$0xff]  ;;  %v11815_v37 = vld [vmem:[#allocation13_spill] sm:$0xff] }
 0x7c5   :  { %5858 = vmatpush.bf16.msra.mxu1 %v11810_v62  ;;  %7272 = vmatmul.msk.bf16.vlgmr.msrb.gmra.mxu3 %vm271_vm3, %v10525_v61  ;;  %vm11915_vm3 = vcmask 916480  }
 0x7c6   :  { %5834 = vmatpush.bf16.msra.mxu3 %v11811_v15 }
 0x7c8   :  { %v4688_v28 = vpop.f32.mrf.mxu3 }
 0x7c9   :  { %5859 = vmatpush.bf16.msra.mxu1 %v11812_v33  ;;  %v4700_v60 = vadd.f32 %v4688_v28, %v4499_v49  ;;  %v10662_v51 = vpop.f32.mrf.mxu1  ;;  %v10664_v35 = vpop.f32.mrf.mxu0 }
 0x7ca   :  { %5835 = vmatpush.bf16.msra.mxu3 %v11813_v63 }
 0x7cd   :  { %5860 = vmatpush.bf16.msra.mxu1 %v11814_v47 }
 0x7ce   :  { %5836 = vmatpush.bf16.msra.mxu3 %v11815_v37 }
 0x7d0   :  { %v10670_v55 = vpop.f32.mrf.mxu3 }
 0x7d1   :  { %5861 = vmatpush.bf16.msra.mxu1 %v11816_v9  ;;  %11817 = vst [vmem:[#allocation59_spill] sm:$0xff] %v10670_v55  ;;  %v4860_v61 = vpop.f32.mrf.mxu1  ;;  %v10672_v45 = vpop.f32.mrf.mxu0 }
 0x7d2   :  { %v10676_v49 = vadd.f32 %v4860_v61, %v4698_v40  ;;  %5837 = vmatpush.bf16.msra.mxu3 %v11819_v3  ;;  %v10690_v40 = vpop.f32.mrf.mxu2 }
 0x7d5   :  { %5862 = vmatpush.bf16.msra.mxu1 %v11820_v42 }
 0x7d6   :  { %5892 = vmatpush.bf16.msrb.mxu3 %v11821_v38 }
 0x7d8   :  { %v4832_v17 = vpop.f32.mrf.mxu3 }
 0x7d9   :  { %5863 = vmatpush.bf16.msra.mxu1 %v11822_v52  ;;  %v10683_v54 = vadd.f32 %v4832_v17, %v4696_v19  ;;  %v10685_v50 = vpop.f32.mrf.mxu1  ;;  %v10687_v32 = vpop.f32.mrf.mxu0 }
 0x7da   :  { %5893 = vmatpush.bf16.msrb.mxu3 %v11823_v29  ;;  %v10695_v34 = vpop.f32.mrf.mxu2 }
 0x7dd   :  { %5864 = vmatpush.bf16.msra.mxu1 %v11824_v41 }
 0x7e0   :  { %v10693_v11 = vpop.f32.mrf.mxu3 }
 0x7e1   :  { %5865 = vmatpush.bf16.msra.mxu1 %v11825_v22  ;;  %v5004_v2 = vpop.f32.mrf.mxu1  ;;  %v5190_v26 = vpop.f32.mrf.mxu0  ;;  %v11831_v22 = vld [vmem:[#allocation5_spill] sm:$0xff] }
 0x7e2   :  { %v5094_v56 = vadd.f32 %v5004_v2, %v4894_v58  ;;  %v5293_v44 = vadd.f32 %v5190_v26, %v5093_v0  ;;  %v10699_v62 = vpop.f32.mrf.mxu2  ;;  %v11832_v2 = vld [vmem:[#allocation127_spill] sm:$0xff] }
 0x7e3   :  { %v4020_v26 = vadd.f32 %v11832_v2, %v11831_v22 }
 0x7e8   :  { %v4888_v19 = vpop.f32.mrf.mxu3 }
 0x7e9   :  { %v10697_v53 = vadd.f32 %v4888_v19, %v4700_v60  ;;  %v5006_v20 = vpop.f32.mrf.mxu1  ;;  %v5192_v28 = vpop.f32.mrf.mxu0 }
 0x7ea   :  { %v10707_v37 = vpop.f32.mrf.mxu2 }
 0x7eb   :  { %11826 = vst [vmem:[#allocation33_spill] sm:$0xff] %v10697_v53 }
 0x7ec   :  { %11828 = vst [vmem:[#allocation11_spill] sm:$0xff] %v10707_v37 }
 0x7f0   :  { %v10701_v15 = vpop.f32.mrf.mxu3 }
 0x7f1   :  { %11827 = vst [vmem:[#allocation62_spill] sm:$0xff] %v10701_v15  ;;  %v5060_v33 = vpop.f32.mrf.mxu1  ;;  %v5246_v0 = vpop.f32.mrf.mxu0 }
 0x7f2   :  { %v10711_v60 = vpop.f32.mrf.mxu2 }
 0x7f8   :  { %v10703_v63 = vpop.f32.mrf.mxu3 }
 0x7f9   :  { %v10705_v47 = vpop.f32.mrf.mxu1  ;;  %v10715_v38 = vpop.f32.mrf.mxu0 }
 0x7fa   :  { %v10717_v52 = vpop.f32.mrf.mxu2 }
 0x800   :  { %v10709_v58 = vpop.f32.mrf.mxu3 }
 0x801   :  { %v5204_v9 = vpop.f32.mrf.mxu1  ;;  %v5390_v41 = vpop.f32.mrf.mxu0 }
 0x802   :  { %v5294_v61 = vadd.f32 %v5204_v9, %v5094_v56  ;;  %v10723_v19 = vpop.f32.mrf.mxu2  ;;  %v11834_v9 = vld [vmem:[#allocation131_spill] sm:$0xff]  ;;  %v5493_v30 = vadd.f32 %v5390_v41, %v5293_v44 }
 0x803   :  { %11833 = vst [vmem:[#allocation8_spill] sm:$0xff] %v10723_v19  ;;  %v4306_v37 = vadd.f32 %v11834_v9, %v4020_v26  ;;  %v11835_v26 = vld [vmem:[#allocation25_spill] sm:$0xff] }
 0x805   :  { %v4500_v55 = vadd.f32 %v10480_v27, %v4306_v37  ;;  %v10742_v27 = vadd.f32 %v5493_v30, %v11835_v26  ;;  %v11836_v37 = vld [vmem:[#allocation124_spill] sm:$0xff]  ;;  %v11838_v30 = vld [vmem:[#allocation133_spill] sm:$0xff] }
 0x807   :  { %v4701_v36 = vadd.f32 %v10558_v24, %v4500_v55 }
 0x808   :  { %v10713_v3 = vpop.f32.mrf.mxu3 }
 0x809   :  { %11829 = vst [vmem:[#allocation35_spill] sm:$0xff] %v10713_v3  ;;  %v5206_v42 = vpop.f32.mrf.mxu1  ;;  %v5392_v25 = vpop.f32.mrf.mxu0  ;;  %v4901_v3 = vadd.f32 %v10618_v43, %v4701_v36  ;;  %v5525_v43 = vmax.f32 %v10742_v27, 0.0 }
 0x80a   :  { %v10739_v19 = vpop.f32.mrf.mxu2 }
 0x80b   :  { %v5101_v59 = vadd.f32 %v10664_v35, %v4901_v3  ;;  %v11837_v35 = vld [vmem:[#allocation129_spill] sm:$0xff] }
 0x80c   :  { %v4076_v3 = vadd.f32 %v11837_v35, %v11836_v37 }
 0x80d   :  { %v5301_v44 = vadd.f32 %v5192_v28, %v5101_v59  ;;  %v5097_v59 = vadd.f32 %v10672_v45, %v10631_v46  ;;  %v11840_v45 = vld [vmem:[#allocation123_spill] sm:$0xff] }
 0x80f   :  { %v5501_v36 = vadd.f32 %v5392_v25, %v5301_v44  ;;  %v5098_v44 = vadd.f32 %v5060_v33, %v10676_v49  ;;  %v5095_v49 = vadd.f32 %v10690_v40, %v10598_v10 }
 0x810   :  { %v10719_v29 = vpop.f32.mrf.mxu3 }
 0x811   :  { %11830 = vst [vmem:[#allocation65_spill] sm:$0xff] %v10719_v29  ;;  %v5260_v17 = vpop.f32.mrf.mxu1  ;;  %v4501_v29 = vadd.f32 %v10556_v21, %v10483_v1  ;;  %v5446_v9 = vpop.f32.mrf.mxu0 }
 0x813   :  { %v4702_v53 = vadd.f32 %v10616_v7, %v4501_v29 }
 0x815   :  { %v4902_v55 = vadd.f32 %v10662_v51, %v4702_v53  ;;  %v11839_v53 = vld [vmem:[#allocation26_spill] sm:$0xff] }
 0x817   :  { %v5102_v21 = vadd.f32 %v5006_v20, %v4902_v55  ;;  %v10758_v20 = vadd.f32 %v5501_v36, %v11839_v53  ;;  %v11841_v36 = vld [vmem:[#allocation126_spill] sm:$0xff] }
 0x818   :  { %v10725_v15 = vpop.f32.mrf.mxu3  ;;  %v4048_v35 = vadd.f32 %v11841_v36, %v11840_v45 }
 0x819   :  { %v10727_v56 = vpop.f32.mrf.mxu1  ;;  %v5302_v29 = vadd.f32 %v5206_v42, %v5102_v21  ;;  %v5533_v21 = vmax.f32 %v10758_v20, 0.0 }
 0x820   :  { %v10735_v22 = vpop.f32.mrf.mxu3 }
 0x821   :  { %v5404_v2 = vpop.f32.mrf.mxu1 }
 0x822   :  { %v5494_v24 = vadd.f32 %v5404_v2, %v5294_v61  ;;  %v4310_v61 = vadd.f32 %v11838_v30, %v4076_v3  ;;  %v5297_v2 = vadd.f32 %v5246_v0, %v5097_v59  ;;  %v5298_v3 = vadd.f32 %v5260_v17, %v5098_v44  ;;  %v11842_v30 = vld [vmem:[#allocation130_spill] sm:$0xff] }
 0x824   :  { %v10746_v1 = vadd.f32 %v5494_v24, %v11835_v26  ;;  %v4504_v25 = vadd.f32 %v10518_v14, %v4310_v61  ;;  %v5418_v24 = vpop.f32.mrf.mxu2  ;;  %v5497_v37 = vadd.f32 %v5446_v9, %v5297_v2  ;;  %v4505_v14 = vadd.f32 %v10588_v6, %v10520_v39 }
 0x825   :  { %v5295_v6 = vadd.f32 %v10711_v60, %v5095_v49 }
 0x826   :  { %v5526_v7 = vmax.f32 %v10746_v1, 0.0  ;;  %v4705_v42 = vadd.f32 %v10590_v31, %v4504_v25  ;;  %v4308_v31 = vadd.f32 %v11842_v30, %v4048_v35  ;;  %v4706_v61 = vadd.f32 %v10643_v23, %v4505_v14 }
 0x827   :  { %v5495_v40 = vadd.f32 %v5418_v24, %v5295_v6 }
 0x828   :  { %v10752_v41 = vpop.f32.mrf.mxu3  ;;  %v4905_v0 = vadd.f32 %v10645_v12, %v4705_v42  ;;  %v4502_v39 = vadd.f32 %v10473_v8, %v4308_v31  ;;  %v5448_v12 = vpop.f32.mrf.mxu0  ;;  %v4906_v17 = vadd.f32 %v10685_v50, %v4706_v61  ;;  %v4503_v50 = vadd.f32 %v10600_v5, %v10539_v48 }
 0x829   :  { %v5406_v51 = vpop.f32.mrf.mxu1 }
 0x82a   :  { %v5502_v28 = vadd.f32 %v5406_v51, %v5302_v29  ;;  %v5105_v9 = vadd.f32 %v10687_v32, %v4905_v0  ;;  %v10781_v51 = vadd.f32 %v5497_v37, %v11835_v26  ;;  %v4703_v23 = vadd.f32 %v10552_v16, %v4502_v39  ;;  %v11843_v0 = vld [vmem:[#allocation125_spill] sm:$0xff] }
 0x82b   :  { %v5096_v32 = vadd.f32 %v10703_v63, %v10683_v54  ;;  %v5106_v25 = vadd.f32 %v10705_v47, %v4906_v17  ;;  %v4704_v54 = vadd.f32 %v10653_v18, %v4503_v50  ;;  %v10804_v47 = vadd.f32 %v5495_v40, %v11835_v26  ;;  %v11846_v17 = vld [vmem:[#allocation8_spill] sm:$0xff] }
 0x82c   :  { %v10762_v55 = vadd.f32 %v5502_v28, %v11839_v53  ;;  %v5305_v28 = vadd.f32 %v10715_v38, %v5105_v9  ;;  %v5420_v2 = vpop.f32.mrf.mxu2  ;;  %v5529_v8 = vmax.f32 %v10781_v51, 0.0  ;;  %v4903_v38 = vadd.f32 %v10612_v13, %v4703_v23 }
 0x82d   :  { %v5296_v44 = vadd.f32 %v10725_v15, %v5096_v32  ;;  %v5306_v16 = vadd.f32 %v10727_v56, %v5106_v25  ;;  %v4904_v5 = vadd.f32 %v10693_v11, %v4704_v54  ;;  %v5527_v56 = vmax.f32 %v10804_v47, 0.0  ;;  %v11847_v32 = vld [vmem:[#allocation135_spill] sm:$0xff] }
 0x82e   :  { %v5534_v46 = vmax.f32 %v10762_v55, 0.0  ;;  %v5505_v60 = vadd.f32 %v5448_v12, %v5305_v28  ;;  %v5103_v63 = vadd.f32 %v10695_v34, %v4903_v38  ;;  %v5099_v9 = vadd.f32 %v10699_v62, %v10625_v4  ;;  %v11848_v62 = vld [vmem:[#allocation33_spill] sm:$0xff]  ;;  %v11849_v25 = vld [vmem:[#allocation35_spill] sm:$0xff] }
 0x82f   :  { %v5104_v35 = vadd.f32 %v10709_v58, %v4904_v5  ;;  %v11851_v38 = vld [vmem:[#allocation31_spill] sm:$0xff] }
 0x830   :  { %v10773_v29 = vpop.f32.mrf.mxu3  ;;  %v10807_v36 = vadd.f32 %v5505_v60, %v11839_v53  ;;  %v5303_v13 = vadd.f32 %v10717_v52, %v5103_v63  ;;  %v11844_v52 = vld [vmem:[#allocation128_spill] sm:$0xff]  ;;  %v5299_v28 = vadd.f32 %v11846_v17, %v5099_v9  ;;  %v11853_v63 = vld [vmem:[#allocation59_spill] sm:$0xff] }
 0x831   :  { %v5460_v33 = vpop.f32.mrf.mxu1  ;;  %v5304_v49 = vadd.f32 %v10735_v22, %v5104_v35 }
 0x832   :  { %v5498_v59 = vadd.f32 %v5460_v33, %v5298_v3  ;;  %v5503_v14 = vadd.f32 %v5420_v2, %v5303_v13  ;;  %v4104_v3 = vadd.f32 %v11844_v52, %v11843_v0  ;;  %v5537_v30 = vmax.f32 %v10807_v36, 0.0  ;;  %v11845_v33 = vld [vmem:[#allocation132_spill] sm:$0xff] }
 0x833   :  { %v5100_v2 = vadd.f32 %v11849_v25, %v11848_v62 }
 0x834   :  { %v10788_v10 = vadd.f32 %v5498_v59, %v11835_v26  ;;  %v4312_v61 = vadd.f32 %v11845_v33, %v4104_v3  ;;  %v5474_v58 = vpop.f32.mrf.mxu2  ;;  %v10834_v39 = vadd.f32 %v5503_v14, %v11839_v53  ;;  %v11855_v14 = vld [vmem:[#allocation62_spill] sm:$0xff]  ;;  %v11856_v33 = vld [vmem:[#allocation65_spill] sm:$0xff] }
 0x835   :  { %v5499_v60 = vadd.f32 %v5474_v58, %v5299_v28  ;;  %v5300_v54 = vadd.f32 %v10752_v41, %v5100_v2  ;;  %v7650_v28 = vpack.i.bf16 %v5534_v46, %v5533_v21 }
 0x836   :  { %v5530_v42 = vmax.f32 %v10788_v10, 0.0  ;;  %v4506_v12 = vadd.f32 %v10514_v57, %v4312_v61  ;;  %v5535_v4 = vmax.f32 %v10834_v39, 0.0  ;;  %v11850_v57 = vld [vmem:[#allocation134_spill] sm:$0xff] }
 0x837   :  { %v10855_v13 = vadd.f32 %v5499_v60, %v11835_v26 }
 0x838   :  { %v5432_v37 = vpop.f32.mrf.mxu3  ;;  %v7620_v34 = vpack.i.bf16 %v5530_v42, %v5529_v8  ;;  %v4707_v40 = vadd.f32 %v11847_v32, %v4506_v12 }
 0x839   :  { %v5496_v24 = vadd.f32 %v5432_v37, %v5296_v44  ;;  %v5462_v45 = vpop.f32.mrf.mxu1  ;;  %v4507_v44 = vadd.f32 %v11851_v38, %v11850_v57 }
 0x83a   :  { %v5506_v48 = vadd.f32 %v5462_v45, %v5306_v16  ;;  %7621 = vrot.lane.b32.xlu0 %v7620_v34, %s7829_s3  ;;  %v11852_v16 = vld [vmem:[#allocation14_spill] sm:$0xff]  ;;  %v11854_v45 = vld [vmem:[#allocation11_spill] sm:$0xff] }
 0x83b   :  { %v10812_v15 = vadd.f32 %v5496_v24, %v11835_v26  ;;  %v4907_v37 = vadd.f32 %v11852_v16, %v4707_v40  ;;  %v4708_v24 = vadd.f32 %v11853_v63, %v4507_v44 }
 0x83c   :  { %v10815_v18 = vadd.f32 %v5506_v48, %v11839_v53  ;;  %v5476_v35 = vpop.f32.mrf.mxu2 }
 0x83d   :  { %v5528_v11 = vmax.f32 %v10812_v15, 0.0  ;;  %v5107_v48 = vadd.f32 %v11854_v45, %v4907_v37  ;;  %v4908_v0 = vadd.f32 %v11855_v14, %v4708_v24 }
 0x83e   :  { %v5538_v31 = vmax.f32 %v10815_v18, 0.0 }
 0x83f   :  { %v7625_v22 = vpack.i.bf16 %v5528_v11, %v5527_v56  ;;  %v5307_v52 = vadd.f32 %v10739_v19, %v5107_v48  ;;  %v5108_v61 = vadd.f32 %v11856_v33, %v4908_v0 }
 0x840   :  { %v5434_v59 = vpop.f32.mrf.mxu3 }
 0x841   :  { %v5504_v6 = vadd.f32 %v5434_v59, %v5304_v49  ;;  %7626 = vrot.lane.b32.xlu2 %v7625_v22, %s7829_s3  ;;  %v5531_v49 = vmax.f32 %v10855_v13, 0.0  ;;  %v5507_v9 = vadd.f32 %v5476_v35, %v5307_v52  ;;  %v5308_v59 = vadd.f32 %v10773_v29, %v5108_v61 }
 0x842   :  { %v7645_v22 = vpack.i.bf16 %v5526_v7, %v5525_v43 }
 0x843   :  { %v5520_v23 = vadd.f32 %v5504_v6, %v11839_v53  ;;  %v10870_v19 = vadd.f32 %v5507_v9, %v11839_v53  ;;  %v7635_v17 = vpack.i.bf16 %v5535_v4, %v5531_v49 }
 0x845   :  { %v5536_v50 = vmax.f32 %v5520_v23, 0.0  ;;  %v5539_v29 = vmax.f32 %v10870_v19, 0.0  ;;  %7636 = vrot.lane.b32.xlu1 %v7635_v17, %s7829_s3 }
 0x847   :  { %v7630_v41 = vpack.i.bf16 %v5537_v30, %v5536_v50 }
 0x848   :  { %v5488_v5 = vpop.f32.mrf.mxu3 }
 0x849   :  { %v5500_v34 = vadd.f32 %v5488_v5, %v5300_v54  ;;  %7631 = vrot.lane.b32.xlu2 %v7630_v41, %s7829_s3 }
 0x84b   :  { %v10860_v3 = vadd.f32 %v5500_v34, %v11835_v26 }
 0x84d   :  { %v5532_v58 = vmax.f32 %v10860_v3, 0.0  ;;  %7646 = vrot.lane.b32.xlu1 %v7645_v22, %s7829_s3 }
 0x850   :  { %v5490_v6 = vpop.f32.mrf.mxu3 }
 0x851   :  { %v5508_v26 = vadd.f32 %v5490_v6, %v5308_v59  ;;  %7651 = vrot.lane.b32.xlu2 %v7650_v28, %s7829_s3 }
 0x853   :  { %v10873_v12 = vadd.f32 %v5508_v26, %v11839_v53  ;;  %v7640_v53 = vpack.i.bf16 %v5539_v29, %v5538_v31 }
 0x855   :  { %v5540_v23 = vmax.f32 %v10873_v12, 0.0  ;;  %7641 = vrot.lane.b32.xlu0 %v7640_v53, %s7829_s3 }
 0x857   :  { %v7655_v32 = vpack.i.bf16 %v5540_v23, %v5532_v58 }
 0x85d   :  { %7656 = vrot.lane.b32.xlu0 %v7655_v32, %s7829_s3 }
 0x89b   :  { %v7627_v40 = vpop.permute.xlu2 %7626 }
 0x89c   :  { %v7629_v60 = vunpack.i.h.bf16 %v7627_v40  ;;  %v7628_v57 = vunpack.i.l.bf16 %v7627_v40 }
 0x89e   :  { %v5615_v54 = vsel %vm263_vm2, %v7628_v57, %v7629_v60 }
 0x89f   :  { %v10912_v35 = vmax.f32 %v5527_v56, %v5615_v54 }
 0x8a3   :  { %v7632_v25 = vpop.permute.xlu2 %7631 }
 0x8a4   :  { %v7634_v38 = vunpack.i.h.bf16 %v7632_v25  ;;  %v7633_v44 = vunpack.i.l.bf16 %v7632_v25 }
 0x8a6   :  { %v5623_v63 = vsel %vm263_vm2, %v7633_v44, %v7634_v38 }
 0x8a7   :  { %v10914_v14 = vmax.f32 %v5536_v50, %v5623_v63 }
 0x8ab   :  { %v7652_v0 = vpop.permute.xlu2 %7651 }
 0x8ac   :  { %v7622_v62 = vpop.permute.xlu0 %7621  ;;  %v7654_v56 = vunpack.i.h.bf16 %v7652_v0  ;;  %v7653_v50 = vunpack.i.l.bf16 %v7652_v0 }
 0x8ad   :  { %v7623_v2 = vunpack.i.l.bf16 %v7622_v62  ;;  %v7624_v16 = vunpack.i.h.bf16 %v7622_v62 }
 0x8ae   :  { %v5620_v51 = vsel %vm263_vm2, %v7653_v50, %v7654_v56 }
 0x8af   :  { %v5616_v37 = vsel %vm263_vm2, %v7629_v60, %v7623_v2  ;;  %v5617_v48 = vsel %vm263_vm2, %v7623_v2, %v7624_v16  ;;  %v5651_v18 = vmax.f32 %v5533_v21, %v5620_v51 }
 0x8b0   :  { %v10907_v24 = vmax.f32 %v5528_v11, %v5616_v37  ;;  %v10920_v15 = vmax.f32 %v5529_v8, %v5617_v48 }
 0x8b2   :  { %v7665_v10 = vpack.i.bf16 %v10920_v15, %v10907_v24 }
 0x8b4   :  { %7666 = vrot.lane.b32.xlu1 %v7665_v10, %s7831_s13  ;;  %v11859_v10 = vld [vmem:[#allocation49_spill] sm:$0xff] }
 0x8b7   :  { %v7637_v45 = vpop.permute.xlu1 %7636 }
 0x8b8   :  { %v7639_v5 = vunpack.i.h.bf16 %v7637_v45  ;;  %v7638_v34 = vunpack.i.l.bf16 %v7637_v45 }
 0x8ba   :  { %v5618_v52 = vsel %vm263_vm2, %v7624_v16, %v7638_v34  ;;  %v5622_v41 = vsel %vm263_vm2, %v7639_v5, %v7633_v44  ;;  %v5621_v8 = vsel %vm263_vm2, %v7654_v56, %v7639_v5 }
 0x8bb   :  { %v10924_v11 = vmax.f32 %v5530_v42, %v5618_v52  ;;  %v10928_v47 = vmax.f32 %v5535_v4, %v5622_v41  ;;  %v5652_v36 = vmax.f32 %v5534_v46, %v5621_v8 }
 0x8bd   :  { %v7660_v42 = vpack.i.bf16 %v10928_v47, %v10912_v35  ;;  %v7680_v12 = vpack.i.bf16 %v5652_v36, %v5651_v18 }
 0x8bf   :  { %v7647_v61 = vpop.permute.xlu1 %7646  ;;  %7661 = vrot.lane.b32.xlu0 %v7660_v42, %s7831_s13 }
 0x8c0   :  { %v7649_v6 = vunpack.i.h.bf16 %v7647_v61  ;;  %v7648_v26 = vunpack.i.l.bf16 %v7647_v61 }
 0x8c2   :  { %v5613_v17 = vsel %vm263_vm2, %v7648_v26, %v7649_v6  ;;  %v5614_v28 = vsel %vm263_vm2, %v7649_v6, %v7628_v57 }
 0x8c3   :  { %v10950_v32 = vmax.f32 %v5525_v43, %v5613_v17  ;;  %v10954_v40 = vmax.f32 %v5526_v7, %v5614_v28  ;;  %v11860_v17 = vld [vmem:[#allocation83_spill] sm:$0xff] }
 0x8c5   :  { %v7670_v1 = vpack.i.bf16 %v10954_v40, %v10950_v32 }
 0x8c7   :  { %v7642_v33 = vpop.permute.xlu0 %7641  ;;  %7671 = vrot.lane.b32.xlu1 %v7670_v1, %s7831_s13  ;;  %v11863_v1 = vld [vmem:[#allocation37_spill] sm:$0xff] }
 0x8c8   :  { %v7644_v9 = vunpack.i.h.bf16 %v7642_v33  ;;  %v7643_v59 = vunpack.i.l.bf16 %v7642_v33  ;;  %v11857_v33 = vld [vmem:[#allocation46_spill] sm:$0xff] }
 0x8ca   :  { %v5624_v39 = vsel %vm263_vm2, %v7634_v38, %v7643_v59  ;;  %v5625_v4 = vsel %vm263_vm2, %v7643_v59, %v7644_v9 }
 0x8cb   :  { %v10942_v53 = vmax.f32 %v5537_v30, %v5624_v39  ;;  %v10946_v22 = vmax.f32 %v5538_v31, %v5625_v4 }
 0x8cd   :  { %v7675_v27 = vpack.i.bf16 %v10942_v53, %v10914_v14  ;;  %v7695_v13 = vpack.i.bf16 %v10946_v22, %v10924_v11 }
 0x8cf   :  { %v7657_v30 = vpop.permute.xlu0 %7656  ;;  %7676 = vrot.lane.b32.xlu2 %v7675_v27, %s7831_s13 }
 0x8d0   :  { %v7659_v31 = vunpack.i.h.bf16 %v7657_v30  ;;  %v7658_v62 = vunpack.i.l.bf16 %v7657_v30  ;;  %v11861_v30 = vld [vmem:[#allocation51_spill] sm:$0xff] }
 0x8d2   :  { %v5626_v43 = vsel %vm263_vm2, %v7644_v9, %v7659_v31  ;;  %v10969_v7 = vmax.f32 %v5540_v23, %v7659_v31  ;;  %v5619_v55 = vsel %vm263_vm2, %v7638_v34, %v7658_v62  ;;  %v10974_v20 = vmax.f32 %v5532_v58, %v7658_v62 }
 0x8d3   :  { %v10978_v21 = vmax.f32 %v5539_v29, %v5626_v43  ;;  %v10982_v46 = vmax.f32 %v5531_v49, %v5619_v55 }
 0x8d4   :  { %v7685_v23 = vpack.i.bf16 %v10969_v7, %v10974_v20 }
 0x8d5   :  { %v7690_v3 = vpack.i.bf16 %v10978_v21, %v10982_v46 }
 0x8d6   :  { %7686 = vrot.lane.b32.xlu0 %v7685_v23, %s7831_s13  ;;  %v11864_v23 = vld [vmem:[#allocation87_spill] sm:$0xff] }
 0x8d7   :  { %7681 = vrot.lane.b32.xlu2 %v7680_v12, %s7831_s13  ;;  %7691 = vrot.lane.b32.xlu1 %v7690_v3, %s7831_s13 }
 0x8df   :  { %7696 = vrot.lane.b32.xlu2 %v7695_v13, %s7831_s13 }
 0x926   :  { %v11000_v29 = vpop.permute.xlu1 %7666 }
 0x927   :  { %v7669_v2 = vunpack.i.h.bf16 %v11000_v29  ;;  %v7668_v60 = vunpack.i.l.bf16 %v11000_v29 }
 0x929   :  { %v10996_v49 = vpop.permute.xlu2 %7676  ;;  %v5734_v37 = vsel %vm805_vm5, %v7668_v60, %v7669_v2 }
 0x92a   :  { %v7679_v58 = vunpack.i.h.bf16 %v10996_v49  ;;  %v7678_v19 = vunpack.i.l.bf16 %v10996_v49  ;;  %v5764_v63 = vmax.f32 %v10907_v24, %v5734_v37  ;;  %v11868_v37 = vld [vmem:[#allocation90_spill] sm:$0xff] }
 0x92b   :  { %v11869_v49 = vld [vmem:[#allocation54_spill] sm:$0xff] }
 0x92c   :  { %v5741_v25 = vsel %vm805_vm5, %v7678_v19, %v7679_v58 }
 0x92d   :  { %v5772_v54 = vmax.f32 %v10914_v14, %v5741_v25 }
 0x92f   :  { %v11014_v0 = vpack.c.bf16 %v5772_v54, %v5764_v63  ;;  %v11870_v63 = vld [vmem:[#allocation66_spill] sm:$0xff] }
 0x931   :  { %v7662_v57 = vpop.permute.xlu0 %7661  ;;  %v7682_v38 = vpop.permute.xlu2 %7681  ;;  %5838 = vmatmul.bf16.vlgmr.msra.gmra.mxu3 %v11014_v0 }
 0x932   :  { %v7664_v44 = vunpack.i.h.bf16 %v7662_v57  ;;  %v7663_v16 = vunpack.i.l.bf16 %v7662_v57  ;;  %v7684_v45 = vunpack.i.h.bf16 %v7682_v38  ;;  %v7683_v48 = vunpack.i.l.bf16 %v7682_v38  ;;  %5900 = vmatpush.bf16.msra.mxu3 %v11857_v33  ;;  %v11882_v33 = vld [vmem:[#allocation78_spill] sm:$0xff] }
 0x934   :  { %v5740_v5 = vsel %vm805_vm5, %v7664_v44, %v7678_v19  ;;  %v5733_v34 = vsel %vm805_vm5, %v7663_v16, %v7668_v60  ;;  %v5738_v14 = vsel %vm805_vm5, %v7683_v48, %v7684_v45  ;;  %v5739_v24 = vsel %vm805_vm5, %v7684_v45, %v7664_v44  ;;  %v11865_v60 = vld [vmem:[#allocation53_spill] sm:$0xff] }
 0x935   :  { %v5771_v52 = vmax.f32 %v10928_v47, %v5740_v5  ;;  %v5763_v41 = vmax.f32 %v10912_v35, %v5733_v34  ;;  %v11858_v35 = vld [vmem:[#allocation79_spill] sm:$0xff]  ;;  %v5769_v6 = vmax.f32 %v5651_v18, %v5738_v14  ;;  %v5770_v26 = vmax.f32 %v5652_v36, %v5739_v24  ;;  %v11871_v45 = vld [vmem:[#allocation41_spill] sm:$0xff]  ;;  %v11880_v14 = vld [vmem:[#allocation98_spill] sm:$0xff] }
 0x936   :  { %5901 = vmatpush.bf16.msra.mxu3 %v11859_v10  ;;  %v11872_v48 = vld [vmem:[#allocation93_spill] sm:$0xff]  ;;  %v11873_v5 = vld [vmem:[#allocation55_spill] sm:$0xff]  ;;  %v11892_v10 = vld [vmem:[#allocation52_spill] sm:$0xff] }
 0x937   :  { %v11018_v56 = vpack.c.bf16 %v5771_v52, %v5763_v41  ;;  %v11874_v52 = vld [vmem:[#allocation70_spill] sm:$0xff]  ;;  %v11875_v41 = vld [vmem:[#allocation43_spill] sm:$0xff]  ;;  %v11881_v24 = vld [vmem:[#allocation57_spill] sm:$0xff] }
 0x939   :  { %v7672_v50 = vpop.permute.xlu1 %7671  ;;  %5824 = vmatmul.bf16.vlgmr.msra.gmra.mxu2 %v11018_v56  ;;  %v7697_v4 = vpop.permute.xlu2 %7696 }
 0x93a   :  { %v7674_v61 = vunpack.i.h.bf16 %v7672_v50  ;;  %v7673_v9 = vunpack.i.l.bf16 %v7672_v50  ;;  %5942 = vmatpush.bf16.msra.mxu2 %v11858_v35  ;;  %5902 = vmatpush.bf16.msra.mxu3 %v11861_v30  ;;  %v7698_v43 = vunpack.i.l.bf16 %v7697_v4  ;;  %v11879_v50 = vld [vmem:[#allocation45_spill] sm:$0xff]  ;;  %v11887_v35 = vld [vmem:[#allocation82_spill] sm:$0xff]  ;;  %v11898_v30 = vld [vmem:[#allocation71_spill] sm:$0xff] }
 0x93c   :  { %v5732_v59 = vsel %vm805_vm5, %v7674_v61, %v7663_v16  ;;  %v5731_v47 = vsel %vm805_vm5, %v7673_v9, %v7674_v61  ;;  %v5735_v44 = vsel %vm805_vm5, %v7669_v2, %v7698_v43  ;;  %v11883_v61 = vld [vmem:[#allocation58_spill] sm:$0xff]  ;;  %v11884_v9 = vld [vmem:[#allocation48_spill] sm:$0xff] }
 0x93d   :  { %v5762_v51 = vmax.f32 %v10954_v40, %v5732_v59  ;;  %v5761_v8 = vmax.f32 %v10950_v32, %v5731_v47  ;;  %v11862_v40 = vld [vmem:[#allocation60_spill] sm:$0xff]  ;;  %v7699_v32 = vunpack.i.h.bf16 %v7697_v4  ;;  %v11886_v47 = vld [vmem:[#allocation102_spill] sm:$0xff] }
 0x93e   :  { %5943 = vmatpush.bf16.msra.mxu2 %v11860_v17  ;;  %5903 = vmatpush.bf16.msra.mxu3 %v11865_v60  ;;  %v11885_v59 = vld [vmem:[#allocation100_spill] sm:$0xff] }
 0x93f   :  { %v11031_v42 = vpack.c.bf16 %v5770_v26, %v5762_v51  ;;  %v5777_v39 = vpack.c.bf16 %v5769_v6, %v5761_v8  ;;  %v5742_v57 = vsel %vm805_vm5, %v7679_v58, %v7699_v32  ;;  %v5765_v58 = vmax.f32 %v10920_v15, %v5735_v44  ;;  %v11876_v15 = vld [vmem:[#allocation96_spill] sm:$0xff]  ;;  %v11888_v6 = vld [vmem:[#allocation50_spill] sm:$0xff]  ;;  %v11889_v26 = vld [vmem:[#allocation61_spill] sm:$0xff] }
 0x940   :  { %v11890_v51 = vld [vmem:[#allocation104_spill] sm:$0xff]  ;;  %v11891_v8 = vld [vmem:[#allocation86_spill] sm:$0xff] }
 0x941   :  { %5796 = vmatmul.bf16.vlgmr.msrb.gmra.mxu0 %v5777_v39  ;;  %5810 = vmatmul.bf16.vlgmr.msrb.gmra.mxu1 %v11031_v42  ;;  %v11893_v4 = vld [vmem:[#allocation64_spill] sm:$0xff] }
 0x942   :  { %5914 = vmatpush.bf16.msrb.mxu0 %v11862_v40  ;;  %5928 = vmatpush.bf16.msrb.mxu1 %v11863_v1  ;;  %v11894_v17 = vld [vmem:[#allocation88_spill] sm:$0xff]  ;;  %v11908_v1 = vld [vmem:[#allocation85_spill] sm:$0xff] }
 0x943   :  { %5944 = vmatpush.bf16.msra.mxu2 %v11864_v23  ;;  %5904 = vmatpush.bf16.msra.mxu3 %v11869_v49  ;;  %v11902_v40 = vld [vmem:[#allocation76_spill] sm:$0xff] }
 0x944   :  { %v11912_v23 = vld [vmem:[#allocation92_spill] sm:$0xff] }
 0x947   :  { %5945 = vmatpush.bf16.msra.mxu2 %v11868_v37  ;;  %5905 = vmatpush.bf16.msra.mxu3 %v11873_v5 }
 0x948   :  { %v7687_v28 = vpop.permute.xlu0 %7686 }
 0x949   :  { %v7689_v18 = vunpack.i.h.bf16 %v7687_v28  ;;  %v7688_v36 = vunpack.i.l.bf16 %v7687_v28  ;;  %v7692_v31 = vpop.permute.xlu1 %7691  ;;  %v11897_v28 = vld [vmem:[#allocation91_spill] sm:$0xff] }
 0x94a   :  { %v7694_v62 = vunpack.i.h.bf16 %v7692_v31  ;;  %v7693_v27 = vunpack.i.l.bf16 %v7692_v31  ;;  %v11901_v31 = vld [vmem:[#allocation75_spill] sm:$0xff] }
 0x94b   :  { %v5776_v55 = vmax.f32 %v10969_v7, %v7689_v18  ;;  %v5768_v12 = vmax.f32 %v10974_v20, %v7688_v36  ;;  %v11866_v7 = vld [vmem:[#allocation63_spill] sm:$0xff]  ;;  %5946 = vmatpush.bf16.msra.mxu2 %v11872_v48 }
 0x94c   :  { %v5744_v3 = vsel %vm805_vm5, %v7694_v62, %v7689_v18  ;;  %v5737_v13 = vsel %vm805_vm5, %v7693_v27, %v7688_v36  ;;  %5915 = vmatpush.bf16.msrb.mxu0 %v11866_v7  ;;  %v11867_v20 = vld [vmem:[#allocation39_spill] sm:$0xff]  ;;  %v5743_v16 = vsel %vm805_vm5, %v7699_v32, %v7694_v62  ;;  %v11899_v18 = vld [vmem:[#allocation72_spill] sm:$0xff]  ;;  %v11900_v36 = vld [vmem:[#allocation94_spill] sm:$0xff] }
 0x94d   :  { %v5784_v19 = vpack.c.bf16 %v5776_v55, %v5768_v12  ;;  %v5775_v25 = vmax.f32 %v10978_v21, %v5744_v3  ;;  %v5767_v38 = vmax.f32 %v10982_v46, %v5737_v13  ;;  %5929 = vmatpush.bf16.msrb.mxu1 %v11867_v20  ;;  %v5736_v21 = vsel %vm805_vm5, %v7698_v43, %v7693_v27  ;;  %v11903_v32 = vld [vmem:[#allocation97_spill] sm:$0xff]  ;;  %v11906_v62 = vld [vmem:[#allocation99_spill] sm:$0xff]  ;;  %v11907_v27 = vld [vmem:[#allocation84_spill] sm:$0xff] }
 0x94e   :  { %v5773_v46 = vmax.f32 %v10942_v53, %v5742_v57  ;;  %v5774_v29 = vmax.f32 %v10946_v22, %v5743_v16  ;;  %v5766_v2 = vmax.f32 %v10924_v11, %v5736_v21  ;;  %v11877_v11 = vld [vmem:[#allocation56_spill] sm:$0xff]  ;;  %v11878_v22 = vld [vmem:[#allocation74_spill] sm:$0xff]  ;;  %v11909_v43 = vld [vmem:[#allocation101_spill] sm:$0xff] }
 0x94f   :  { %v11057_v54 = vpack.c.bf16 %v5775_v25, %v5767_v38  ;;  %7273 = vmatmul.msk.bf16.vlgmr.msrb.gmra.mxu3 %vm2882_vm11, %v5784_v19  ;;  %5947 = vmatpush.bf16.msra.mxu2 %v11876_v15  ;;  %v11910_v55 = vld [vmem:[#allocation89_spill] sm:$0xff]  ;;  %v11911_v12 = vld [vmem:[#allocation103_spill] sm:$0xff] }
 0x950   :  { %5916 = vmatpush.bf16.msrb.mxu0 %v11870_v63  ;;  %v5781_v34 = vpack.c.bf16 %v5773_v46, %v5765_v58  ;;  %v5782_v53 = vpack.c.bf16 %v5774_v29, %v5766_v2  ;;  %5906 = vmatpush.bf16.msra.mxu3 %v11877_v11  ;;  %v11913_v3 = vld [vmem:[#allocation105_spill] sm:$0xff]  ;;  %v11914_v13 = vld [vmem:[#allocation95_spill] sm:$0xff] }
 0x951   :  { %5880 = vmatmul.bf16.vlgmr.msrb.gmra.mxu2 %v11057_v54  ;;  %5930 = vmatpush.bf16.msrb.mxu1 %v11871_v45 }
 0x952   :  { %5852 = vmatmul.bf16.vlgmr.msra.gmra.mxu0 %v5781_v34  ;;  %5866 = vmatmul.bf16.vlgmr.msra.gmra.mxu1 %v5782_v53 }
 0x953   :  { %5948 = vmatpush.bf16.msra.mxu2 %v11880_v14 }
 0x954   :  { %5917 = vmatpush.bf16.msrb.mxu0 %v11874_v52  ;;  %5907 = vmatpush.bf16.msra.mxu3 %v11881_v24 }
 0x955   :  { %5931 = vmatpush.bf16.msrb.mxu1 %v11875_v41 }
 0x957   :  { %5949 = vmatpush.bf16.msra.mxu2 %v11885_v59 }
 0x958   :  { %5918 = vmatpush.bf16.msrb.mxu0 %v11878_v22  ;;  %5956 = vmatpush.bf16.msrb.mxu3 %v11883_v61 }
 0x959   :  { %5932 = vmatpush.bf16.msrb.mxu1 %v11879_v50 }
 0x95b   :  { %6004 = vmatpush.bf16.msrb.mxu2 %v11886_v47 }
 0x95c   :  { %5919 = vmatpush.bf16.msrb.mxu0 %v11882_v33  ;;  %5957 = vmatpush.bf16.msrb.mxu3 %v11889_v26 }
 0x95d   :  { %5933 = vmatpush.bf16.msrb.mxu1 %v11884_v9 }
 0x95f   :  { %5908 = vmatmul.bf16.vlgmr.msra.gmra.mxu3 %v5777_v39  ;;  %6005 = vmatpush.bf16.msrb.mxu2 %v11890_v51  ;;  %v11895_v39 = vld [vmem:[#allocation67_spill] sm:$0xff] }
 0x960   :  { %5920 = vmatpush.bf16.msrb.mxu0 %v11887_v35  ;;  %5958 = vmatpush.bf16.msrb.mxu3 %v11893_v4 }
 0x961   :  { %5950 = vmatmul.bf16.vlgmr.msra.gmra.mxu2 %v11014_v0  ;;  %5934 = vmatpush.bf16.msrb.mxu1 %v11888_v6  ;;  %v11896_v0 = vld [vmem:[#allocation68_spill] sm:$0xff] }
 0x964   :  { %5921 = vmatpush.bf16.msrb.mxu0 %v11891_v8  ;;  %5959 = vmatpush.bf16.msrb.mxu3 %v11896_v0 }
 0x965   :  { %5935 = vmatpush.bf16.msrb.mxu1 %v11892_v10 }
 0x967   :  { %5922 = vmatmul.bf16.vlgmr.msrb.gmra.mxu0 %v11031_v42  ;;  %v11904_v42 = vld [vmem:[#allocation80_spill] sm:$0xff] }
 0x968   :  { %5970 = vmatpush.bf16.msra.mxu0 %v11894_v17  ;;  %5936 = vmatmul.bf16.vlgmr.msrb.gmra.mxu1 %v11018_v56  ;;  %v11905_v56 = vld [vmem:[#allocation81_spill] sm:$0xff] }
 0x969   :  { %5984 = vmatpush.bf16.msra.mxu1 %v11895_v39  ;;  %5960 = vmatpush.bf16.msrb.mxu3 %v11899_v18 }
 0x96c   :  { %5971 = vmatpush.bf16.msra.mxu0 %v11897_v28 }
 0x96d   :  { %5985 = vmatpush.bf16.msra.mxu1 %v11898_v30  ;;  %5961 = vmatpush.bf16.msrb.mxu3 %v11902_v40 }
 0x970   :  { %5972 = vmatpush.bf16.msra.mxu0 %v11900_v36 }
 0x971   :  { %5986 = vmatpush.bf16.msra.mxu1 %v11901_v31  ;;  %7274 = vmatmul.msk.bf16.vlgmr.msrb.gmra.mxu2 %vm2882_vm11, %v5784_v19 }
 0x972   :  { %5962 = vmatpush.bf16.msrb.mxu3 %v11905_v56 }
 0x974   :  { %5973 = vmatpush.bf16.msra.mxu0 %v11903_v32 }
 0x975   :  { %5987 = vmatpush.bf16.msra.mxu1 %v11904_v42 }
 0x976   :  { %5963 = vmatpush.bf16.msrb.mxu3 %v11908_v1 }
 0x978   :  { %5974 = vmatpush.bf16.msra.mxu0 %v11906_v62 }
 0x979   :  { %5988 = vmatpush.bf16.msra.mxu1 %v11907_v27  ;;  %5964 = vmatmul.bf16.vlgmr.msrb.gmra.mxu3 %v5781_v34 }
 0x97c   :  { %5975 = vmatpush.bf16.msra.mxu0 %v11909_v43 }
 0x97d   :  { %5989 = vmatpush.bf16.msra.mxu1 %v11910_v55 }
 0x980   :  { %5976 = vmatpush.bf16.msra.mxu0 %v11911_v12 }
 0x981   :  { %5990 = vmatpush.bf16.msra.mxu1 %v11912_v23 }
 0x984   :  { %5977 = vmatpush.bf16.msra.mxu0 %v11913_v3 }
 0x985   :  { %5991 = vmatpush.bf16.msra.mxu1 %v11914_v13 }
 0x987   :  { %5978 = vmatmul.bf16.vlgmr.msra.gmra.mxu0 %v5782_v53 }
 0x988   :  { %5992 = vmatmul.bf16.vlgmr.msra.gmra.mxu1 %v11057_v54 }
 0x9b4   :  { %v5839_v19 = vpop.f32.mrf.mxu3 }
 0x9bc   :  { %v5825_v25 = vpop.f32.mrf.mxu2  ;;  %v5841_v38 = vpop.f32.mrf.mxu3 }
 0x9be   :  { %v5797_v60 = vpop.f32.mrf.mxu0  ;;  %v5811_v57 = vpop.f32.mrf.mxu1 }
 0x9bf   :  { %v5812_v34 = vadd.f32 %v5811_v57, %v5797_v60 }
 0x9c1   :  { %v5826_v50 = vadd.f32 %v5825_v25, %v5812_v34 }
 0x9c3   :  { %v5840_v61 = vadd.f32 %v5839_v19, %v5826_v50 }
 0x9c4   :  { %v5827_v7 = vpop.f32.mrf.mxu2 }
 0x9c6   :  { %v5799_v20 = vpop.f32.mrf.mxu0  ;;  %v5813_v44 = vpop.f32.mrf.mxu1 }
 0x9c7   :  { %v5814_v52 = vadd.f32 %v5813_v44, %v5799_v20 }
 0x9c9   :  { %v5828_v14 = vadd.f32 %v5827_v7, %v5814_v52 }
 0x9cb   :  { %v5842_v35 = vadd.f32 %v5841_v38, %v5828_v14  ;;  %v11917_v14 = vld [vmem:[#allocation122_spill] sm:$0xff] }
 0x9cf   :  { %v5853_v37 = vpop.f32.mrf.mxu0  ;;  %v5867_v46 = vpop.f32.mrf.mxu1 }
 0x9d0   :  { %v5854_v47 = vadd.f32 %v5853_v37, %v5840_v61  ;;  %v7790_v61 = vld [vmem:[%s11425_s6 + $0x50] sm:$0xff] }
 0x9d2   :  { %v5895_v16 = vpop.f32.mrf.mxu3  ;;  %v5868_v17 = vadd.f32 %v5867_v46, %v5854_v47  ;;  %v7793_v47 = vld [vmem:[%s11425_s6 + $0x28] sm:$0xff] }
 0x9d4   :  { %v5881_v21 = vpop.f32.mrf.mxu2 }
 0x9d5   :  { %v5882_v36 = vadd.f32 %v5881_v21, %v5868_v17  ;;  %v7799_v17 = vld [vmem:[%s11425_s6] sm:$0xff] }
 0x9d7   :  { %v5855_v29 = vpop.f32.mrf.mxu0  ;;  %v5869_v2 = vpop.f32.mrf.mxu1  ;;  %v5896_v62 = vadd.f32 %v5895_v16, %v5882_v36 }
 0x9d8   :  { %v5856_v8 = vadd.f32 %v5855_v29, %v5842_v35  ;;  %v7794_v35 = vld [vmem:[%s11425_s6 + $0x40] sm:$0xff] }
 0x9da   :  { %v5897_v49 = vpop.f32.mrf.mxu3  ;;  %v5870_v0 = vadd.f32 %v5869_v2, %v5856_v8  ;;  %v11922_v8 = vld [vmem:[#allocation109_spill] sm:$0xff] }
 0x9dc   :  { %v5883_v58 = vpop.f32.mrf.mxu2 }
 0x9dd   :  { %v5884_v40 = vadd.f32 %v5883_v58, %v5870_v0  ;;  %v11926_v0 = vld [vmem:[#allocation111_spill] sm:$0xff] }
 0x9df   :  { %v5898_v43 = vadd.f32 %v5897_v49, %v5884_v40  ;;  %v11933_v40 = vld [vmem:[#allocation114_spill] sm:$0xff] }
 0x9e2   :  { %v5909_v63 = vpop.f32.mrf.mxu3 }
 0x9e4   :  { %v5951_v45 = vpop.f32.mrf.mxu2  ;;  %v5923_v48 = vpop.f32.mrf.mxu0 }
 0x9e5   :  { %v5937_v54 = vpop.f32.mrf.mxu1  ;;  %v5924_v5 = vadd.f32 %v5923_v48, %v5909_v63 }
 0x9e7   :  { %v5938_v15 = vadd.f32 %v5937_v54, %v5924_v5 }
 0x9e9   :  { %v5952_v33 = vadd.f32 %v5951_v45, %v5938_v15 }
 0x9ea   :  { %v5911_v53 = vpop.f32.mrf.mxu3 }
 0x9ec   :  { %v5953_v41 = vpop.f32.mrf.mxu2  ;;  %v5925_v11 = vpop.f32.mrf.mxu0 }
 0x9ed   :  { %v5939_v22 = vpop.f32.mrf.mxu1  ;;  %v5926_v24 = vadd.f32 %v5925_v11, %v5911_v53  ;;  %v11916_v11 = vld [vmem:[#allocation106_spill] sm:$0xff] }
 0x9ef   :  { %v5940_v6 = vadd.f32 %v5939_v22, %v5926_v24  ;;  %v7789_v24 = vld [vmem:[%s11425_s6 + $0x38] sm:$0xff] }
 0x9f1   :  { %v5954_v39 = vadd.f32 %v5953_v41, %v5940_v6  ;;  %v7795_v6 = vld [vmem:[%s11425_s6 + $0x20] sm:$0xff] }
 0x9f4   :  { %v6007_v4 = vpop.f32.mrf.mxu2 }
 0x9fc   :  { %v5965_v9 = vpop.f32.mrf.mxu3  ;;  %v6009_v1 = vpop.f32.mrf.mxu2 }
 0x9fd   :  { %v5966_v59 = vadd.f32 %v5965_v9, %v5952_v33  ;;  %v11918_v33 = vld [vmem:[#allocation107_spill] sm:$0xff]  ;;  %v7791_v9 = vld [vmem:[%s11425_s6 + $0x30] sm:$0xff] }
 0xa04   :  { %v5979_v26 = vpop.f32.mrf.mxu0  ;;  %v5967_v30 = vpop.f32.mrf.mxu3 }
 0xa05   :  { %v5993_v51 = vpop.f32.mrf.mxu1  ;;  %v5980_v10 = vadd.f32 %v5979_v26, %v5966_v59  ;;  %v5968_v18 = vadd.f32 %v5967_v30, %v5954_v39  ;;  %v7792_v59 = vld [vmem:[%s11425_s6 + $0x48] sm:$0xff]  ;;  %v11921_v26 = vld [vmem:[#allocation108_spill] sm:$0xff]  ;;  %v11925_v39 = vld [vmem:[#allocation110_spill] sm:$0xff] }
 0xa06   :  { %v11930_v30 = vld [vmem:[#allocation113_spill] sm:$0xff] }
 0xa07   :  { %v5994_v28 = vadd.f32 %v5993_v51, %v5980_v10  ;;  %v7796_v51 = vld [vmem:[%s11425_s6 + $0x18] sm:$0xff]  ;;  %v7797_v10 = vld [vmem:[%s11425_s6 + $0x10] sm:$0xff] }
 0xa09   :  { %v6008_v32 = vadd.f32 %v6007_v4, %v5994_v28  ;;  %v7798_v4 = vld [vmem:[%s11425_s6 + $0x8] sm:$0xff]  ;;  %v11929_v28 = vld [vmem:[#allocation112_spill] sm:$0xff] }
 0xa0b   :  { %v6012_v55 = vpack.c.bf16 %v6008_v32, %v5896_v62 }
 0xa0c   :  { %v5981_v31 = vpop.f32.mrf.mxu0 }
 0xa0d   :  { %v5982_v42 = vadd.f32 %v5981_v31, %v5968_v18  ;;  %v5995_v56 = vpop.f32.mrf.mxu1  ;;  %v6016_v3 = vunpack.c.l.b16 %v6012_v55  ;;  %v6017_v13 = vunpack.c.h.b16 %v6012_v55 }
 0xa0f   :  { %v5996_v27 = vadd.f32 %v5995_v56, %v5982_v42 }
 0xa11   :  { %v6010_v12 = vadd.f32 %v6009_v1, %v5996_v27 }
 0xa13   :  { %v6013_v23 = vpack.c.bf16 %v6010_v12, %v5898_v43 }
 0xa15   :  { %v6018_v19 = vunpack.c.l.b16 %v6013_v23  ;;  %v6019_v25 = vunpack.c.h.b16 %v6013_v23 }
 0xa17   :  { %v6020_v60 = vpack.c.b16 %v6018_v19, %v6016_v3  ;;  %v6021_v57 = vpack.c.b16 %v6019_v25, %v6017_v13  ;;  %v11934_v3 = vld [vmem:[#allocation115_spill] sm:$0xff] }
 0xa19   :  { %6068 = vrot.lane.b32.xlu1 %v6021_v57, %s7839_s2  ;;  %6059 = vrot.lane.b32.xlu2 %v6020_v60, %s7840_s26 }
 0xa1a   :  { %6066 = vrot.lane.b32.xlu0 %v6020_v60, %s7839_s2 }
 0xa21   :  { %6052 = vrot.lane.b32.xlu1 %v6020_v60, %s7841_s27  ;;  %6054 = vrot.lane.b32.xlu2 %v6021_v57, %s7841_s27 }
 0xa22   :  { %6061 = vrot.lane.b32.xlu0 %v6021_v57, %s7840_s26 }
 0xa29   :  { %6047 = vrot.lane.b32.xlu1 %v6021_v57, %s7842_s29  ;;  %6038 = vrot.lane.b32.xlu2 %v6020_v60, %s7843_s30 }
 0xa2a   :  { %6045 = vrot.lane.b32.xlu0 %v6020_v60, %s7842_s29 }
 0xa31   :  { %6031 = vrot.lane.b32.xlu1 %v6020_v60, %s7830_s12  ;;  %6033 = vrot.lane.b32.xlu2 %v6021_v57, %s7830_s12 }
 0xa32   :  { %6040 = vrot.lane.b32.xlu0 %v6021_v57, %s7843_s30 }
 0xa39   :  { %6026 = vrot.lane.b32.xlu1 %v6021_v57, %s7829_s3  ;;  %6073 = vrot.lane.b32.xlu2 %v6020_v60, %s7831_s13 }
 0xa3a   :  { %6024 = vrot.lane.b32.xlu0 %v6020_v60, %s7829_s3 }
 0xa42   :  { %6075 = vrot.lane.b32.xlu0 %v6021_v57, %s7831_s13 }
 0xa73   :  { %v6060_v38 = vpop.permute.xlu2 %6059 }
 0xa7b   :  { %v6055_v21 = vpop.permute.xlu2 %6054 }
 0xa83   :  { %v6039_v63 = vpop.permute.xlu2 %6038 }
 0xa8b   :  { %v6069_v7 = vpop.permute.xlu1 %6068  ;;  %v6034_v5 = vpop.permute.xlu2 %6033 }
 0xa8c   :  { %v6067_v20 = vpop.permute.xlu0 %6066  ;;  %6138 = vmatpush.bf16.msrb.mxu0 %v6069_v7 }
 0xa8d   :  { %v6070_v44 = vsel %vm3172_vm12, %v6067_v20, %v6069_v7 }
 0xa8e   :  { %6080 = vmatpush.bf16.msra.mxu2 %v6070_v44 }
 0xa93   :  { %v6053_v16 = vpop.permute.xlu1 %6052  ;;  %v6074_v15 = vpop.permute.xlu2 %6073 }
 0xa94   :  { %v6062_v37 = vpop.permute.xlu0 %6061  ;;  %v6056_v49 = vsel %vm3156_vm14, %v6053_v16, %v6055_v21 }
 0xa95   :  { %6139 = vmatpush.bf16.msrb.mxu0 %v6062_v37  ;;  %v6063_v46 = vsel %vm3164_vm13, %v6060_v38, %v6062_v37  ;;  %v11935_v37 = vld [vmem:[#allocation116_spill] sm:$0xff] }
 0xa96   :  { %6081 = vmatpush.bf16.msra.mxu2 %v6063_v46 }
 0xa99   :  { %6140 = vmatpush.bf16.msrb.mxu0 %v6055_v21 }
 0xa9a   :  { %6082 = vmatpush.bf16.msra.mxu2 %v6056_v49 }
 0xa9b   :  { %v6048_v58 = vpop.permute.xlu1 %6047 }
 0xa9c   :  { %v6046_v29 = vpop.permute.xlu0 %6045 }
 0xa9d   :  { %6141 = vmatpush.bf16.msrb.mxu0 %v6048_v58  ;;  %v6049_v2 = vsel %vm11915_vm3, %v6046_v29, %v6048_v58 }
 0xa9e   :  { %6083 = vmatpush.bf16.msra.mxu2 %v6049_v2 }
 0xaa3   :  { %v6032_v45 = vpop.permute.xlu1 %6031 }
 0xaa4   :  { %v6041_v48 = vpop.permute.xlu0 %6040  ;;  %v6035_v34 = vsel %vm602_vm4, %v6032_v45, %v6034_v5  ;;  %vm11919_vm4 = vcmask 130048  }
 0xaa5   :  { %6142 = vmatpush.bf16.msrb.mxu0 %v6041_v48  ;;  %v6042_v54 = vsel %vm3140_vm1, %v6039_v63, %v6041_v48  ;;  %vm11920_vm6 = vmmov %vm11919_vm4 }
 0xaa6   :  { %6084 = vmatpush.bf16.msra.mxu2 %v6042_v54  ;;  %vm11924_vm7 = vmmov %vm11919_vm4 }
 0xaa7   :  { %vm11927_vm8 = vmmov %vm11919_vm4 }
 0xaa8   :  { %vm11928_vm9 = vmmov %vm11919_vm4 }
 0xaa9   :  { %6143 = vmatpush.bf16.msrb.mxu0 %v6034_v5  ;;  %vm11931_vm10 = vmmov %vm11919_vm4 }
 0xaaa   :  { %6085 = vmatpush.bf16.msra.mxu2 %v6035_v34  ;;  %vm11932_vm11 = vmmov %vm11919_vm4 }
 0xaab   :  { %v6027_v53 = vpop.permute.xlu1 %6026 }
 0xaac   :  { %v6025_v52 = vpop.permute.xlu0 %6024 }
 0xaad   :  { %6144 = vmatpush.bf16.msrb.mxu0 %v6027_v53  ;;  %v6028_v41 = vsel %vm263_vm2, %v6025_v52, %v6027_v53  ;;  %v11936_v53 = vld [vmem:[#allocation117_spill] sm:$0xff] }
 0xaae   :  { %6086 = vmatpush.bf16.msra.mxu2 %v6028_v41 }
 0xab1   :  { %6145 = vmatpush.bf16.msrb.mxu0 %v6021_v57 }
 0xab2   :  { %6087 = vmatpush.bf16.msra.mxu2 %v6020_v60 }
 0xab4   :  { %6146 = vmatmul.bf16.vlgmr.msrb.gmra.mxu0 %v11916_v11  ;;  %v6076_v22 = vpop.permute.xlu0 %6075 }
 0xab5   :  { %v6077_v50 = vsel %vm805_vm5, %v6074_v15, %v6076_v22  ;;  %6088 = vmatmul.bf16.vlgmr.msra.gmra.mxu2 %v11916_v11  ;;  %6174 = vmatpush.bf16.msrb.mxu1 %v6076_v22  ;;  %vm11923_vm5 = vmmov %vm11919_vm4 }
 0xab6   :  { %6116 = vmatpush.bf16.msra.mxu3 %v6077_v50 }
 0xab8   :  { %7279 = vmatmul.msk.bf16.vlgmr.msrb.gmra.mxu1 %vm11919_vm4, %v11918_v33 }
 0xab9   :  { %6489 = vmatpush.bf16.msra.mxu1 %v11917_v14  ;;  %7275 = vmatmul.msk.bf16.vlgmr.msra.gmra.mxu3 %vm11920_vm6, %v11918_v33 }
 0xaba   :  { %6456 = vmatpush.bf16.msrb.mxu3 %v7789_v24 }
 0xabd   :  { %6490 = vmatpush.bf16.msra.mxu1 %v7790_v61 }
 0xabe   :  { %6457 = vmatpush.bf16.msrb.mxu3 %v7791_v9 }
 0xac1   :  { %6491 = vmatpush.bf16.msra.mxu1 %v7792_v59  ;;  %v11937_v59 = vld [vmem:[#allocation118_spill] sm:$0xff] }
 0xac2   :  { %6458 = vmatpush.bf16.msrb.mxu3 %v7793_v47 }
 0xac4   :  { %6151 = vmatmul.bf16.gmra.mxu0 %v11921_v26 }
 0xac5   :  { %6492 = vmatpush.bf16.msra.mxu1 %v7794_v35  ;;  %6093 = vmatmul.bf16.gmra.mxu2 %v11921_v26 }
 0xac6   :  { %6459 = vmatpush.bf16.msrb.mxu3 %v7795_v6 }
 0xac8   :  { %7280 = vmatmul.msk.bf16.gmra.mxu1 %vm11923_vm5, %v11922_v8 }
 0xac9   :  { %7276 = vmatmul.msk.bf16.gmra.mxu3 %vm11924_vm7, %v11922_v8 }
 0xaca   :  { %6460 = vmatpush.bf16.msrb.mxu3 %v7796_v51 }
 0xace   :  { %6461 = vmatpush.bf16.msrb.mxu3 %v7797_v10 }
 0xad2   :  { %6462 = vmatpush.bf16.msrb.mxu3 %v7798_v4 }
 0xad4   :  { %6156 = vmatmul.bf16.gmra.mxu0 %v11925_v39 }
 0xad5   :  { %6098 = vmatmul.bf16.gmra.mxu2 %v11925_v39 }
 0xad6   :  { %6463 = vmatpush.bf16.msrb.mxu3 %v7799_v17 }
 0xad8   :  { %7281 = vmatmul.msk.bf16.gmra.mxu1 %vm11927_vm8, %v11926_v0 }
 0xad9   :  { %7277 = vmatmul.msk.bf16.gmra.mxu3 %vm11928_vm9, %v11926_v0 }
 0xae4   :  { %6161 = vmatmul.bf16.gmra.mxu0 %v11929_v28 }
 0xae5   :  { %6103 = vmatmul.bf16.gmra.mxu2 %v11929_v28  ;;  %v11938_v28 = vld [vmem:[#allocation119_spill] sm:$0xff] }
 0xae8   :  { %7282 = vmatmul.msk.bf16.gmra.mxu1 %vm11931_vm10, %v11930_v30 }
 0xae9   :  { %7278 = vmatmul.msk.bf16.gmra.mxu3 %vm11932_vm11, %v11930_v30 }
 0xb31   :  { %v6147_v18 = vpop.f32.mrf.mxu0 }
 0xb32   :  { %v6148_v32 = vadd.f32 %v6147_v18, %v11933_v40 }
 0xb35   :  { %v6176_v36 = vpop.f32.mrf.mxu1 }
 0xb36   :  { %v11199_v56 = vadd.f32 %v6176_v36, %v6148_v32 }
 0xb38   :  { %v6089_v31 = vpop.f32.mrf.mxu2  ;;  %v6197_v55 = vmax.f32 %v11199_v56, 0.0 }
 0xb39   :  { %v6149_v42 = vpop.f32.mrf.mxu0  ;;  %v6090_v62 = vadd.f32 %v6089_v31, %v11933_v40 }
 0xb3a   :  { %v6150_v13 = vadd.f32 %v6149_v42, %v11934_v3 }
 0xb3c   :  { %v6118_v27 = vpop.f32.mrf.mxu3 }
 0xb3d   :  { %v11202_v1 = vadd.f32 %v6118_v27, %v6090_v62  ;;  %v6178_v43 = vpop.f32.mrf.mxu1 }
 0xb3e   :  { %v11207_v25 = vadd.f32 %v6178_v43, %v6150_v13 }
 0xb3f   :  { %v6196_v12 = vmax.f32 %v11202_v1, 0.0 }
 0xb40   :  { %v6091_v23 = vpop.f32.mrf.mxu2  ;;  %v6199_v44 = vmax.f32 %v11207_v25, 0.0 }
 0xb41   :  { %v6152_v19 = vpop.f32.mrf.mxu0  ;;  %v6092_v60 = vadd.f32 %v6091_v23, %v11934_v3  ;;  %v7700_v38 = vpack.i.bf16 %v6197_v55, %v6196_v12  ;;  %v11939_v3 = vld [vmem:[#allocation120_spill] sm:$0xff] }
 0xb42   :  { %v6153_v46 = vadd.f32 %v6152_v19, %v11935_v37 }
 0xb43   :  { %7701 = vrot.lane.b32.xlu1 %v7700_v38, %s7829_s3 }
 0xb44   :  { %v6120_v57 = vpop.f32.mrf.mxu3 }
 0xb45   :  { %v11214_v7 = vadd.f32 %v6120_v57, %v6092_v60  ;;  %v6181_v20 = vpop.f32.mrf.mxu1 }
 0xb46   :  { %v11220_v58 = vadd.f32 %v6181_v20, %v6153_v46 }
 0xb47   :  { %v6198_v16 = vmax.f32 %v11214_v7, 0.0 }
 0xb48   :  { %v6094_v21 = vpop.f32.mrf.mxu2  ;;  %v6201_v54 = vmax.f32 %v11220_v58, 0.0 }
 0xb49   :  { %v6154_v49 = vpop.f32.mrf.mxu0  ;;  %v6095_v29 = vadd.f32 %v6094_v21, %v11935_v37  ;;  %v7705_v63 = vpack.i.bf16 %v6199_v44, %v6198_v16 }
 0xb4a   :  { %v6155_v52 = vadd.f32 %v6154_v49, %v11936_v53 }
 0xb4b   :  { %7706 = vrot.lane.b32.xlu2 %v7705_v63, %s7829_s3 }
 0xb4c   :  { %v6123_v2 = vpop.f32.mrf.mxu3 }
 0xb4d   :  { %v11227_v45 = vadd.f32 %v6123_v2, %v6095_v29  ;;  %v6183_v48 = vpop.f32.mrf.mxu1 }
 0xb4e   :  { %v11233_v15 = vadd.f32 %v6183_v48, %v6155_v52 }
 0xb4f   :  { %v6200_v5 = vmax.f32 %v11227_v45, 0.0 }
 0xb50   :  { %v6096_v34 = vpop.f32.mrf.mxu2  ;;  %v6203_v33 = vmax.f32 %v11233_v15, 0.0 }
 0xb51   :  { %v6157_v41 = vpop.f32.mrf.mxu0  ;;  %v6097_v11 = vadd.f32 %v6096_v34, %v11936_v53  ;;  %v7710_v50 = vpack.i.bf16 %v6201_v54, %v6200_v5 }
 0xb52   :  { %v6158_v47 = vadd.f32 %v6157_v41, %v11937_v59 }
 0xb53   :  { %7711 = vrot.lane.b32.xlu0 %v7710_v50, %s7829_s3 }
 0xb54   :  { %v6125_v22 = vpop.f32.mrf.mxu3 }
 0xb55   :  { %v11240_v14 = vadd.f32 %v6125_v22, %v6097_v11  ;;  %v6186_v24 = vpop.f32.mrf.mxu1  ;;  %v11940_v22 = vld [vmem:[#allocation121_spill] sm:$0xff] }
 0xb56   :  { %v11246_v35 = vadd.f32 %v6186_v24, %v6158_v47 }
 0xb57   :  { %v6202_v61 = vmax.f32 %v11240_v14, 0.0 }
 0xb58   :  { %v6099_v9 = vpop.f32.mrf.mxu2  ;;  %v6205_v17 = vmax.f32 %v11246_v35, 0.0 }
 0xb59   :  { %v6100_v6 = vadd.f32 %v6099_v9, %v11937_v59  ;;  %v6159_v26 = vpop.f32.mrf.mxu0  ;;  %v7715_v8 = vpack.i.bf16 %v6203_v33, %v6202_v61 }
 0xb5a   :  { %v6160_v30 = vadd.f32 %v6159_v26, %v11938_v28 }
 0xb5b   :  { %7716 = vrot.lane.b32.xlu1 %v7715_v8, %s7829_s3 }
 0xb5c   :  { %v6128_v51 = vpop.f32.mrf.mxu3 }
 0xb5d   :  { %v6129_v10 = vadd.f32 %v6128_v51, %v6100_v6  ;;  %v6188_v4 = vpop.f32.mrf.mxu1 }
 0xb5e   :  { %v11256_v18 = vadd.f32 %v6188_v4, %v6160_v30 }
 0xb5f   :  { %v6204_v39 = vmax.f32 %v6129_v10, 0.0 }
 0xb60   :  { %v6101_v0 = vpop.f32.mrf.mxu2  ;;  %v6207_v62 = vmax.f32 %v11256_v18, 0.0 }
 0xb61   :  { %v6102_v36 = vadd.f32 %v6101_v0, %v11938_v28  ;;  %v7720_v40 = vpack.i.bf16 %v6205_v17, %v6204_v39  ;;  %v6162_v42 = vpop.f32.mrf.mxu0 }
 0xb62   :  { %v6163_v13 = vadd.f32 %v6162_v42, %v11939_v3 }
 0xb63   :  { %7721 = vrot.lane.b32.xlu2 %v7720_v40, %s7829_s3 }
 0xb64   :  { %v6130_v31 = vpop.f32.mrf.mxu3 }
 0xb65   :  { %v11259_v32 = vadd.f32 %v6130_v31, %v6102_v36  ;;  %v6191_v43 = vpop.f32.mrf.mxu1 }
 0xb66   :  { %v11265_v19 = vadd.f32 %v6191_v43, %v6163_v13 }
 0xb67   :  { %v6206_v27 = vmax.f32 %v11259_v32, 0.0 }
 0xb68   :  { %v6104_v23 = vpop.f32.mrf.mxu2  ;;  %v6209_v21 = vmax.f32 %v11265_v19, 0.0 }
 0xb69   :  { %v6105_v60 = vadd.f32 %v6104_v23, %v11939_v3  ;;  %v7725_v38 = vpack.i.bf16 %v6207_v62, %v6206_v27  ;;  %v6164_v41 = vpop.f32.mrf.mxu0 }
 0xb6a   :  { %v6165_v59 = vadd.f32 %v6164_v41, %v11940_v22 }
 0xb6b   :  { %7726 = vrot.lane.b32.xlu0 %v7725_v38, %s7829_s3 }
 0xb6c   :  { %v6133_v57 = vpop.f32.mrf.mxu3 }
 0xb6d   :  { %v11272_v20 = vadd.f32 %v6133_v57, %v6105_v60  ;;  %v6193_v25 = vpop.f32.mrf.mxu1 }
 0xb6e   :  { %v11301_v35 = vadd.f32 %v6193_v25, %v6165_v59 }
 0xb6f   :  { %v6208_v37 = vmax.f32 %v11272_v20, 0.0 }
 0xb70   :  { %v6106_v52 = vpop.f32.mrf.mxu2  ;;  %v6211_v51 = vmax.f32 %v11301_v35, 0.0 }
 0xb71   :  { %v7740_v46 = vpack.i.bf16 %v6209_v21, %v6208_v37  ;;  %v6107_v50 = vadd.f32 %v6106_v52, %v11940_v22 }
 0xb73   :  { %7741 = vrot.lane.b32.xlu0 %v7740_v46, %s7829_s3 }
 0xb74   :  { %v6135_v11 = vpop.f32.mrf.mxu3 }
 0xb75   :  { %v11296_v47 = vadd.f32 %v6135_v11, %v6107_v50 }
 0xb77   :  { %v6210_v26 = vmax.f32 %v11296_v47, 0.0 }
 0xba5   :  { %v7707_v49 = vpop.permute.xlu2 %7706 }
 0xba6   :  { %v7709_v29 = vunpack.i.h.bf16 %v7707_v49  ;;  %v7708_v2 = vunpack.i.l.bf16 %v7707_v49 }
 0xba8   :  { %v11284_v63 = vmax.f32 %v6199_v44, %v7709_v29  ;;  %v6285_v48 = vsel %vm263_vm2, %v7708_v2, %v7709_v29 }
 0xba9   :  { %v11289_v34 = vmax.f32 %v6198_v16, %v6285_v48 }
 0xbab   :  { %v7735_v53 = vpack.i.bf16 %v11284_v63, %v11289_v34 }
 0xbad   :  { %7736 = vrot.lane.b32.xlu2 %v7735_v53, %s7843_s30 }
 0xbb5   :  { %v7702_v24 = vpop.permute.xlu1 %7701 }
 0xbb6   :  { %v7704_v44 = vunpack.i.h.bf16 %v7702_v24  ;;  %v7703_v9 = vunpack.i.l.bf16 %v7702_v24 }
 0xbb8   :  { %v6309_v7 = vmax.f32 %v6197_v55, %v7704_v44  ;;  %v6284_v16 = vsel %vm263_vm2, %v7703_v9, %v7704_v44 }
 0xbb9   :  { %v6308_v6 = vmax.f32 %v6196_v12, %v6284_v16  ;;  %v7745_v12 = vpack.i.bf16 %v6211_v51, %v6210_v26 }
 0xbbb   :  { %v7730_v0 = vpack.i.bf16 %v6309_v7, %v6308_v6 }
 0xbbd   :  { %v7722_v8 = vpop.permute.xlu2 %7721  ;;  %7731 = vrot.lane.b32.xlu1 %v7730_v0, %s7843_s30 }
 0xbbe   :  { %v7724_v10 = vunpack.i.h.bf16 %v7722_v8  ;;  %v7723_v4 = vunpack.i.l.bf16 %v7722_v8 }
 0xbc0   :  { %v6288_v28 = vsel %vm263_vm2, %v7723_v4, %v7724_v10  ;;  %v11309_v56 = vmax.f32 %v6205_v17, %v7724_v10 }
 0xbc1   :  { %v11311_v55 = vmax.f32 %v6204_v39, %v6288_v28 }
 0xbc3   :  { %v7760_v3 = vpack.i.bf16 %v11309_v56, %v11311_v55 }
 0xbc5   :  { %v7712_v30 = vpop.permute.xlu0 %7711  ;;  %7746 = vrot.lane.b32.xlu1 %v7745_v12, %s7829_s3 }
 0xbc6   :  { %v7714_v36 = vunpack.i.h.bf16 %v7712_v30  ;;  %v7713_v1 = vunpack.i.l.bf16 %v7712_v30 }
 0xbc8   :  { %v11319_v31 = vmax.f32 %v6201_v54, %v7714_v36  ;;  %v6286_v40 = vsel %vm263_vm2, %v7713_v1, %v7714_v36 }
 0xbc9   :  { %v11324_v17 = vmax.f32 %v6200_v5, %v6286_v40 }
 0xbcb   :  { %v7750_v23 = vpack.i.bf16 %v11319_v31, %v11324_v17 }
 0xbcd   :  { %v7717_v39 = vpop.permute.xlu1 %7716  ;;  %7751 = vrot.lane.b32.xlu2 %v7750_v23, %s7843_s30  ;;  %7761 = vrot.lane.b32.xlu1 %v7760_v3, %s7843_s30 }
 0xbce   :  { %v7719_v42 = vunpack.i.h.bf16 %v7717_v39  ;;  %v7718_v43 = vunpack.i.l.bf16 %v7717_v39 }
 0xbd0   :  { %v6315_v58 = vmax.f32 %v6203_v33, %v7719_v42  ;;  %v6287_v54 = vsel %vm263_vm2, %v7718_v43, %v7719_v42 }
 0xbd1   :  { %v6314_v45 = vmax.f32 %v6202_v61, %v6287_v54 }
 0xbd3   :  { %v7755_v5 = vpack.i.bf16 %v6315_v58, %v6314_v45 }
 0xbd5   :  { %7756 = vrot.lane.b32.xlu0 %v7755_v5, %s7843_s30 }
 0xbdd   :  { %v7727_v13 = vpop.permute.xlu0 %7726 }
 0xbde   :  { %v7729_v60 = vunpack.i.h.bf16 %v7727_v13  ;;  %v7728_v57 = vunpack.i.l.bf16 %v7727_v13 }
 0xbe0   :  { %v6319_v38 = vmax.f32 %v6207_v62, %v7729_v60  ;;  %v6289_v15 = vsel %vm263_vm2, %v7728_v57, %v7729_v60 }
 0xbe1   :  { %v11344_v33 = vmax.f32 %v6206_v27, %v6289_v15 }
 0xbe3   :  { %v7765_v49 = vpack.i.bf16 %v6319_v38, %v11344_v33 }
 0xbe5   :  { %v7742_v14 = vpop.permute.xlu0 %7741  ;;  %7766 = vrot.lane.b32.xlu2 %v7765_v49, %s7843_s30 }
 0xbe6   :  { %v7744_v61 = vunpack.i.h.bf16 %v7742_v14  ;;  %v7743_v46 = vunpack.i.l.bf16 %v7742_v14 }
 0xbe8   :  { %v11349_v29 = vmax.f32 %v6209_v21, %v7744_v61  ;;  %v6290_v2 = vsel %vm263_vm2, %v7743_v46, %v7744_v61 }
 0xbe9   :  { %v11354_v18 = vmax.f32 %v6208_v37, %v6290_v2 }
 0xbeb   :  { %v7770_v32 = vpack.i.bf16 %v11349_v29, %v11354_v18 }
 0xbed   :  { %7771 = vrot.lane.b32.xlu0 %v7770_v32, %s7843_s30 }
 0xc07   :  { %v7737_v62 = vpop.permute.xlu2 %7736 }
 0xc08   :  { %v7739_v27 = vunpack.i.h.bf16 %v7737_v62  ;;  %v7738_v48 = vunpack.i.l.bf16 %v7737_v62 }
 0xc0a   :  { %v6397_v19 = vsel %vm3140_vm1, %v7738_v48, %v7739_v27  ;;  %v6423_v41 = vmax.f32 %v11284_v63, %v7739_v27 }
 0xc0b   :  { %v6422_v11 = vmax.f32 %v11289_v34, %v6397_v19 }
 0xc2f   :  { %v7732_v53 = vpop.permute.xlu1 %7731 }
 0xc30   :  { %v7734_v21 = vunpack.i.h.bf16 %v7732_v53  ;;  %v7733_v52 = vunpack.i.l.bf16 %v7732_v53 }
 0xc32   :  { %v6421_v20 = vmax.f32 %v6309_v7, %v7734_v21  ;;  %v6396_v37 = vsel %vm3140_vm1, %v7733_v52, %v7734_v21  ;;  %v7752_v7 = vpop.permute.xlu2 %7751 }
 0xc33   :  { %v6420_v22 = vmax.f32 %v6308_v6, %v6396_v37  ;;  %v7754_v34 = vunpack.i.h.bf16 %v7752_v7  ;;  %v7753_v6 = vunpack.i.l.bf16 %v7752_v7 }
 0xc34   :  { %v6437_v50 = vpack.c.bf16 %v6423_v41, %v6421_v20 }
 0xc35   :  { %v6436_v24 = vpack.c.bf16 %v6422_v11, %v6420_v22  ;;  %v6398_v4 = vsel %vm3140_vm1, %v7753_v6, %v7754_v34  ;;  %v6425_v30 = vmax.f32 %v11319_v31, %v7754_v34 }
 0xc36   :  { %7283 = vmatmul.msk.bf16.vlgmr.msra.gmra.mxu1 %vm3706_vm0, %v6437_v50  ;;  %v6424_v36 = vmax.f32 %v11324_v17, %v6398_v4 }
 0xc37   :  { %v7747_v25 = vpop.permute.xlu1 %7746  ;;  %6464 = vmatmul.bf16.vlgmr.msrb.gmra.mxu3 %v6436_v24 }
 0xc38   :  { %v7749_v44 = vunpack.i.h.bf16 %v7747_v25  ;;  %v7748_v9 = vunpack.i.l.bf16 %v7747_v25 }
 0xc3a   :  { %v6323_v59 = vmax.f32 %v6211_v51, %v7749_v44  ;;  %v6291_v16 = vsel %vm263_vm2, %v7748_v9, %v7749_v44 }
 0xc3b   :  { %v6322_v63 = vmax.f32 %v6210_v26, %v6291_v16 }
 0xc3d   :  { %v7775_v8 = vpack.i.bf16 %v6323_v59, %v6322_v63 }
 0xc3f   :  { %7776 = vrot.lane.b32.xlu1 %v7775_v8, %s7843_s30  ;;  %v7767_v12 = vpop.permute.xlu2 %7766  ;;  %v7762_v40 = vpop.permute.xlu1 %7761 }
 0xc40   :  { %v7769_v39 = vunpack.i.h.bf16 %v7767_v12  ;;  %v7768_v42 = vunpack.i.l.bf16 %v7767_v12  ;;  %v7764_v43 = vunpack.i.h.bf16 %v7762_v40  ;;  %v7763_v23 = vunpack.i.l.bf16 %v7762_v40 }
 0xc42   :  { %v6401_v3 = vsel %vm3140_vm1, %v7768_v42, %v7769_v39  ;;  %v6400_v31 = vsel %vm3140_vm1, %v7763_v23, %v7764_v43  ;;  %v6429_v54 = vmax.f32 %v11309_v56, %v7764_v43 }
 0xc43   :  { %v6428_v17 = vmax.f32 %v11311_v55, %v6400_v31 }
 0xc47   :  { %v7757_v10 = vpop.permute.xlu0 %7756 }
 0xc48   :  { %v7759_v0 = vunpack.i.h.bf16 %v7757_v10  ;;  %v7758_v28 = vunpack.i.l.bf16 %v7757_v10 }
 0xc4a   :  { %v6427_v35 = vmax.f32 %v6315_v58, %v7759_v0  ;;  %v6399_v51 = vsel %vm3140_vm1, %v7758_v28, %v7759_v0  ;;  %v6431_v58 = vmax.f32 %v6319_v38, %v7769_v39 }
 0xc4b   :  { %v6426_v47 = vmax.f32 %v6314_v45, %v6399_v51  ;;  %v6430_v45 = vmax.f32 %v11344_v33, %v6401_v3 }
 0xc4c   :  { %v6439_v26 = vpack.c.bf16 %v6427_v35, %v6425_v30  ;;  %v6441_v5 = vpack.c.bf16 %v6431_v58, %v6429_v54 }
 0xc4d   :  { %v6438_v1 = vpack.c.bf16 %v6426_v47, %v6424_v36  ;;  %v6440_v13 = vpack.c.bf16 %v6430_v45, %v6428_v17 }
 0xc4e   :  { %7284 = vmatmul.msk.bf16.gmra.mxu1 %vm3706_vm0, %v6439_v26 }
 0xc4f   :  { %6469 = vmatmul.bf16.gmra.mxu3 %v6438_v1 }
 0xc5e   :  { %7285 = vmatmul.msk.bf16.gmra.mxu1 %vm3706_vm0, %v6441_v5 }
 0xc5f   :  { %6474 = vmatmul.bf16.gmra.mxu3 %v6440_v13  ;;  %v7772_v60 = vpop.permute.xlu0 %7771 }
 0xc60   :  { %v7774_v57 = vunpack.i.h.bf16 %v7772_v60  ;;  %v7773_v15 = vunpack.i.l.bf16 %v7772_v60 }
 0xc62   :  { %v6402_v61 = vsel %vm3140_vm1, %v7773_v15, %v7774_v57  ;;  %v6433_v38 = vmax.f32 %v11349_v29, %v7774_v57 }
 0xc63   :  { %v6432_v33 = vmax.f32 %v11354_v18, %v6402_v61 }
 0xcb1   :  { %v7777_v14 = vpop.permute.xlu1 %7776 }
 0xcb2   :  { %v7779_v46 = vunpack.i.h.bf16 %v7777_v14  ;;  %v7778_v49 = vunpack.i.l.bf16 %v7777_v14 }
 0xcb3   :  { %v6494_v56 = vpop.f32.mrf.mxu1 }
 0xcb4   :  { %v6435_v2 = vmax.f32 %v6323_v59, %v7779_v46  ;;  %v6403_v55 = vsel %vm3140_vm1, %v7778_v49, %v7779_v46 }
 0xcb5   :  { %v6434_v32 = vmax.f32 %v6322_v63, %v6403_v55 }
 0xcb6   :  { %v6443_v62 = vpack.c.bf16 %v6435_v2, %v6433_v38 }
 0xcb7   :  { %v6442_v53 = vpack.c.bf16 %v6434_v32, %v6432_v33 }
 0xcb8   :  { %7286 = vmatmul.msk.bf16.gmra.mxu1 %vm3706_vm0, %v6443_v62 }
 0xcb9   :  { %6479 = vmatmul.bf16.gmra.mxu3 %v6442_v53 }
 0xcba   :  { %v6465_v27 = vpop.f32.mrf.mxu3 }
 0xcbb   :  { %v6495_v48 = vadd.f32 %v6494_v56, %v6465_v27  ;;  %v6496_v29 = vpop.f32.mrf.mxu1 }
 0xcbd   :  { %v6514_v19 = vpack.c.bf16 %v6495_v48, %v6495_v48 }
 0xcbf   :  { %7287 = vst.msk [vmem:[%s11426_s7 + $0x20] sm:$0xf] %vm3788_vm15, %v6514_v19 }
 0xcc2   :  { %v6467_v21 = vpop.f32.mrf.mxu3 }
 0xcc3   :  { %v6497_v52 = vadd.f32 %v6496_v29, %v6467_v21 }
 0xcc5   :  { %v6515_v41 = vpack.c.bf16 %v6497_v52, %v6497_v52 }
 0xcc7   :  { %7288 = vst.msk [vmem:[%s11426_s7 + $0x24] sm:$0xf] %vm3788_vm15, %v6515_v41 }
 0xccb   :  { %v6499_v18 = vpop.f32.mrf.mxu1 }
 0xcd2   :  { %v6470_v20 = vpop.f32.mrf.mxu3 }
 0xcd3   :  { %v6500_v37 = vadd.f32 %v6499_v18, %v6470_v20  ;;  %v6501_v22 = vpop.f32.mrf.mxu1 }
 0xcd5   :  { %v6516_v11 = vpack.c.bf16 %v6500_v37, %v6500_v37 }
 0xcd7   :  { %7289 = vst.msk [vmem:[%s11426_s7 + $0x28] sm:$0xf] %vm3788_vm15, %v6516_v11 }
 0xcda   :  { %v6472_v50 = vpop.f32.mrf.mxu3 }
 0xcdb   :  { %v6502_v24 = vadd.f32 %v6501_v22, %v6472_v50  ;;  %v6504_v44 = vpop.f32.mrf.mxu1 }
 0xcdd   :  { %v6517_v25 = vpack.c.bf16 %v6502_v24, %v6502_v24 }
 0xcdf   :  { %7290 = vst.msk [vmem:[%s11426_s7 + $0x2c] sm:$0xf] %vm3788_vm15, %v6517_v25 }
 0xce2   :  { %v6475_v9 = vpop.f32.mrf.mxu3 }
 0xce3   :  { %v6505_v59 = vadd.f32 %v6504_v44, %v6475_v9  ;;  %v6506_v63 = vpop.f32.mrf.mxu1 }
 0xce5   :  { %v6518_v16 = vpack.c.bf16 %v6505_v59, %v6505_v59 }
 0xce7   :  { %7291 = vst.msk [vmem:[%s11426_s7 + $0x30] sm:$0xf] %vm3788_vm15, %v6518_v16 }
 0xcea   :  { %v6477_v7 = vpop.f32.mrf.mxu3 }
 0xceb   :  { %v6507_v8 = vadd.f32 %v6506_v63, %v6477_v7 }
 0xced   :  { %v6519_v34 = vpack.c.bf16 %v6507_v8, %v6507_v8 }
 0xcef   :  { %7292 = vst.msk [vmem:[%s11426_s7 + $0x34] sm:$0xf] %vm3788_vm15, %v6519_v34 }
 0xd35   :  { %v6509_v6 = vpop.f32.mrf.mxu1 }
 0xd3c   :  { %v6480_v10 = vpop.f32.mrf.mxu3 }
 0xd3d   :  { %v6510_v4 = vadd.f32 %v6509_v6, %v6480_v10  ;;  %v6511_v28 = vpop.f32.mrf.mxu1 }
 0xd3f   :  { %v6520_v0 = vpack.c.bf16 %v6510_v4, %v6510_v4 }
 0xd41   :  { %7293 = vst.msk [vmem:[%s11426_s7 + $0x38] sm:$0xf] %vm3788_vm15, %v6520_v0 }
 0xd44   :  { %v6482_v30 = vpop.f32.mrf.mxu3 }
 0xd45   :  { %v6512_v35 = vadd.f32 %v6511_v28, %v6482_v30 }
 0xd47   :  { %v6521_v51 = vpack.c.bf16 %v6512_v35, %v6512_v35 }
 0xd49   :  { %7294 = vst.msk [vmem:[%s11426_s7 + $0x3c] sm:$0xf] %vm3788_vm15, %v6521_v51 }
 0xd4a   :  { %6535 = vsyncpa [#allocation3], 1 }

</bundles_post_ra>
